<compile_context>
chip_gen: v5e
topology: v5e:2x2
jax: 0.10.0
libtpu: 0.0.40
codegen_flags: <defaults>
</compile_context>

<pallas_src>
import numpy as np

import jax
import jax.numpy as jnp
from jax.experimental import pallas as pl
from jax.experimental.pallas import tpu as pltpu


# ------------------------- host-side weight re-layout ------------------------

def _conv_weight_mat(w, win, pad):
    """(Cout,Cin,kh,kw) -> single (kh*Win*Cin, Wo*Cout) banded matmul operand.

    Row index = di*(Win*Cin) + ji*Cin + ci, col index = jo*Cout + co, so that
    conv(x)[i, jo*Cout+co] = concat_d(x_row[i+d]) @ W.  Column padding (`pad`)
    is baked into the band structure.
    """
    w = np.asarray(w, np.float32)
    cout, cin, kh, kw = w.shape
    wo = win + 2 * pad - kw + 1
    m = np.zeros((kh, win * cin, wo * cout), np.float32)
    for di in range(kh):
        for dj in range(kw):
            blk = w[:, :, di, dj].T                      # (Cin, Cout)
            for jo in range(wo):
                ji = jo - pad + dj
                if 0 <= ji < win:
                    m[di, ji * cin:(ji + 1) * cin,
                      jo * cout:(jo + 1) * cout] += blk
    return jnp.asarray(m.reshape(kh * win * cin, wo * cout), dtype=jnp.bfloat16)


def _conv_bias(b, wo):
    # column index is jo*Cout + co -> bias tiled wo times.
    return jnp.asarray(np.tile(np.asarray(b, np.float32), wo).reshape(1, -1))


def _pool_right(w, c):
    """Column mix of the 2x2/stride-2 avg pool; the full 0.25 factor lives here
    so the in-kernel row mix is a plain add."""
    wp = w // 2
    r = np.zeros((w * c, wp * c), np.float32)
    eye = 0.25 * np.eye(c, dtype=np.float32)
    for j in range(wp):
        for k in range(2):
            r[(2 * j + k) * c:(2 * j + k + 1) * c, j * c:(j + 1) * c] = eye
    return jnp.asarray(r, dtype=jnp.bfloat16)


_PREP_ORDER = ("w1", "b1", "r1", "w3", "b3", "w4", "b4", "r2",
               "w5", "b5", "w6", "b6", "w7", "b7", "w8", "b8")


def prepare_params(params):
    """One-time host-side re-layout of MyLeNet5 params into kernel operands."""
    p = {}
    p["w1"] = _conv_weight_mat(params["c1_w"], win=28, pad=2)   # (140, 168)
    p["b1"] = _conv_bias(params["c1_b"], 28)                    # (1, 168)
    p["r1"] = _pool_right(28, 6)                                # (168, 84)
    p["w3"] = _conv_weight_mat(params["c3_w"], win=14, pad=0)   # (420, 160)
    p["b3"] = _conv_bias(params["c3_b"], 10)                    # (1, 160)
    p["w4"] = _conv_weight_mat(params["c4_w"], win=10, pad=0)   # (480, 256)
    p["b4"] = _conv_bias(params["c4_b"], 8)                     # (1, 256)
    p["r2"] = _pool_right(8, 32)                                # (256, 128)
    p["w5"] = _conv_weight_mat(params["c5_w"], win=4, pad=0)    # (384, 240)
    p["b5"] = _conv_bias(params["c5_b"], 2)                     # (1, 240)
    # f6 taps the c5 activation layout directly: our column index is j*120+c
    # and row blocks are i=0,1; torch.flatten order is c*4 + i*2 + j.
    w6 = np.asarray(params["f6_w"], np.float32).reshape(84, 120, 2, 2)
    w6 = w6.transpose(2, 3, 1, 0).reshape(480, 84)   # row idx = i*240 + j*120 + c
    p["w6"] = jnp.asarray(w6, dtype=jnp.bfloat16)
    p["b6"] = jnp.asarray(np.asarray(params["f6_b"], np.float32).reshape(1, 84))
    p["w7"] = jnp.asarray(np.asarray(params["f7_w"], np.float32).T,
                          dtype=jnp.bfloat16)                   # (84, 42)
    p["b7"] = jnp.asarray(np.asarray(params["f7_b"], np.float32).reshape(1, 42))
    p["w8"] = jnp.asarray(np.asarray(params["out_w"], np.float32).T,
                          dtype=jnp.bfloat16)                   # (42, 10)
    p["b8"] = jnp.asarray(np.asarray(params["out_b"], np.float32).reshape(1, 10))
    return p


# --------------------------------- kernel ------------------------------------

def _lenet5_kernel(x_ref, w1, b1, r1, w3, b3, w4, b4, r2, w5, b5,
                   w6, b6, w7, b7, w8, b8, o_ref):
    f32, bf16 = jnp.float32, jnp.bfloat16
    tb = o_ref.shape[0]                       # images per grid step

    def conv_sigmoid(act_bf16, w_ref, b_ref, kh, hout):
        # act: (Hin*tb, Win*Cin) bf16, row index = image_row*tb + image.
        # Single MXU matmul: kh row-windows concatenated along lanes.
        lhs = jnp.concatenate(
            [act_bf16[d * tb:(d + hout) * tb, :] for d in range(kh)], axis=1)
        y = jnp.dot(lhs, w_ref[...], preferred_element_type=f32) + b_ref[...]
        return 1.0 / (1.0 + jnp.exp(-y))                      # f32 epilogue

    def avgpool(y_f32, r_ref, hout):
        # Column mix (0.25 folded into r) on the MXU, then a row-pair add.
        z = jnp.dot(y_f32.astype(bf16), r_ref[...], preferred_element_type=f32)
        rows = [z[(2 * p) * tb:(2 * p + 1) * tb, :] +
                z[(2 * p + 1) * tb:(2 * p + 2) * tb, :] for p in range(hout)]
        return jnp.concatenate(rows, axis=0)                  # (hout*tb, .) f32

    # c1: fuse the padding=2 row pad (column pad is baked into w1).
    zpad = jnp.zeros((2 * tb, x_ref.shape[1]), bf16)
    a0 = jnp.concatenate([zpad, x_ref[...].astype(bf16), zpad], axis=0)  # (32tb, 28)
    y1 = conv_sigmoid(a0, w1, b1, kh=5, hout=28)              # (28tb, 168) f32
    s2 = avgpool(y1, r1, hout=14).astype(bf16)                # (14tb, 84)
    a3 = conv_sigmoid(s2, w3, b3, kh=5, hout=10).astype(bf16)  # (10tb, 160)
    y4 = conv_sigmoid(a3, w4, b4, kh=3, hout=8)               # (8tb, 256) f32
    s4 = avgpool(y4, r2, hout=4).astype(bf16)                 # (4tb, 128)
    a5 = conv_sigmoid(s4, w5, b5, kh=3, hout=2).astype(bf16)  # (2tb, 240)

    # flatten (rows i=0,1 concatenated along lanes; w6 pre-permuted) + f6/f7/out.
    h = jnp.concatenate([a5[0:tb, :], a5[tb:2 * tb, :]], axis=1)          # (tb, 480)
    h = jnp.dot(h, w6[...], preferred_element_type=f32) + b6[...]
    h = jnp.dot(h.astype(bf16), w7[...], preferred_element_type=f32) + b7[...]
    h = jnp.dot(h.astype(bf16), w8[...], preferred_element_type=f32) + b8[...]
    o_ref[...] = h                                                        # (tb, 10)


# --------------------------------- wrapper ------------------------------------

def _round_up(a, m):
    return (a + m - 1) // m * m


def lenet5_forward(prep, x, *, tb=64):
    """x: (B, 1, 28, 28) float32 -> (B, 10) float32, one fused Pallas call."""
    B = x.shape[0]
    assert x.shape[1:] == (1, 28, 28)
    tb = min(tb, _round_up(B, 8))             # keep slices sublane-aligned
    Bp = _round_up(B, tb)
    G = Bp // tb

    xf = x.astype(jnp.float32).reshape(B, 28, 28)
    if Bp != B:
        xf = jnp.pad(xf, ((0, Bp - B), (0, 0), (0, 0)))
    # Row-interleaved ("row-major, batch-minor") layout: row = g*28*tb + r*tb + b.
    # This lets the kernel batch every matmul (M = tb*rows) with only contiguous
    # static slices -- no in-kernel reshapes.  Cheap host-side layout op.
    xt = xf.reshape(G, tb, 28, 28).transpose(0, 2, 1, 3).reshape(G * 28 * tb, 28)

    weights = [prep[k] for k in _PREP_ORDER]

    def const_spec(a):
        zeros = (0,) * a.ndim
        return pl.BlockSpec(a.shape, lambda g, _z=zeros: _z)

    out = pl.pallas_call(
        _lenet5_kernel,
        out_shape=jax.ShapeDtypeStruct((Bp, 10), jnp.float32),
        grid=(G,),
        in_specs=[pl.BlockSpec((28 * tb, 28), lambda g: (g, 0))]
        + [const_spec(a) for a in weights],
        out_specs=pl.BlockSpec((tb, 10), lambda g: (g, 0)),
        compiler_params=pltpu.CompilerParams(
            dimension_semantics=("parallel",)),
    )(xt, *weights)
    return out[:B]


# ------------------------- pure-JAX reference & params ------------------------

def lenet5_reference(params, x):
    def conv(x, w, b, pad):
        y = jax.lax.conv_general_dilated(
            x, w, window_strides=(1, 1),
            padding=((pad, pad), (pad, pad)),
            dimension_numbers=("NCHW", "OIHW", "NCHW"))
        return y + b.reshape(1, -1, 1, 1)

    def sigmoid(v):
        return 1.0 / (1.0 + jnp.exp(-v))

    def avgpool(v):
        n, c, h, w = v.shape
        return v.reshape(n, c, h // 2, 2, w // 2, 2).mean(axis=(3, 5))

    y = sigmoid(conv(x, params["c1_w"], params["c1_b"], 2))
    y = avgpool(y)
    y = sigmoid(conv(y, params["c3_w"], params["c3_b"], 0))
    y = sigmoid(conv(y, params["c4_w"], params["c4_b"], 0))
    y = avgpool(y)
    y = sigmoid(conv(y, params["c5_w"], params["c5_b"], 0))
    y = y.reshape(y.shape[0], -1)
    y = y @ params["f6_w"].T + params["f6_b"]
    y = y @ params["f7_w"].T + params["f7_b"]
    y = y @ params["out_w"].T + params["out_b"]
    return y


def init_params(key):
    """Deterministic synthetic parameters matching MyLeNet5 shapes."""
    specs = {
        "c1_w": (6, 1, 5, 5),    "c1_b": (6,),
        "c3_w": (16, 6, 5, 5),   "c3_b": (16,),
        "c4_w": (32, 16, 3, 3),  "c4_b": (32,),
        "c5_w": (120, 32, 3, 3), "c5_b": (120,),
        "f6_w": (84, 480),       "f6_b": (84,),
        "f7_w": (42, 84),        "f7_b": (42,),
        "out_w": (10, 42),       "out_b": (10,),
    }
    params = {}
    keys = jax.random.split(key, len(specs))
    for k, (name, shape) in zip(keys, sorted(specs.items())):
        params[name] = 0.1 * jax.random.normal(k, shape, dtype=jnp.float32)
    return params


if __name__ == "__main__":
    key = jax.random.PRNGKey(0)
    pkey, xkey = jax.random.split(key)
    params = init_params(pkey)
    prep = prepare_params(params)       # one-time host-side weight re-layout
    # Input must be 28x28 so the c5 output flattens to 480 (= 120*2*2).
    x = jax.random.normal(xkey, (2, 1, 28, 28), dtype=jnp.float32)
    fwd = jax.jit(lenet5_forward)
    out = jax.block_until_ready(fwd(prep, x))
    assert out.shape == (2, 10) and out.dtype == jnp.float32
    ref = lenet5_reference(params, x)
    np.testing.assert_allclose(np.asarray(out), np.asarray(ref),
                               rtol=0.15, atol=0.15)
    print("KERNEL_OK")
</pallas_src>

<mosaic_0001>
module attributes {stable_mosaic.version = 11 : i64} {
  func.func @_lenet5_kernel(%arg0: i32, %arg1: memref<224x28xf32, #tpu.memory_space<vmem>>, %arg2: memref<140x168xbf16, #tpu.memory_space<vmem>>, %arg3: memref<1x168xf32, #tpu.memory_space<vmem>>, %arg4: memref<168x84xbf16, #tpu.memory_space<vmem>>, %arg5: memref<420x160xbf16, #tpu.memory_space<vmem>>, %arg6: memref<1x160xf32, #tpu.memory_space<vmem>>, %arg7: memref<480x256xbf16, #tpu.memory_space<vmem>>, %arg8: memref<1x256xf32, #tpu.memory_space<vmem>>, %arg9: memref<256x128xbf16, #tpu.memory_space<vmem>>, %arg10: memref<384x240xbf16, #tpu.memory_space<vmem>>, %arg11: memref<1x240xf32, #tpu.memory_space<vmem>>, %arg12: memref<480x84xbf16, #tpu.memory_space<vmem>>, %arg13: memref<1x84xf32, #tpu.memory_space<vmem>>, %arg14: memref<84x42xbf16, #tpu.memory_space<vmem>>, %arg15: memref<1x42xf32, #tpu.memory_space<vmem>>, %arg16: memref<42x10xbf16, #tpu.memory_space<vmem>>, %arg17: memref<1x10xf32, #tpu.memory_space<vmem>>, %arg18: memref<8x10xf32, #tpu.memory_space<vmem>>) attributes {dimension_semantics = [#tpu.dimension_semantics<parallel>], iteration_bounds = array<i64: 1>, scalar_prefetch = 0 : i64, scratch_operands = 0 : i64, tpu.core_type = #tpu.core_type<tc>, window_params = [{transform_indices = @transform_0, window_bounds = array<i64: 224, 28>}, {pipeline_mode = #tpu.pipeline_mode<synchronous>, transform_indices = @transform_1, window_bounds = array<i64: 140, 168>}, {pipeline_mode = #tpu.pipeline_mode<synchronous>, transform_indices = @transform_2, window_bounds = array<i64: 1, 168>}, {pipeline_mode = #tpu.pipeline_mode<synchronous>, transform_indices = @transform_3, window_bounds = array<i64: 168, 84>}, {pipeline_mode = #tpu.pipeline_mode<synchronous>, transform_indices = @transform_4, window_bounds = array<i64: 420, 160>}, {pipeline_mode = #tpu.pipeline_mode<synchronous>, transform_indices = @transform_5, window_bounds = array<i64: 1, 160>}, {pipeline_mode = #tpu.pipeline_mode<synchronous>, transform_indices = @transform_6, window_bounds = array<i64: 480, 256>}, {pipeline_mode = #tpu.pipeline_mode<synchronous>, transform_indices = @transform_7, window_bounds = array<i64: 1, 256>}, {pipeline_mode = #tpu.pipeline_mode<synchronous>, transform_indices = @transform_8, window_bounds = array<i64: 256, 128>}, {pipeline_mode = #tpu.pipeline_mode<synchronous>, transform_indices = @transform_9, window_bounds = array<i64: 384, 240>}, {pipeline_mode = #tpu.pipeline_mode<synchronous>, transform_indices = @transform_10, window_bounds = array<i64: 1, 240>}, {pipeline_mode = #tpu.pipeline_mode<synchronous>, transform_indices = @transform_11, window_bounds = array<i64: 480, 84>}, {pipeline_mode = #tpu.pipeline_mode<synchronous>, transform_indices = @transform_12, window_bounds = array<i64: 1, 84>}, {pipeline_mode = #tpu.pipeline_mode<synchronous>, transform_indices = @transform_13, window_bounds = array<i64: 84, 42>}, {pipeline_mode = #tpu.pipeline_mode<synchronous>, transform_indices = @transform_14, window_bounds = array<i64: 1, 42>}, {pipeline_mode = #tpu.pipeline_mode<synchronous>, transform_indices = @transform_15, window_bounds = array<i64: 42, 10>}, {pipeline_mode = #tpu.pipeline_mode<synchronous>, transform_indices = @transform_16, window_bounds = array<i64: 1, 10>}, {transform_indices = @transform_17, window_bounds = array<i64: 8, 10>}]} {
    %cst = arith.constant 0.000000e+00 : bf16
    %0 = vector.broadcast %cst : bf16 to vector<16x28xbf16>
    %c0 = arith.constant 0 : index
    %c0_0 = arith.constant 0 : index
    %1 = vector.load %arg1[%c0, %c0_0] : memref<224x28xf32, #tpu.memory_space<vmem>>, vector<224x28xf32>
    %2 = arith.truncf %1 : vector<224x28xf32> to vector<224x28xbf16>
    %3 = tpu.concatenate %0, %2, %0 in 0 : vector<16x28xbf16>, vector<224x28xbf16>, vector<16x28xbf16> -> vector<256x28xbf16>
    %4 = vector.extract_strided_slice %3 {offsets = [0, 0], sizes = [224, 28], strides = [1, 1]} : vector<256x28xbf16> to vector<224x28xbf16>
    %5 = vector.extract_strided_slice %3 {offsets = [8, 0], sizes = [224, 28], strides = [1, 1]} : vector<256x28xbf16> to vector<224x28xbf16>
    %6 = vector.extract_strided_slice %3 {offsets = [16, 0], sizes = [224, 28], strides = [1, 1]} : vector<256x28xbf16> to vector<224x28xbf16>
    %7 = vector.extract_strided_slice %3 {offsets = [24, 0], sizes = [224, 28], strides = [1, 1]} : vector<256x28xbf16> to vector<224x28xbf16>
    %8 = vector.extract_strided_slice %3 {offsets = [32, 0], sizes = [224, 28], strides = [1, 1]} : vector<256x28xbf16> to vector<224x28xbf16>
    %9 = tpu.concatenate %4, %5, %6, %7, %8 in 1 : vector<224x28xbf16>, vector<224x28xbf16>, vector<224x28xbf16>, vector<224x28xbf16>, vector<224x28xbf16> -> vector<224x140xbf16>
    %c0_1 = arith.constant 0 : index
    %c0_2 = arith.constant 0 : index
    %10 = vector.load %arg2[%c0_1, %c0_2] : memref<140x168xbf16, #tpu.memory_space<vmem>>, vector<140x168xbf16>
    %cst_3 = arith.constant dense<0.000000e+00> : vector<224x168xf32>
    %11 = tpu.matmul %9, %10, %cst_3 {dimension_numbers = #tpu.dot_dimension_numbers<[1], [0], [0], [1], [0, 0, 1, 1], [], []>} : vector<224x140xbf16>, vector<140x168xbf16>, vector<224x168xf32> -> vector<224x168xf32>
    %c0_4 = arith.constant 0 : index
    %c0_5 = arith.constant 0 : index
    %12 = vector.load %arg3[%c0_4, %c0_5] : memref<1x168xf32, #tpu.memory_space<vmem>>, vector<1x168xf32>
    %13 = vector.broadcast %12 : vector<1x168xf32> to vector<224x168xf32>
    %14 = arith.addf %11, %13 : vector<224x168xf32>
    %cst_6 = arith.constant 0.000000e+00 : f32
    %15 = vector.broadcast %cst_6 : f32 to vector<224x168xf32>
    %16 = arith.subf %15, %14 : vector<224x168xf32>
    %17 = math.exp %16 : vector<224x168xf32>
    %cst_7 = arith.constant 1.000000e+00 : f32
    %18 = vector.broadcast %cst_7 : f32 to vector<224x168xf32>
    %19 = arith.addf %18, %17 : vector<224x168xf32>
    %cst_8 = arith.constant 1.000000e+00 : f32
    %20 = vector.broadcast %cst_8 : f32 to vector<224x168xf32>
    %21 = arith.divf %20, %19 : vector<224x168xf32>
    %22 = arith.truncf %21 : vector<224x168xf32> to vector<224x168xbf16>
    %c0_9 = arith.constant 0 : index
    %c0_10 = arith.constant 0 : index
    %23 = vector.load %arg4[%c0_9, %c0_10] : memref<168x84xbf16, #tpu.memory_space<vmem>>, vector<168x84xbf16>
    %cst_11 = arith.constant dense<0.000000e+00> : vector<224x84xf32>
    %24 = tpu.matmul %22, %23, %cst_11 {dimension_numbers = #tpu.dot_dimension_numbers<[1], [0], [0], [1], [0, 0, 1, 1], [], []>} : vector<224x168xbf16>, vector<168x84xbf16>, vector<224x84xf32> -> vector<224x84xf32>
    %25 = vector.extract_strided_slice %24 {offsets = [0, 0], sizes = [8, 84], strides = [1, 1]} : vector<224x84xf32> to vector<8x84xf32>
    %26 = vector.extract_strided_slice %24 {offsets = [8, 0], sizes = [8, 84], strides = [1, 1]} : vector<224x84xf32> to vector<8x84xf32>
    %27 = arith.addf %25, %26 : vector<8x84xf32>
    %28 = vector.extract_strided_slice %24 {offsets = [16, 0], sizes = [8, 84], strides = [1, 1]} : vector<224x84xf32> to vector<8x84xf32>
    %29 = vector.extract_strided_slice %24 {offsets = [24, 0], sizes = [8, 84], strides = [1, 1]} : vector<224x84xf32> to vector<8x84xf32>
    %30 = arith.addf %28, %29 : vector<8x84xf32>
    %31 = vector.extract_strided_slice %24 {offsets = [32, 0], sizes = [8, 84], strides = [1, 1]} : vector<224x84xf32> to vector<8x84xf32>
    %32 = vector.extract_strided_slice %24 {offsets = [40, 0], sizes = [8, 84], strides = [1, 1]} : vector<224x84xf32> to vector<8x84xf32>
    %33 = arith.addf %31, %32 : vector<8x84xf32>
    %34 = vector.extract_strided_slice %24 {offsets = [48, 0], sizes = [8, 84], strides = [1, 1]} : vector<224x84xf32> to vector<8x84xf32>
    %35 = vector.extract_strided_slice %24 {offsets = [56, 0], sizes = [8, 84], strides = [1, 1]} : vector<224x84xf32> to vector<8x84xf32>
    %36 = arith.addf %34, %35 : vector<8x84xf32>
    %37 = vector.extract_strided_slice %24 {offsets = [64, 0], sizes = [8, 84], strides = [1, 1]} : vector<224x84xf32> to vector<8x84xf32>
    %38 = vector.extract_strided_slice %24 {offsets = [72, 0], sizes = [8, 84], strides = [1, 1]} : vector<224x84xf32> to vector<8x84xf32>
    %39 = arith.addf %37, %38 : vector<8x84xf32>
    %40 = vector.extract_strided_slice %24 {offsets = [80, 0], sizes = [8, 84], strides = [1, 1]} : vector<224x84xf32> to vector<8x84xf32>
    %41 = vector.extract_strided_slice %24 {offsets = [88, 0], sizes = [8, 84], strides = [1, 1]} : vector<224x84xf32> to vector<8x84xf32>
    %42 = arith.addf %40, %41 : vector<8x84xf32>
    %43 = vector.extract_strided_slice %24 {offsets = [96, 0], sizes = [8, 84], strides = [1, 1]} : vector<224x84xf32> to vector<8x84xf32>
    %44 = vector.extract_strided_slice %24 {offsets = [104, 0], sizes = [8, 84], strides = [1, 1]} : vector<224x84xf32> to vector<8x84xf32>
    %45 = arith.addf %43, %44 : vector<8x84xf32>
    %46 = vector.extract_strided_slice %24 {offsets = [112, 0], sizes = [8, 84], strides = [1, 1]} : vector<224x84xf32> to vector<8x84xf32>
    %47 = vector.extract_strided_slice %24 {offsets = [120, 0], sizes = [8, 84], strides = [1, 1]} : vector<224x84xf32> to vector<8x84xf32>
    %48 = arith.addf %46, %47 : vector<8x84xf32>
    %49 = vector.extract_strided_slice %24 {offsets = [128, 0], sizes = [8, 84], strides = [1, 1]} : vector<224x84xf32> to vector<8x84xf32>
    %50 = vector.extract_strided_slice %24 {offsets = [136, 0], sizes = [8, 84], strides = [1, 1]} : vector<224x84xf32> to vector<8x84xf32>
    %51 = arith.addf %49, %50 : vector<8x84xf32>
    %52 = vector.extract_strided_slice %24 {offsets = [144, 0], sizes = [8, 84], strides = [1, 1]} : vector<224x84xf32> to vector<8x84xf32>
    %53 = vector.extract_strided_slice %24 {offsets = [152, 0], sizes = [8, 84], strides = [1, 1]} : vector<224x84xf32> to vector<8x84xf32>
    %54 = arith.addf %52, %53 : vector<8x84xf32>
    %55 = vector.extract_strided_slice %24 {offsets = [160, 0], sizes = [8, 84], strides = [1, 1]} : vector<224x84xf32> to vector<8x84xf32>
    %56 = vector.extract_strided_slice %24 {offsets = [168, 0], sizes = [8, 84], strides = [1, 1]} : vector<224x84xf32> to vector<8x84xf32>
    %57 = arith.addf %55, %56 : vector<8x84xf32>
    %58 = vector.extract_strided_slice %24 {offsets = [176, 0], sizes = [8, 84], strides = [1, 1]} : vector<224x84xf32> to vector<8x84xf32>
    %59 = vector.extract_strided_slice %24 {offsets = [184, 0], sizes = [8, 84], strides = [1, 1]} : vector<224x84xf32> to vector<8x84xf32>
    %60 = arith.addf %58, %59 : vector<8x84xf32>
    %61 = vector.extract_strided_slice %24 {offsets = [192, 0], sizes = [8, 84], strides = [1, 1]} : vector<224x84xf32> to vector<8x84xf32>
    %62 = vector.extract_strided_slice %24 {offsets = [200, 0], sizes = [8, 84], strides = [1, 1]} : vector<224x84xf32> to vector<8x84xf32>
    %63 = arith.addf %61, %62 : vector<8x84xf32>
    %64 = vector.extract_strided_slice %24 {offsets = [208, 0], sizes = [8, 84], strides = [1, 1]} : vector<224x84xf32> to vector<8x84xf32>
    %65 = vector.extract_strided_slice %24 {offsets = [216, 0], sizes = [8, 84], strides = [1, 1]} : vector<224x84xf32> to vector<8x84xf32>
    %66 = arith.addf %64, %65 : vector<8x84xf32>
    %67 = tpu.concatenate %27, %30, %33, %36, %39, %42, %45, %48, %51, %54, %57, %60, %63, %66 in 0 : vector<8x84xf32>, vector<8x84xf32>, vector<8x84xf32>, vector<8x84xf32>, vector<8x84xf32>, vector<8x84xf32>, vector<8x84xf32>, vector<8x84xf32>, vector<8x84xf32>, vector<8x84xf32>, vector<8x84xf32>, vector<8x84xf32>, vector<8x84xf32>, vector<8x84xf32> -> vector<112x84xf32>
    %68 = arith.truncf %67 : vector<112x84xf32> to vector<112x84xbf16>
    %69 = vector.extract_strided_slice %68 {offsets = [0, 0], sizes = [80, 84], strides = [1, 1]} : vector<112x84xbf16> to vector<80x84xbf16>
    %70 = vector.extract_strided_slice %68 {offsets = [8, 0], sizes = [80, 84], strides = [1, 1]} : vector<112x84xbf16> to vector<80x84xbf16>
    %71 = vector.extract_strided_slice %68 {offsets = [16, 0], sizes = [80, 84], strides = [1, 1]} : vector<112x84xbf16> to vector<80x84xbf16>
    %72 = vector.extract_strided_slice %68 {offsets = [24, 0], sizes = [80, 84], strides = [1, 1]} : vector<112x84xbf16> to vector<80x84xbf16>
    %73 = vector.extract_strided_slice %68 {offsets = [32, 0], sizes = [80, 84], strides = [1, 1]} : vector<112x84xbf16> to vector<80x84xbf16>
    %74 = tpu.concatenate %69, %70, %71, %72, %73 in 1 : vector<80x84xbf16>, vector<80x84xbf16>, vector<80x84xbf16>, vector<80x84xbf16>, vector<80x84xbf16> -> vector<80x420xbf16>
    %c0_12 = arith.constant 0 : index
    %c0_13 = arith.constant 0 : index
    %75 = vector.load %arg5[%c0_12, %c0_13] : memref<420x160xbf16, #tpu.memory_space<vmem>>, vector<420x160xbf16>
    %cst_14 = arith.constant dense<0.000000e+00> : vector<80x160xf32>
    %76 = tpu.matmul %74, %75, %cst_14 {dimension_numbers = #tpu.dot_dimension_numbers<[1], [0], [0], [1], [0, 0, 1, 1], [], []>} : vector<80x420xbf16>, vector<420x160xbf16>, vector<80x160xf32> -> vector<80x160xf32>
    %c0_15 = arith.constant 0 : index
    %c0_16 = arith.constant 0 : index
    %77 = vector.load %arg6[%c0_15, %c0_16] : memref<1x160xf32, #tpu.memory_space<vmem>>, vector<1x160xf32>
    %78 = vector.broadcast %77 : vector<1x160xf32> to vector<80x160xf32>
    %79 = arith.addf %76, %78 : vector<80x160xf32>
    %cst_17 = arith.constant 0.000000e+00 : f32
    %80 = vector.broadcast %cst_17 : f32 to vector<80x160xf32>
    %81 = arith.subf %80, %79 : vector<80x160xf32>
    %82 = math.exp %81 : vector<80x160xf32>
    %cst_18 = arith.constant 1.000000e+00 : f32
    %83 = vector.broadcast %cst_18 : f32 to vector<80x160xf32>
    %84 = arith.addf %83, %82 : vector<80x160xf32>
    %cst_19 = arith.constant 1.000000e+00 : f32
    %85 = vector.broadcast %cst_19 : f32 to vector<80x160xf32>
    %86 = arith.divf %85, %84 : vector<80x160xf32>
    %87 = arith.truncf %86 : vector<80x160xf32> to vector<80x160xbf16>
    %88 = vector.extract_strided_slice %87 {offsets = [0, 0], sizes = [64, 160], strides = [1, 1]} : vector<80x160xbf16> to vector<64x160xbf16>
    %89 = vector.extract_strided_slice %87 {offsets = [8, 0], sizes = [64, 160], strides = [1, 1]} : vector<80x160xbf16> to vector<64x160xbf16>
    %90 = vector.extract_strided_slice %87 {offsets = [16, 0], sizes = [64, 160], strides = [1, 1]} : vector<80x160xbf16> to vector<64x160xbf16>
    %91 = tpu.concatenate %88, %89, %90 in 1 : vector<64x160xbf16>, vector<64x160xbf16>, vector<64x160xbf16> -> vector<64x480xbf16>
    %c0_20 = arith.constant 0 : index
    %c0_21 = arith.constant 0 : index
    %92 = vector.load %arg7[%c0_20, %c0_21] : memref<480x256xbf16, #tpu.memory_space<vmem>>, vector<480x256xbf16>
    %cst_22 = arith.constant dense<0.000000e+00> : vector<64x256xf32>
    %93 = tpu.matmul %91, %92, %cst_22 {dimension_numbers = #tpu.dot_dimension_numbers<[1], [0], [0], [1], [0, 0, 1, 1], [], []>} : vector<64x480xbf16>, vector<480x256xbf16>, vector<64x256xf32> -> vector<64x256xf32>
    %c0_23 = arith.constant 0 : index
    %c0_24 = arith.constant 0 : index
    %94 = vector.load %arg8[%c0_23, %c0_24] : memref<1x256xf32, #tpu.memory_space<vmem>>, vector<1x256xf32>
    %95 = vector.broadcast %94 : vector<1x256xf32> to vector<64x256xf32>
    %96 = arith.addf %93, %95 : vector<64x256xf32>
    %cst_25 = arith.constant 0.000000e+00 : f32
    %97 = vector.broadcast %cst_25 : f32 to vector<64x256xf32>
    %98 = arith.subf %97, %96 : vector<64x256xf32>
    %99 = math.exp %98 : vector<64x256xf32>
    %cst_26 = arith.constant 1.000000e+00 : f32
    %100 = vector.broadcast %cst_26 : f32 to vector<64x256xf32>
    %101 = arith.addf %100, %99 : vector<64x256xf32>
    %cst_27 = arith.constant 1.000000e+00 : f32
    %102 = vector.broadcast %cst_27 : f32 to vector<64x256xf32>
    %103 = arith.divf %102, %101 : vector<64x256xf32>
    %104 = arith.truncf %103 : vector<64x256xf32> to vector<64x256xbf16>
    %c0_28 = arith.constant 0 : index
    %c0_29 = arith.constant 0 : index
    %105 = vector.load %arg9[%c0_28, %c0_29] : memref<256x128xbf16, #tpu.memory_space<vmem>>, vector<256x128xbf16>
    %cst_30 = arith.constant dense<0.000000e+00> : vector<64x128xf32>
    %106 = tpu.matmul %104, %105, %cst_30 {dimension_numbers = #tpu.dot_dimension_numbers<[1], [0], [0], [1], [0, 0, 1, 1], [], []>} : vector<64x256xbf16>, vector<256x128xbf16>, vector<64x128xf32> -> vector<64x128xf32>
    %107 = vector.extract_strided_slice %106 {offsets = [0, 0], sizes = [8, 128], strides = [1, 1]} : vector<64x128xf32> to vector<8x128xf32>
    %108 = vector.extract_strided_slice %106 {offsets = [8, 0], sizes = [8, 128], strides = [1, 1]} : vector<64x128xf32> to vector<8x128xf32>
    %109 = arith.addf %107, %108 : vector<8x128xf32>
    %110 = vector.extract_strided_slice %106 {offsets = [16, 0], sizes = [8, 128], strides = [1, 1]} : vector<64x128xf32> to vector<8x128xf32>
    %111 = vector.extract_strided_slice %106 {offsets = [24, 0], sizes = [8, 128], strides = [1, 1]} : vector<64x128xf32> to vector<8x128xf32>
    %112 = arith.addf %110, %111 : vector<8x128xf32>
    %113 = vector.extract_strided_slice %106 {offsets = [32, 0], sizes = [8, 128], strides = [1, 1]} : vector<64x128xf32> to vector<8x128xf32>
    %114 = vector.extract_strided_slice %106 {offsets = [40, 0], sizes = [8, 128], strides = [1, 1]} : vector<64x128xf32> to vector<8x128xf32>
    %115 = arith.addf %113, %114 : vector<8x128xf32>
    %116 = vector.extract_strided_slice %106 {offsets = [48, 0], sizes = [8, 128], strides = [1, 1]} : vector<64x128xf32> to vector<8x128xf32>
    %117 = vector.extract_strided_slice %106 {offsets = [56, 0], sizes = [8, 128], strides = [1, 1]} : vector<64x128xf32> to vector<8x128xf32>
    %118 = arith.addf %116, %117 : vector<8x128xf32>
    %119 = tpu.concatenate %109, %112, %115, %118 in 0 : vector<8x128xf32>, vector<8x128xf32>, vector<8x128xf32>, vector<8x128xf32> -> vector<32x128xf32>
    %120 = arith.truncf %119 : vector<32x128xf32> to vector<32x128xbf16>
    %121 = vector.extract_strided_slice %120 {offsets = [0, 0], sizes = [16, 128], strides = [1, 1]} : vector<32x128xbf16> to vector<16x128xbf16>
    %122 = vector.extract_strided_slice %120 {offsets = [8, 0], sizes = [16, 128], strides = [1, 1]} : vector<32x128xbf16> to vector<16x128xbf16>
    %123 = vector.extract_strided_slice %120 {offsets = [16, 0], sizes = [16, 128], strides = [1, 1]} : vector<32x128xbf16> to vector<16x128xbf16>
    %124 = tpu.concatenate %121, %122, %123 in 1 : vector<16x128xbf16>, vector<16x128xbf16>, vector<16x128xbf16> -> vector<16x384xbf16>
    %c0_31 = arith.constant 0 : index
    %c0_32 = arith.constant 0 : index
    %125 = vector.load %arg10[%c0_31, %c0_32] : memref<384x240xbf16, #tpu.memory_space<vmem>>, vector<384x240xbf16>
    %cst_33 = arith.constant dense<0.000000e+00> : vector<16x240xf32>
    %126 = tpu.matmul %124, %125, %cst_33 {dimension_numbers = #tpu.dot_dimension_numbers<[1], [0], [0], [1], [0, 0, 1, 1], [], []>} : vector<16x384xbf16>, vector<384x240xbf16>, vector<16x240xf32> -> vector<16x240xf32>
    %c0_34 = arith.constant 0 : index
    %c0_35 = arith.constant 0 : index
    %127 = vector.load %arg11[%c0_34, %c0_35] : memref<1x240xf32, #tpu.memory_space<vmem>>, vector<1x240xf32>
    %128 = vector.broadcast %127 : vector<1x240xf32> to vector<16x240xf32>
    %129 = arith.addf %126, %128 : vector<16x240xf32>
    %cst_36 = arith.constant 0.000000e+00 : f32
    %130 = vector.broadcast %cst_36 : f32 to vector<16x240xf32>
    %131 = arith.subf %130, %129 : vector<16x240xf32>
    %132 = math.exp %131 : vector<16x240xf32>
    %cst_37 = arith.constant 1.000000e+00 : f32
    %133 = vector.broadcast %cst_37 : f32 to vector<16x240xf32>
    %134 = arith.addf %133, %132 : vector<16x240xf32>
    %cst_38 = arith.constant 1.000000e+00 : f32
    %135 = vector.broadcast %cst_38 : f32 to vector<16x240xf32>
    %136 = arith.divf %135, %134 : vector<16x240xf32>
    %137 = arith.truncf %136 : vector<16x240xf32> to vector<16x240xbf16>
    %138 = vector.extract_strided_slice %137 {offsets = [0, 0], sizes = [8, 240], strides = [1, 1]} : vector<16x240xbf16> to vector<8x240xbf16>
    %139 = vector.extract_strided_slice %137 {offsets = [8, 0], sizes = [8, 240], strides = [1, 1]} : vector<16x240xbf16> to vector<8x240xbf16>
    %140 = tpu.concatenate %138, %139 in 1 : vector<8x240xbf16>, vector<8x240xbf16> -> vector<8x480xbf16>
    %c0_39 = arith.constant 0 : index
    %c0_40 = arith.constant 0 : index
    %141 = vector.load %arg12[%c0_39, %c0_40] : memref<480x84xbf16, #tpu.memory_space<vmem>>, vector<480x84xbf16>
    %cst_41 = arith.constant dense<0.000000e+00> : vector<8x84xf32>
    %142 = tpu.matmul %140, %141, %cst_41 {dimension_numbers = #tpu.dot_dimension_numbers<[1], [0], [0], [1], [0, 0, 1, 1], [], []>} : vector<8x480xbf16>, vector<480x84xbf16>, vector<8x84xf32> -> vector<8x84xf32>
    %c0_42 = arith.constant 0 : index
    %c0_43 = arith.constant 0 : index
    %143 = vector.load %arg13[%c0_42, %c0_43] : memref<1x84xf32, #tpu.memory_space<vmem>>, vector<1x84xf32>
    %144 = vector.broadcast %143 : vector<1x84xf32> to vector<8x84xf32>
    %145 = arith.addf %142, %144 : vector<8x84xf32>
    %146 = arith.truncf %145 : vector<8x84xf32> to vector<8x84xbf16>
    %c0_44 = arith.constant 0 : index
    %c0_45 = arith.constant 0 : index
    %147 = vector.load %arg14[%c0_44, %c0_45] : memref<84x42xbf16, #tpu.memory_space<vmem>>, vector<84x42xbf16>
    %cst_46 = arith.constant dense<0.000000e+00> : vector<8x42xf32>
    %148 = tpu.matmul %146, %147, %cst_46 {dimension_numbers = #tpu.dot_dimension_numbers<[1], [0], [0], [1], [0, 0, 1, 1], [], []>} : vector<8x84xbf16>, vector<84x42xbf16>, vector<8x42xf32> -> vector<8x42xf32>
    %c0_47 = arith.constant 0 : index
    %c0_48 = arith.constant 0 : index
    %149 = vector.load %arg15[%c0_47, %c0_48] : memref<1x42xf32, #tpu.memory_space<vmem>>, vector<1x42xf32>
    %150 = vector.broadcast %149 : vector<1x42xf32> to vector<8x42xf32>
    %151 = arith.addf %148, %150 : vector<8x42xf32>
    %152 = arith.truncf %151 : vector<8x42xf32> to vector<8x42xbf16>
    %c0_49 = arith.constant 0 : index
    %c0_50 = arith.constant 0 : index
    %153 = vector.load %arg16[%c0_49, %c0_50] : memref<42x10xbf16, #tpu.memory_space<vmem>>, vector<42x10xbf16>
    %cst_51 = arith.constant dense<0.000000e+00> : vector<8x10xf32>
    %154 = tpu.matmul %152, %153, %cst_51 {dimension_numbers = #tpu.dot_dimension_numbers<[1], [0], [0], [1], [0, 0, 1, 1], [], []>} : vector<8x42xbf16>, vector<42x10xbf16>, vector<8x10xf32> -> vector<8x10xf32>
    %c0_52 = arith.constant 0 : index
    %c0_53 = arith.constant 0 : index
    %155 = vector.load %arg17[%c0_52, %c0_53] : memref<1x10xf32, #tpu.memory_space<vmem>>, vector<1x10xf32>
    %156 = vector.broadcast %155 : vector<1x10xf32> to vector<8x10xf32>
    %157 = arith.addf %154, %156 : vector<8x10xf32>
    %c0_54 = arith.constant 0 : index
    %c0_55 = arith.constant 0 : index
    %158 = vector.load %arg18[%c0_54, %c0_55] : memref<8x10xf32, #tpu.memory_space<vmem>>, vector<8x10xf32>
    tpu.vector_store %arg18[%c0_54, %c0_55], %157 {strides = array<i32>} : memref<8x10xf32, #tpu.memory_space<vmem>>, vector<8x10xf32>,
    return
  }
  func.func @transform_0(%arg0: i32) -> (i32, i32) {
    %c0_i32 = arith.constant 0 : i32
    %c0_i32_0 = arith.constant 0 : i32
    return %arg0, %c0_i32 : i32, i32
  }
  func.func @transform_1(%arg0: i32) -> (i32, i32) {
    %c0_i32 = arith.constant 0 : i32
    %c0_i32_0 = arith.constant 0 : i32
    %c0_i32_1 = arith.constant 0 : i32
    return %c0_i32, %c0_i32_0 : i32, i32
  }
  func.func @transform_2(%arg0: i32) -> (i32, i32) {
    %c0_i32 = arith.constant 0 : i32
    %c0_i32_0 = arith.constant 0 : i32
    %c0_i32_1 = arith.constant 0 : i32
    return %c0_i32, %c0_i32_0 : i32, i32
  }
  func.func @transform_3(%arg0: i32) -> (i32, i32) {
    %c0_i32 = arith.constant 0 : i32
    %c0_i32_0 = arith.constant 0 : i32
    %c0_i32_1 = arith.constant 0 : i32
    return %c0_i32, %c0_i32_0 : i32, i32
  }
  func.func @transform_4(%arg0: i32) -> (i32, i32) {
    %c0_i32 = arith.constant 0 : i32
    %c0_i32_0 = arith.constant 0 : i32
    %c0_i32_1 = arith.constant 0 : i32
    return %c0_i32, %c0_i32_0 : i32, i32
  }
  func.func @transform_5(%arg0: i32) -> (i32, i32) {
    %c0_i32 = arith.constant 0 : i32
    %c0_i32_0 = arith.constant 0 : i32
    %c0_i32_1 = arith.constant 0 : i32
    return %c0_i32, %c0_i32_0 : i32, i32
  }
  func.func @transform_6(%arg0: i32) -> (i32, i32) {
    %c0_i32 = arith.constant 0 : i32
    %c0_i32_0 = arith.constant 0 : i32
    %c0_i32_1 = arith.constant 0 : i32
    return %c0_i32, %c0_i32_0 : i32, i32
  }
  func.func @transform_7(%arg0: i32) -> (i32, i32) {
    %c0_i32 = arith.constant 0 : i32
    %c0_i32_0 = arith.constant 0 : i32
    %c0_i32_1 = arith.constant 0 : i32
    return %c0_i32, %c0_i32_0 : i32, i32
  }
  func.func @transform_8(%arg0: i32) -> (i32, i32) {
    %c0_i32 = arith.constant 0 : i32
    %c0_i32_0 = arith.constant 0 : i32
    %c0_i32_1 = arith.constant 0 : i32
    return %c0_i32, %c0_i32_0 : i32, i32
  }
  func.func @transform_9(%arg0: i32) -> (i32, i32) {
    %c0_i32 = arith.constant 0 : i32
    %c0_i32_0 = arith.constant 0 : i32
    %c0_i32_1 = arith.constant 0 : i32
    return %c0_i32, %c0_i32_0 : i32, i32
  }
  func.func @transform_10(%arg0: i32) -> (i32, i32) {
    %c0_i32 = arith.constant 0 : i32
    %c0_i32_0 = arith.constant 0 : i32
    %c0_i32_1 = arith.constant 0 : i32
    return %c0_i32, %c0_i32_0 : i32, i32
  }
  func.func @transform_11(%arg0: i32) -> (i32, i32) {
    %c0_i32 = arith.constant 0 : i32
    %c0_i32_0 = arith.constant 0 : i32
    %c0_i32_1 = arith.constant 0 : i32
    return %c0_i32, %c0_i32_0 : i32, i32
  }
  func.func @transform_12(%arg0: i32) -> (i32, i32) {
    %c0_i32 = arith.constant 0 : i32
    %c0_i32_0 = arith.constant 0 : i32
    %c0_i32_1 = arith.constant 0 : i32
    return %c0_i32, %c0_i32_0 : i32, i32
  }
  func.func @transform_13(%arg0: i32) -> (i32, i32) {
    %c0_i32 = arith.constant 0 : i32
    %c0_i32_0 = arith.constant 0 : i32
    %c0_i32_1 = arith.constant 0 : i32
    return %c0_i32, %c0_i32_0 : i32, i32
  }
  func.func @transform_14(%arg0: i32) -> (i32, i32) {
    %c0_i32 = arith.constant 0 : i32
    %c0_i32_0 = arith.constant 0 : i32
    %c0_i32_1 = arith.constant 0 : i32
    return %c0_i32, %c0_i32_0 : i32, i32
  }
  func.func @transform_15(%arg0: i32) -> (i32, i32) {
    %c0_i32 = arith.constant 0 : i32
    %c0_i32_0 = arith.constant 0 : i32
    %c0_i32_1 = arith.constant 0 : i32
    return %c0_i32, %c0_i32_0 : i32, i32
  }
  func.func @transform_16(%arg0: i32) -> (i32, i32) {
    %c0_i32 = arith.constant 0 : i32
    %c0_i32_0 = arith.constant 0 : i32
    %c0_i32_1 = arith.constant 0 : i32
    return %c0_i32, %c0_i32_0 : i32, i32
  }
  func.func @transform_17(%arg0: i32) -> (i32, i32) {
    %c0_i32 = arith.constant 0 : i32
    %c0_i32_0 = arith.constant 0 : i32
    return %arg0, %c0_i32 : i32, i32
  }
}

</mosaic_0001>

<bundles_post_ra>
// kernel: lenet5_forward.1
= control target key start
LH: loop header
LB: loop body
LE: loop exit
PB: predicated region body
PF: predicated region fallthrough
CT: control target
= control target key end

     0   :  { %s12071_s27 = smov 112   ;;  %v7321_v27 = vmov 0   ;;  %vm184_vm0 = vcmask 1043456   ;;  %s12067_s18 = smov 56   ;;  %vm612_vm1 = vcmask 1045504   ;;  %vm583_vm2 = vcmask 97280   ;;  %s12047_s0 = inlined_call_operand.vmem [shape: f32[224,28], index: 0, kind: input, shape index: {}]   ;;  %s12048_s1 = inlined_call_operand.vmem [shape: bf16[140,168], index: 1, kind: input, shape index: {}]   ;;  %s12049_s3 = inlined_call_operand.vmem [shape: bf16[168,84], index: 3, kind: input, shape index: {}]   ;;  %s12050_s2 = inlined_call_operand.vmem [shape: f32[1,168], index: 2, kind: input, shape index: {}]   ;;  %s12051_s4 = inlined_call_operand.vmem [shape: bf16[420,160], index: 4, kind: input, shape index: {}]   ;;  %s12052_s5 = inlined_call_operand.vmem [shape: f32[1,160], index: 5, kind: input, shape index: {}]   ;;  %s12053_s6 = inlined_call_operand.vmem [shape: bf16[480,256], index: 6, kind: input, shape index: {}]   ;;  %s12054_s7 = inlined_call_operand.vmem [shape: f32[1,256], index: 7, kind: input, shape index: {}]   ;;  %s12055_s8 = inlined_call_operand.vmem [shape: bf16[256,128], index: 8, kind: input, shape index: {}]   ;;  %s12056_s9 = inlined_call_operand.vmem [shape: bf16[384,240], index: 9, kind: input, shape index: {}]   ;;  %s12057_s10 = inlined_call_operand.vmem [shape: f32[1,240], index: 10, kind: input, shape index: {}]   ;;  %s12058_s11 = inlined_call_operand.vmem [shape: bf16[480,84], index: 11, kind: input, shape index: {}]   ;;  %s12059_s12 = inlined_call_operand.vmem [shape: f32[1,84], index: 12, kind: input, shape index: {}]   ;;  %s12060_s14 = inlined_call_operand.vmem [shape: f32[1,42], index: 14, kind: input, shape index: {}]   ;;  %s12061_s13 = inlined_call_operand.vmem [shape: bf16[84,42], index: 13, kind: input, shape index: {}]   ;;  %s12062_s15 = inlined_call_operand.vmem [shape: bf16[42,10], index: 15, kind: input, shape index: {}]   ;;  %s12063_s16 = inlined_call_operand.vmem [shape: f32[1,10], index: 16, kind: input, shape index: {}]   ;;  %s12064_s17 = inlined_call_operand.vmem [shape: f32[8,10], index: 17, kind: output, shape index: {}]  }
   0x1   :  { %12075 = sst [smem:[#allocation2_spill]] %s12047_s0  ;;  %v7455_v28 = vrot.slane %v7321_v27, 4  ;;  %s12069_s19 = smov 28   ;;  %vm327_vm3 = vcmask 228352   ;;  %vm370_vm4 = vcmask 457728   ;;  %vm399_vm5 = vcmask 687104  }
   0x2   :  { %12076 = sst [smem:[#allocation3_spill]] %s12048_s1  ;;  %s12073_s23 = smov 84   ;;  %vm428_vm6 = vcmask 916480  }
   0x3   :  { %s12077_s26 = sld [smem:[#allocation2_spill]]  ;;  %s12079_s22 = smov 56  }
   0x4   :  { %s12078_s0 = sld [smem:[#allocation3_spill]]  ;;  %s12080_s30 = smov 28  }
   0x5   :  { %s12081_s20 = smov 112   ;;  %s12082_s29 = smov 84  }
   0x6   :  { %s7326_s25 = smov 124  }
   0x9   :  { %v63_v0 = vld [vmem:[%s12077_s26 + $0x30] sm:$0xff]  ;;  %v64_v1 = vld [vmem:[%s12077_s26 + $0x38] sm:$0xff]  ;;  %v61_v7 = vld [vmem:[%s12077_s26 + $0x20] sm:$0xff] }
   0xa   :  { %v59_v2 = vld [vmem:[%s12077_s26 + $0x10] sm:$0xff]  ;;  %v91_v3 = vpack.c.bf16 %v63_v0, %v63_v0  ;;  %v92_v4 = vpack.c.bf16 %v64_v1, %v64_v1  ;;  %v60_v5 = vld [vmem:[%s12077_s26 + $0x18] sm:$0xff]  ;;  %v62_v8 = vld [vmem:[%s12077_s26 + $0x28] sm:$0xff]  ;;  %v89_v17 = vpack.c.bf16 %v61_v7, %v61_v7 }
   0xb   :  { %v87_v6 = vpack.c.bf16 %v59_v2, %v59_v2  ;;  %v88_v9 = vpack.c.bf16 %v60_v5, %v60_v5  ;;  %v57_v10 = vld [vmem:[%s12077_s26] sm:$0xff]  ;;  %v58_v11 = vld [vmem:[%s12077_s26 + $0x8] sm:$0xff]  ;;  %v90_v18 = vpack.c.bf16 %v62_v8, %v62_v8  ;;  %v67_v39 = vld [vmem:[%s12077_s26 + $0x50] sm:$0xff] }
   0xc   :  { %v147_v12 = vunpack.c.l.b16 %v91_v3  ;;  %v148_v13 = vunpack.c.l.b16 %v92_v4  ;;  %v85_v15 = vpack.c.bf16 %v57_v10, %v57_v10  ;;  %v86_v19 = vpack.c.bf16 %v58_v11, %v58_v11  ;;  %v65_v29 = vld [vmem:[%s12077_s26 + $0x40] sm:$0xff]  ;;  %v66_v30 = vld [vmem:[%s12077_s26 + $0x48] sm:$0xff]  ;;  %v68_v40 = vld [vmem:[%s12077_s26 + $0x58] sm:$0xff] }
   0xd   :  { %v143_v14 = vunpack.c.l.b16 %v87_v6  ;;  %v144_v16 = vunpack.c.l.b16 %v88_v9  ;;  %v145_v24 = vunpack.c.l.b16 %v89_v17  ;;  %v146_v25 = vunpack.c.l.b16 %v90_v18  ;;  %v69_v51 = vld [vmem:[%s12077_s26 + $0x60] sm:$0xff]  ;;  %v70_v52 = vld [vmem:[%s12077_s26 + $0x68] sm:$0xff]  ;;  %v71_v59 = vld [vmem:[%s12077_s26 + $0x70] sm:$0xff] }
   0xe   :  { %v7444_v20 = vpack.c.b16 %v148_v13, %v147_v12  ;;  %v141_v21 = vunpack.c.l.b16 %v85_v15  ;;  %v142_v23 = vunpack.c.l.b16 %v86_v19  ;;  %v93_v34 = vpack.c.bf16 %v65_v29, %v65_v29  ;;  %v72_v60 = vld [vmem:[%s12077_s26 + $0x78] sm:$0xff]  ;;  %v73_v0 = vld [vmem:[%s12077_s26 + $0x80] sm:$0xff]  ;;  %v74_v1 = vld [vmem:[%s12077_s26 + $0x88] sm:$0xff] }
   0xf   :  { %v7446_v22 = vpack.c.b16 %v144_v16, %v143_v14  ;;  %v7466_v32 = vpack.c.b16 %v146_v25, %v145_v24  ;;  %v94_v35 = vpack.c.bf16 %v66_v30, %v66_v30  ;;  %v95_v42 = vpack.c.bf16 %v67_v39, %v67_v39  ;;  %v5708_v4 = vld [vmem:[%s12078_s0 + $0x70] sm:$0xf]  ;;  %v6696_v5 = vld [vmem:[%s12078_s0 + $0x74] sm:$0xf0]  ;;  %v6695_v6 = vld [vmem:[%s12078_s0 + $0x74] sm:$0xf] }
  0x10   :  { %303 = vrot.lane.b32.xlu1 %v7444_v20, %s12071_s27  ;;  %v7452_v26 = vpack.c.b16 %v142_v23, %v141_v21  ;;  %v149_v37 = vunpack.c.l.b16 %v93_v34  ;;  %v96_v43 = vpack.c.bf16 %v68_v40, %v68_v40  ;;  %v192_v50 = vrot.slane %v7444_v20, 4  ;;  %v5710_v9 = vld [vmem:[%s12078_s0 + $0x78] sm:$0xf0]  ;;  %v5700_v10 = vld [vmem:[%s12078_s0 + $0x60] sm:$0xf] }
  0x11   :  { %299 = vrot.lane.b32.xlu0 %v7446_v22, %s12071_s27  ;;  %v188_v36 = vrot.slane %v7446_v22, 4  ;;  %v150_v38 = vunpack.c.l.b16 %v94_v35  ;;  %v151_v45 = vunpack.c.l.b16 %v95_v42  ;;  %v190_v47 = vrot.slane %v7466_v32, 4  ;;  %v6694_v11 = vld [vmem:[%s12078_s0 + $0x64] sm:$0xf0]  ;;  %v6693_v13 = vld [vmem:[%s12078_s0 + $0x64] sm:$0xf] }
  0x12   :  { %v186_v31 = vrot.slane %v7452_v26, 4  ;;  %242 = vrot.lane.b32.xlu2 %v7452_v26, %s12067_s18  ;;  %v152_v46 = vunpack.c.l.b16 %v96_v43  ;;  %v97_v53 = vpack.c.bf16 %v69_v51, %v69_v51  ;;  %v98_v54 = vpack.c.bf16 %v70_v52, %v70_v52  ;;  %v5702_v14 = vld [vmem:[%s12078_s0 + $0x68] sm:$0xf0]  ;;  %v5692_v25 = vld [vmem:[%s12078_s0 + $0x50] sm:$0xf] }
  0x13   :  { %v7482_v44 = vpack.c.b16 %v150_v38, %v149_v37  ;;  %v191_v49 = vsel %vm184_vm0, %v188_v36, %v190_v47  ;;  %v193_v57 = vsel %vm184_vm0, %v190_v47, %v192_v50  ;;  %v99_v61 = vpack.c.bf16 %v71_v59, %v71_v59  ;;  %v6692_v29 = vld [vmem:[%s12078_s0 + $0x54] sm:$0xf0]  ;;  %v6691_v30 = vld [vmem:[%s12078_s0 + $0x54] sm:$0xf]  ;;  %v5684_v34 = vld [vmem:[%s12078_s0 + $0x40] sm:$0xf] }
  0x14   :  { %v187_v33 = vsel %vm184_vm0, %v7455_v28, %v186_v31  ;;  %v189_v41 = vsel %vm184_vm0, %v186_v31, %v188_v36  ;;  %v7490_v48 = vpack.c.b16 %v152_v46, %v151_v45  ;;  %v153_v55 = vunpack.c.l.b16 %v97_v53  ;;  %v6690_v35 = vld [vmem:[%s12078_s0 + $0x44] sm:$0xf0]  ;;  %v6689_v37 = vld [vmem:[%s12078_s0 + $0x44] sm:$0xf]  ;;  %v5686_v38 = vld [vmem:[%s12078_s0 + $0x48] sm:$0xf0] }
  0x15   :  { %v154_v56 = vunpack.c.l.b16 %v98_v54  ;;  %v100_v62 = vpack.c.bf16 %v72_v60, %v72_v60  ;;  %v194_v63 = vrot.slane %v7482_v44, 4  ;;  %v155_v2 = vunpack.c.l.b16 %v99_v61  ;;  %v75_v45 = vld [vmem:[%s12077_s26 + $0x90] sm:$0xff]  ;;  %v76_v46 = vld [vmem:[%s12077_s26 + $0x98] sm:$0xff]  ;;  %v5716_v52 = vld [vmem:[%s12078_s0 + $0x80] sm:$0xf] }
  0x16   :  { %v5709_v8 = vor.u32 %v6696_v5, %v5708_v4  ;;  %v5713_v12 = vor.u32 %v6695_v6, %v5710_v9  ;;  %v101_v15 = vpack.c.bf16 %v73_v0, %v73_v0  ;;  %v102_v16 = vpack.c.bf16 %v74_v1, %v74_v1  ;;  %v5676_v47 = vld [vmem:[%s12078_s0 + $0x30] sm:$0xf]  ;;  %v6688_v51 = vld [vmem:[%s12078_s0 + $0x34] sm:$0xf0]  ;;  %v6698_v53 = vld [vmem:[%s12078_s0 + $0x84] sm:$0x30] }
  0x17   :  { %v7505_v58 = vpack.c.b16 %v154_v56, %v153_v55  ;;  %v156_v3 = vunpack.c.l.b16 %v100_v62  ;;  %v195_v7 = vsel %vm184_vm0, %v192_v50, %v194_v63  ;;  %v5701_v17 = vor.u32 %v6694_v11, %v5700_v10  ;;  %v6687_v56 = vld [vmem:[%s12078_s0 + $0x34] sm:$0xf]  ;;  %v6697_v59 = vld [vmem:[%s12078_s0 + $0x84] sm:$0xf]  ;;  %v78_v6 = vld [vmem:[%s12077_s26 + $0xa8] sm:$0xff] }
  0x18   :  { %214 = vrot.lane.b32.xlu1 %v187_v33, %s12069_s19  ;;  %619 = vmatpush.bf16.msra.mxu0 %v5709_v8  ;;  %v5705_v19 = vor.u32 %v6693_v13, %v5702_v14  ;;  %v196_v21 = vrot.slane %v7490_v48, 4  ;;  %v157_v23 = vunpack.c.l.b16 %v101_v15  ;;  %v158_v24 = vunpack.c.l.b16 %v102_v16  ;;  %v5694_v33 = vld [vmem:[%s12078_s0 + $0x58] sm:$0xf0]  ;;  %v77_v5 = vld [vmem:[%s12077_s26 + $0xa0] sm:$0xff]  ;;  %v79_v15 = vld [vmem:[%s12077_s26 + $0xb0] sm:$0xff] }
  0x19   :  { %301 = vrot.lane.b32.xlu0 %v7466_v32, %s12071_s27  ;;  %v7554_v18 = vpack.c.b16 %v156_v3, %v155_v2  ;;  %777 = vmatpush.bf16.msra.mxu2 %v5713_v12  ;;  %v5693_v31 = vor.u32 %v6692_v29, %v5692_v25  ;;  %v5697_v36 = vor.u32 %v6691_v30, %v5694_v33  ;;  %v198_v43 = vrot.slane %v7505_v58, 4  ;;  %v80_v16 = vld [vmem:[%s12077_s26 + $0xb8] sm:$0xff]  ;;  %v5670_v29 = vld [vmem:[%s12078_s0 + $0x28] sm:$0xf0]  ;;  %v2047_v30 = vld [vmem:[%s12049_s3 + $0x50] sm:$0xf] }
  0x1a   :  { %271 = vrot.lane.b32.xlu2 %v189_v41, %s12073_s23  ;;  %v7586_v39 = vpack.c.b16 %v158_v24, %v157_v23  ;;  %v5685_v40 = vor.u32 %v6690_v35, %v5684_v34  ;;  %v197_v42 = vsel %vm184_vm0, %v194_v63, %v196_v21  ;;  %v104_v50 = vpack.c.bf16 %v76_v46, %v76_v46  ;;  %v5718_v63 = vld [vmem:[%s12078_s0 + $0x88] sm:$0x30]  ;;  %v5660_v35 = vld [vmem:[%s12078_s0 + $0x10] sm:$0xf] }
  0x1b   :  { %v5677_v54 = vor.u32 %v6688_v51, %v5676_v47  ;;  %v5717_v55 = vor.u32 %v6698_v53, %v5716_v52  ;;  %v199_v0 = vsel %vm184_vm0, %v196_v21, %v198_v43  ;;  %v5721_v2 = vor.u32 %v6697_v59, %v5718_v63  ;;  %v6685_v21 = vld [vmem:[%s12078_s0 + $0x24] sm:$0xf]  ;;  %v6682_v51 = vld [vmem:[%s12078_s0 + $0x4] sm:$0xf0] }
  0x1c   :  { %620 = vmatpush.bf16.msra.mxu0 %v5701_v17  ;;  %v160_v61 = vunpack.c.l.b16 %v104_v50  ;;  %v106_v8 = vpack.c.bf16 %v78_v6, %v78_v6  ;;  %v200_v9 = vrot.slane %v7554_v18, 4  ;;  %v202_v14 = vrot.slane %v7586_v39, 4  ;;  %v5668_v17 = vld [vmem:[%s12078_s0 + $0x20] sm:$0xf]  ;;  %v6681_v52 = vld [vmem:[%s12078_s0 + $0x4] sm:$0xf] }
  0x1d   :  { %778 = vmatpush.bf16.msra.mxu2 %v5705_v19  ;;  %v614_v1 = vsel %vm612_vm1, %v5717_v55, 0  ;;  %v617_v4 = vsel %vm612_vm1, %v5721_v2, 0  ;;  %v6686_v19 = vld [vmem:[%s12078_s0 + $0x24] sm:$0xf0]  ;;  %v107_v23 = vpack.c.bf16 %v79_v15, %v79_v15  ;;  %v108_v24 = vpack.c.bf16 %v80_v16, %v80_v16  ;;  %v5652_v50 = vld [vmem:[%s12078_s0] sm:$0xf] }
  0x1e   :  { %705 = vmatpush.bf16.msra.mxu1 %v614_v1  ;;  %863 = vmatpush.bf16.msra.mxu3 %v617_v4  ;;  %v162_v11 = vunpack.c.l.b16 %v106_v8  ;;  %v201_v12 = vsel %vm184_vm0, %v198_v43, %v200_v9  ;;  %v5669_v25 = vor.u32 %v6686_v19, %v5668_v17  ;;  %v203_v43 = vsel %vm184_vm0, %v200_v9, %v202_v14 }
  0x1f   :  { %v163_v33 = vunpack.c.l.b16 %v107_v23  ;;  %v164_v34 = vunpack.c.l.b16 %v108_v24  ;;  %v5653_v53 = vor.u32 %v6682_v51, %v5652_v50 }
  0x20   :  { %216 = vrot.lane.b32.xlu1 %v189_v41, %s12069_s19  ;;  %621 = vmatpush.bf16.msra.mxu0 %v5693_v31  ;;  %v5689_v41 = vor.u32 %v6689_v37, %v5686_v38  ;;  %v5673_v31 = vor.u32 %v6685_v21, %v5670_v29  ;;  %v2089_v37 = vunpack.c.l.b16 %v2047_v30 }
  0x21   :  { %305 = vrot.lane.b32.xlu0 %v7482_v44, %s12071_s27  ;;  %779 = vmatpush.bf16.msra.mxu2 %v5697_v36  ;;  %v6684_v36 = vld [vmem:[%s12078_s0 + $0x14] sm:$0xf0] }
  0x22   :  { %244 = vrot.lane.b32.xlu2 %v7446_v22, %s12067_s18  ;;  %v5661_v38 = vor.u32 %v6684_v36, %v5660_v35  ;;  %v2100_v47 = vpack.c.b16 %v2089_v37, %v2089_v37 }
  0x24   :  { %622 = vmatpush.bf16.msra.mxu0 %v5685_v40  ;;  %v6683_v40 = vld [vmem:[%s12078_s0 + $0x14] sm:$0xf] }
  0x25   :  { %780 = vmatpush.bf16.msra.mxu2 %v5689_v41  ;;  %v5662_v41 = vld [vmem:[%s12078_s0 + $0x18] sm:$0xf0] }
  0x26   :  { %v5665_v46 = vor.u32 %v6683_v40, %v5662_v41 }
  0x28   :  { %307 = vrot.lane.b32.xlu1 %v7490_v48, %s12071_s27  ;;  %623 = vmatpush.bf16.msra.mxu0 %v5677_v54  ;;  %v5654_v54 = vld [vmem:[%s12078_s0 + $0x8] sm:$0xf0] }
  0x29   :  { %273 = vrot.lane.b32.xlu0 %v191_v49, %s12073_s23  ;;  %v5657_v55 = vor.u32 %v6681_v52, %v5654_v54 }
  0x2a   :  { %218 = vrot.lane.b32.xlu2 %v191_v49, %s12069_s19  ;;  %v103_v49 = vpack.c.bf16 %v75_v45, %v75_v45  ;;  %v7691_v45 = vpack.c.b16 %v164_v34, %v163_v33 }
  0x2c   :  { %v159_v60 = vunpack.c.l.b16 %v103_v49  ;;  %624 = vmatpush.bf16.msra.mxu0 %v5669_v25  ;;  %v2156_v49 = vsel %vm184_vm0, %v2100_v47, 0  ;;  %v208_v9 = vrot.slane %v7691_v45, 4  ;;  %v6708_v47 = vld [vmem:[%s12049_s3 + $0x48] sm:$0xff] }
  0x2d   :  { %2242 = vmatpush.bf16.msrb.mxu3 %v2156_v49 }
  0x2e   :  { %v7626_v3 = vpack.c.b16 %v160_v61, %v159_v60  ;;  %v83_v60 = vld [vmem:[%s12077_s26 + $0xd0] sm:$0xff]  ;;  %v84_v61 = vld [vmem:[%s12077_s26 + $0xd8] sm:$0xff] }
  0x2f   :  { %v111_v63 = vpack.c.bf16 %v83_v60, %v83_v60 }
  0x30   :  { %275 = vrot.lane.b32.xlu1 %v193_v57, %s12073_s23  ;;  %625 = vmatpush.bf16.msra.mxu0 %v5661_v38 }
  0x31   :  { %246 = vrot.lane.b32.xlu0 %v7466_v32, %s12067_s18  ;;  %v167_v2 = vunpack.c.l.b16 %v111_v63  ;;  %2243 = vmatpush.bf16.msrb.mxu3 %v6708_v47 }
  0x32   :  { %309 = vrot.lane.b32.xlu2 %v7505_v58, %s12071_s27 }
  0x34   :  { %626 = vmatpush.bf16.msra.mxu0 %v5653_v53 }
  0x38   :  { %248 = vrot.lane.b32.xlu1 %v7444_v20, %s12067_s18 }
  0x39   :  { %220 = vrot.lane.b32.xlu0 %v193_v57, %s12069_s19  ;;  %v5678_v57 = vld [vmem:[%s12078_s0 + $0x38] sm:$0xf0] }
  0x3a   :  { %277 = vrot.lane.b32.xlu2 %v195_v7, %s12073_s23  ;;  %v5681_v62 = vor.u32 %v6687_v56, %v5678_v57  ;;  %v204_v56 = vrot.slane %v7626_v3, 4 }
  0x3c   :  { %781 = vmatpush.bf16.msra.mxu2 %v5681_v62  ;;  %v205_v57 = vsel %vm184_vm0, %v202_v14, %v204_v56 }
  0x40   :  { %222 = vrot.lane.b32.xlu1 %v195_v7, %s12069_s19  ;;  %v105_v7 = vpack.c.bf16 %v77_v5, %v77_v5  ;;  %782 = vmatpush.bf16.msra.mxu2 %v5673_v31  ;;  %v6705_v5 = vld [vmem:[%s12049_s3 + $0x30] sm:$0xff] }
  0x41   :  { %311 = vrot.lane.b32.xlu0 %v7554_v18, %s12071_s27 }
  0x42   :  { %250 = vrot.lane.b32.xlu2 %v7482_v44, %s12079_s22  ;;  %v161_v10 = vunpack.c.l.b16 %v105_v7 }
  0x44   :  { %v7646_v13 = vpack.c.b16 %v162_v11, %v161_v10  ;;  %783 = vmatpush.bf16.msra.mxu2 %v5665_v46  ;;  %v81_v10 = vld [vmem:[%s12077_s26 + $0xc0] sm:$0xff]  ;;  %v82_v11 = vld [vmem:[%s12077_s26 + $0xc8] sm:$0xff]  ;;  %s7328_s26 = smov 32  }
  0x45   :  { %v109_v15 = vpack.c.bf16 %v81_v10, %v81_v10  ;;  %v110_v16 = vpack.c.bf16 %v82_v11, %v82_v11 }
  0x46   :  { %v206_v6 = vrot.slane %v7646_v13, 4 }
  0x47   :  { %v165_v23 = vunpack.c.l.b16 %v109_v15  ;;  %v166_v24 = vunpack.c.l.b16 %v110_v16 }
  0x48   :  { %313 = vrot.lane.b32.xlu1 %v7586_v39, %s12071_s27  ;;  %784 = vmatpush.bf16.msra.mxu2 %v5657_v55  ;;  %v207_v8 = vsel %vm184_vm0, %v204_v56, %v206_v6  ;;  %v209_v29 = vsel %vm184_vm0, %v206_v6, %v208_v9  ;;  %s7325_s27 = smov 40  }
  0x49   :  { %279 = vrot.lane.b32.xlu0 %v197_v42, %s12073_s23  ;;  %v7750_v31 = vpack.c.b16 %v166_v24, %v165_v23 }
  0x4a   :  { %224 = vrot.lane.b32.xlu2 %v197_v42, %s12080_s30  ;;  %v6706_v42 = vld [vmem:[%s12049_s3 + $0x38] sm:$0xff] }
  0x4b   :  { %2158 = vmatpush.bf16.msrb.mxu1 %v6706_v42  ;;  %v210_v35 = vrot.slane %v7750_v31, 4 }
  0x4d   :  { %v211_v38 = vsel %vm184_vm0, %v208_v9, %v210_v35 }
  0x4f   :  { %2159 = vmatpush.bf16.msrb.mxu1 %v6705_v5 }
  0x50   :  { %281 = vrot.lane.b32.xlu1 %v199_v0, %s12073_s23 }
  0x51   :  { %252 = vrot.lane.b32.xlu0 %v7490_v48, %s12079_s22 }
  0x52   :  { %315 = vrot.lane.b32.xlu2 %v7626_v3, %s12081_s20 }
  0x58   :  { %254 = vrot.lane.b32.xlu1 %v7505_v58, %s12079_s22 }
  0x59   :  { %226 = vrot.lane.b32.xlu0 %v199_v0, %s12080_s30  ;;  %v112_v0 = vpack.c.bf16 %v84_v61, %v84_v61 }
  0x5a   :  { %283 = vrot.lane.b32.xlu2 %v201_v12, %s12073_s23 }
  0x5b   :  { %v168_v4 = vunpack.c.l.b16 %v112_v0 }
  0x5d   :  { %v7732_v7 = vpack.c.b16 %v168_v4, %v167_v2 }
  0x5f   :  { %v212_v49 = vrot.slane %v7732_v7, 4 }
  0x60   :  { %228 = vrot.lane.b32.xlu1 %v201_v12, %s12080_s30 }
  0x61   :  { %317 = vrot.lane.b32.xlu0 %v7646_v13, %s12081_s20  ;;  %v213_v52 = vsel %vm184_vm0, %v210_v35, %v212_v49  ;;  %v270_v60 = vsel %vm184_vm0, %v212_v49, %v7455_v28 }
  0x62   :  { %256 = vrot.lane.b32.xlu2 %v7554_v18, %s12079_s22 }
  0x68   :  { %319 = vrot.lane.b32.xlu1 %v7691_v45, %s12081_s20 }
  0x69   :  { %285 = vrot.lane.b32.xlu0 %v203_v43, %s12082_s29 }
  0x6a   :  { %230 = vrot.lane.b32.xlu2 %v203_v43, %s12080_s30 }
  0x6c   :  { %v243_v59 = vpop.permute.xlu2 %242 }
  0x70   :  { %287 = vrot.lane.b32.xlu1 %v205_v57, %s12082_s29 }
  0x71   :  { %258 = vrot.lane.b32.xlu0 %v7586_v39, %s12079_s22 }
  0x72   :  { %321 = vrot.lane.b32.xlu2 %v7750_v31, %s12081_s20 }
  0x74   :  { %v272_v14 = vpop.permute.xlu2 %271 }
  0x78   :  { %260 = vrot.lane.b32.xlu1 %v7626_v3, %s12079_s22 }
  0x79   :  { %232 = vrot.lane.b32.xlu0 %v205_v57, %s12080_s30 }
  0x7a   :  { %289 = vrot.lane.b32.xlu2 %v207_v8, %s12082_s29 }
  0x7c   :  { %v245_v37 = vpop.permute.xlu2 %244 }
  0x80   :  { %234 = vrot.lane.b32.xlu1 %v207_v8, %s12080_s30 }
  0x81   :  { %323 = vrot.lane.b32.xlu0 %v7732_v7, %s12081_s20 }
  0x82   :  { %v7724_v62 = vpop.permute.xlu1 %303  ;;  %262 = vrot.lane.b32.xlu2 %v7646_v13, %s12079_s22 }
  0x83   :  { %v300_v1 = vpop.permute.xlu0 %299 }
  0x84   :  { %5722 = vmatmul.msk.bf16.vlgmr.msra.gmra.mxu1 %vm583_vm2, %v300_v1  ;;  %5736 = vmatmul.msk.bf16.vlgmr.msra.gmra.mxu3 %vm583_vm2, %v300_v1  ;;  %v219_v46 = vpop.permute.xlu2 %218 }
  0x85   :  { %v336_v50 = vsel %vm327_vm3, %v7446_v22, %v219_v46 }
  0x88   :  { %325 = vrot.lane.b32.xlu1 %v7321_v27, %s12081_s20 }
  0x89   :  { %291 = vrot.lane.b32.xlu0 %v209_v29, %s12082_s29 }
  0x8a   :  { %v215_v12 = vpop.permute.xlu1 %214  ;;  %236 = vrot.lane.b32.xlu2 %v209_v29, %s12080_s30 }
  0x8b   :  { %v302_v17 = vpop.permute.xlu0 %301  ;;  %v330_v19 = vsel %vm327_vm3, 0, %v215_v12 }
  0x8c   :  { %v372_v21 = vsel %vm370_vm4, %v330_v19, %v243_v59  ;;  %v310_v56 = vpop.permute.xlu2 %309  ;;  %v6703_v59 = vld [vmem:[%s12049_s3 + $0x20] sm:$0xff] }
  0x8d   :  { %v401_v25 = vsel %vm399_vm5, %v372_v21, %v272_v14 }
  0x8e   :  { %v430_v30 = vsel %vm428_vm6, %v401_v25, %v300_v1 }
  0x8f   :  { %627 = vmatmul.bf16.vlgmr.msra.gmra.mxu0 %v430_v30  ;;  %785 = vmatmul.bf16.vlgmr.msra.gmra.mxu2 %v430_v30 }
  0x90   :  { %293 = vrot.lane.b32.xlu1 %v211_v38, %s12082_s29 }
  0x91   :  { %264 = vrot.lane.b32.xlu0 %v7691_v45, %s12079_s22 }
  0x92   :  { %v217_v34 = vpop.permute.xlu1 %216  ;;  %238 = vrot.lane.b32.xlu2 %v211_v38, %s12080_s30 }
  0x93   :  { %v306_v33 = vpop.permute.xlu0 %305  ;;  %v333_v36 = vsel %vm327_vm3, %v7452_v26, %v217_v34  ;;  %v6704_v26 = vld [vmem:[%s12049_s3 + $0x28] sm:$0xff] }
  0x94   :  { %5723 = vmatmul.msk.bf16.gmra.mxu1 %vm583_vm2, %v302_v17  ;;  %5737 = vmatmul.msk.bf16.gmra.mxu3 %vm583_vm2, %v302_v17  ;;  %v374_v27 = vsel %vm370_vm4, %v333_v36, %v245_v37  ;;  %v278_v0 = vpop.permute.xlu2 %277 }
  0x95   :  { %2160 = vmatpush.bf16.msrb.mxu1 %v6704_v26 }
  0x98   :  { %295 = vrot.lane.b32.xlu1 %v213_v52, %s12082_s29 }
  0x99   :  { %266 = vrot.lane.b32.xlu0 %v7750_v31, %s12079_s22  ;;  %2161 = vmatpush.bf16.msrb.mxu1 %v6703_v59 }
  0x9a   :  { %v308_v42 = vpop.permute.xlu1 %307  ;;  %240 = vrot.lane.b32.xlu2 %v213_v52, %s12080_s30  ;;  %s7329_s30 = smov 64  }
  0x9b   :  { %v274_v40 = vpop.permute.xlu0 %273 }
  0x9c   :  { %v403_v41 = vsel %vm399_vm5, %v374_v27, %v274_v40  ;;  %v251_v5 = vpop.permute.xlu2 %250 }
  0x9d   :  { %v433_v43 = vsel %vm428_vm6, %v403_v41, %v302_v17 }
  0x9f   :  { %632 = vmatmul.bf16.gmra.mxu0 %v433_v43  ;;  %790 = vmatmul.bf16.gmra.mxu2 %v433_v43 }
  0xa0   :  { %297 = vrot.lane.b32.xlu1 %v270_v60, %s12082_s29 }
  0xa1   :  { %268 = vrot.lane.b32.xlu0 %v7732_v7, %s12079_s22 }
  0xa2   :  { %v276_v54 = vpop.permute.xlu1 %275 }
  0xa3   :  { %v247_v51 = vpop.permute.xlu0 %246 }
  0xa4   :  { %5724 = vmatmul.msk.bf16.gmra.mxu1 %vm583_vm2, %v7724_v62  ;;  %5738 = vmatmul.msk.bf16.gmra.mxu3 %vm583_vm2, %v7724_v62  ;;  %v376_v53 = vsel %vm370_vm4, %v336_v50, %v247_v51  ;;  %v225_v11 = vpop.permute.xlu2 %224  ;;  %v489_v50 = vld [vmem:[%s12050_s2] sm:$0x3] }
  0xa5   :  { %v405_v55 = vsel %vm399_vm5, %v376_v53, %v276_v54  ;;  %v345_v12 = vsel %vm327_vm3, %v7482_v44, %v225_v11 }
  0xa6   :  { %v436_v22 = vsel %vm428_vm6, %v405_v55, %v7724_v62  ;;  %v7856_v55 = vperm.slane %v489_v50, 0 }
  0xaa   :  { %v249_v62 = vpop.permute.xlu1 %248 }
  0xab   :  { %v221_v57 = vpop.permute.xlu0 %220 }
  0xac   :  { %v339_v61 = vsel %vm327_vm3, %v7466_v32, %v221_v57  ;;  %v316_v19 = vpop.permute.xlu2 %315 }
  0xad   :  { %v378_v63 = vsel %vm370_vm4, %v339_v61, %v249_v62 }
  0xae   :  { %v407_v1 = vsel %vm399_vm5, %v378_v63, %v278_v0  ;;  %v7863_v63 = vperm.slane %v489_v50, 1  ;;  %v6701_v0 = vld [vmem:[%s12049_s3 + $0x10] sm:$0xff] }
  0xaf   :  { %637 = vmatmul.bf16.gmra.mxu0 %v436_v22  ;;  %795 = vmatmul.bf16.gmra.mxu2 %v436_v22  ;;  %v439_v4 = vsel %vm428_vm6, %v407_v1, %v306_v33  ;;  %v6707_v1 = vld [vmem:[%s12049_s3 + $0x40] sm:$0xff] }
  0xb0   :  { %2244 = vmatpush.bf16.msrb.mxu3 %v6707_v1 }
  0xb2   :  { %v223_v28 = vpop.permute.xlu1 %222 }
  0xb3   :  { %v312_v2 = vpop.permute.xlu0 %311  ;;  %v342_v32 = vsel %vm327_vm3, %v7444_v20, %v223_v28  ;;  %v6702_v20 = vld [vmem:[%s12049_s3 + $0x18] sm:$0xff] }
  0xb4   :  { %5725 = vmatmul.msk.bf16.gmra.mxu1 %vm583_vm2, %v306_v33  ;;  %5739 = vmatmul.msk.bf16.gmra.mxu3 %vm583_vm2, %v306_v33  ;;  %v380_v6 = vsel %vm370_vm4, %v342_v32, %v251_v5  ;;  %v284_v29 = vpop.permute.xlu2 %283 }
  0xb5   :  { %2162 = vmatpush.bf16.msrb.mxu1 %v6702_v20 }
  0xb9   :  { %2163 = vmatpush.bf16.msrb.mxu1 %v6701_v0 }
  0xba   :  { %v314_v9 = vpop.permute.xlu1 %313 }
  0xbb   :  { %v280_v7 = vpop.permute.xlu0 %279 }
  0xbc   :  { %v409_v8 = vsel %vm399_vm5, %v380_v6, %v280_v7  ;;  %v257_v36 = vpop.permute.xlu2 %256 }
  0xbd   :  { %v442_v10 = vsel %vm428_vm6, %v409_v8, %v308_v42 }
  0xbf   :  { %642 = vmatmul.bf16.gmra.mxu0 %v439_v4  ;;  %800 = vmatmul.bf16.gmra.mxu2 %v439_v4 }
  0xc2   :  { %v282_v16 = vpop.permute.xlu1 %281 }
  0xc3   :  { %v253_v14 = vpop.permute.xlu0 %252 }
  0xc4   :  { %5726 = vmatmul.msk.bf16.gmra.mxu1 %vm583_vm2, %v308_v42  ;;  %5740 = vmatmul.msk.bf16.gmra.mxu3 %vm583_vm2, %v308_v42  ;;  %v382_v15 = vsel %vm370_vm4, %v345_v12, %v253_v14  ;;  %v231_v40 = vpop.permute.xlu2 %230 }
  0xc5   :  { %v411_v17 = vsel %vm399_vm5, %v382_v15, %v282_v16  ;;  %v354_v49 = vsel %vm327_vm3, %v7554_v18, %v231_v40 }
  0xc6   :  { %v445_v21 = vsel %vm428_vm6, %v411_v17, %v310_v56 }
  0xca   :  { %v255_v24 = vpop.permute.xlu1 %254 }
  0xcb   :  { %v227_v23 = vpop.permute.xlu0 %226 }
  0xcc   :  { %v348_v44 = vsel %vm327_vm3, %v7490_v48, %v227_v23  ;;  %v7846_v47 = vpop.permute.xlu2 %321 }
  0xcd   :  { %v384_v25 = vsel %vm370_vm4, %v348_v44, %v255_v24 }
  0xce   :  { %v413_v33 = vsel %vm399_vm5, %v384_v25, %v284_v29 }
  0xcf   :  { %647 = vmatmul.bf16.gmra.mxu0 %v442_v10  ;;  %805 = vmatmul.bf16.gmra.mxu2 %v442_v10  ;;  %v448_v35 = vsel %vm428_vm6, %v413_v33, %v312_v2 }
  0xd2   :  { %v229_v34 = vpop.permute.xlu1 %228 }
  0xd3   :  { %v7833_v30 = vpop.permute.xlu0 %317  ;;  %v351_v48 = vsel %vm327_vm3, %v7505_v58, %v229_v34 }
  0xd4   :  { %5727 = vmatmul.msk.bf16.gmra.mxu1 %vm583_vm2, %v310_v56  ;;  %5741 = vmatmul.msk.bf16.gmra.mxu3 %vm583_vm2, %v310_v56  ;;  %v386_v27 = vsel %vm370_vm4, %v351_v48, %v257_v36  ;;  %v290_v22 = vpop.permute.xlu2 %289 }
  0xda   :  { %v7841_v38 = vpop.permute.xlu1 %319 }
  0xdb   :  { %v286_v37 = vpop.permute.xlu0 %285 }
  0xdc   :  { %v415_v41 = vsel %vm399_vm5, %v386_v27, %v286_v37  ;;  %v7872_v7 = vpop.permute.xlu2 %262 }
  0xdd   :  { %v451_v43 = vsel %vm428_vm6, %v415_v41, %v314_v9 }
  0xdf   :  { %652 = vmatmul.bf16.gmra.mxu0 %v445_v21  ;;  %810 = vmatmul.bf16.gmra.mxu2 %v445_v21 }
  0xe2   :  { %v288_v26 = vpop.permute.xlu1 %287 }
  0xe3   :  { %v259_v42 = vpop.permute.xlu0 %258 }
  0xe4   :  { %5728 = vmatmul.msk.bf16.gmra.mxu1 %vm583_vm2, %v312_v2  ;;  %5742 = vmatmul.msk.bf16.gmra.mxu3 %vm583_vm2, %v312_v2  ;;  %v388_v53 = vsel %vm370_vm4, %v354_v49, %v259_v42  ;;  %v237_v33 = vpop.permute.xlu2 %236 }
  0xe5   :  { %v417_v56 = vsel %vm399_vm5, %v388_v53, %v288_v26 }
  0xe6   :  { %v454_v18 = vsel %vm428_vm6, %v417_v56, %v316_v19  ;;  %v6700_v56 = vld [vmem:[%s12049_s3 + $0x8] sm:$0xff] }
  0xe7   :  { %2164 = vmatpush.bf16.msrb.mxu1 %v6700_v56 }
  0xea   :  { %v261_v52 = vpop.permute.xlu1 %260 }
  0xeb   :  { %v233_v58 = vpop.permute.xlu0 %232 }
  0xef   :  { %657 = vmatmul.bf16.gmra.mxu0 %v448_v35  ;;  %815 = vmatmul.bf16.gmra.mxu2 %v448_v35 }
  0xf2   :  { %v235_v2 = vpop.permute.xlu1 %234 }
  0xf3   :  { %v7859_v59 = vpop.permute.xlu0 %323  ;;  %v360_v53 = vsel %vm327_vm3, %v7626_v3, %v235_v2  ;;  %v363_v3 = vsel %vm327_vm3, %v7646_v13, %v237_v33 }
  0xf4   :  { %5729 = vmatmul.msk.bf16.gmra.mxu1 %vm583_vm2, %v314_v9  ;;  %5743 = vmatmul.msk.bf16.gmra.mxu3 %vm583_vm2, %v314_v9  ;;  %v357_v9 = vsel %vm327_vm3, %v7586_v39, %v233_v58  ;;  %v392_v0 = vsel %vm370_vm4, %v360_v53, %v7872_v7 }
  0xf5   :  { %v390_v17 = vsel %vm370_vm4, %v357_v9, %v261_v52 }
  0xf6   :  { %v419_v25 = vsel %vm399_vm5, %v390_v17, %v290_v22  ;;  %v239_v22 = vpop.permute.xlu2 %238 }
  0xf7   :  { %v457_v48 = vsel %vm428_vm6, %v419_v25, %v7833_v30  ;;  %v366_v1 = vsel %vm327_vm3, %v7691_v45, %v239_v22 }
  0xfa   :  { %v7883_v16 = vpop.permute.xlu1 %325 }
  0xfb   :  { %v7881_v20 = vpop.permute.xlu0 %291 }
  0xfe   :  { %v241_v53 = vpop.permute.xlu2 %240 }
  0xff   :  { %662 = vmatmul.bf16.gmra.mxu0 %v451_v43  ;;  %820 = vmatmul.bf16.gmra.mxu2 %v451_v43 }
 0x101   :  { %v707_v46 = vpop.f32.mrf.mxu1 }
 0x102   :  { %v294_v49 = vpop.permute.xlu1 %293 }
 0x103   :  { %v265_v27 = vpop.permute.xlu0 %264 }
 0x104   :  { %5730 = vmatmul.msk.bf16.gmra.mxu1 %vm583_vm2, %v316_v19  ;;  %5744 = vmatmul.msk.bf16.gmra.mxu3 %vm583_vm2, %v316_v19  ;;  %v394_v13 = vsel %vm370_vm4, %v363_v3, %v265_v27 }
 0x105   :  { %v423_v17 = vsel %vm399_vm5, %v394_v13, %v294_v49 }
 0x106   :  { %v7953_v27 = vsel %vm428_vm6, %v423_v17, %v7846_v47 }
 0x107   :  { %v865_v51 = vpop.f32.mrf.mxu3 }
 0x109   :  { %v709_v54 = vpop.f32.mrf.mxu1 }
 0x10b   :  { %v267_v2 = vpop.permute.xlu0 %266 }
 0x10c   :  { %v628_v57 = vpop.f32.mrf.mxu0  ;;  %v396_v45 = vsel %vm370_vm4, %v366_v1, %v267_v2 }
 0x10d   :  { %v629_v60 = vadd.f32 %v628_v57, %v7856_v55 }
 0x10f   :  { %v708_v61 = vadd.f32 %v707_v46, %v629_v60  ;;  %v867_v62 = vpop.f32.mrf.mxu3  ;;  %667 = vmatmul.bf16.gmra.mxu0 %v454_v18  ;;  %825 = vmatmul.bf16.gmra.mxu2 %v454_v18 }
 0x111   :  { %v935_v4 = vsub.f32 0.0, %v708_v61  ;;  %v712_v28 = vpop.f32.mrf.mxu1 }
 0x112   :  { %v786_v32 = vpop.f32.mrf.mxu2 }
 0x113   :  { %v991_v5 = vmul.f32 1.442695, %v935_v4  ;;  %v787_v6 = vadd.f32 %v786_v32, %v7863_v63  ;;  %v269_v17 = vpop.permute.xlu0 %268 }
 0x114   :  { %5731 = vmatmul.msk.bf16.gmra.mxu1 %vm583_vm2, %v7833_v30  ;;  %5745 = vmatmul.msk.bf16.gmra.mxu3 %vm583_vm2, %v7833_v30  ;;  %v630_v8 = vpop.f32.mrf.mxu0 }
 0x115   :  { %6936 = vpow2.f32 %v991_v5  ;;  %v866_v10 = vadd.f32 %v865_v51, %v787_v6  ;;  %v631_v11 = vadd.f32 %v630_v8, %v7856_v55  ;;  %v421_v8 = vsel %vm399_vm5, %v392_v0, %v7881_v20 }
 0x117   :  { %v936_v12 = vsub.f32 0.0, %v866_v10  ;;  %v710_v14 = vadd.f32 %v709_v54, %v631_v11  ;;  %v870_v15 = vpop.f32.mrf.mxu3  ;;  %v296_v11 = vpop.permute.xlu1 %295 }
 0x119   :  { %v993_v19 = vmul.f32 1.442695, %v936_v12  ;;  %v937_v21 = vsub.f32 0.0, %v710_v14  ;;  %v714_v23 = vpop.f32.mrf.mxu1 }
 0x11a   :  { %v788_v44 = vpop.f32.mrf.mxu2 }
 0x11b   :  { %v6937_v24 = vpop.eup %6936  ;;  %6938 = vpow2.f32 %v993_v19  ;;  %v995_v39 = vmul.f32 1.442695, %v937_v21  ;;  %v789_v29 = vadd.f32 %v788_v44, %v7863_v63 }
 0x11c   :  { %v7888_v34 = vadd.f32 1.0, %v6937_v24  ;;  %v633_v35 = vpop.f32.mrf.mxu0 }
 0x11d   :  { %6940 = vpow2.f32 %v995_v39  ;;  %v868_v36 = vadd.f32 %v867_v62, %v789_v29  ;;  %v634_v37 = vadd.f32 %v633_v35, %v7856_v55  ;;  %v460_v39 = vsel %vm428_vm6, %v421_v8, %v7841_v38 }
 0x11e   :  { %6942 = vrcp.f32 %v7888_v34  ;;  %v1170_v20 = vand.u32 2147483648, %v7888_v34  ;;  %v425_v29 = vsel %vm399_vm5, %v396_v45, %v296_v11  ;;  %vm1164_vm7 = vweird.f32 %v7888_v34 }
 0x11f   :  { %v938_v40 = vsub.f32 0.0, %v868_v36  ;;  %v713_v41 = vadd.f32 %v712_v28, %v634_v37  ;;  %v872_v42 = vpop.f32.mrf.mxu3  ;;  %672 = vmatmul.bf16.gmra.mxu0 %v457_v48  ;;  %830 = vmatmul.bf16.gmra.mxu2 %v457_v48 }
 0x121   :  { %v6939_v43 = vpop.eup %6938  ;;  %v997_v26 = vmul.f32 1.442695, %v938_v40  ;;  %v939_v46 = vsub.f32 0.0, %v713_v41  ;;  %v7894_v58 = vpop.f32.mrf.mxu1 }
 0x122   :  { %v7896_v50 = vadd.f32 1.0, %v6939_v43  ;;  %v791_v51 = vpop.f32.mrf.mxu2  ;;  %v7960_v43 = vsel %vm428_vm6, %v425_v29, %v7859_v59 }
 0x123   :  { %v6941_v52 = vpop.eup %6940  ;;  %6944 = vpow2.f32 %v997_v26  ;;  %v999_v30 = vmul.f32 1.442695, %v939_v46  ;;  %v792_v54 = vadd.f32 %v791_v51, %v7863_v63 }
 0x124   :  { %6946 = vrcp.f32 %v7896_v50  ;;  %v7905_v57 = vadd.f32 1.0, %v6941_v52  ;;  %5732 = vmatmul.msk.bf16.gmra.mxu1 %vm583_vm2, %v7841_v38  ;;  %5746 = vmatmul.msk.bf16.gmra.mxu3 %vm583_vm2, %v7841_v38  ;;  %v635_v60 = vpop.f32.mrf.mxu0  ;;  %v7913_v18 = vpop.eup %6942  ;;  %v1168_v38 = vand.u32 2147483647, %v7888_v34  ;;  %v1183_v0 = vand.u32 2147483647, %v7896_v50 }
 0x125   :  { %6948 = vpow2.f32 %v999_v30  ;;  %v871_v61 = vadd.f32 %v870_v15, %v792_v54  ;;  %v636_v62 = vadd.f32 %v635_v60, %v7856_v55  ;;  %v1160_v5 = vmul.f32 %v7913_v18, %v7888_v34 }
 0x126   :  { %6950 = vrcp.f32 %v7905_v57  ;;  %vm1165_vm8 = vweird.f32 %v7913_v18  ;;  %v1198_v54 = vand.u32 2147483647, %v7905_v57  ;;  %v1200_v56 = vand.u32 2147483648, %v7905_v57 }
 0x127   :  { %v940_v4 = vsub.f32 0.0, %v871_v61  ;;  %v715_v28 = vadd.f32 %v714_v23, %v636_v62  ;;  %v7921_v32 = vpop.f32.mrf.mxu3  ;;  %v1161_v24 = vsub.f32 1.0, %v1160_v5  ;;  %vm7977_vm9 = vcmp.eq.f32.partialorder %v1168_v38, 8.507059e+37  ;;  %vm8012_vm12 = vmor %vm1164_vm7, %vm1165_vm8  ;;  %v298_v38 = vpop.permute.xlu1 %297 }
 0x128   :  { %vm1179_vm10 = vweird.f32 %v7896_v50  ;;  %vm1194_vm11 = vweird.f32 %v7905_v57  ;;  %vm8016_vm13 = vcmp.eq.f32.partialorder %v1198_v54, 8.507059e+37  ;;  %vm8026_vm15 = vcmp.eq.f32.partialorder %v1183_v0, 8.507059e+37 }
 0x129   :  { %v6945_v6 = vpop.eup %6944  ;;  %v1001_v9 = vmul.f32 1.442695, %v940_v4  ;;  %v941_v10 = vsub.f32 0.0, %v715_v28  ;;  %v7928_v7 = vpop.f32.mrf.mxu1  ;;  %v1162_v46 = vmul.f32 %v7913_v18, %v1161_v24  ;;  %v1185_v28 = vand.u32 2147483648, %v7896_v50 }
 0x12a   :  { %v7931_v12 = vpop.eup %6946  ;;  %v7933_v14 = vadd.f32 1.0, %v6945_v6  ;;  %v793_v15 = vpop.f32.mrf.mxu2  ;;  %v369_v6 = vsel %vm327_vm3, %v7750_v31, %v241_v53 }
 0x12b   :  { %v6949_v19 = vpop.eup %6948  ;;  %6952 = vpow2.f32 %v1001_v9  ;;  %v1003_v21 = vmul.f32 1.442695, %v941_v10  ;;  %v794_v23 = vadd.f32 %v793_v15, %v7863_v63  ;;  %v1175_v37 = vmul.f32 %v7931_v12, %v7896_v50 }
 0x12c   :  { %v7938_v44 = vpop.eup %6950  ;;  %6954 = vrcp.f32 %v7933_v14  ;;  %v638_v25 = vpop.f32.mrf.mxu0  ;;  %v7946_v35 = vadd.f32 1.0, %v6949_v19  ;;  %v1163_v8 = vadd.f32 %v7913_v18, %v1162_v46  ;;  %vm1180_vm0 = vweird.f32 %v7931_v12 }
 0x12d   :  { %v1190_v33 = vmul.f32 %v7938_v44, %v7905_v57  ;;  %6956 = vpow2.f32 %v1003_v21  ;;  %v873_v36 = vadd.f32 %v872_v42, %v794_v23  ;;  %v639_v48 = vadd.f32 %v638_v25, %v7856_v55  ;;  %vm8070_vm7 = vmor %vm1179_vm10, %vm1180_vm0 }
 0x12e   :  { %v7963_v42 = vor.u32 1.1754944e-38, %v1170_v20  ;;  %6958 = vrcp.f32 %v7946_v35  ;;  %v1176_v60 = vsub.f32 1.0, %v1175_v37  ;;  %v1186_v25 = vor.u32 1.1754944e-38, %v1185_v28 }
 0x12f   :  { %v942_v40 = vsub.f32 0.0, %v873_v36  ;;  %v7956_v41 = vpop.f32.mrf.mxu3  ;;  %677 = vmatmul.bf16.gmra.mxu0 %v460_v39  ;;  %835 = vmatmul.bf16.gmra.mxu2 %v460_v39  ;;  %v718_v26 = vadd.f32 %v7894_v58, %v639_v48  ;;  %v1191_v49 = vsub.f32 1.0, %v1190_v33  ;;  %v398_v39 = vsel %vm370_vm4, %v369_v6, %v269_v17 }
 0x130   :  { %v1177_v19 = vmul.f32 %v7931_v12, %v1176_v60  ;;  %vm1195_vm14 = vweird.f32 %v7938_v44  ;;  %v1213_v46 = vand.u32 2147483647, %v7933_v14  ;;  %vm1209_vm3 = vweird.f32 %v7933_v14 }
 0x131   :  { %v6953_v51 = vpop.eup %6952  ;;  %v1005_v52 = vmul.f32 1.442695, %v942_v40  ;;  %v7969_v30 = vpop.f32.mrf.mxu1  ;;  %v943_v3 = vsub.f32 0.0, %v718_v26  ;;  %v1192_v9 = vmul.f32 %v7938_v44, %v1191_v49  ;;  %vm8053_vm1 = vmor %vm1194_vm11, %vm1195_vm14  ;;  %vm1224_vm10 = vweird.f32 %v7946_v35 }
 0x132   :  { %v7973_v22 = vpop.eup %6954  ;;  %v7975_v58 = vadd.f32 1.0, %v6953_v51  ;;  %v796_v61 = vpop.f32.mrf.mxu2  ;;  %vm8078_vm8 = vcmp.eq.f32.partialorder %v1213_v46, 8.507059e+37 }
 0x133   :  { %v6957_v1 = vpop.eup %6956  ;;  %v1205_v2 = vmul.f32 %v7973_v22, %v7933_v14  ;;  %6960 = vpow2.f32 %v1005_v52  ;;  %v797_v4 = vadd.f32 %v796_v61, %v7863_v63  ;;  %v1007_v45 = vmul.f32 1.442695, %v943_v3 }
 0x134   :  { %v7987_v13 = vadd.f32 1.0, %v6957_v1  ;;  %5733 = vmatmul.msk.bf16.gmra.mxu1 %vm583_vm2, %v7846_v47  ;;  %5747 = vmatmul.msk.bf16.gmra.mxu3 %vm583_vm2, %v7846_v47  ;;  %v640_v5 = vpop.f32.mrf.mxu0  ;;  %6962 = vrcp.f32 %v7975_v58  ;;  %v1201_v47 = vor.u32 1.1754944e-38, %v1200_v56  ;;  %v8002_v21 = vpop.eup %6958  ;;  %v1193_v29 = vadd.f32 %v7938_v44, %v1192_v9 }
 0x135   :  { %v1206_v10 = vsub.f32 1.0, %v1205_v2  ;;  %v876_v11 = vadd.f32 %v7921_v32, %v797_v4  ;;  %v641_v15 = vadd.f32 %v640_v5, %v7856_v55  ;;  %v1220_v49 = vmul.f32 %v8002_v21, %v7946_v35 }
 0x136   :  { %6964 = vrcp.f32 %v7987_v13  ;;  %v427_v3 = vsel %vm399_vm5, %v398_v39, %v298_v38  ;;  %vm1210_vm4 = vweird.f32 %v7973_v22  ;;  %v1197_v1 = vsel %vm8053_vm1, %v7938_v44, %v1193_v29 }
 0x137   :  { %v944_v31 = vsub.f32 0.0, %v876_v11  ;;  %v720_v23 = vadd.f32 %v7928_v7, %v641_v15  ;;  %v8006_v20 = vpop.f32.mrf.mxu3  ;;  %v1167_v7 = vsel %vm8012_vm12, %v7913_v18, %v1163_v8  ;;  %6966 = vpow2.f32 %v1007_v45 }
 0x138   :  { %v1207_v40 = vmul.f32 %v7973_v22, %v1206_v10  ;;  %v1178_v18 = vadd.f32 %v7931_v12, %v1177_v19  ;;  %v8044_v53 = vsel %vm7977_vm9, %v7963_v42, %v1167_v7  ;;  %v1215_v44 = vand.u32 2147483648, %v7933_v14  ;;  %v6699_v10 = vld [vmem:[%s12049_s3] sm:$0xff]  ;;  %vm8106_vm9 = vmor %vm1209_vm3, %vm1210_vm4 }
 0x139   :  { %v6961_v33 = vpop.eup %6960  ;;  %v1009_v36 = vmul.f32 1.442695, %v944_v31  ;;  %v945_v37 = vsub.f32 0.0, %v720_v23  ;;  %v8030_v48 = vpop.f32.mrf.mxu1  ;;  %v1221_v28 = vsub.f32 1.0, %v1220_v49  ;;  %2165 = vmatpush.bf16.msrb.mxu1 %v6699_v10  ;;  %vm1225_vm11 = vweird.f32 %v8002_v21 }
 0x13a   :  { %v798_v26 = vpop.f32.mrf.mxu2  ;;  %v8038_v51 = vadd.f32 1.0, %v6961_v33  ;;  %v8046_v54 = vpop.eup %6962  ;;  %v1208_v2 = vadd.f32 %v7973_v22, %v1207_v40  ;;  %v1216_v32 = vor.u32 1.1754944e-38, %v1215_v44  ;;  %v1230_v49 = vand.u32 2147483648, %v7946_v35  ;;  %vm8167_vm14 = vmor %vm1224_vm10, %vm1225_vm11 }
 0x13b   :  { %6968 = vpow2.f32 %v1009_v36  ;;  %v799_v52 = vadd.f32 %v798_v26, %v7863_v63  ;;  %v1011_v56 = vmul.f32 1.442695, %v945_v37  ;;  %v1235_v9 = vmul.f32 %v8046_v54, %v7975_v58 }
 0x13c   :  { %v643_v60 = vpop.f32.mrf.mxu0  ;;  %v8059_v42 = vpop.eup %6964  ;;  %6970 = vrcp.f32 %v8038_v51  ;;  %v1212_v14 = vsel %vm8106_vm9, %v7973_v22, %v1208_v2  ;;  %v1222_v24 = vmul.f32 %v8002_v21, %v1221_v28  ;;  %vm1254_vm12 = vweird.f32 %v7987_v13 }
 0x13d   :  { %v878_v62 = vadd.f32 %v7956_v41, %v799_v52  ;;  %v644_v0 = vadd.f32 %v643_v60, %v7856_v55  ;;  %v1182_v41 = vsel %vm8070_vm7, %v7931_v12, %v1178_v18  ;;  %v6967_v5 = vpop.eup %6966  ;;  %v8091_v12 = vsel %vm428_vm6, %v427_v3, %v7883_v16 }
 0x13e   :  { %6972 = vpow2.f32 %v1011_v56  ;;  %v1250_v45 = vmul.f32 %v8059_v42, %v7987_v13  ;;  %v8122_v31 = vadd.f32 1.0, %v6967_v5  ;;  %v1236_v34 = vsub.f32 1.0, %v1235_v9 }
 0x13f   :  { %v946_v50 = vsub.f32 0.0, %v878_v62  ;;  %v723_v6 = vadd.f32 %v7969_v30, %v644_v0  ;;  %v8085_v8 = vpop.f32.mrf.mxu3  ;;  %682 = vmatmul.bf16.gmra.mxu0 %v7953_v27  ;;  %840 = vmatmul.bf16.gmra.mxu2 %v7953_v27  ;;  %v8100_v30 = vsel %vm8016_vm13, %v1201_v47, %v1197_v1  ;;  %v8117_v47 = vsel %vm8026_vm15, %v1186_v25, %v1182_v41 }
 0x140   :  { %v1251_v39 = vsub.f32 1.0, %v1250_v45  ;;  %v1999_v29 = vpack.c.bf16 %v8100_v30, %v8044_v53  ;;  %v1228_v25 = vand.u32 2147483647, %v7946_v35  ;;  %v8138_v36 = vsel %vm8078_vm8, %v1216_v32, %v1212_v14 }
 0x141   :  { %v6969_v11 = vpop.eup %6968  ;;  %v1013_v15 = vmul.f32 1.442695, %v946_v50  ;;  %v947_v17 = vsub.f32 0.0, %v723_v6  ;;  %v8113_v19 = vpop.f32.mrf.mxu1  ;;  %vm1255_vm13 = vweird.f32 %v8059_v42  ;;  %v1258_v61 = vand.u32 2147483647, %v7987_v13 }
 0x142   :  { %v801_v23 = vpop.f32.mrf.mxu2  ;;  %v8130_v33 = vadd.f32 1.0, %v6969_v11  ;;  %v1252_v37 = vmul.f32 %v8059_v42, %v1251_v39  ;;  %v8141_v38 = vpop.eup %6970  ;;  %v1260_v62 = vand.u32 2147483648, %v7987_v13  ;;  %v2000_v4 = vpack.c.bf16 %v8138_v36, %v8117_v47  ;;  %vm8184_vm0 = vmor %vm1254_vm12, %vm1255_vm13 }
 0x143   :  { %v802_v7 = vadd.f32 %v801_v23, %v7863_v63  ;;  %6974 = vpow2.f32 %v1013_v15  ;;  %v1015_v40 = vmul.f32 1.442695, %v947_v17  ;;  %vm8176_vm15 = vcmp.eq.f32.partialorder %v1228_v25, 8.507059e+37 }
 0x144   :  { %5734 = vmatmul.msk.bf16.gmra.mxu1 %vm583_vm2, %v7859_v59  ;;  %5748 = vmatmul.msk.bf16.gmra.mxu3 %vm583_vm2, %v7859_v59  ;;  %v645_v22 = vpop.f32.mrf.mxu0  ;;  %v6973_v46 = vpop.eup %6972  ;;  %6976 = vrcp.f32 %v8122_v31  ;;  %v1223_v59 = vadd.f32 %v8002_v21, %v1222_v24  ;;  %v1253_v3 = vadd.f32 %v8059_v42, %v1252_v37  ;;  %v1237_v5 = vmul.f32 %v8046_v54, %v1236_v34 }
 0x145   :  { %v881_v26 = vadd.f32 %v8006_v20, %v802_v7  ;;  %v646_v18 = vadd.f32 %v645_v22, %v7856_v55  ;;  %v1265_v20 = vmul.f32 %v8141_v38, %v8038_v51  ;;  %6978 = vrcp.f32 %v8130_v33 }
 0x146   :  { %v8159_v0 = vadd.f32 1.0, %v6973_v46  ;;  %6980 = vpow2.f32 %v1015_v40  ;;  %v1227_v44 = vsel %vm8167_vm14, %v8002_v21, %v1223_v59  ;;  %v1257_v21 = vsel %vm8184_vm0, %v8059_v42, %v1253_v3 }
 0x147   :  { %v948_v52 = vsub.f32 0.0, %v881_v26  ;;  %v725_v56 = vadd.f32 %v8030_v48, %v646_v18  ;;  %v8150_v60 = vpop.f32.mrf.mxu3  ;;  %v1231_v45 = vor.u32 1.1754944e-38, %v1230_v49  ;;  %vm1259_vm1 = vcmp.eq.f32.partialorder %v1258_v61, 8.507059e+37 }
 0x148   :  { %v1261_v13 = vor.u32 1.1754944e-38, %v1260_v62  ;;  %v1266_v11 = vsub.f32 1.0, %v1265_v20  ;;  %vm1240_vm3 = vweird.f32 %v8046_v54  ;;  %v1238_v32 = vadd.f32 %v8046_v54, %v1237_v5 }
 0x149   :  { %v1017_v1 = vmul.f32 1.442695, %v948_v52  ;;  %v949_v48 = vsub.f32 0.0, %v725_v56  ;;  %v8161_v57 = vpop.f32.mrf.mxu1  ;;  %v6975_v50 = vpop.eup %6974  ;;  %v1243_v24 = vand.u32 2147483647, %v7975_v58  ;;  %v1245_v34 = vand.u32 2147483648, %v7975_v58 }
 0x14a   :  { %v803_v41 = vpop.f32.mrf.mxu2  ;;  %v8193_v10 = vpop.eup %6976  ;;  %v8201_v23 = vadd.f32 1.0, %v6975_v50  ;;  %v8203_v42 = vsel %vm1259_vm1, %v1261_v13, %v1257_v21  ;;  %v8215_v22 = vsel %vm8176_vm15, %v1231_v45, %v1227_v44  ;;  %vm1239_vm4 = vweird.f32 %v7975_v58 }
 0x14b   :  { %6982 = vpow2.f32 %v1017_v1  ;;  %v1019_v6 = vmul.f32 1.442695, %v949_v48  ;;  %v804_v9 = vadd.f32 %v803_v41, %v7863_v63  ;;  %v8199_v14 = vpop.eup %6978  ;;  %v1267_v37 = vmul.f32 %v8141_v38, %v1266_v11  ;;  %vm8231_vm7 = vmor %vm1239_vm4, %vm1240_vm3 }
 0x14c   :  { %v648_v27 = vpop.f32.mrf.mxu0  ;;  %6984 = vrcp.f32 %v8159_v0  ;;  %v6981_v39 = vpop.eup %6980  ;;  %v1280_v40 = vmul.f32 %v8193_v10, %v8122_v31  ;;  %v8223_v26 = vmul.f32 %v8199_v14, %v8130_v33  ;;  %v2001_v59 = vpack.c.bf16 %v8203_v42, %v8215_v22 }
 0x14d   :  { %v883_v15 = vadd.f32 %v8085_v8, %v804_v9  ;;  %v649_v17 = vadd.f32 %v648_v27, %v7856_v55  ;;  %6986 = vpow2.f32 %v1019_v6  ;;  %v8236_v49 = vadd.f32 1.0, %v6981_v39 }
 0x14e   :  { %6988 = vrcp.f32 %v8201_v23  ;;  %v1242_v56 = vsel %vm8231_vm7, %v8046_v54, %v1238_v32  ;;  %v1281_v3 = vsub.f32 1.0, %v1280_v40  ;;  %vm8244_vm8 = vcmp.eq.f32.partialorder %v1243_v24, 8.507059e+37 }
 0x14f   :  { %v950_v7 = vsub.f32 0.0, %v883_v15  ;;  %v728_v25 = vadd.f32 %v8113_v19, %v649_v17  ;;  %v8208_v8 = vpop.f32.mrf.mxu3  ;;  %687 = vmatmul.bf16.gmra.mxu0 %v7960_v43  ;;  %845 = vmatmul.bf16.gmra.mxu2 %v7960_v43  ;;  %v1246_v1 = vor.u32 1.1754944e-38, %v1245_v34  ;;  %v1268_v2 = vadd.f32 %v8141_v38, %v1267_v37 }
 0x150   :  { %vm1270_vm9 = vweird.f32 %v8141_v38  ;;  %v1275_v41 = vand.u32 2147483648, %v8038_v51  ;;  %v1296_v28 = vsub.f32 1.0, %v8223_v26  ;;  %vm1269_vm10 = vweird.f32 %v8038_v51 }
 0x151   :  { %v6983_v19 = vpop.eup %6982  ;;  %v1021_v18 = vmul.f32 1.442695, %v950_v7  ;;  %v951_v43 = vsub.f32 0.0, %v728_v25  ;;  %v8225_v46 = vpop.f32.mrf.mxu1  ;;  %v1282_v6 = vmul.f32 %v8193_v10, %v1281_v3  ;;  %v8269_v45 = vsel %vm8244_vm8, %v1246_v1, %v1242_v56 }
 0x152   :  { %v806_v52 = vpop.f32.mrf.mxu2  ;;  %v8241_v20 = vpop.eup %6984  ;;  %v8248_v48 = vadd.f32 1.0, %v6983_v19  ;;  %v1276_v15 = vor.u32 1.1754944e-38, %v1275_v41  ;;  %vm2111_vm11 = vcmask 326656   ;;  %vm1284_vm13 = vweird.f32 %v8122_v31 }
 0x153   :  { %6990 = vpow2.f32 %v1021_v18  ;;  %v807_v61 = vadd.f32 %v806_v52, %v7863_v63  ;;  %v6987_v44 = vpop.eup %6986  ;;  %v1023_v35 = vmul.f32 1.442695, %v951_v43  ;;  %v8290_v34 = vadd.f32 %v8193_v10, %v1282_v6 }
 0x154   :  { %5735 = vmatmul.msk.bf16.gmra.mxu1 %vm583_vm2, %v7883_v16  ;;  %5749 = vmatmul.msk.bf16.gmra.mxu3 %vm583_vm2, %v7883_v16  ;;  %v650_v54 = vpop.f32.mrf.mxu0  ;;  %6992 = vrcp.f32 %v8236_v49  ;;  %v1273_v16 = vand.u32 2147483647, %v8038_v51  ;;  %vm8273_vm2 = vmor %vm1269_vm10, %vm1270_vm9  ;;  %v1310_v51 = vmul.f32 %v8241_v20, %v8159_v0  ;;  %v8279_v13 = vpop.eup %6988  ;;  %vm1285_vm14 = vweird.f32 %v8193_v10 }
 0x155   :  { %v886_v5 = vadd.f32 %v8150_v60, %v807_v61  ;;  %v651_v50 = vadd.f32 %v650_v54, %v7856_v55  ;;  %6994 = vrcp.f32 %v8248_v48  ;;  %v1272_v11 = vsel %vm8273_vm2, %v8141_v38, %v1268_v2  ;;  %vm8315_vm15 = vmor %vm1284_vm13, %vm1285_vm14 }
 0x156   :  { %6996 = vpow2.f32 %v1023_v35  ;;  %v1311_v7 = vsub.f32 1.0, %v1310_v51  ;;  %vm1274_vm12 = vcmp.eq.f32.partialorder %v1273_v16, 8.507059e+37  ;;  %v8296_v38 = vmul.f32 %v8279_v13, %v8201_v23 }
 0x157   :  { %v952_v9 = vsub.f32 0.0, %v886_v5  ;;  %v730_v21 = vadd.f32 %v8161_v57, %v651_v50  ;;  %v8265_v27 = vpop.f32.mrf.mxu3  ;;  %v8282_v57 = vadd.f32 1.0, %v6987_v44  ;;  %v8299_v40 = vsel %vm1274_vm12, %v1276_v15, %v1272_v11 }
 0x158   :  { %v1288_v43 = vand.u32 2147483647, %v8122_v31  ;;  %v1290_v58 = vand.u32 2147483648, %v8122_v31  ;;  %v1312_v52 = vmul.f32 %v8241_v20, %v1311_v7  ;;  %v1287_v54 = vsel %vm8315_vm15, %v8193_v10, %v8290_v34 }
 0x159   :  { %v6991_v17 = vpop.eup %6990  ;;  %v1025_v32 = vmul.f32 1.442695, %v952_v9  ;;  %v953_v24 = vsub.f32 0.0, %v730_v21  ;;  %v8287_v39 = vpop.f32.mrf.mxu1  ;;  %vm1314_vm0 = vweird.f32 %v8159_v0  ;;  %vm1315_vm1 = vweird.f32 %v8241_v20 }
 0x15a   :  { %v808_v25 = vpop.f32.mrf.mxu2  ;;  %v8301_v19 = vpop.eup %6992  ;;  %v8303_v26 = vadd.f32 1.0, %v6991_v17  ;;  %v1313_v35 = vadd.f32 %v8241_v20, %v1312_v52  ;;  %v1320_v10 = vand.u32 2147483648, %v8159_v0  ;;  %vm8336_vm3 = vcmp.eq.f32.partialorder %v1288_v43, 8.507059e+37  ;;  %vm8355_vm4 = vmor %vm1314_vm0, %vm1315_vm1 }
 0x15b   :  { %6998 = vpow2.f32 %v1025_v32  ;;  %v809_v37 = vadd.f32 %v808_v25, %v7863_v63  ;;  %v1027_v56 = vmul.f32 1.442695, %v953_v24  ;;  %v8319_v1 = vpop.eup %6994  ;;  %v1291_v50 = vor.u32 1.1754944e-38, %v1290_v58 }
 0x15c   :  { %v653_v18 = vpop.f32.mrf.mxu0  ;;  %7000 = vrcp.f32 %v8282_v57  ;;  %v6997_v2 = vpop.eup %6996  ;;  %v1297_v16 = vmul.f32 %v8199_v14, %v1296_v28  ;;  %v8343_v6 = vmul.f32 %v8319_v1, %v8248_v48  ;;  %v1326_v17 = vsub.f32 1.0, %v8296_v38 }
 0x15d   :  { %v888_v3 = vadd.f32 %v8208_v8, %v809_v37  ;;  %v654_v61 = vadd.f32 %v653_v18, %v7856_v55  ;;  %v1318_v8 = vand.u32 2147483647, %v8159_v0  ;;  %7002 = vrcp.f32 %v8303_v26 }
 0x15e   :  { %7004 = vpow2.f32 %v1027_v56  ;;  %v8347_v60 = vadd.f32 1.0, %v6997_v2  ;;  %v1317_v25 = vsel %vm8355_vm4, %v8241_v20, %v1313_v35  ;;  %v1321_v0 = vor.u32 1.1754944e-38, %v1320_v10 }
 0x15f   :  { %v954_v41 = vsub.f32 0.0, %v888_v3  ;;  %v733_v31 = vadd.f32 %v8225_v46, %v654_v61  ;;  %v8329_v44 = vpop.f32.mrf.mxu3  ;;  %692 = vmatmul.bf16.gmra.mxu0 %v8091_v12  ;;  %850 = vmatmul.bf16.gmra.mxu2 %v8091_v12  ;;  %vm8359_vm7 = vcmp.eq.f32.partialorder %v1318_v8, 8.507059e+37  ;;  %v1298_v38 = vadd.f32 %v8199_v14, %v1297_v16 }
 0x160   :  { %vm1300_vm8 = vweird.f32 %v8199_v14  ;;  %v1303_v37 = vand.u32 2147483647, %v8130_v33  ;;  %v1305_v53 = vand.u32 2147483648, %v8130_v33  ;;  %v8388_v47 = vsel %vm8359_vm7, %v1321_v0, %v1317_v25 }
 0x161   :  { %v6999_v46 = vpop.eup %6998  ;;  %v1029_v12 = vmul.f32 1.442695, %v954_v41  ;;  %v955_v9 = vsub.f32 0.0, %v733_v31  ;;  %v8345_v21 = vpop.f32.mrf.mxu1  ;;  %vm1299_vm9 = vweird.f32 %v8130_v33  ;;  %v2002_v58 = vpack.c.bf16 %v8299_v40, %v8269_v45 }
 0x162   :  { %v8349_v51 = vadd.f32 1.0, %v6999_v46  ;;  %v811_v11 = vpop.f32.mrf.mxu2  ;;  %v8364_v32 = vpop.eup %7000  ;;  %v8399_v52 = vsel %vm8336_vm3, %v1291_v50, %v1287_v54  ;;  %vm8403_vm10 = vmor %vm1299_vm9, %vm1300_vm8  ;;  %v1356_v33 = vsub.f32 1.0, %v8343_v6  ;;  %v1340_v3 = vmul.f32 %v8301_v19, %v8236_v49 }
 0x163   :  { %v1031_v24 = vmul.f32 1.442695, %v955_v9  ;;  %v812_v7 = vadd.f32 %v811_v11, %v7863_v63  ;;  %7006 = vpow2.f32 %v1029_v12  ;;  %v8384_v30 = vpop.eup %7002  ;;  %v2003_v54 = vpack.c.bf16 %v8388_v47, %v8399_v52 }
 0x164   :  { %2166 = vmatmul.bf16.vlgmr.msrb.gmra.mxu1 %v1999_v29  ;;  %5790 = vmatmul.msk.bf16.vlgmr.msrb.gmra.mxu3 %vm2111_vm11, %v2000_v4  ;;  %v655_v34 = vpop.f32.mrf.mxu0  ;;  %7008 = vrcp.f32 %v8349_v51  ;;  %v1327_v29 = vmul.f32 %v8279_v13, %v1326_v17  ;;  %v7005_v36 = vpop.eup %7004  ;;  %vm1304_vm2 = vcmp.eq.f32.partialorder %v1303_v37, 8.507059e+37  ;;  %v1306_v8 = vor.u32 1.1754944e-38, %v1305_v53 }
 0x165   :  { %v891_v20 = vadd.f32 %v8265_v27, %v812_v7  ;;  %v656_v18 = vadd.f32 %v655_v34, %v7856_v55  ;;  %7010 = vpow2.f32 %v1031_v24  ;;  %v8418_v41 = vadd.f32 1.0, %v7005_v36 }
 0x166   :  { %7012 = vrcp.f32 %v8347_v60  ;;  %v1328_v10 = vadd.f32 %v8279_v13, %v1327_v29  ;;  %vm1330_vm12 = vweird.f32 %v8279_v13  ;;  %v8426_v5 = vmul.f32 %v8384_v30, %v8303_v26 }
 0x167   :  { %v956_v4 = vsub.f32 0.0, %v891_v20  ;;  %v735_v43 = vadd.f32 %v8287_v39, %v656_v18  ;;  %v8393_v27 = vpop.f32.mrf.mxu3  ;;  %v1302_v39 = vsel %vm8403_vm10, %v8199_v14, %v1298_v38  ;;  %v1370_v16 = vmul.f32 %v8364_v32, %v8282_v57 }
 0x168   :  { %v8431_v9 = vsel %vm1304_vm2, %v1306_v8, %v1302_v39  ;;  %vm1329_vm13 = vweird.f32 %v8201_v23  ;;  %v1333_v11 = vand.u32 2147483647, %v8201_v23  ;;  %v1341_v28 = vsub.f32 1.0, %v1340_v3 }
 0x169   :  { %v1033_v61 = vmul.f32 1.442695, %v956_v4  ;;  %v8414_v62 = vpop.f32.mrf.mxu1  ;;  %v7007_v2 = vpop.eup %7006  ;;  %v957_v31 = vsub.f32 0.0, %v735_v43  ;;  %vm8441_vm14 = vmor %vm1329_vm13, %vm1330_vm12  ;;  %v1335_v25 = vand.u32 2147483648, %v8201_v23  ;;  %v1371_v23 = vsub.f32 1.0, %v1370_v16 }
 0x16a   :  { %v813_v35 = vpop.f32.mrf.mxu2  ;;  %v8422_v14 = vpop.eup %7008  ;;  %v8435_v15 = vadd.f32 1.0, %v7007_v2  ;;  %vm8461_vm15 = vcmp.eq.f32.partialorder %v1333_v11, 8.507059e+37  ;;  %v1342_v36 = vmul.f32 %v8301_v19, %v1341_v28  ;;  %vm1344_vm0 = vweird.f32 %v8236_v49 }
 0x16b   :  { %7014 = vpow2.f32 %v1033_v61  ;;  %v814_v50 = vadd.f32 %v813_v35, %v7863_v63  ;;  %v7011_v46 = vpop.eup %7010  ;;  %v8450_v34 = vmul.f32 %v8422_v14, %v8349_v51  ;;  %v1035_v38 = vmul.f32 1.442695, %v957_v31 }
 0x16c   :  { %v658_v12 = vpop.f32.mrf.mxu0  ;;  %v8446_v0 = vpop.eup %7012  ;;  %7016 = vrcp.f32 %v8418_v41  ;;  %v8456_v37 = vadd.f32 1.0, %v7011_v46  ;;  %vm1345_vm1 = vweird.f32 %v8301_v19  ;;  %v1372_v56 = vmul.f32 %v8364_v32, %v1371_v23 }
 0x16d   :  { %v893_v17 = vadd.f32 %v8329_v44, %v814_v50  ;;  %v659_v24 = vadd.f32 %v658_v12, %v7856_v55  ;;  %v1332_v44 = vsel %vm8441_vm14, %v8279_v13, %v1328_v10  ;;  %7018 = vrcp.f32 %v8435_v15  ;;  %vm8502_vm4 = vmor %vm1344_vm0, %vm1345_vm1 }
 0x16e   :  { %7020 = vpow2.f32 %v1035_v38  ;;  %v1348_v61 = vand.u32 2147483647, %v8236_v49  ;;  %v1350_v8 = vand.u32 2147483648, %v8236_v49  ;;  %v1416_v2 = vsub.f32 1.0, %v8450_v34 }
 0x16f   :  { %v958_v20 = vsub.f32 0.0, %v893_v17  ;;  %v738_v18 = vadd.f32 %v8345_v21, %v659_v24  ;;  %v8459_v53 = vpop.f32.mrf.mxu3  ;;  %v1336_v21 = vor.u32 1.1754944e-38, %v1335_v25  ;;  %7022 = vrcp.f32 %v8456_v37 }
 0x170   :  { %v1343_v46 = vadd.f32 %v8301_v19, %v1342_v36  ;;  %v1373_v12 = vadd.f32 %v8364_v32, %v1372_v56  ;;  %vm1375_vm3 = vweird.f32 %v8364_v32  ;;  %v1380_v42 = vand.u32 2147483648, %v8282_v57 }
 0x171   :  { %v7015_v4 = vpop.eup %7014  ;;  %v1037_v13 = vmul.f32 1.442695, %v958_v20  ;;  %v8469_v43 = vpop.f32.mrf.mxu1  ;;  %v959_v39 = vsub.f32 0.0, %v738_v18  ;;  %v8479_v35 = vsel %vm8461_vm15, %v1336_v21, %v1332_v44  ;;  %vm1374_vm7 = vweird.f32 %v8282_v57 }
 0x172   :  { %v816_v3 = vpop.f32.mrf.mxu2  ;;  %v8481_v10 = vpop.eup %7016  ;;  %v8483_v50 = vadd.f32 1.0, %v7015_v4  ;;  %v1378_v45 = vand.u32 2147483647, %v8282_v57  ;;  %v1357_v40 = vmul.f32 %v8319_v1, %v1356_v33  ;;  %v2004_v49 = vpack.c.bf16 %v8479_v35, %v8431_v9  ;;  %vm8524_vm9 = vmor %vm1374_vm7, %vm1375_vm3 }
 0x173   :  { %v817_v31 = vadd.f32 %v816_v3, %v7863_v63  ;;  %7024 = vpow2.f32 %v1037_v13  ;;  %v1039_v22 = vmul.f32 1.442695, %v959_v39  ;;  %vm8518_vm8 = vcmp.eq.f32.partialorder %v1348_v61, 8.507059e+37 }
 0x174   :  { %2171 = vmatmul.bf16.gmra.mxu1 %v2001_v59  ;;  %5791 = vmatmul.msk.bf16.gmra.mxu3 %vm2111_vm11, %v2002_v58  ;;  %v660_v16 = vpop.f32.mrf.mxu0  ;;  %v1347_v33 = vsel %vm8502_vm4, %v8301_v19, %v1343_v46  ;;  %v1377_v25 = vsel %vm8524_vm9, %v8364_v32, %v1373_v12  ;;  %v1386_v38 = vsub.f32 1.0, %v8426_v5  ;;  %7026 = vrcp.f32 %v8483_v50 }
 0x175   :  { %v896_v11 = vadd.f32 %v8393_v27, %v817_v31  ;;  %v661_v28 = vadd.f32 %v660_v16, %v7856_v55  ;;  %v8511_v27 = vpop.eup %7018  ;;  %v1381_v29 = vor.u32 1.1754944e-38, %v1380_v42  ;;  %7028 = vpow2.f32 %v1039_v22 }
 0x176   :  { %v7021_v6 = vpop.eup %7020  ;;  %vm1379_vm10 = vcmp.eq.f32.partialorder %v1378_v45, 8.507059e+37  ;;  %v1358_v19 = vadd.f32 %v8319_v1, %v1357_v40  ;;  %vm1360_vm2 = vweird.f32 %v8319_v1  ;;  %v1363_v13 = vand.u32 2147483647, %v8248_v48 }
 0x177   :  { %v960_v58 = vsub.f32 0.0, %v896_v11  ;;  %v740_v17 = vadd.f32 %v8414_v62, %v661_v28  ;;  %v8514_v24 = vpop.f32.mrf.mxu3  ;;  %v1351_v62 = vor.u32 1.1754944e-38, %v1350_v8  ;;  %v8535_v44 = vpop.eup %7022  ;;  %v8543_v5 = vsel %vm1379_vm10, %v1381_v29, %v1377_v25 }
 0x178   :  { %vm1359_vm12 = vweird.f32 %v8248_v48  ;;  %v1365_v39 = vand.u32 2147483648, %v8248_v48  ;;  %v1387_v3 = vmul.f32 %v8384_v30, %v1386_v38  ;;  %v8555_v61 = vmul.f32 %v8511_v27, %v8435_v15 }
 0x179   :  { %v1041_v20 = vmul.f32 1.442695, %v960_v58  ;;  %v961_v18 = vsub.f32 0.0, %v740_v17  ;;  %v8538_v23 = vpop.f32.mrf.mxu1  ;;  %v7025_v4 = vpop.eup %7024  ;;  %v8548_v56 = vsel %vm8518_vm8, %v1351_v62, %v1347_v33  ;;  %vm8561_vm13 = vmor %vm1359_vm12, %vm1360_vm2  ;;  %v8565_v12 = vadd.f32 1.0, %v7021_v6 }
 0x17a   :  { %v818_v36 = vpop.f32.mrf.mxu2  ;;  %v8567_v48 = vadd.f32 1.0, %v7025_v4  ;;  %v2005_v11 = vpack.c.bf16 %v8543_v5, %v8548_v56  ;;  %v1362_v28 = vsel %vm8561_vm13, %v8319_v1, %v1358_v19  ;;  %vm8579_vm14 = vcmp.eq.f32.partialorder %v1363_v13, 8.507059e+37 }
 0x17b   :  { %7030 = vpow2.f32 %v1041_v20  ;;  %v819_v32 = vadd.f32 %v818_v36, %v7863_v63  ;;  %v1043_v8 = vmul.f32 1.442695, %v961_v18  ;;  %v1400_v40 = vmul.f32 %v8446_v0, %v8347_v60 }
 0x17c   :  { %v663_v21 = vpop.f32.mrf.mxu0  ;;  %v1366_v17 = vor.u32 1.1754944e-38, %v1365_v39  ;;  %v1388_v7 = vadd.f32 %v8384_v30, %v1387_v3  ;;  %vm1389_vm15 = vweird.f32 %v8303_v26  ;;  %vm1390_vm0 = vweird.f32 %v8384_v30 }
 0x17d   :  { %v898_v31 = vadd.f32 %v8459_v53, %v819_v32  ;;  %v664_v16 = vadd.f32 %v663_v21, %v7856_v55  ;;  %v8574_v53 = vpop.eup %7026  ;;  %7032 = vpow2.f32 %v1043_v8  ;;  %v1401_v33 = vsub.f32 1.0, %v1400_v40  ;;  %vm8607_vm1 = vmor %vm1389_vm15, %vm1390_vm0 }
 0x17e   :  { %v7029_v58 = vpop.eup %7028  ;;  %7034 = vrcp.f32 %v8567_v48  ;;  %v1395_v38 = vand.u32 2147483648, %v8303_v26  ;;  %v1430_v20 = vmul.f32 %v8481_v10, %v8418_v41  ;;  %v8598_v18 = vmul.f32 %v8574_v53, %v8483_v50 }
 0x17f   :  { %v962_v42 = vsub.f32 0.0, %v898_v31  ;;  %v743_v22 = vadd.f32 %v8469_v43, %v664_v16  ;;  %v8577_v59 = vpop.f32.mrf.mxu3  ;;  %v8600_v29 = vadd.f32 1.0, %v7029_v58  ;;  %v1393_v4 = vand.u32 2147483647, %v8303_v26 }
 0x180   :  { %7036 = vrcp.f32 %v8565_v12  ;;  %v8622_v13 = vsel %vm8579_vm14, %v1366_v17, %v1362_v28  ;;  %v1392_v26 = vsel %vm8607_vm1, %v8384_v30, %v1388_v7  ;;  %v1402_v21 = vmul.f32 %v8446_v0, %v1401_v33 }
 0x181   :  { %v7031_v1 = vpop.eup %7030  ;;  %v1045_v43 = vmul.f32 1.442695, %v962_v42  ;;  %v963_v57 = vsub.f32 0.0, %v743_v22  ;;  %v8588_v6 = vpop.f32.mrf.mxu1  ;;  %v1408_v9 = vand.u32 2147483647, %v8347_v60  ;;  %v1431_v35 = vsub.f32 1.0, %v1430_v20 }
 0x182   :  { %v8591_v62 = vadd.f32 1.0, %v7031_v1  ;;  %v821_v25 = vpop.f32.mrf.mxu2  ;;  %vm1394_vm3 = vcmp.eq.f32.partialorder %v1393_v4, 8.507059e+37  ;;  %v1403_v16 = vadd.f32 %v8446_v0, %v1402_v21  ;;  %vm1405_vm4 = vweird.f32 %v8446_v0 }
 0x183   :  { %v822_v36 = vadd.f32 %v821_v25, %v7863_v63  ;;  %7038 = vpow2.f32 %v1045_v43  ;;  %v1047_v39 = vmul.f32 1.442695, %v963_v57  ;;  %v1432_v46 = vmul.f32 %v8481_v10, %v1431_v35 }
 0x184   :  { %2176 = vmatmul.bf16.gmra.mxu1 %v2003_v54  ;;  %5792 = vmatmul.msk.bf16.gmra.mxu3 %vm2111_vm11, %v2004_v49  ;;  %v665_v32 = vpop.f32.mrf.mxu0  ;;  %7040 = vrcp.f32 %v8591_v62  ;;  %v1396_v54 = vor.u32 1.1754944e-38, %v1395_v38  ;;  %v7033_v49 = vpop.eup %7032  ;;  %v1476_v28 = vsub.f32 1.0, %v8598_v18  ;;  %vm1404_vm7 = vweird.f32 %v8347_v60 }
 0x185   :  { %v901_v47 = vadd.f32 %v8514_v24, %v822_v36  ;;  %v666_v52 = vadd.f32 %v665_v32, %v7856_v55  ;;  %7042 = vrcp.f32 %v8600_v29  ;;  %v8636_v31 = vpop.eup %7034  ;;  %v8648_v40 = vadd.f32 1.0, %v7033_v49  ;;  %vm8665_vm9 = vmor %vm1404_vm7, %vm1405_vm4 }
 0x186   :  { %v8638_v24 = vsel %vm1394_vm3, %v1396_v54, %v1392_v26  ;;  %7044 = vpow2.f32 %v1047_v39  ;;  %vm8651_vm8 = vcmp.eq.f32.partialorder %v1408_v9, 8.507059e+37  ;;  %v1410_v7 = vand.u32 2147483648, %v8347_v60 }
 0x187   :  { %v964_v3 = vsub.f32 0.0, %v901_v47  ;;  %v745_v30 = vadd.f32 %v8538_v23, %v666_v52  ;;  %v8634_v8 = vpop.f32.mrf.mxu3  ;;  %v8646_v23 = vpop.eup %7036  ;;  %v8658_v43 = vmul.f32 %v8636_v31, %v8567_v48  ;;  %v2006_v33 = vpack.c.bf16 %v8638_v24, %v8622_v13 }
 0x188   :  { %vm1435_vm10 = vweird.f32 %v8481_v10  ;;  %v1407_v20 = vsel %vm8665_vm9, %v8446_v0, %v1403_v16  ;;  %v1433_v36 = vadd.f32 %v8481_v10, %v1432_v46  ;;  %v1438_v19 = vand.u32 2147483647, %v8418_v41 }
 0x189   :  { %v1049_v42 = vmul.f32 1.442695, %v964_v3  ;;  %v965_v22 = vsub.f32 0.0, %v745_v30  ;;  %v8644_v45 = vpop.f32.mrf.mxu1  ;;  %v7039_v1 = vpop.eup %7038  ;;  %v1440_v4 = vand.u32 2147483648, %v8418_v41  ;;  %v1411_v47 = vor.u32 1.1754944e-38, %v1410_v7 }
 0x18a   :  { %v823_v58 = vpop.f32.mrf.mxu2  ;;  %v8670_v38 = vpop.eup %7040  ;;  %v8683_v39 = vadd.f32 1.0, %v7039_v1  ;;  %v1417_v0 = vmul.f32 %v8422_v14, %v1416_v2  ;;  %vm1434_vm2 = vweird.f32 %v8418_v41  ;;  %vm8706_vm13 = vcmp.eq.f32.partialorder %v1438_v19, 8.507059e+37 }
 0x18b   :  { %v824_v57 = vadd.f32 %v823_v58, %v7863_v63  ;;  %v8678_v32 = vpop.eup %7042  ;;  %7046 = vpow2.f32 %v1049_v42  ;;  %v1051_v13 = vmul.f32 1.442695, %v965_v22  ;;  %v8690_v54 = vmul.f32 %v8670_v38, %v8591_v62  ;;  %vm8702_vm12 = vmor %vm1434_vm2, %vm1435_vm10 }
 0x18c   :  { %v668_v60 = vpop.f32.mrf.mxu0  ;;  %7048 = vrcp.f32 %v8648_v40  ;;  %v7045_v52 = vpop.eup %7044  ;;  %v8698_v49 = vsel %vm8651_vm8, %v1411_v47, %v1407_v20  ;;  %v1441_v3 = vor.u32 1.1754944e-38, %v1440_v4  ;;  %v1437_v16 = vsel %vm8702_vm12, %v8481_v10, %v1433_v36 }
 0x18d   :  { %v903_v26 = vadd.f32 %v8577_v59, %v824_v57  ;;  %v669_v21 = vadd.f32 %v668_v60, %v7856_v55  ;;  %7050 = vpow2.f32 %v1051_v13  ;;  %v8717_v46 = vadd.f32 1.0, %v7045_v52 }
 0x18e   :  { %7052 = vrcp.f32 %v8683_v39  ;;  %v8720_v22 = vadd.f32 %v8422_v14, %v1417_v0  ;;  %v1536_v17 = vsub.f32 1.0, %v8690_v54  ;;  %vm1419_vm14 = vweird.f32 %v8349_v51 }
 0x18f   :  { %v966_v9 = vsub.f32 0.0, %v903_v26  ;;  %v748_v35 = vadd.f32 %v8588_v6, %v669_v21  ;;  %v8693_v59 = vpop.f32.mrf.mxu3  ;;  %v1446_v6 = vsub.f32 1.0, %v8555_v61  ;;  %v8734_v25 = vsel %vm8706_vm13, %v1441_v3, %v1437_v16 }
 0x190   :  { %vm1420_vm15 = vweird.f32 %v8422_v14  ;;  %vm1450_vm0 = vweird.f32 %v8511_v27  ;;  %vm1449_vm1 = vweird.f32 %v8435_v15  ;;  %v1455_v56 = vand.u32 2147483648, %v8435_v15 }
 0x191   :  { %v1053_v30 = vmul.f32 1.442695, %v966_v9  ;;  %v967_v41 = vsub.f32 0.0, %v748_v35  ;;  %v8711_v24 = vpop.f32.mrf.mxu1  ;;  %v1447_v58 = vmul.f32 %v8511_v27, %v1446_v6  ;;  %v7047_v61 = vpop.eup %7046  ;;  %vm8751_vm3 = vmor %vm1449_vm1, %vm1450_vm0  ;;  %v1453_v21 = vand.u32 2147483647, %v8435_v15 }
 0x192   :  { %v826_v42 = vpop.f32.mrf.mxu2  ;;  %v8726_v57 = vpop.eup %7048  ;;  %v8742_v5 = vadd.f32 1.0, %v7047_v61  ;;  %v2007_v0 = vpack.c.bf16 %v8734_v25, %v8698_v49  ;;  %v1425_v52 = vand.u32 2147483648, %v8349_v51  ;;  %vm8771_vm4 = vmor %vm1419_vm14, %vm1420_vm15  ;;  %v1490_v49 = vmul.f32 %v8646_v23, %v8565_v12 }
 0x193   :  { %v1055_v7 = vmul.f32 1.442695, %v967_v41  ;;  %v827_v1 = vadd.f32 %v826_v42, %v7863_v63  ;;  %v1448_v60 = vadd.f32 %v8511_v27, %v1447_v58  ;;  %7054 = vpow2.f32 %v1053_v30 }
 0x194   :  { %2181 = vmatmul.bf16.gmra.mxu1 %v2005_v11  ;;  %5793 = vmatmul.msk.bf16.gmra.mxu3 %vm2111_vm11, %v2006_v33  ;;  %v670_v10 = vpop.f32.mrf.mxu0  ;;  %v1460_v11 = vmul.f32 %v8535_v44, %v8456_v37  ;;  %v7051_v33 = vpop.eup %7050  ;;  %v1422_v6 = vsel %vm8771_vm4, %v8422_v14, %v8720_v22  ;;  %v1456_v30 = vor.u32 1.1754944e-38, %v1455_v56  ;;  %vm1454_vm8 = vcmp.eq.f32.partialorder %v1453_v21, 8.507059e+37 }
 0x195   :  { %v906_v20 = vadd.f32 %v8634_v8, %v827_v1  ;;  %v671_v36 = vadd.f32 %v670_v10, %v7856_v55  ;;  %7056 = vpow2.f32 %v1055_v7  ;;  %v1423_v8 = vand.u32 2147483647, %v8349_v51  ;;  %v8756_v47 = vpop.eup %7052 }
 0x196   :  { %7058 = vrcp.f32 %v8717_v46  ;;  %v1461_v2 = vsub.f32 1.0, %v1460_v11  ;;  %v8778_v3 = vadd.f32 1.0, %v7051_v33  ;;  %v1426_v58 = vor.u32 1.1754944e-38, %v1425_v52 }
 0x197   :  { %v968_v19 = vsub.f32 0.0, %v906_v20  ;;  %v750_v4 = vadd.f32 %v8644_v45, %v671_v36  ;;  %v8748_v13 = vpop.f32.mrf.mxu3  ;;  %v1452_v45 = vsel %vm8751_vm3, %v8511_v27, %v1448_v60  ;;  %7060 = vrcp.f32 %v8742_v5 }
 0x198   :  { %vm1424_vm7 = vcmp.eq.f32.partialorder %v1423_v8, 8.507059e+37  ;;  %v1457_v61 = vsel %vm1454_vm8, %v1456_v30, %v1452_v45  ;;  %v1470_v7 = vand.u32 2147483648, %v8456_v37  ;;  %v1491_v1 = vsub.f32 1.0, %v1490_v49 }
 0x199   :  { %v1057_v9 = vmul.f32 1.442695, %v968_v19  ;;  %v969_v35 = vsub.f32 0.0, %v750_v4  ;;  %v8765_v34 = vpop.f32.mrf.mxu1  ;;  %v7055_v51 = vpop.eup %7054  ;;  %v1462_v14 = vmul.f32 %v8535_v44, %v1461_v2  ;;  %v1427_v36 = vsel %vm1424_vm7, %v1426_v58, %v1422_v6 }
 0x19a   :  { %v828_v27 = vpop.f32.mrf.mxu2  ;;  %v8792_v20 = vadd.f32 1.0, %v7055_v51  ;;  %v1492_v56 = vmul.f32 %v8646_v23, %v1491_v1  ;;  %vm1464_vm9 = vweird.f32 %v8456_v37  ;;  %v2008_v8 = vpack.c.bf16 %v1457_v61, %v1427_v36 }
 0x19b   :  { %7062 = vpow2.f32 %v1057_v9  ;;  %v829_v41 = vadd.f32 %v828_v27, %v7863_v63  ;;  %v7057_v16 = vpop.eup %7056  ;;  %v1059_v10 = vmul.f32 1.442695, %v969_v35  ;;  %vm1465_vm10 = vweird.f32 %v8535_v44 }
 0x19c   :  { %v673_v42 = vpop.f32.mrf.mxu0  ;;  %v8789_v22 = vpop.eup %7058  ;;  %7064 = vrcp.f32 %v8778_v3  ;;  %v8795_v11 = vadd.f32 1.0, %v7057_v16  ;;  %v1468_v26 = vand.u32 2147483647, %v8456_v37  ;;  %v8805_v21 = vor.u32 1.1754944e-38, %v1470_v7  ;;  %vm8833_vm12 = vmor %vm1464_vm9, %vm1465_vm10 }
 0x19d   :  { %v908_v25 = vadd.f32 %v8693_v59, %v829_v41  ;;  %v674_v60 = vadd.f32 %v673_v42, %v7856_v55  ;;  %v8801_v59 = vpop.eup %7060  ;;  %7066 = vpow2.f32 %v1059_v10  ;;  %v1493_v2 = vadd.f32 %v8646_v23, %v1492_v56 }
 0x19e   :  { %7068 = vrcp.f32 %v8792_v20  ;;  %vm1495_vm2 = vweird.f32 %v8646_v23  ;;  %v1477_v49 = vmul.f32 %v8574_v53, %v1476_v28  ;;  %v8820_v27 = vmul.f32 %v8801_v59, %v8742_v5 }
 0x19f   :  { %v970_v33 = vsub.f32 0.0, %v908_v25  ;;  %v753_v19 = vadd.f32 %v8711_v24, %v674_v60  ;;  %v8798_v4 = vpop.f32.mrf.mxu3  ;;  %v8810_v24 = vadd.f32 %v8535_v44, %v1462_v14  ;;  %7070 = vrcp.f32 %v8795_v11 }
 0x1a0   :  { %vm1494_vm13 = vweird.f32 %v8565_v12  ;;  %v1498_v28 = vand.u32 2147483647, %v8565_v12  ;;  %v1500_v42 = vand.u32 2147483648, %v8565_v12  ;;  %v1478_v7 = vadd.f32 %v8574_v53, %v1477_v49 }
 0x1a1   :  { %v7063_v52 = vpop.eup %7062  ;;  %v1061_v45 = vmul.f32 1.442695, %v970_v33  ;;  %v971_v9 = vsub.f32 0.0, %v753_v19  ;;  %v8807_v35 = vpop.f32.mrf.mxu1  ;;  %v1467_v37 = vsel %vm8833_vm12, %v8535_v44, %v8810_v24  ;;  %vm8848_vm14 = vmor %vm1494_vm13, %vm1495_vm2  ;;  %vm1479_vm15 = vweird.f32 %v8483_v50 }
 0x1a2   :  { %v831_v15 = vpop.f32.mrf.mxu2  ;;  %v8824_v51 = vpop.eup %7064  ;;  %v8826_v41 = vadd.f32 1.0, %v7063_v52  ;;  %v1497_v12 = vsel %vm8848_vm14, %v8646_v23, %v1493_v2  ;;  %vm1480_vm0 = vweird.f32 %v8574_v53  ;;  %vm8861_vm1 = vcmp.eq.f32.partialorder %v1468_v26, 8.507059e+37 }
 0x1a3   :  { %v1063_v6 = vmul.f32 1.442695, %v971_v9  ;;  %v832_v30 = vadd.f32 %v831_v15, %v7863_v63  ;;  %7072 = vpow2.f32 %v1061_v45  ;;  %v1506_v60 = vsub.f32 1.0, %v8658_v43  ;;  %vm8882_vm4 = vmor %vm1479_vm15, %vm1480_vm0 }
 0x1a4   :  { %2186 = vmatmul.bf16.gmra.mxu1 %v2007_v0  ;;  %5794 = vmatmul.msk.bf16.gmra.mxu3 %vm2111_vm11, %v2008_v8  ;;  %v675_v16 = vpop.f32.mrf.mxu0  ;;  %vm1499_vm3 = vcmp.eq.f32.partialorder %v1498_v28, 8.507059e+37  ;;  %v1501_v14 = vor.u32 1.1754944e-38, %v1500_v42  ;;  %v1485_v36 = vand.u32 2147483648, %v8483_v50  ;;  %v1515_v26 = vand.u32 2147483648, %v8567_v48 }
 0x1a5   :  { %v911_v0 = vadd.f32 %v8748_v13, %v832_v30  ;;  %v676_v58 = vadd.f32 %v675_v16, %v7856_v55  ;;  %v7067_v13 = vpop.eup %7066  ;;  %7074 = vpow2.f32 %v1063_v6  ;;  %v1507_v8 = vmul.f32 %v8636_v31, %v1506_v60 }
 0x1a6   :  { %v8866_v23 = vpop.eup %7068  ;;  %7076 = vrcp.f32 %v8826_v41  ;;  %v8876_v52 = vadd.f32 1.0, %v7067_v13  ;;  %v1502_v45 = vsel %vm1499_vm3, %v1501_v14, %v1497_v12  ;;  %vm1510_vm7 = vweird.f32 %v8636_v31 }
 0x1a7   :  { %v972_v1 = vsub.f32 0.0, %v911_v0  ;;  %v755_v44 = vadd.f32 %v8765_v34, %v676_v58  ;;  %v8859_v10 = vpop.f32.mrf.mxu3  ;;  %v8870_v56 = vpop.eup %7070  ;;  %v1513_v24 = vand.u32 2147483647, %v8567_v48  ;;  %v1482_v6 = vsel %vm8882_vm4, %v8574_v53, %v1478_v7 }
 0x1a8   :  { %v1520_v30 = vmul.f32 %v8678_v32, %v8600_v29  ;;  %v1483_v18 = vand.u32 2147483647, %v8483_v50  ;;  %v1486_v28 = vor.u32 1.1754944e-38, %v1485_v36  ;;  %v1508_v42 = vadd.f32 %v8636_v31, %v1507_v8 }
 0x1a9   :  { %v1065_v33 = vmul.f32 1.442695, %v972_v1  ;;  %v973_v34 = vsub.f32 0.0, %v755_v44  ;;  %v8872_v19 = vpop.f32.mrf.mxu1  ;;  %v7073_v15 = vpop.eup %7072  ;;  %vm1509_vm8 = vweird.f32 %v8567_v48  ;;  %v1516_v53 = vor.u32 1.1754944e-38, %v1515_v26 }
 0x1aa   :  { %v833_v43 = vpop.f32.mrf.mxu2  ;;  %vm1511_vm9 = vmor %vm1509_vm8, %vm1510_vm7  ;;  %v8903_v7 = vadd.f32 1.0, %v7073_v15  ;;  %vm1514_vm10 = vcmp.eq.f32.partialorder %v1513_v24, 8.507059e+37  ;;  %v1521_v44 = vsub.f32 1.0, %v1520_v30  ;;  %v1472_v14 = vsel %vm8861_vm1, %v8805_v21, %v1467_v37 }
 0x1ab   :  { %v1067_v2 = vmul.f32 1.442695, %v973_v34  ;;  %v834_v49 = vadd.f32 %v833_v43, %v7863_v63  ;;  %v7075_v0 = vpop.eup %7074  ;;  %7078 = vpow2.f32 %v1065_v33  ;;  %v1512_v50 = vsel %vm1511_vm9, %v8636_v31, %v1508_v42 }
 0x1ac   :  { %v678_v16 = vpop.f32.mrf.mxu0  ;;  %v8901_v12 = vpop.eup %7076  ;;  %v8910_v60 = vadd.f32 1.0, %v7075_v0  ;;  %vm1484_vm2 = vcmp.eq.f32.partialorder %v1483_v18, 8.507059e+37  ;;  %v8921_v8 = vmul.f32 %v8756_v47, %v8683_v39  ;;  %v2009_v43 = vpack.c.bf16 %v1502_v45, %v1472_v14 }
 0x1ad   :  { %v913_v58 = vadd.f32 %v8798_v4, %v834_v49  ;;  %v679_v61 = vadd.f32 %v678_v16, %v7856_v55  ;;  %7080 = vpow2.f32 %v1067_v2  ;;  %v1517_v4 = vsel %vm1514_vm10, %v1516_v53, %v1512_v50 }
 0x1ae   :  { %7082 = vrcp.f32 %v8876_v52  ;;  %v1487_v34 = vsel %vm1484_vm2, %v1486_v28, %v1482_v6  ;;  %v1522_v24 = vmul.f32 %v8678_v32, %v1521_v44  ;;  %v1596_v2 = vsub.f32 1.0, %v8820_v27 }
 0x1af   :  { %v974_v13 = vsub.f32 0.0, %v913_v58  ;;  %v758_v48 = vadd.f32 %v8807_v35, %v679_v61  ;;  %v8907_v1 = vpop.f32.mrf.mxu3  ;;  %v1550_v35 = vmul.f32 %v8726_v57, %v8648_v40  ;;  %7084 = vrcp.f32 %v8903_v7 }
 0x1b0   :  { %v2010_v9 = vpack.c.bf16 %v1517_v4, %v1487_v34  ;;  %v8929_v49 = vmul.f32 %v8866_v23, %v8792_v20  ;;  %vm1525_vm12 = vweird.f32 %v8678_v32  ;;  %v1528_v18 = vand.u32 2147483647, %v8600_v29 }
 0x1b1   :  { %v1069_v36 = vmul.f32 1.442695, %v974_v13  ;;  %v975_v33 = vsub.f32 0.0, %v758_v48  ;;  %v8915_v31 = vpop.f32.mrf.mxu1  ;;  %v7079_v25 = vpop.eup %7078  ;;  %v1551_v6 = vsub.f32 1.0, %v1550_v35  ;;  %v1530_v0 = vand.u32 2147483648, %v8600_v29 }
 0x1b2   :  { %v836_v26 = vpop.f32.mrf.mxu2  ;;  %v8939_v42 = vadd.f32 1.0, %v7079_v25  ;;  %v1523_v13 = vadd.f32 %v8678_v32, %v1522_v24  ;;  %vm1524_vm13 = vweird.f32 %v8600_v29  ;;  %vm1555_vm14 = vweird.f32 %v8726_v57 }
 0x1b3   :  { %7086 = vpow2.f32 %v1069_v36  ;;  %v1071_v21 = vmul.f32 1.442695, %v975_v33  ;;  %v837_v37 = vadd.f32 %v836_v26, %v7863_v63  ;;  %v7081_v15 = vpop.eup %7080  ;;  %v1552_v58 = vmul.f32 %v8726_v57, %v1551_v6  ;;  %vm8966_vm0 = vmor %vm1524_vm13, %vm1525_vm12 }
 0x1b4   :  { %7088 = vrcp.f32 %v8910_v60  ;;  %2191 = vmatmul.bf16.gmra.mxu1 %v2009_v43  ;;  %5795 = vmatmul.msk.bf16.gmra.mxu3 %vm2111_vm11, %v2010_v9  ;;  %v680_v45 = vpop.f32.mrf.mxu0  ;;  %v8937_v28 = vpop.eup %7082  ;;  %v8943_v61 = vadd.f32 1.0, %v7081_v15  ;;  %v1537_v44 = vmul.f32 %v8670_v38, %v1536_v17  ;;  %vm1554_vm15 = vweird.f32 %v8648_v40 }
 0x1b5   :  { %v916_v30 = vadd.f32 %v8859_v10, %v837_v37  ;;  %v681_v16 = vadd.f32 %v680_v45, %v7856_v55  ;;  %7090 = vpow2.f32 %v1071_v21  ;;  %v8949_v48 = vpop.eup %7084  ;;  %v1553_v4 = vadd.f32 %v8726_v57, %v1552_v58  ;;  %vm8982_vm3 = vmor %vm1554_vm15, %vm1555_vm14 }
 0x1b6   :  { %v1560_v34 = vand.u32 2147483648, %v8648_v40  ;;  %7092 = vrcp.f32 %v8939_v42  ;;  %vm8970_vm1 = vcmp.eq.f32.partialorder %v1528_v18, 8.507059e+37  ;;  %v1531_v26 = vor.u32 1.1754944e-38, %v1530_v0 }
 0x1b7   :  { %v976_v53 = vsub.f32 0.0, %v916_v30  ;;  %v760_v10 = vadd.f32 %v8872_v19, %v681_v16  ;;  %v8946_v50 = vpop.f32.mrf.mxu3  ;;  %v1558_v43 = vand.u32 2147483647, %v8648_v40  ;;  %7094 = vrcp.f32 %v8943_v61 }
 0x1b8   :  { %v1527_v25 = vsel %vm8966_vm0, %v8678_v32, %v1523_v13  ;;  %vm1540_vm4 = vweird.f32 %v8670_v38  ;;  %v1557_v15 = vsel %vm8982_vm3, %v8726_v57, %v1553_v4  ;;  %v1538_v45 = vadd.f32 %v8670_v38, %v1537_v44 }
 0x1b9   :  { %v7087_v14 = vpop.eup %7086  ;;  %v1073_v36 = vmul.f32 1.442695, %v976_v53  ;;  %v977_v33 = vsub.f32 0.0, %v760_v10  ;;  %v8957_v19 = vpop.f32.mrf.mxu1  ;;  %v1561_v16 = vor.u32 1.1754944e-38, %v1560_v34  ;;  %vm1559_vm7 = vcmp.eq.f32.partialorder %v1558_v43, 8.507059e+37 }
 0x1ba   :  { %v8961_v35 = vpop.eup %7088  ;;  %v838_v29 = vpop.f32.mrf.mxu2  ;;  %v8987_v24 = vadd.f32 1.0, %v7087_v14  ;;  %vm1539_vm8 = vweird.f32 %v8591_v62  ;;  %v1543_v18 = vand.u32 2147483647, %v8591_v62  ;;  %v1545_v0 = vand.u32 2147483648, %v8591_v62 }
 0x1bb   :  { %v839_v9 = vadd.f32 %v838_v29, %v7863_v63  ;;  %v7091_v37 = vpop.eup %7090  ;;  %7096 = vpow2.f32 %v1073_v36  ;;  %v1075_v32 = vmul.f32 1.442695, %v977_v33  ;;  %v1562_v10 = vsel %vm1559_vm7, %v1561_v16, %v1557_v15  ;;  %vm9005_vm9 = vmor %vm1539_vm8, %vm1540_vm4 }
 0x1bc   :  { %v683_v40 = vpop.f32.mrf.mxu0  ;;  %v8998_v58 = vadd.f32 1.0, %v7091_v37  ;;  %v1566_v13 = vsub.f32 1.0, %v8921_v8  ;;  %v9010_v4 = vpop.eup %7092  ;;  %7098 = vrcp.f32 %v8987_v24  ;;  %v1532_v44 = vsel %vm8970_vm1, %v1531_v26, %v1527_v25 }
 0x1bd   :  { %v918_v6 = vadd.f32 %v8907_v1, %v839_v9  ;;  %v684_v30 = vadd.f32 %v683_v40, %v7856_v55  ;;  %v9018_v14 = vpop.eup %7094  ;;  %7100 = vpow2.f32 %v1075_v32  ;;  %v1575_v8 = vand.u32 2147483648, %v8683_v39 }
 0x1be   :  { %v1567_v33 = vmul.f32 %v8756_v47, %v1566_v13  ;;  %v1580_v34 = vmul.f32 %v8789_v22, %v8717_v46  ;;  %v2011_v26 = vpack.c.bf16 %v1562_v10, %v1532_v44  ;;  %vm1570_vm10 = vweird.f32 %v8756_v47 }
 0x1bf   :  { %v763_v53 = vadd.f32 %v8915_v31, %v684_v30  ;;  %v9001_v57 = vpop.f32.mrf.mxu3  ;;  %v978_v62 = vsub.f32 0.0, %v918_v6  ;;  %v1542_v31 = vsel %vm9005_vm9, %v8670_v38, %v1538_v45  ;;  %v1573_v38 = vand.u32 2147483647, %v8683_v39 }
 0x1c0   :  { %7102 = vrcp.f32 %v8998_v58  ;;  %vm9030_vm2 = vcmp.eq.f32.partialorder %v1543_v18, 8.507059e+37  ;;  %v1546_v25 = vor.u32 1.1754944e-38, %v1545_v0  ;;  %v1568_v37 = vadd.f32 %v8756_v47, %v1567_v33 }
 0x1c1   :  { %v9020_v36 = vpop.f32.mrf.mxu1  ;;  %v7097_v29 = vpop.eup %7096  ;;  %v979_v54 = vsub.f32 0.0, %v763_v53  ;;  %v1077_v21 = vmul.f32 1.442695, %v978_v62  ;;  %vm1569_vm12 = vweird.f32 %v8683_v39  ;;  %v1581_v15 = vsub.f32 1.0, %v1580_v34 }
 0x1c2   :  { %v841_v17 = vpop.f32.mrf.mxu2  ;;  %v9036_v45 = vadd.f32 1.0, %v7097_v29  ;;  %vm1571_vm13 = vmor %vm1569_vm12, %vm1570_vm10  ;;  %v1576_v6 = vor.u32 1.1754944e-38, %v1575_v8  ;;  %v9040_v16 = vpop.eup %7098  ;;  %vm1574_vm14 = vcmp.eq.f32.partialorder %v1573_v38, 8.507059e+37  ;;  %v1547_v1 = vsel %vm9030_vm2, %v1546_v25, %v1542_v31 }
 0x1c3   :  { %v842_v43 = vadd.f32 %v841_v17, %v7863_v63  ;;  %v1079_v18 = vmul.f32 1.442695, %v979_v54  ;;  %v1572_v0 = vsel %vm1571_vm13, %v8756_v47, %v1568_v37  ;;  %v1582_v53 = vmul.f32 %v8789_v22, %v1581_v15  ;;  %v7101_v10 = vpop.eup %7100 }
 0x1c4   :  { %2196 = vmatmul.bf16.gmra.mxu1 %v2011_v26  ;;  %v685_v40 = vpop.f32.mrf.mxu0  ;;  %v1577_v13 = vsel %vm1574_vm14, %v1576_v6, %v1572_v0  ;;  %v9051_v44 = vmul.f32 %v8901_v12, %v8826_v41  ;;  %7104 = vpow2.f32 %v1077_v21  ;;  %v1610_v47 = vmul.f32 %v8824_v51, %v8778_v3 }
 0x1c5   :  { %v921_v32 = vadd.f32 %v8946_v50, %v842_v43  ;;  %v686_v30 = vadd.f32 %v685_v40, %v7856_v55  ;;  %v2012_v33 = vpack.c.bf16 %v1577_v13, %v1547_v1  ;;  %v9059_v34 = vmul.f32 %v9010_v4, %v8939_v42 }
 0x1c6   :  { %v9055_v8 = vpop.eup %7102  ;;  %7106 = vrcp.f32 %v9036_v45  ;;  %v1590_v29 = vand.u32 2147483648, %v8717_v46  ;;  %v1583_v17 = vadd.f32 %v8789_v22, %v1582_v53  ;;  %vm1585_vm15 = vweird.f32 %v8789_v22 }
 0x1c7   :  { %v980_v39 = vsub.f32 0.0, %v921_v32  ;;  %v765_v50 = vadd.f32 %v8957_v19, %v686_v30  ;;  %v9047_v62 = vpop.f32.mrf.mxu3  ;;  %7108 = vpow2.f32 %v1079_v18  ;;  %5796 = vmatmul.msk.bf16.gmra.mxu3 %vm2111_vm11, %v2012_v33  ;;  %v1611_v26 = vsub.f32 1.0, %v1610_v47 }
 0x1c8   :  { %vm1584_vm0 = vweird.f32 %v8717_v46  ;;  %v9070_v9 = vadd.f32 1.0, %v7101_v10  ;;  %v1588_v21 = vand.u32 2147483647, %v8717_v46  ;;  %vm1615_vm1 = vweird.f32 %v8824_v51 }
 0x1c9   :  { %v1081_v19 = vmul.f32 1.442695, %v980_v39  ;;  %v9062_v31 = vpop.f32.mrf.mxu1  ;;  %v981_v38 = vsub.f32 0.0, %v765_v50  ;;  %v1612_v37 = vmul.f32 %v8824_v51, %v1611_v26  ;;  %vm9077_vm3 = vmor %vm1584_vm0, %vm1585_vm15  ;;  %v1591_v6 = vor.u32 1.1754944e-38, %v1590_v29 }
 0x1ca   :  { %v843_v54 = vpop.f32.mrf.mxu2  ;;  %vm1614_vm4 = vweird.f32 %v8778_v3  ;;  %v7105_v30 = vpop.eup %7104  ;;  %v1587_v46 = vsel %vm9077_vm3, %v8789_v22, %v1583_v17  ;;  %v1618_v0 = vand.u32 2147483647, %v8778_v3  ;;  %v1597_v22 = vmul.f32 %v8801_v59, %v1596_v2 }
 0x1cb   :  { %7110 = vpow2.f32 %v1081_v19  ;;  %v844_v43 = vadd.f32 %v843_v54, %v7863_v63  ;;  %v1613_v18 = vadd.f32 %v8824_v51, %v1612_v37  ;;  %v1083_v10 = vmul.f32 1.442695, %v981_v38  ;;  %vm9095_vm7 = vmor %vm1614_vm4, %vm1615_vm1 }
 0x1cc   :  { %v688_v25 = vpop.f32.mrf.mxu0  ;;  %v9088_v53 = vpop.eup %7106  ;;  %7112 = vrcp.f32 %v9070_v9  ;;  %vm1589_vm8 = vcmp.eq.f32.partialorder %v1588_v21, 8.507059e+37  ;;  %v9106_v19 = vadd.f32 1.0, %v7105_v30  ;;  %vm1619_vm9 = vcmp.eq.f32.partialorder %v1618_v0, 8.507059e+37 }
 0x1cd   :  { %v923_v40 = vadd.f32 %v9001_v57, %v844_v43  ;;  %v689_v15 = vadd.f32 %v688_v25, %v7856_v55  ;;  %v1620_v57 = vand.u32 2147483648, %v8778_v3  ;;  %v7109_v33 = vpop.eup %7108  ;;  %v1617_v3 = vsel %vm9095_vm7, %v8824_v51, %v1613_v18 }
 0x1ce   :  { %v1592_v17 = vsel %vm1589_vm8, %v1591_v6, %v1587_v46  ;;  %v1626_v43 = vsub.f32 1.0, %v8929_v49  ;;  %7114 = vpow2.f32 %v1083_v10  ;;  %v1598_v51 = vadd.f32 %v8801_v59, %v1597_v22 }
 0x1cf   :  { %v982_v39 = vsub.f32 0.0, %v923_v40  ;;  %v768_v1 = vadd.f32 %v9020_v36, %v689_v15  ;;  %v9091_v13 = vpop.f32.mrf.mxu3  ;;  %v1621_v36 = vor.u32 1.1754944e-38, %v1620_v57  ;;  %vm1600_vm10 = vweird.f32 %v8801_v59 }
 0x1d0   :  { %v9118_v21 = vmul.f32 %v9088_v53, %v9036_v45  ;;  %v9120_v37 = vadd.f32 1.0, %v7109_v33  ;;  %vm1599_vm2 = vweird.f32 %v8742_v5  ;;  %v1603_v32 = vand.u32 2147483647, %v8742_v5 }
 0x1d1   :  { %v7111_v47 = vpop.eup %7110  ;;  %v1085_v29 = vmul.f32 1.442695, %v982_v39  ;;  %v9108_v54 = vpop.f32.mrf.mxu1  ;;  %v983_v2 = vsub.f32 0.0, %v768_v1  ;;  %v1622_v38 = vsel %vm1619_vm9, %v1621_v36, %v1617_v3  ;;  %v1605_v6 = vand.u32 2147483648, %v8742_v5  ;;  %vm9129_vm12 = vmor %vm1599_vm2, %vm1600_vm10 }
 0x1d2   :  { %v9110_v27 = vadd.f32 1.0, %v7111_v47  ;;  %v846_v26 = vpop.f32.mrf.mxu2  ;;  %v2013_v40 = vpack.c.bf16 %v1622_v38, %v1592_v17  ;;  %v9126_v30 = vpop.eup %7112  ;;  %v1627_v0 = vmul.f32 %v8866_v23, %v1626_v43  ;;  %vm1630_vm13 = vweird.f32 %v8866_v23 }
 0x1d3   :  { %v847_v25 = vadd.f32 %v846_v26, %v7863_v63  ;;  %7116 = vpow2.f32 %v1085_v29  ;;  %v1087_v46 = vmul.f32 1.442695, %v983_v2  ;;  %v1633_v5 = vand.u32 2147483647, %v8792_v20 }
 0x1d4   :  { %v690_v15 = vpop.f32.mrf.mxu0  ;;  %7118 = vrcp.f32 %v9110_v27  ;;  %2201 = vmatmul.bf16.gmra.mxu1 %v2013_v40  ;;  %v1635_v10 = vand.u32 2147483648, %v8792_v20  ;;  %v1628_v1 = vadd.f32 %v8866_v23, %v1627_v0  ;;  %vm1629_vm14 = vweird.f32 %v8792_v20  ;;  %v7115_v33 = vpop.eup %7114 }
 0x1d5   :  { %v926_v49 = vadd.f32 %v9047_v62, %v847_v25  ;;  %v1602_v62 = vsel %vm9129_vm12, %v8801_v59, %v1598_v51  ;;  %v691_v50 = vadd.f32 %v690_v15, %v7856_v55  ;;  %v1640_v22 = vmul.f32 %v8870_v56, %v8795_v11  ;;  %vm1631_vm0 = vmor %vm1629_vm14, %vm1630_vm13 }
 0x1d6   :  { %vm1604_vm15 = vcmp.eq.f32.partialorder %v1603_v32, 8.507059e+37  ;;  %v1606_v36 = vor.u32 1.1754944e-38, %v1605_v6  ;;  %v1636_v59 = vor.u32 1.1754944e-38, %v1635_v10  ;;  %v1632_v29 = vsel %vm1631_vm0, %v8866_v23, %v1628_v1 }
 0x1d7   :  { %v984_v57 = vsub.f32 0.0, %v926_v49  ;;  %v9140_v39 = vpop.f32.mrf.mxu3  ;;  %vm1634_vm1 = vcmp.eq.f32.partialorder %v1633_v5, 8.507059e+37  ;;  %v770_v17 = vadd.f32 %v9062_v31, %v691_v50  ;;  %v1641_v20 = vsub.f32 1.0, %v1640_v22 }
 0x1d8   :  { %7120 = vrcp.f32 %v9106_v19  ;;  %v1607_v38 = vsel %vm1604_vm15, %v1606_v36, %v1602_v62  ;;  %v1637_v43 = vsel %vm1634_vm1, %v1636_v59, %v1632_v29  ;;  %v9156_v40 = vadd.f32 1.0, %v7115_v33 }
 0x1d9   :  { %v1089_v3 = vmul.f32 1.442695, %v984_v57  ;;  %v9147_v47 = vpop.f32.mrf.mxu1  ;;  %v7117_v26 = vpop.eup %7116  ;;  %7122 = vrcp.f32 %v9120_v37  ;;  %v2014_v15 = vpack.c.bf16 %v1637_v43, %v1607_v38  ;;  %v985_v23 = vsub.f32 0.0, %v770_v17 }
 0x1da   :  { %v848_v2 = vpop.f32.mrf.mxu2  ;;  %v9153_v51 = vpop.eup %7118  ;;  %v1656_v31 = vsub.f32 1.0, %v9051_v44  ;;  %v9163_v18 = vmul.f32 %v8949_v48, %v8903_v7  ;;  %v1716_v0 = vsub.f32 1.0, %v9059_v34  ;;  %v1642_v57 = vmul.f32 %v8870_v56, %v1641_v20 }
 0x1db   :  { %v849_v25 = vadd.f32 %v848_v2, %v7863_v63  ;;  %7124 = vpow2.f32 %v1089_v3  ;;  %5797 = vmatmul.msk.bf16.gmra.mxu3 %vm2111_vm11, %v2014_v15  ;;  %v1091_v62 = vmul.f32 1.442695, %v985_v23  ;;  %v9175_v1 = vmul.f32 %v9040_v16, %v8987_v24 }
 0x1dc   :  { %v693_v49 = vpop.f32.mrf.mxu0  ;;  %7126 = vpow2.f32 %v1087_v46  ;;  %v1776_v50 = vsub.f32 1.0, %v9118_v21  ;;  %vm1644_vm3 = vweird.f32 %v8795_v11  ;;  %v9182_v22 = vadd.f32 1.0, %v7117_v26 }
 0x1dd   :  { %v928_v32 = vadd.f32 %v9091_v13, %v849_v25  ;;  %v694_v6 = vadd.f32 %v693_v49, %v7856_v55  ;;  %v1670_v13 = vmul.f32 %v8937_v28, %v8876_v52  ;;  %7128 = vrcp.f32 %v9156_v40 }
 0x1de   :  { %v9180_v46 = vpop.eup %7120  ;;  %v1648_v3 = vand.u32 2147483647, %v8795_v11  ;;  %v9191_v29 = vmul.f32 %v9153_v51, %v9110_v27  ;;  %v1643_v2 = vadd.f32 %v8870_v56, %v1642_v57  ;;  %vm1645_vm4 = vweird.f32 %v8870_v56 }
 0x1df   :  { %v986_v5 = vsub.f32 0.0, %v928_v32  ;;  %v773_v44 = vadd.f32 %v9108_v54, %v694_v6  ;;  %v9169_v10 = vpop.f32.mrf.mxu3  ;;  %v1671_v36 = vsub.f32 1.0, %v1670_v13  ;;  %v9187_v59 = vpop.eup %7122  ;;  %v1650_v20 = vand.u32 2147483648, %v8795_v11  ;;  %vm9205_vm8 = vmor %vm1644_vm3, %vm1645_vm4 }
 0x1e0   :  { %7130 = vpow2.f32 %v1091_v62  ;;  %vm1675_vm7 = vweird.f32 %v8937_v28  ;;  %v1678_v49 = vand.u32 2147483647, %v8876_v52  ;;  %v1680_v32 = vand.u32 2147483648, %v8876_v52 }
 0x1e1   :  { %v987_v54 = vsub.f32 0.0, %v773_v44  ;;  %v9184_v33 = vpop.f32.mrf.mxu1  ;;  %v7125_v26 = vpop.eup %7124  ;;  %v1093_v38 = vmul.f32 1.442695, %v986_v5  ;;  %v1672_v23 = vmul.f32 %v8937_v28, %v1671_v36  ;;  %7132 = vrcp.f32 %v9182_v22 }
 0x1e2   :  { %v851_v17 = vpop.f32.mrf.mxu2  ;;  %v7127_v25 = vpop.eup %7126  ;;  %vm9209_vm9 = vcmp.eq.f32.partialorder %v1648_v3, 8.507059e+37  ;;  %vm1674_vm10 = vweird.f32 %v8876_v52  ;;  %v9216_v44 = vadd.f32 1.0, %v7125_v26  ;;  %v1657_v13 = vmul.f32 %v8901_v12, %v1656_v31 }
 0x1e3   :  { %v852_v43 = vadd.f32 %v851_v17, %v7863_v63  ;;  %v1095_v15 = vmul.f32 1.442695, %v987_v54  ;;  %v9214_v5 = vpop.eup %7128  ;;  %v1673_v11 = vadd.f32 %v8937_v28, %v1672_v23  ;;  %7134 = vpow2.f32 %v1093_v38  ;;  %vm1676_vm2 = vmor %vm1674_vm10, %vm1675_vm7 }
 0x1e4   :  { %v1651_v3 = vor.u32 1.1754944e-38, %v1650_v20  ;;  %v1681_v36 = vor.u32 1.1754944e-38, %v1680_v32  ;;  %vm1679_vm12 = vcmp.eq.f32.partialorder %v1678_v49, 8.507059e+37  ;;  %v1686_v26 = vsub.f32 1.0, %v9163_v18 }
 0x1e5   :  { %v931_v6 = vadd.f32 %v9140_v39, %v852_v43  ;;  %v1647_v39 = vsel %vm9205_vm8, %v8870_v56, %v1643_v2  ;;  %7136 = vpow2.f32 %v1095_v15  ;;  %v1677_v17 = vsel %vm1676_vm2, %v8937_v28, %v1673_v11  ;;  %v695_v28 = vpop.f32.mrf.mxu0 }
 0x1e6   :  { %v7131_v43 = vpop.eup %7130  ;;  %v1652_v2 = vsel %vm9209_vm9, %v1651_v3, %v1647_v39  ;;  %v1682_v31 = vsel %vm1679_vm12, %v1681_v36, %v1677_v17  ;;  %vm1660_vm13 = vweird.f32 %v8901_v12  ;;  %7138 = vrcp.f32 %v9216_v44 }
 0x1e7   :  { %v988_v54 = vsub.f32 0.0, %v931_v6  ;;  %v2246_v52 = vpop.f32.mrf.mxu3  ;;  %v2015_v38 = vpack.c.bf16 %v1682_v31, %v1652_v2  ;;  %v1658_v23 = vadd.f32 %v8901_v12, %v1657_v13  ;;  %v1687_v15 = vmul.f32 %v8949_v48, %v1686_v26  ;;  %v9233_v49 = vpop.eup %7132 }
 0x1e8   :  { %vm1659_vm14 = vweird.f32 %v8826_v41  ;;  %v1665_v18 = vand.u32 2147483648, %v8826_v41  ;;  %vm1690_vm15 = vweird.f32 %v8949_v48  ;;  %v1663_v57 = vand.u32 2147483647, %v8826_v41 }
 0x1e9   :  { %v1097_v56 = vmul.f32 1.442695, %v988_v54  ;;  %v2169_v20 = vpop.f32.mrf.mxu1  ;;  %2206 = vmatmul.bf16.gmra.mxu1 %v2015_v38  ;;  %vm9238_vm0 = vmor %vm1659_vm14, %vm1660_vm13  ;;  %v1688_v62 = vadd.f32 %v8949_v48, %v1687_v15  ;;  %vm1689_vm1 = vweird.f32 %v8903_v7  ;;  %v1693_v39 = vand.u32 2147483647, %v8903_v7  ;;  %v7135_v11 = vpop.eup %7134 }
 0x1ea   :  { %v853_v32 = vpop.f32.mrf.mxu2  ;;  %v9246_v13 = vadd.f32 1.0, %v7127_v25  ;;  %v9248_v54 = vadd.f32 1.0, %v7131_v43  ;;  %vm9250_vm3 = vmor %vm1689_vm1, %vm1690_vm15  ;;  %v1695_v36 = vand.u32 2147483648, %v8903_v7  ;;  %v696_v17 = vadd.f32 %v695_v28, %v7856_v55 }
 0x1eb   :  { %7140 = vpow2.f32 %v1097_v56  ;;  %v7137_v41 = vpop.eup %7136  ;;  %v1662_v26 = vsel %vm9238_vm0, %v8901_v12, %v1658_v23  ;;  %v1692_v25 = vsel %vm9250_vm3, %v8949_v48, %v1688_v62  ;;  %v9263_v43 = vadd.f32 %v2246_v52, %v9184_v33 }
 0x1ec   :  { %v854_v56 = vadd.f32 %v853_v32, %v7863_v63  ;;  %v1666_v2 = vor.u32 1.1754944e-38, %v1665_v18  ;;  %v1696_v31 = vor.u32 1.1754944e-38, %v1695_v36  ;;  %v775_v7 = vadd.f32 %v9147_v47, %v696_v17  ;;  %v9269_v15 = vpop.eup %7138 }
 0x1ed   :  { %v1700_v55 = vmul.f32 %v8961_v35, %v8910_v60  ;;  %v9271_v12 = vadd.f32 1.0, %v7135_v11  ;;  %vm1664_vm4 = vcmp.eq.f32.partialorder %v1663_v57, 8.507059e+37  ;;  %vm1694_vm7 = vcmp.eq.f32.partialorder %v1693_v39, 8.507059e+37 }
 0x1ee   :  { %v933_v48 = vadd.f32 %v9169_v10, %v854_v56  ;;  %v9274_v52 = vadd.f32 1.0, %v7137_v41  ;;  %v1667_v63 = vsel %vm1664_vm4, %v1666_v2, %v1662_v26  ;;  %v1697_v23 = vsel %vm1694_vm7, %v1696_v31, %v1692_v25 }
 0x1ef   :  { %v2248_v38 = vpop.f32.mrf.mxu3  ;;  %v1701_v47 = vsub.f32 1.0, %v1700_v55  ;;  %v9280_v18 = vmul.f32 %v9180_v46, %v9106_v19  ;;  %v1836_v32 = vsub.f32 1.0, %v9191_v29  ;;  %7142 = vrcp.f32 %v9246_v13 }
 0x1f0   :  { %v2016_v6 = vpack.c.bf16 %v1697_v23, %v1667_v63  ;;  %7144 = vrcp.f32 %v9248_v54  ;;  %v989_v10 = vsub.f32 0.0, %v775_v7  ;;  %v1708_v62 = vand.u32 2147483647, %v8910_v60 }
 0x1f1   :  { %v7141_v33 = vpop.eup %7140  ;;  %v9276_v28 = vpop.f32.mrf.mxu1  ;;  %v1702_v57 = vmul.f32 %v8961_v35, %v1701_v47  ;;  %7146 = vrcp.f32 %v9271_v12  ;;  %v990_v11 = vsub.f32 0.0, %v933_v48  ;;  %v1710_v3 = vand.u32 2147483648, %v8910_v60 }
 0x1f2   :  { %v9288_v39 = vadd.f32 1.0, %v7141_v33  ;;  %5798 = vmatmul.msk.bf16.gmra.mxu3 %vm2111_vm11, %v2016_v6  ;;  %v9294_v36 = vmul.f32 %v9233_v49, %v9182_v22  ;;  %v9298_v17 = vmul.f32 %v9269_v15, %v9216_v44  ;;  %7148 = vrcp.f32 %v9274_v52 }
 0x1f3   :  { %v1730_v41 = vmul.f32 %v9018_v14, %v8943_v61  ;;  %v9303_v26 = vadd.f32 %v2248_v38, %v2169_v20  ;;  %v1703_v25 = vadd.f32 %v8961_v35, %v1702_v57  ;;  %vm1704_vm8 = vweird.f32 %v8910_v60 }
 0x1f4   :  { %vm1705_vm9 = vweird.f32 %v8961_v35  ;;  %v1099_v56 = vmul.f32 1.442695, %v989_v10  ;;  %vm9308_vm10 = vcmp.eq.f32.partialorder %v1708_v62, 8.507059e+37  ;;  %v1717_v7 = vmul.f32 %v9010_v4, %v1716_v0 }
 0x1f5   :  { %v1731_v31 = vsub.f32 1.0, %v1730_v41  ;;  %v9315_v48 = vpop.eup %7142  ;;  %7150 = vrcp.f32 %v9288_v39  ;;  %v1101_v20 = vmul.f32 1.442695, %v990_v11  ;;  %v1711_v38 = vor.u32 1.1754944e-38, %v1710_v3  ;;  %vm9321_vm2 = vmor %vm1704_vm8, %vm1705_vm9 }
 0x1f6   :  { %v1740_v60 = vand.u32 2147483648, %v8943_v61  ;;  %v9319_v33 = vpop.eup %7144  ;;  %vm1734_vm12 = vweird.f32 %v8943_v61  ;;  %vm1735_vm13 = vweird.f32 %v9018_v14  ;;  %v1738_v34 = vand.u32 2147483647, %v8943_v61 }
 0x1f7   :  { %v2251_v55 = vpop.f32.mrf.mxu3  ;;  %v1732_v23 = vmul.f32 %v9018_v14, %v1731_v31  ;;  %v9329_v47 = vpop.eup %7146  ;;  %v1707_v6 = vsel %vm9321_vm2, %v8961_v35, %v1703_v25  ;;  %v1718_v10 = vadd.f32 %v9010_v4, %v1717_v7  ;;  %vm1720_vm14 = vweird.f32 %v9010_v4  ;;  %vm1736_vm0 = vmor %vm1734_vm12, %vm1735_vm13 }
 0x1f8   :  { %v1746_v57 = vsub.f32 1.0, %v9175_v1  ;;  %v9337_v62 = vpop.eup %7148  ;;  %vm1719_vm15 = vweird.f32 %v8939_v42  ;;  %v1723_v61 = vand.u32 2147483647, %v8939_v42  ;;  %v1725_v3 = vand.u32 2147483648, %v8939_v42 }
 0x1f9   :  { %v2174_v0 = vpop.f32.mrf.mxu1  ;;  %v1733_v11 = vadd.f32 %v9018_v14, %v1732_v23  ;;  %v1741_v41 = vor.u32 1.1754944e-38, %v1740_v60  ;;  %vm1750_vm1 = vweird.f32 %v9040_v16  ;;  %v1753_v25 = vand.u32 2147483647, %v8987_v24  ;;  %vm9351_vm4 = vmor %vm1719_vm15, %vm1720_vm14 }
 0x1fa   :  { %v1747_v35 = vmul.f32 %v9040_v16, %v1746_v57  ;;  %v1712_v1 = vsel %vm9308_vm10, %v1711_v38, %v1707_v6  ;;  %vm1739_vm3 = vcmp.eq.f32.partialorder %v1738_v34, 8.507059e+37  ;;  %v1755_v42 = vand.u32 2147483648, %v8987_v24 }
 0x1fb   :  { %v1737_v31 = vsel %vm1736_vm0, %v9018_v14, %v1733_v11  ;;  %v9356_v60 = vpop.eup %7150  ;;  %v1722_v23 = vsel %vm9351_vm4, %v9010_v4, %v1718_v10  ;;  %vm1749_vm7 = vweird.f32 %v8987_v24  ;;  %vm1724_vm8 = vcmp.eq.f32.partialorder %v1723_v61, 8.507059e+37 }
 0x1fc   :  { %v1742_v63 = vsel %vm1739_vm3, %v1741_v41, %v1737_v31  ;;  %v1748_v2 = vadd.f32 %v9040_v16, %v1747_v35  ;;  %v1726_v38 = vor.u32 1.1754944e-38, %v1725_v3  ;;  %vm1751_vm9 = vmor %vm1749_vm7, %vm1750_vm1  ;;  %v1756_v34 = vor.u32 1.1754944e-38, %v1755_v42 }
 0x1fd   :  { %v2017_v14 = vpack.c.bf16 %v1742_v63, %v1712_v1  ;;  %vm1754_vm10 = vcmp.eq.f32.partialorder %v1753_v25, 8.507059e+37  ;;  %v1760_v41 = vmul.f32 %v9055_v8, %v8998_v58  ;;  %v1896_v4 = vsub.f32 1.0, %v9298_v17 }
 0x1fe   :  { %v1752_v57 = vsel %vm1751_vm9, %v9040_v16, %v1748_v2  ;;  %7152 = vpow2.f32 %v1099_v56  ;;  %v1727_v24 = vsel %vm1724_vm8, %v1726_v38, %v1722_v23  ;;  %v2252_v35 = vadd.f32 %v2251_v55, %v9276_v28 }
 0x1ff   :  { %v2253_v6 = vpop.f32.mrf.mxu3  ;;  %2211 = vmatmul.bf16.gmra.mxu1 %v2017_v14  ;;  %v1757_v10 = vsel %vm1754_vm10, %v1756_v34, %v1752_v57  ;;  %v1761_v1 = vsub.f32 1.0, %v1760_v41  ;;  %v1768_v31 = vand.u32 2147483647, %v8998_v58  ;;  %v9375_v16 = vmul.f32 %v9329_v47, %v9271_v12 }
 0x200   :  { %v2254_v11 = vadd.f32 %v2253_v6, %v2174_v0  ;;  %v2018_v3 = vpack.c.bf16 %v1757_v10, %v1727_v24  ;;  %7154 = vpow2.f32 %v1101_v20  ;;  %v9379_v0 = vadd.f32 %v9303_v26, %v9263_v43 }
 0x201   :  { %v9369_v61 = vpop.f32.mrf.mxu1  ;;  %v1790_v56 = vmul.f32 %v9126_v30, %v9070_v9  ;;  %v1762_v28 = vmul.f32 %v9055_v8, %v1761_v1  ;;  %vm1765_vm2 = vweird.f32 %v9055_v8  ;;  %v1770_v55 = vand.u32 2147483648, %v8998_v58 }
 0x202   :  { %5799 = vmatmul.msk.bf16.gmra.mxu3 %vm2111_vm11, %v2018_v3  ;;  %v9384_v25 = vadd.f32 %v2254_v11, %v2252_v35  ;;  %v1798_v20 = vand.u32 2147483647, %v9070_v9  ;;  %v1800_v42 = vand.u32 2147483648, %v9070_v9  ;;  %v1777_v43 = vmul.f32 %v9088_v53, %v1776_v50  ;;  %v6740_v3 = vld [vmem:[%s12051_s4 + $0xf4] sm:$0xf0] }
 0x203   :  { %v1791_v7 = vsub.f32 1.0, %v1790_v56  ;;  %v1763_v26 = vadd.f32 %v9055_v8, %v1762_v28  ;;  %vm1764_vm12 = vweird.f32 %v8998_v58  ;;  %vm9396_vm13 = vcmp.eq.f32.partialorder %v1768_v31, 8.507059e+37 }
 0x204   :  { %vm1795_vm14 = vweird.f32 %v9126_v30  ;;  %v7153_v23 = vpop.eup %7152  ;;  %vm1794_vm15 = vweird.f32 %v9070_v9  ;;  %v1778_v14 = vadd.f32 %v9088_v53, %v1777_v43  ;;  %vm1780_vm0 = vweird.f32 %v9088_v53  ;;  %vm9409_vm1 = vmor %vm1764_vm12, %vm1765_vm2  ;;  %v5926_v9 = vld [vmem:[%s12051_s4 + $0xf0] sm:$0xf] }
 0x205   :  { %v1792_v2 = vmul.f32 %v9126_v30, %v1791_v7  ;;  %v2331_v50 = vpack.c.bf16 %v9384_v25, %v9384_v25  ;;  %v1771_v38 = vor.u32 1.1754944e-38, %v1770_v55  ;;  %vm1779_vm3 = vweird.f32 %v9036_v45  ;;  %vm9421_vm4 = vmor %vm1794_vm15, %vm1795_vm14  ;;  %v5862_v25 = vld [vmem:[%s12051_s4 + $0x70] sm:$0xf] }
 0x206   :  { %v1806_v34 = vsub.f32 1.0, %v9280_v18  ;;  %v7155_v6 = vpop.eup %7154  ;;  %vm9425_vm7 = vcmp.eq.f32.partialorder %v1798_v20, 8.507059e+37  ;;  %v1801_v24 = vor.u32 1.1754944e-38, %v1800_v42  ;;  %v1785_v18 = vand.u32 2147483648, %v9036_v45  ;;  %vm9438_vm8 = vmor %vm1779_vm3, %vm1780_vm0 }
 0x207   :  { %v2256_v21 = vpop.f32.mrf.mxu3  ;;  %v1793_v57 = vadd.f32 %v9126_v30, %v1792_v2  ;;  %v1767_v35 = vsel %vm9409_vm1, %v9055_v8, %v1763_v26  ;;  %v1783_v31 = vand.u32 2147483647, %v9036_v45  ;;  %vm1810_vm9 = vweird.f32 %v9180_v46  ;;  %v6724_v8 = vld [vmem:[%s12051_s4 + $0x74] sm:$0xf0] }
 0x208   :  { %v1807_v56 = vmul.f32 %v9180_v46, %v1806_v34  ;;  %v1782_v45 = vsel %vm9438_vm8, %v9088_v53, %v1778_v14  ;;  %v1813_v55 = vand.u32 2147483647, %v9106_v19  ;;  %v1815_v7 = vand.u32 2147483648, %v9106_v19 }
 0x209   :  { %v2179_v10 = vpop.f32.mrf.mxu1  ;;  %v1797_v28 = vsel %vm9421_vm4, %v9126_v30, %v1793_v57  ;;  %vm1809_vm10 = vweird.f32 %v9106_v19  ;;  %v5927_v43 = vor.u32 %v6740_v3, %v5926_v9  ;;  %v1772_v26 = vsel %vm9396_vm13, %v1771_v38, %v1767_v35 }
 0x20a   :  { %v1802_v20 = vsel %vm9425_vm7, %v1801_v24, %v1797_v28  ;;  %v1808_v42 = vadd.f32 %v9180_v46, %v1807_v56  ;;  %v1786_v30 = vor.u32 1.1754944e-38, %v1785_v18  ;;  %vm1811_vm2 = vmor %vm1809_vm10, %vm1810_vm9  ;;  %v1816_v2 = vor.u32 1.1754944e-38, %v1815_v7 }
 0x20b   :  { %v5863_v58 = vor.u32 %v6724_v8, %v5862_v25  ;;  %vm1784_vm12 = vcmp.eq.f32.partialorder %v1783_v31, 8.507059e+37  ;;  %vm1814_vm14 = vcmp.eq.f32.partialorder %v1813_v55, 8.507059e+37  ;;  %2863 = vmatpush.bf16.msrb.mxu2 %v5927_v43  ;;  %v1820_v14 = vmul.f32 %v9187_v59, %v9120_v37 }
 0x20c   :  { %v1812_v53 = vsel %vm1811_vm2, %v9180_v46, %v1808_v42  ;;  %v2019_v34 = vpack.c.bf16 %v1802_v20, %v1772_v26  ;;  %v1787_v57 = vsel %vm1784_vm12, %v1786_v30, %v1782_v45  ;;  %v1850_v63 = vmul.f32 %v9214_v5, %v9156_v40 }
 0x20d   :  { %v1817_v11 = vsel %vm1814_vm14, %v1816_v2, %v1812_v53  ;;  %2829 = vmatpush.bf16.msrb.mxu0 %v5863_v58  ;;  %v2257_v9 = vadd.f32 %v2256_v21, %v9369_v61  ;;  %v1821_v24 = vsub.f32 1.0, %v1820_v14  ;;  %v9473_v46 = vmul.f32 %v9356_v60, %v9288_v39 }
 0x20e   :  { %v2020_v38 = vpack.c.bf16 %v1817_v11, %v1787_v57  ;;  %v2330_v18 = vpack.c.bf16 %v9379_v0, %v9379_v0  ;;  %v1830_v35 = vand.u32 2147483648, %v9120_v37  ;;  %v1851_v1 = vsub.f32 1.0, %v1850_v63 }
 0x20f   :  { %v2258_v19 = vpop.f32.mrf.mxu3  ;;  %2216 = vmatmul.bf16.gmra.mxu1 %v2019_v34  ;;  %v9480_v31 = vadd.f32 1.0, %v7153_v23  ;;  %v9482_v56 = vadd.f32 1.0, %v7155_v6  ;;  %v9484_v61 = vunpack.c.l.b16 %v2331_v50  ;;  %vm1824_vm13 = vweird.f32 %v9120_v37 }
 0x210   :  { %v2259_v41 = vadd.f32 %v2258_v19, %v2179_v10  ;;  %v1822_v10 = vmul.f32 %v9187_v59, %v1821_v24  ;;  %v1852_v25 = vmul.f32 %v9214_v5, %v1851_v1  ;;  %v1837_v8 = vmul.f32 %v9153_v51, %v1836_v32 }
 0x211   :  { %v9477_v3 = vpop.f32.mrf.mxu1  ;;  %vm1825_vm15 = vweird.f32 %v9187_v59  ;;  %v1828_v23 = vand.u32 2147483647, %v9120_v37  ;;  %v1860_v50 = vand.u32 2147483648, %v9156_v40  ;;  %v1831_v6 = vor.u32 1.1754944e-38, %v1830_v35 }
 0x212   :  { %v2318_v21 = vadd.f32 %v2259_v41, %v2257_v9  ;;  %5800 = vmatmul.msk.bf16.gmra.mxu3 %vm2111_vm11, %v2020_v38  ;;  %v1853_v45 = vadd.f32 %v9214_v5, %v1852_v25  ;;  %vm1854_vm0 = vweird.f32 %v9156_v40  ;;  %vm1855_vm1 = vweird.f32 %v9214_v5  ;;  %vm9529_vm2 = vmor %vm1824_vm13, %vm1825_vm15 }
 0x213   :  { %v1838_v29 = vadd.f32 %v9153_v51, %v1837_v8  ;;  %vm1840_vm3 = vweird.f32 %v9153_v51  ;;  %v1866_v32 = vsub.f32 1.0, %v9294_v36  ;;  %v1823_v7 = vadd.f32 %v9187_v59, %v1822_v10  ;;  %vm9508_vm7 = vmor %vm1854_vm0, %vm1855_vm1 }
 0x214   :  { %v2332_v28 = vpack.c.bf16 %v2318_v21, %v2318_v21  ;;  %v1858_v20 = vand.u32 2147483647, %v9156_v40  ;;  %vm1839_vm4 = vweird.f32 %v9110_v27  ;;  %v1845_v42 = vand.u32 2147483648, %v9110_v27 }
 0x215   :  { %v1861_v30 = vor.u32 1.1754944e-38, %v1860_v50  ;;  %v1843_v2 = vand.u32 2147483647, %v9110_v27  ;;  %v1867_v58 = vmul.f32 %v9233_v49, %v1866_v32  ;;  %vm1870_vm8 = vweird.f32 %v9233_v49  ;;  %vm9518_vm9 = vmor %vm1839_vm4, %vm1840_vm3 }
 0x216   :  { %v9499_v55 = vunpack.c.l.b16 %v2332_v28  ;;  %v1857_v40 = vsel %vm9508_vm7, %v9214_v5, %v1853_v45  ;;  %vm1869_vm10 = vweird.f32 %v9182_v22  ;;  %v1873_v53 = vand.u32 2147483647, %v9182_v22 }
 0x217   :  { %v2261_v43 = vpop.f32.mrf.mxu3  ;;  %v1875_v14 = vand.u32 2147483648, %v9182_v22  ;;  %v1842_v5 = vsel %vm9518_vm9, %v9153_v51, %v1838_v29  ;;  %v1868_v57 = vadd.f32 %v9233_v49, %v1867_v58  ;;  %v1880_v22 = vmul.f32 %v9315_v48, %v9246_v13  ;;  %vm1871_vm14 = vmor %vm1869_vm10, %vm1870_vm8 }
 0x218   :  { %v2371_v11 = vpack.c.b16 %v9499_v55, %v9484_v61  ;;  %v1827_v37 = vsel %vm9529_vm2, %v9187_v59, %v1823_v7  ;;  %vm1859_vm12 = vcmp.eq.f32.partialorder %v1858_v20, 8.507059e+37  ;;  %v1846_v19 = vor.u32 1.1754944e-38, %v1845_v42 }
 0x219   :  { %v2184_v34 = vpop.f32.mrf.mxu1  ;;  %v1876_v63 = vor.u32 1.1754944e-38, %v1875_v14  ;;  %v1862_v38 = vsel %vm1859_vm12, %v1861_v30, %v1857_v40  ;;  %vm1844_vm13 = vcmp.eq.f32.partialorder %v1843_v2, 8.507059e+37  ;;  %v1872_v51 = vsel %vm1871_vm14, %v9233_v49, %v1868_v57  ;;  %v5918_v30 = vld [vmem:[%s12051_s4 + $0xe0] sm:$0xf]  ;;  %v6738_v2 = vld [vmem:[%s12051_s4 + $0xe4] sm:$0xf0] }
 0x21a   :  { %vm1874_vm15 = vcmp.eq.f32.partialorder %v1873_v53, 8.507059e+37  ;;  %2376 = vrot.lane.b32.xlu2 %v2371_v11, %s12082_s29  ;;  %vm1829_vm0 = vcmp.eq.f32.partialorder %v1828_v23, 8.507059e+37  ;;  %v1847_v9 = vsel %vm1844_vm13, %v1846_v19, %v1842_v5  ;;  %v1910_v24 = vmul.f32 %v9319_v33, %v9248_v54  ;;  %v5854_v53 = vld [vmem:[%s12051_s4 + $0x60] sm:$0xf]  ;;  %v6722_v14 = vld [vmem:[%s12051_s4 + $0x64] sm:$0xf0] }
 0x21b   :  { %v1877_v41 = vsel %vm1874_vm15, %v1876_v63, %v1872_v51  ;;  %v1956_v59 = vsub.f32 1.0, %v9473_v46  ;;  %v1832_v35 = vsel %vm1829_vm0, %v1831_v6, %v1827_v37  ;;  %v1881_v21 = vsub.f32 1.0, %v1880_v22 }
 0x21c   :  { %v2022_v1 = vpack.c.bf16 %v1877_v41, %v1847_v9  ;;  %7156 = vrcp.f32 %v9480_v31  ;;  %v2021_v10 = vpack.c.bf16 %v1862_v38, %v1832_v35  ;;  %v1911_v8 = vsub.f32 1.0, %v1910_v24 }
 0x21d   :  { %v1897_v49 = vmul.f32 %v9269_v15, %v1896_v4  ;;  %7158 = vrcp.f32 %v9482_v56  ;;  %v2262_v28 = vadd.f32 %v2261_v43, %v9477_v3  ;;  %vm1885_vm1 = vweird.f32 %v9315_v48 }
 0x21e   :  { %vm1884_vm3 = vweird.f32 %v9246_v13  ;;  %v1888_v6 = vand.u32 2147483647, %v9246_v13  ;;  %v1890_v45 = vand.u32 2147483648, %v9246_v13  ;;  %v1912_v17 = vmul.f32 %v9319_v33, %v1911_v8 }
 0x21f   :  { %v2263_v25 = vpop.f32.mrf.mxu3  ;;  %2221 = vmatmul.bf16.gmra.mxu1 %v2021_v10  ;;  %vm1914_vm4 = vweird.f32 %v9248_v54  ;;  %v1882_v29 = vmul.f32 %v9315_v48, %v1881_v21  ;;  %v1898_v3 = vadd.f32 %v9269_v15, %v1897_v49  ;;  %vm1900_vm7 = vweird.f32 %v9269_v15 }
 0x220   :  { %v2264_v23 = vadd.f32 %v2263_v25, %v2184_v34  ;;  %vm1915_vm8 = vweird.f32 %v9319_v33  ;;  %v1918_v32 = vand.u32 2147483647, %v9248_v54  ;;  %v1903_v7 = vand.u32 2147483647, %v9216_v44 }
 0x221   :  { %v9558_v50 = vpop.f32.mrf.mxu1  ;;  %v1926_v20 = vsub.f32 1.0, %v9375_v16  ;;  %v1920_v43 = vand.u32 2147483648, %v9248_v54  ;;  %vm1899_vm9 = vweird.f32 %v9216_v44  ;;  %v1905_v26 = vand.u32 2147483648, %v9216_v44  ;;  %vm9611_vm12 = vmor %vm1914_vm4, %vm1915_vm8 }
 0x222   :  { %v2319_v4 = vadd.f32 %v2264_v23, %v2262_v28  ;;  %5801 = vmatmul.msk.bf16.gmra.mxu3 %vm2111_vm11, %v2022_v1  ;;  %v9582_v58 = vpop.eup %7156  ;;  %v1913_v16 = vadd.f32 %v9319_v33, %v1912_v17  ;;  %vm9585_vm10 = vmor %vm1899_vm9, %vm1900_vm7  ;;  %vm1930_vm2 = vweird.f32 %v9329_v47  ;;  %v1933_v44 = vand.u32 2147483647, %v9271_v12 }
 0x223   :  { %v1927_v36 = vmul.f32 %v9329_v47, %v1926_v20  ;;  %v9598_v34 = vpop.eup %7158  ;;  %v1883_v5 = vadd.f32 %v9315_v48, %v1882_v29  ;;  %v1902_v57 = vsel %vm9585_vm10, %v9269_v15, %v1898_v3  ;;  %v1935_v11 = vand.u32 2147483648, %v9271_v12  ;;  %vm9637_vm4 = vmor %vm1884_vm3, %vm1885_vm1  ;;  %v6736_v20 = vld [vmem:[%s12051_s4 + $0xd4] sm:$0xf0] }
 0x224   :  { %v2333_v42 = vpack.c.bf16 %v2319_v4, %v2319_v4  ;;  %vm9615_vm14 = vcmp.eq.f32.partialorder %v1903_v7, 8.507059e+37  ;;  %vm1929_vm13 = vweird.f32 %v9271_v12  ;;  %v5919_v15 = vor.u32 %v6738_v2, %v5918_v30  ;;  %v5846_v30 = vld [vmem:[%s12051_s4 + $0x50] sm:$0xf]  ;;  %v6720_v2 = vld [vmem:[%s12051_s4 + $0x54] sm:$0xf0] }
 0x225   :  { %v1928_v19 = vadd.f32 %v9329_v47, %v1927_v36  ;;  %v1906_v38 = vor.u32 1.1754944e-38, %v1905_v26  ;;  %vm1931_vm15 = vmor %vm1929_vm13, %vm1930_vm2  ;;  %v1936_v51 = vor.u32 1.1754944e-38, %v1935_v11  ;;  %v5855_v9 = vor.u32 %v6722_v14, %v5854_v53 }
 0x226   :  { %v9600_v27 = vunpack.c.l.b16 %v2333_v42  ;;  %v1917_v41 = vsel %vm9611_vm12, %v9319_v33, %v1913_v16  ;;  %vm1934_vm0 = vcmp.eq.f32.partialorder %v1933_v44, 8.507059e+37  ;;  %2864 = vmatpush.bf16.msrb.mxu2 %v5919_v15  ;;  %v1940_v35 = vmul.f32 %v9337_v62, %v9274_v52 }
 0x227   :  { %v2266_v63 = vpop.f32.mrf.mxu3  ;;  %v1932_v24 = vsel %vm1931_vm15, %v9329_v47, %v1928_v19  ;;  %v1921_v1 = vor.u32 1.1754944e-38, %v1920_v43  ;;  %v1907_v33 = vsel %vm9615_vm14, %v1906_v38, %v1902_v57  ;;  %2830 = vmatpush.bf16.msrb.mxu0 %v5855_v9  ;;  %v1970_v47 = vmul.f32 %v9582_v58, %v9480_v31 }
 0x228   :  { %v9625_v54 = vpack.c.b16 %v9600_v27, %v9499_v55  ;;  %v1937_v21 = vsel %vm1934_vm0, %v1936_v51, %v1932_v24  ;;  %v1887_v10 = vsel %vm9637_vm4, %v9315_v48, %v1883_v5  ;;  %vm1919_vm1 = vcmp.eq.f32.partialorder %v1918_v32, 8.507059e+37 }
 0x229   :  { %v2189_v12 = vpop.f32.mrf.mxu1  ;;  %v2024_v25 = vpack.c.bf16 %v1937_v21, %v1907_v33  ;;  %v1985_v8 = vmul.f32 %v9598_v34, %v9482_v56  ;;  %v1891_v49 = vor.u32 1.1754944e-38, %v1890_v45  ;;  %v1922_v28 = vsel %vm1919_vm1, %v1921_v1, %v1917_v41 }
 0x22a   :  { %2389 = vrot.lane.b32.xlu0 %v9625_v54, %s7325_s27  ;;  %v1971_v23 = vsub.f32 1.0, %v1970_v47  ;;  %vm1889_vm3 = vcmp.eq.f32.partialorder %v1888_v6, 8.507059e+37  ;;  %v1941_v17 = vsub.f32 1.0, %v1940_v35  ;;  %v1957_v4 = vmul.f32 %v9356_v60, %v1956_v59 }
 0x22b   :  { %v9660_v48 = vunpack.c.l.b16 %v2330_v18  ;;  %v1892_v29 = vsel %vm1889_vm3, %v1891_v49, %v1887_v10  ;;  %v2267_v32 = vadd.f32 %v2266_v63, %v9558_v50  ;;  %vm1945_vm7 = vweird.f32 %v9337_v62  ;;  %v5910_v50 = vld [vmem:[%s12051_s4 + $0xd0] sm:$0xf] }
 0x22c   :  { %v2023_v3 = vpack.c.bf16 %v1922_v28, %v1892_v29  ;;  %v1972_v13 = vmul.f32 %v9582_v58, %v1971_v23  ;;  %vm1974_vm8 = vweird.f32 %v9480_v31  ;;  %vm1975_vm9 = vweird.f32 %v9582_v58 }
 0x22d   :  { %v1986_v46 = vsub.f32 1.0, %v1985_v8  ;;  %v1942_v0 = vmul.f32 %v9337_v62, %v1941_v17  ;;  %v1980_v18 = vand.u32 2147483648, %v9480_v31  ;;  %v1958_v7 = vadd.f32 %v9356_v60, %v1957_v4  ;;  %vm9719_vm1 = vmor %vm1974_vm8, %vm1975_vm9 }
 0x22e   :  { %vm1960_vm10 = vweird.f32 %v9356_v60  ;;  %vm1959_vm2 = vweird.f32 %v9288_v39  ;;  %v1965_v43 = vand.u32 2147483648, %v9288_v39  ;;  %v1973_v16 = vadd.f32 %v9582_v58, %v1972_v13 }
 0x22f   :  { %v2268_v45 = vpop.f32.mrf.mxu3  ;;  %2226 = vmatmul.bf16.gmra.mxu1 %v2023_v3  ;;  %v1987_v26 = vmul.f32 %v9598_v34, %v1986_v46  ;;  %v1963_v40 = vand.u32 2147483647, %v9288_v39  ;;  %vm1990_vm12 = vweird.f32 %v9598_v34  ;;  %v1993_v36 = vand.u32 2147483647, %v9482_v56  ;;  %vm9693_vm14 = vmor %vm1959_vm2, %vm1960_vm10  ;;  %v5902_v3 = vld [vmem:[%s12051_s4 + $0xc0] sm:$0xf] }
 0x230   :  { %v2269_v6 = vadd.f32 %v2268_v45, %v2189_v12  ;;  %vm1989_vm13 = vweird.f32 %v9482_v56  ;;  %v1995_v5 = vand.u32 2147483648, %v9482_v56  ;;  %v1962_v39 = vsel %vm9693_vm14, %v9356_v60, %v1958_v7  ;;  %v5838_v45 = vld [vmem:[%s12051_s4 + $0x40] sm:$0xf] }
 0x231   :  { %v2192_v59 = vpop.f32.mrf.mxu1  ;;  %v1988_v14 = vadd.f32 %v9598_v34, %v1987_v26  ;;  %vm9703_vm15 = vmor %vm1989_vm13, %vm1990_vm12  ;;  %v5911_v11 = vor.u32 %v6736_v20, %v5910_v50  ;;  %v5847_v22 = vor.u32 %v6720_v2, %v5846_v30  ;;  %v2364_v37 = vpack.c.b16 %v9484_v61, %v9660_v48  ;;  %v5830_v20 = vld [vmem:[%s12051_s4 + $0x30] sm:$0xf]  ;;  %v6714_v30 = vld [vmem:[%s12051_s4 + $0x24] sm:$0xf0] }
 0x232   :  { %v2320_v42 = vadd.f32 %v2269_v6, %v2267_v32  ;;  %5802 = vmatmul.msk.bf16.gmra.mxu3 %vm2111_vm11, %v2024_v25  ;;  %v1966_v63 = vor.u32 1.1754944e-38, %v1965_v43  ;;  %v1996_v56 = vor.u32 1.1754944e-38, %v1995_v5  ;;  %v1943_v38 = vadd.f32 %v9337_v62, %v1942_v0  ;;  %v6734_v32 = vld [vmem:[%s12051_s4 + $0xc4] sm:$0xf0]  ;;  %v5822_v43 = vld [vmem:[%s12051_s4 + $0x20] sm:$0xf] }
 0x233   :  { %v1992_v15 = vsel %vm9703_vm15, %v9598_v34, %v1988_v14  ;;  %v1978_v60 = vand.u32 2147483647, %v9480_v31  ;;  %vm1964_vm0 = vcmp.eq.f32.partialorder %v1963_v40, 8.507059e+37  ;;  %vm1994_vm4 = vcmp.eq.f32.partialorder %v1993_v36, 8.507059e+37  ;;  %2865 = vmatpush.bf16.msrb.mxu2 %v5911_v11  ;;  %2831 = vmatpush.bf16.msrb.mxu0 %v5847_v22  ;;  %v6718_v6 = vld [vmem:[%s12051_s4 + $0x44] sm:$0xf0] }
 0x234   :  { %v2334_v44 = vpack.c.bf16 %v2320_v42, %v2320_v42  ;;  %v1950_v9 = vand.u32 2147483648, %v9274_v52  ;;  %v1967_v34 = vsel %vm1964_vm0, %v1966_v63, %v1962_v39  ;;  %v1997_v24 = vsel %vm1994_vm4, %v1996_v56, %v1992_v15  ;;  %v6716_v42 = vld [vmem:[%s12051_s4 + $0x34] sm:$0xf0]  ;;  %v5814_v14 = vld [vmem:[%s12051_s4 + $0x10] sm:$0xf] }
 0x235   :  { %vm1944_vm3 = vweird.f32 %v9274_v52  ;;  %v1948_v35 = vand.u32 2147483647, %v9274_v52  ;;  %v1977_v55 = vsel %vm9719_vm1, %v9582_v58, %v1973_v16  ;;  %v2026_v1 = vpack.c.bf16 %v1997_v24, %v1967_v34  ;;  %v6712_v5 = vld [vmem:[%s12051_s4 + $0x14] sm:$0xf0]  ;;  %v5806_v39 = vld [vmem:[%s12051_s4] sm:$0xf] }
 0x236   :  { %v2358_v19 = vunpack.c.l.b16 %v2334_v44  ;;  %vm1946_vm8 = vmor %vm1944_vm3, %vm1945_vm7  ;;  %v1981_v31 = vor.u32 1.1754944e-38, %v1980_v18  ;;  %vm1979_vm9 = vcmp.eq.f32.partialorder %v1978_v60, 8.507059e+37  ;;  %v1951_v21 = vor.u32 1.1754944e-38, %v1950_v9  ;;  %v6710_v11 = vld [vmem:[%s12051_s4 + $0x4] sm:$0xf0] }
 0x237   :  { %v2271_v51 = vpop.f32.mrf.mxu3  ;;  %vm1949_vm10 = vcmp.eq.f32.partialorder %v1948_v35, 8.507059e+37  ;;  %v5903_v13 = vor.u32 %v6734_v32, %v5902_v3  ;;  %v5839_v46 = vor.u32 %v6718_v6, %v5838_v45  ;;  %v5831_v26 = vor.u32 %v6716_v42, %v5830_v20  ;;  %v6732_v60 = vld [vmem:[%s12051_s4 + $0xb4] sm:$0xf0]  ;;  %v6730_v61 = vld [vmem:[%s12051_s4 + $0xa4] sm:$0xf0] }
 0x238   :  { %v2372_v12 = vpack.c.b16 %v2358_v19, %v9600_v27  ;;  %v1947_v27 = vsel %vm1946_vm8, %v9337_v62, %v1943_v38  ;;  %v1982_v52 = vsel %vm1979_vm9, %v1981_v31, %v1977_v55  ;;  %v2272_v25 = vadd.f32 %v2271_v51, %v2192_v59  ;;  %v5894_v38 = vld [vmem:[%s12051_s4 + $0xb0] sm:$0xf] }
 0x239   :  { %v2194_v33 = vpop.f32.mrf.mxu1  ;;  %v1952_v47 = vsel %vm1949_vm10, %v1951_v21, %v1947_v27  ;;  %2866 = vmatpush.bf16.msrb.mxu2 %v5903_v13  ;;  %2832 = vmatpush.bf16.msrb.mxu0 %v5839_v46  ;;  %v5823_v16 = vor.u32 %v6714_v30, %v5822_v43  ;;  %v5815_v57 = vor.u32 %v6712_v5, %v5814_v14  ;;  %v5992_v5 = vld [vmem:[%s12051_s4 + $0x178] sm:$0xf0]  ;;  %vm2822_vm7 = vcmask 1041408  }
 0x23a   :  { %2378 = vrot.lane.b32.xlu2 %v2372_v12, %s12082_s29  ;;  %2402 = vrot.lane.b32.xlu1 %v2372_v12, %s7326_s25  ;;  %v2025_v10 = vpack.c.bf16 %v1982_v52, %v1952_v47  ;;  %v5895_v51 = vor.u32 %v6732_v60, %v5894_v38  ;;  %vm2455_vm2 = vcmask 1014784   ;;  %vm2471_vm12 = vcmask 654336  }
 0x23b   :  { %vm2811_vm14 = vcmask 293888  }
 0x23d   :  { %2833 = vmatpush.bf16.msrb.mxu0 %v5831_v26  ;;  %2867 = vmatpush.bf16.msrb.mxu2 %v5895_v51 }
 0x23f   :  { %v2273_v58 = vpop.f32.mrf.mxu3  ;;  %2231 = vmatmul.bf16.gmra.mxu1 %v2025_v10 }
 0x240   :  { %v2274_v8 = vadd.f32 %v2273_v58, %v2194_v33 }
 0x241   :  { %v2197_v28 = vpop.f32.mrf.mxu1  ;;  %2834 = vmatpush.bf16.msrb.mxu0 %v5823_v16 }
 0x242   :  { %v2321_v49 = vadd.f32 %v2274_v8, %v2272_v25  ;;  %5803 = vmatmul.msk.bf16.gmra.mxu3 %vm2111_vm11, %v2026_v1 }
 0x244   :  { %v2335_v23 = vpack.c.bf16 %v2321_v49, %v2321_v49  ;;  %v5886_v49 = vld [vmem:[%s12051_s4 + $0xa0] sm:$0xf] }
 0x245   :  { %2835 = vmatpush.bf16.msrb.mxu0 %v5815_v57  ;;  %v5887_v48 = vor.u32 %v6730_v61, %v5886_v49 }
 0x246   :  { %v2359_v17 = vunpack.c.l.b16 %v2335_v23 }
 0x247   :  { %2868 = vmatpush.bf16.msrb.mxu2 %v5887_v48 }
 0x248   :  { %v9735_v4 = vpack.c.b16 %v2359_v17, %v2358_v19  ;;  %v5807_v19 = vor.u32 %v6710_v11, %v5806_v39 }
 0x249   :  { %v2199_v62 = vpop.f32.mrf.mxu1 }
 0x24a   :  { %2391 = vrot.lane.b32.xlu0 %v9735_v4, %s7325_s27  ;;  %v2276_v29 = vpop.f32.mrf.mxu3  ;;  %2836 = vmatpush.bf16.msrb.mxu0 %v5807_v19 }
 0x24b   :  { %v2277_v0 = vadd.f32 %v2276_v29, %v2197_v28 }
 0x251   :  { %v2202_v7 = vpop.f32.mrf.mxu1 }
 0x252   :  { %v2278_v59 = vpop.f32.mrf.mxu3 }
 0x253   :  { %v2279_v18 = vadd.f32 %v2278_v59, %v2199_v62  ;;  %v5878_v59 = vld [vmem:[%s12051_s4 + $0x90] sm:$0xf] }
 0x255   :  { %v2322_v50 = vadd.f32 %v2279_v18, %v2277_v0  ;;  %v6728_v0 = vld [vmem:[%s12051_s4 + $0x94] sm:$0xf0] }
 0x256   :  { %v5879_v18 = vor.u32 %v6728_v0, %v5878_v59  ;;  %v6749_v59 = vld [vmem:[%s12051_s4 + $0x144] sm:$0xf]  ;;  %v5968_v0 = vld [vmem:[%s12051_s4 + $0x148] sm:$0xf0] }
 0x257   :  { %v2336_v2 = vpack.c.bf16 %v2322_v50, %v2322_v50 }
 0x258   :  { %2869 = vmatpush.bf16.msrb.mxu2 %v5879_v18 }
 0x259   :  { %v2360_v40 = vunpack.c.l.b16 %v2336_v2  ;;  %v2204_v44 = vpop.f32.mrf.mxu1 }
 0x25b   :  { %v2373_v36 = vpack.c.b16 %v2360_v40, %v2359_v17 }
 0x25d   :  { %2380 = vrot.lane.b32.xlu2 %v2373_v36, %s12082_s29  ;;  %2404 = vrot.lane.b32.xlu1 %v2373_v36, %s7326_s25  ;;  %v6755_v36 = vld [vmem:[%s12051_s4 + $0x174] sm:$0xf] }
 0x25e   :  { %v2281_v53 = vpop.f32.mrf.mxu3  ;;  %v5995_v57 = vor.u32 %v6755_v36, %v5992_v5  ;;  %v6752_v5 = vld [vmem:[%s12051_s4 + $0x154] sm:$0xf0] }
 0x25f   :  { %v2282_v63 = vadd.f32 %v2281_v53, %v2202_v7  ;;  %v6726_v7 = vld [vmem:[%s12051_s4 + $0x84] sm:$0xf0] }
 0x260   :  { %3033 = vmatpush.bf16.msra.mxu1 %v5995_v57 }
 0x266   :  { %v2283_v22 = vpop.f32.mrf.mxu3  ;;  %v2207_v56 = vpop.f32.mrf.mxu1 }
 0x267   :  { %v2284_v15 = vadd.f32 %v2283_v22, %v2204_v44 }
 0x269   :  { %v2323_v9 = vadd.f32 %v2284_v15, %v2282_v63 }
 0x26b   :  { %v2337_v41 = vpack.c.bf16 %v2323_v9, %v2323_v9 }
 0x26d   :  { %v2361_v34 = vunpack.c.l.b16 %v2337_v41 }
 0x26e   :  { %v2209_v12 = vpop.f32.mrf.mxu1 }
 0x26f   :  { %v9783_v24 = vpack.c.b16 %v2361_v34, %v2360_v40  ;;  %v9832_v40 = vld [vmem:[%s12051_s4 + $0x1a0] sm:$0x33] }
 0x270   :  { %v2704_v14 = vunpack.c.h.b16 %v9832_v40 }
 0x271   :  { %2393 = vrot.lane.b32.xlu0 %v9783_v24, %s7325_s27 }
 0x272   :  { %v2758_v22 = vpack.c.b16 %v2704_v14, %v2704_v14  ;;  %v2703_v14 = vunpack.c.l.b16 %v9832_v40  ;;  %v5966_v40 = vld [vmem:[%s12051_s4 + $0x140] sm:$0xf] }
 0x274   :  { %v9787_v35 = vpop.permute.xlu2 %2376  ;;  %v2827_v19 = vsel %vm2822_vm7, %v2758_v22, 0  ;;  %v2757_v22 = vpack.c.b16 %v2703_v14, %v2703_v14 }
 0x275   :  { %v2286_v55 = vpop.f32.mrf.mxu3  ;;  %v9794_v1 = vsel %vm399_vm5, %v2364_v37, %v9787_v35  ;;  %3072 = vmatpush.bf16.msra.mxu3 %v2827_v19 }
 0x276   :  { %2837 = vmatmul.bf16.vlgmr.msrb.gmra.mxu0 %v9794_v1  ;;  %v2287_v27 = vadd.f32 %v2286_v55, %v2207_v56 }
 0x27c   :  { %v2212_v33 = vpop.f32.mrf.mxu1 }
 0x27d   :  { %v2288_v31 = vpop.f32.mrf.mxu3 }
 0x27e   :  { %v2289_v21 = vadd.f32 %v2288_v31, %v2209_v12  ;;  %v6753_v31 = vld [vmem:[%s12051_s4 + $0x164] sm:$0xf] }
 0x280   :  { %v2324_v52 = vadd.f32 %v2289_v21, %v2287_v27  ;;  %v5984_v27 = vld [vmem:[%s12051_s4 + $0x168] sm:$0xf0] }
 0x282   :  { %v2338_v47 = vpack.c.bf16 %v2324_v52, %v2324_v52 }
 0x284   :  { %v2362_v10 = vunpack.c.l.b16 %v2338_v47  ;;  %v2214_v58 = vpop.f32.mrf.mxu1  ;;  %v5987_v47 = vor.u32 %v6753_v31, %v5984_v27  ;;  %v5958_v31 = vld [vmem:[%s12051_s4 + $0x130] sm:$0xf] }
 0x285   :  { %v2291_v25 = vpop.f32.mrf.mxu3 }
 0x286   :  { %v2374_v8 = vpack.c.b16 %v2362_v10, %v2361_v34  ;;  %v2292_v23 = vadd.f32 %v2291_v25, %v2212_v33  ;;  %3034 = vmatpush.bf16.msra.mxu1 %v5987_v47  ;;  %v5944_v47 = vld [vmem:[%s12051_s4 + $0x118] sm:$0xf0] }
 0x288   :  { %2382 = vrot.lane.b32.xlu2 %v2374_v8, %s12082_s29  ;;  %2406 = vrot.lane.b32.xlu1 %v2374_v8, %s7326_s25 }
 0x28c   :  { %v2217_v37 = vpop.f32.mrf.mxu1 }
 0x28d   :  { %v2293_v28 = vpop.f32.mrf.mxu3 }
 0x28e   :  { %v2294_v17 = vadd.f32 %v2293_v28, %v2214_v58  ;;  %v6756_v28 = vld [vmem:[%s12051_s4 + $0x174] sm:$0xf0] }
 0x290   :  { %v2325_v62 = vadd.f32 %v2294_v17, %v2292_v23  ;;  %v6751_v23 = vld [vmem:[%s12051_s4 + $0x154] sm:$0xf] }
 0x292   :  { %v2339_v29 = vpack.c.bf16 %v2325_v62, %v2325_v62 }
 0x294   :  { %v9805_v3 = vpop.permute.xlu2 %2378  ;;  %v2363_v45 = vunpack.c.l.b16 %v2339_v29  ;;  %v2219_v13 = vpop.f32.mrf.mxu1  ;;  %v5976_v29 = vld [vmem:[%s12051_s4 + $0x158] sm:$0xf0] }
 0x295   :  { %v9810_v32 = vsel %vm399_vm5, %v9625_v54, %v9805_v3  ;;  %v2296_v6 = vpop.f32.mrf.mxu3  ;;  %v5870_v54 = vld [vmem:[%s12051_s4 + $0x80] sm:$0xf] }
 0x296   :  { %2842 = vmatmul.bf16.gmra.mxu0 %v9810_v32  ;;  %v9813_v46 = vpack.c.b16 %v2363_v45, %v2362_v10  ;;  %v5871_v50 = vor.u32 %v6726_v7, %v5870_v54  ;;  %v2297_v43 = vadd.f32 %v2296_v6, %v2217_v37  ;;  %v5979_v6 = vor.u32 %v6751_v23, %v5976_v29 }
 0x297   :  { %v5971_v54 = vor.u32 %v6749_v59, %v5968_v0  ;;  %v6006_v59 = vld [vmem:[%s12051_s4 + $0x190] sm:$0xf]  ;;  %v6760_v0 = vld [vmem:[%s12051_s4 + $0x194] sm:$0xf0] }
 0x298   :  { %2395 = vrot.lane.b32.xlu0 %v9813_v46, %s7325_s27  ;;  %2870 = vmatpush.bf16.msrb.mxu2 %v5871_v50 }
 0x299   :  { %3035 = vmatpush.bf16.msra.mxu1 %v5979_v6 }
 0x29c   :  { %v2222_v20 = vpop.f32.mrf.mxu1  ;;  %v2390_v11 = vpop.permute.xlu0 %2389 }
 0x29d   :  { %v2298_v42 = vpop.f32.mrf.mxu3  ;;  %v2446_v63 = vsel %vm2111_vm11, %v9787_v35, %v2390_v11  ;;  %3036 = vmatpush.bf16.msra.mxu1 %v5971_v54  ;;  %v5960_v11 = vld [vmem:[%s12051_s4 + $0x138] sm:$0xf0] }
 0x29e   :  { %v2299_v26 = vadd.f32 %v2298_v42, %v2219_v13  ;;  %v6754_v13 = vld [vmem:[%s12051_s4 + $0x164] sm:$0xf0] }
 0x2a0   :  { %v2326_v30 = vadd.f32 %v2299_v26, %v2297_v43 }
 0x2a2   :  { %v2340_v2 = vpack.c.bf16 %v2326_v30, %v2326_v30 }
 0x2a4   :  { %v2370_v16 = vunpack.c.l.b16 %v2340_v2  ;;  %v2224_v53 = vpop.f32.mrf.mxu1 }
 0x2a5   :  { %v2301_v44 = vpop.f32.mrf.mxu3 }
 0x2a6   :  { %v2375_v39 = vpack.c.b16 %v2370_v16, %v2363_v45  ;;  %v2302_v60 = vadd.f32 %v2301_v44, %v2222_v20  ;;  %v5982_v45 = vld [vmem:[%s12051_s4 + $0x160] sm:$0xf] }
 0x2a7   :  { %v5983_v18 = vor.u32 %v6754_v13, %v5982_v45  ;;  %v5934_v45 = vld [vmem:[%s12051_s4 + $0x100] sm:$0xf]  ;;  %v6742_v13 = vld [vmem:[%s12051_s4 + $0x104] sm:$0xf0] }
 0x2a8   :  { %2384 = vrot.lane.b32.xlu2 %v2375_v39, %s12082_s29  ;;  %2408 = vrot.lane.b32.xlu1 %v2375_v39, %s7326_s25  ;;  %s7327_s29 = smov 80   ;;  %v6747_v39 = vld [vmem:[%s12051_s4 + $0x134] sm:$0xf]  ;;  %v5935_v6 = vor.u32 %v6742_v13, %v5934_v45  ;;  %v5832_v45 = vld [vmem:[%s12051_s4 + $0x38] sm:$0xf0] }
 0x2a9   :  { %v5963_v19 = vor.u32 %v6747_v39, %v5960_v11  ;;  %v6739_v11 = vld [vmem:[%s12051_s4 + $0xf4] sm:$0xf] }
 0x2ab   :  { %3037 = vmatpush.bf16.msra.mxu1 %v5963_v19 }
 0x2ac   :  { %v9846_v15 = vpop.permute.xlu1 %2402  ;;  %v2227_v9 = vpop.f32.mrf.mxu1 }
 0x2ad   :  { %v9850_v56 = vsel %vm2455_vm2, %v2446_v63, %v9846_v15  ;;  %v2303_v38 = vpop.f32.mrf.mxu3  ;;  %v6750_v63 = vld [vmem:[%s12051_s4 + $0x144] sm:$0xf0] }
 0x2ae   :  { %2871 = vmatmul.bf16.vlgmr.msrb.gmra.mxu2 %v9850_v56  ;;  %v2304_v51 = vadd.f32 %v2303_v38, %v2224_v53  ;;  %v6745_v38 = vld [vmem:[%s12051_s4 + $0x124] sm:$0xf] }
 0x2b0   :  { %v2327_v41 = vadd.f32 %v2304_v51, %v2302_v60  ;;  %2415 = vrot.lane.b32.xlu2 %v9735_v4, %s7327_s29  ;;  %v5967_v60 = vor.u32 %v6750_v63, %v5966_v40  ;;  %v5952_v51 = vld [vmem:[%s12051_s4 + $0x128] sm:$0xf0]  ;;  %v5928_v40 = vld [vmem:[%s12051_s4 + $0xf8] sm:$0xf0] }
 0x2b1   :  { %v5931_v19 = vor.u32 %v6739_v11, %v5928_v40  ;;  %v5864_v63 = vld [vmem:[%s12051_s4 + $0x78] sm:$0xf0]  ;;  %v6731_v11 = vld [vmem:[%s12051_s4 + $0xb4] sm:$0xf] }
 0x2b2   :  { %v2341_v34 = vpack.c.bf16 %v2327_v41, %v2327_v41  ;;  %v5955_v41 = vor.u32 %v6745_v38, %v5952_v51  ;;  %v5896_v40 = vld [vmem:[%s12051_s4 + $0xb8] sm:$0xf0] }
 0x2b4   :  { %v2387_v12 = vunpack.c.l.b16 %v2341_v34  ;;  %v2229_v21 = vpop.f32.mrf.mxu1  ;;  %3038 = vmatpush.bf16.msra.mxu1 %v5955_v41 }
 0x2b5   :  { %v2306_v35 = vpop.f32.mrf.mxu3 }
 0x2b6   :  { %v2388_v55 = vpack.c.b16 %v2387_v12, %v2370_v16  ;;  %v2307_v58 = vadd.f32 %v2306_v35, %v2227_v9  ;;  %v2824_v9 = vsel %vm2822_vm7, %v2757_v22, 0  ;;  %v6759_v35 = vld [vmem:[%s12051_s4 + $0x194] sm:$0xf] }
 0x2b7   :  { %v9857_v33 = vpop.permute.xlu2 %2380  ;;  %2936 = vmatpush.bf16.msra.mxu2 %v2824_v9  ;;  %v6723_v22 = vld [vmem:[%s12051_s4 + $0x74] sm:$0xf] }
 0x2b8   :  { %2421 = vrot.lane.b32.xlu2 %v2388_v55, %s7327_s29  ;;  %2397 = vrot.lane.b32.xlu0 %v2388_v55, %s7325_s27  ;;  %v9868_v52 = vsel %vm399_vm5, %v9735_v4, %v9857_v33  ;;  %v5990_v4 = vld [vmem:[%s12051_s4 + $0x170] sm:$0xf]  ;;  %v6008_v55 = vld [vmem:[%s12051_s4 + $0x198] sm:$0xf0] }
 0x2b9   :  { %2847 = vmatmul.bf16.gmra.mxu0 %v9868_v52  ;;  %v5991_v62 = vor.u32 %v6756_v28, %v5990_v4  ;;  %v6011_v27 = vor.u32 %v6759_v35, %v6008_v55  ;;  %v5936_v4 = vld [vmem:[%s12051_s4 + $0x108] sm:$0xf0]  ;;  %v6737_v35 = vld [vmem:[%s12051_s4 + $0xe4] sm:$0xf] }
 0x2ba   :  { %v5920_v55 = vld [vmem:[%s12051_s4 + $0xe8] sm:$0xf0] }
 0x2bb   :  { %2897 = vmatpush.bf16.msra.mxu0 %v5991_v62  ;;  %3073 = vmatpush.bf16.msra.mxu3 %v6011_v27  ;;  %v6744_v62 = vld [vmem:[%s12051_s4 + $0x114] sm:$0xf0]  ;;  %v5923_v27 = vor.u32 %v6737_v35, %v5920_v55 }
 0x2bc   :  { %v2232_v61 = vpop.f32.mrf.mxu1  ;;  %v2392_v7 = vpop.permute.xlu0 %2391 }
 0x2bd   :  { %v2308_v10 = vpop.f32.mrf.mxu3  ;;  %v2448_v26 = vsel %vm2111_vm11, %v9805_v3, %v2392_v7  ;;  %v5974_v3 = vld [vmem:[%s12051_s4 + $0x150] sm:$0xf] }
 0x2be   :  { %v2309_v25 = vadd.f32 %v2308_v10, %v2229_v21  ;;  %v5975_v57 = vor.u32 %v6752_v5, %v5974_v3  ;;  %v6743_v21 = vld [vmem:[%s12051_s4 + $0x114] sm:$0xf]  ;;  %v10033_v3 = vld [vmem:[%s12052_s5] sm:$0x3] }
 0x2bf   :  { %2898 = vmatpush.bf16.msra.mxu0 %v5983_v18  ;;  %v6007_v18 = vor.u32 %v6760_v0, %v6006_v59  ;;  %v10036_v5 = vperm.slane %v10033_v3, 0  ;;  %v5824_v59 = vld [vmem:[%s12051_s4 + $0x28] sm:$0xf0]  ;;  %v6733_v0 = vld [vmem:[%s12051_s4 + $0xc4] sm:$0xf] }
 0x2c0   :  { %v2328_v8 = vadd.f32 %v2309_v25, %v2307_v58  ;;  %2417 = vrot.lane.b32.xlu0 %v9783_v24, %s7327_s29  ;;  %v5947_v58 = vor.u32 %v6743_v21, %v5944_v47  ;;  %v6757_v25 = vld [vmem:[%s12051_s4 + $0x184] sm:$0xf] }
 0x2c1   :  { %2937 = vmatpush.bf16.msra.mxu2 %v6007_v18 }
 0x2c2   :  { %v2342_v49 = vpack.c.bf16 %v2328_v8, %v2328_v8  ;;  %v6000_v8 = vld [vmem:[%s12051_s4 + $0x188] sm:$0xf0]  ;;  %3039 = vmatpush.bf16.msra.mxu1 %v5947_v58  ;;  %v6719_v58 = vld [vmem:[%s12051_s4 + $0x54] sm:$0xf] }
 0x2c3   :  { %2899 = vmatpush.bf16.msra.mxu0 %v5975_v57 }
 0x2c4   :  { %v2400_v48 = vunpack.c.l.b16 %v2342_v49  ;;  %v2234_v50 = vpop.f32.mrf.mxu1  ;;  %v5950_v49 = vld [vmem:[%s12051_s4 + $0x120] sm:$0xf] }
 0x2c5   :  { %v2311_v37 = vpop.f32.mrf.mxu3 }
 0x2c6   :  { %v2401_v17 = vpack.c.b16 %v2400_v48, %v2387_v12  ;;  %v2312_v42 = vadd.f32 %v2311_v37, %v2232_v61  ;;  %v6003_v61 = vor.u32 %v6757_v25, %v6000_v8  ;;  %v6741_v37 = vld [vmem:[%s12051_s4 + $0x104] sm:$0xf]  ;;  %v5848_v25 = vld [vmem:[%s12051_s4 + $0x58] sm:$0xf0]  ;;  %v6735_v8 = vld [vmem:[%s12051_s4 + $0xd4] sm:$0xf] }
 0x2c7   :  { %2900 = vmatpush.bf16.msra.mxu0 %v5967_v60  ;;  %v5939_v23 = vor.u32 %v6741_v37, %v5936_v4  ;;  %v5867_v60 = vor.u32 %v6723_v22, %v5864_v63  ;;  %v6717_v4 = vld [vmem:[%s12051_s4 + $0x44] sm:$0xf]  ;;  %v5899_v63 = vor.u32 %v6731_v11, %v5896_v40 }
 0x2c8   :  { %2410 = vrot.lane.b32.xlu1 %v2401_v17, %s7326_s25  ;;  %3074 = vmatpush.bf16.msra.mxu3 %v6003_v61  ;;  %v5942_v17 = vld [vmem:[%s12051_s4 + $0x110] sm:$0xf]  ;;  %v5912_v61 = vld [vmem:[%s12051_s4 + $0xd8] sm:$0xf0] }
 0x2c9   :  { %3040 = vmatpush.bf16.msra.mxu1 %v5939_v23  ;;  %v5943_v29 = vor.u32 %v6744_v62, %v5942_v17 }
 0x2cd   :  { %v2313_v20 = vpop.f32.mrf.mxu3 }
 0x2ce   :  { %v2314_v43 = vadd.f32 %v2313_v20, %v2234_v50 }
 0x2cf   :  { %v9902_v2 = vpop.permute.xlu1 %2404 }
 0x2d0   :  { %v2329_v30 = vadd.f32 %v2314_v43, %v2312_v42  ;;  %2419 = vrot.lane.b32.xlu1 %v9813_v46, %s7327_s29  ;;  %v9906_v16 = vsel %vm2455_vm2, %v2448_v26, %v9902_v2 }
 0x2d1   :  { %2876 = vmatmul.bf16.gmra.mxu2 %v9906_v16 }
 0x2d2   :  { %v2343_v36 = vpack.c.bf16 %v2329_v30, %v2329_v30  ;;  %v5998_v30 = vld [vmem:[%s12051_s4 + $0x180] sm:$0xf] }
 0x2d4   :  { %v2413_v44 = vunpack.c.l.b16 %v2343_v36 }
 0x2d6   :  { %v2414_v53 = vpack.c.b16 %v2413_v44, %v2400_v48  ;;  %v6746_v48 = vld [vmem:[%s12051_s4 + $0x124] sm:$0xf0] }
 0x2d7   :  { %v5951_v28 = vor.u32 %v6746_v48, %v5950_v49  ;;  %v5851_v49 = vor.u32 %v6719_v58, %v5848_v25  ;;  %v5915_v48 = vor.u32 %v6735_v8, %v5912_v61 }
 0x2d8   :  { %2423 = vrot.lane.b32.xlu0 %v2414_v53, %s7327_s29 }
 0x2e2   :  { %v2383_v34 = vpop.permute.xlu2 %2382 }
 0x2e3   :  { %v9938_v12 = vsel %vm399_vm5, %v9783_v24, %v2383_v34  ;;  %v6748_v24 = vld [vmem:[%s12051_s4 + $0x134] sm:$0xf0]  ;;  %v2394_v54 = vpop.permute.xlu0 %2393 }
 0x2e4   :  { %2852 = vmatmul.bf16.gmra.mxu0 %v9938_v12  ;;  %v5959_v10 = vor.u32 %v6748_v24, %v5958_v31  ;;  %v2450_v7 = vsel %vm2111_vm11, %v9857_v33, %v2394_v54  ;;  %v6721_v31 = vld [vmem:[%s12051_s4 + $0x64] sm:$0xf]  ;;  %v5856_v24 = vld [vmem:[%s12051_s4 + $0x68] sm:$0xf0] }
 0x2e6   :  { %2901 = vmatpush.bf16.msra.mxu0 %v5959_v10 }
 0x2ea   :  { %2902 = vmatpush.bf16.msra.mxu0 %v5951_v28  ;;  %v5840_v28 = vld [vmem:[%s12051_s4 + $0x48] sm:$0xf0] }
 0x2eb   :  { %v5843_v62 = vor.u32 %v6717_v4, %v5840_v28 }
 0x2ee   :  { %2903 = vmatpush.bf16.msra.mxu0 %v5943_v29  ;;  %v6715_v29 = vld [vmem:[%s12051_s4 + $0x34] sm:$0xf] }
 0x2ef   :  { %v5835_v13 = vor.u32 %v6715_v29, %v5832_v45 }
 0x2f2   :  { %2904 = vmatpush.bf16.msra.mxu0 %v5935_v6  ;;  %v6713_v6 = vld [vmem:[%s12051_s4 + $0x24] sm:$0xf] }
 0x2f3   :  { %v2838_v57 = vpop.f32.mrf.mxu0  ;;  %v5827_v54 = vor.u32 %v6713_v6, %v5824_v59 }
 0x2f4   :  { %v2839_v38 = vadd.f32 %v2838_v57, %v10036_v5 }
 0x2f6   :  { %2965 = vmatpush.bf16.msrb.mxu0 %v5867_v60  ;;  %v5888_v60 = vld [vmem:[%s12051_s4 + $0xa8] sm:$0xf0] }
 0x2fa   :  { %v9997_v50 = vpop.permute.xlu1 %2406 }
 0x2fb   :  { %v10001_v20 = vsel %vm2455_vm2, %v2450_v7, %v9997_v50  ;;  %v10098_v23 = vpop.f32.mrf.mxu0  ;;  %v5904_v7 = vld [vmem:[%s12051_s4 + $0xc8] sm:$0xf0] }
 0x2fc   :  { %2881 = vmatmul.bf16.gmra.mxu2 %v10001_v20  ;;  %v2841_v11 = vadd.f32 %v10098_v23, %v10036_v5 }
 0x302   :  { %v2385_v42 = vpop.permute.xlu2 %2384 }
 0x303   :  { %v10006_v43 = vsel %vm399_vm5, %v9813_v46, %v2385_v42  ;;  %v6758_v46 = vld [vmem:[%s12051_s4 + $0x184] sm:$0xf0] }
 0x304   :  { %2857 = vmatmul.bf16.gmra.mxu0 %v10006_v43  ;;  %v5999_v36 = vor.u32 %v6758_v46, %v5998_v30 }
 0x306   :  { %2938 = vmatpush.bf16.msra.mxu2 %v5999_v36  ;;  %v6709_v36 = vld [vmem:[%s12051_s4 + $0x4] sm:$0xf] }
 0x30a   :  { %v10009_v26 = vpop.permute.xlu2 %2415  ;;  %v2396_v44 = vpop.permute.xlu0 %2395  ;;  %2999 = vmatpush.bf16.msrb.mxu2 %v5931_v19 }
 0x30b   :  { %v2473_v33 = vsel %vm2471_vm12, %v9846_v15, %v10009_v26  ;;  %6017 = vmatmul.msk.bf16.vlgmr.msra.gmra.mxu3 %vm2811_vm14, %v10009_v26  ;;  %v2452_v53 = vsel %vm2111_vm11, %v2383_v34, %v2396_v44 }
 0x30c   :  { %3041 = vmatmul.bf16.vlgmr.msra.gmra.mxu1 %v2473_v33 }
 0x30e   :  { %3000 = vmatpush.bf16.msrb.mxu2 %v5923_v27  ;;  %v5880_v27 = vld [vmem:[%s12051_s4 + $0x98] sm:$0xf0] }
 0x312   :  { %3001 = vmatpush.bf16.msrb.mxu2 %v5915_v48 }
 0x313   :  { %v2843_v18 = vpop.f32.mrf.mxu0 }
 0x314   :  { %2905 = vmatmul.bf16.vlgmr.msra.gmra.mxu0 %v2473_v33  ;;  %v5816_v33 = vld [vmem:[%s12051_s4 + $0x18] sm:$0xf0]  ;;  %v2844_v57 = vadd.f32 %v2843_v18, %v10036_v5 }
 0x31a   :  { %v10023_v14 = vpop.permute.xlu1 %2408 }
 0x31b   :  { %v10027_v15 = vsel %vm2455_vm2, %v2452_v53, %v10023_v14  ;;  %v2422_v53 = vpop.permute.xlu2 %2421  ;;  %v10147_v22 = vpop.f32.mrf.mxu0 }
 0x31c   :  { %2886 = vmatmul.bf16.gmra.mxu2 %v10027_v15 }
 0x32a   :  { %v2398_v39 = vpop.permute.xlu0 %2397 }
 0x32b   :  { %v2454_v21 = vsel %vm2111_vm11, %v2385_v42, %v2398_v39  ;;  %v6711_v42 = vld [vmem:[%s12051_s4 + $0x14] sm:$0xf]  ;;  %v2482_v39 = vsel %vm2471_vm12, %v10023_v14, %v2422_v53  ;;  %v6729_v14 = vld [vmem:[%s12051_s4 + $0xa4] sm:$0xf] }
 0x32c   :  { %v5819_v46 = vor.u32 %v6711_v42, %v5816_v33 }
 0x331   :  { %v2872_v51 = vpop.f32.mrf.mxu2 }
 0x332   :  { %v10051_v9 = vadd.f32 %v2872_v51, %v2839_v38  ;;  %v10053_v41 = vpop.permute.xlu0 %2417 }
 0x333   :  { %6018 = vmatmul.msk.bf16.gmra.mxu3 %vm2811_vm14, %v10053_v41  ;;  %v2476_v34 = vsel %vm2471_vm12, %v9902_v2, %v10053_v41  ;;  %v5859_v2 = vor.u32 %v6721_v31, %v5856_v24  ;;  %v6727_v31 = vld [vmem:[%s12051_s4 + $0x94] sm:$0xf] }
 0x334   :  { %2910 = vmatmul.bf16.gmra.mxu0 %v2476_v34  ;;  %3046 = vmatmul.bf16.gmra.mxu1 %v2476_v34  ;;  %v5891_v34 = vor.u32 %v6729_v14, %v5888_v60  ;;  %v5883_v24 = vor.u32 %v6727_v31, %v5880_v27 }
 0x335   :  { %2966 = vmatpush.bf16.msrb.mxu0 %v5859_v2 }
 0x336   :  { %v2848_v51 = vpop.f32.mrf.mxu0 }
 0x339   :  { %2967 = vmatpush.bf16.msrb.mxu0 %v5851_v49  ;;  %v10129_v30 = vpop.f32.mrf.mxu2  ;;  %v2849_v49 = vadd.f32 %v2848_v51, %v10036_v5 }
 0x33a   :  { %v10073_v47 = vpop.permute.xlu1 %2410  ;;  %v2875_v40 = vadd.f32 %v10129_v30, %v2841_v11 }
 0x33b   :  { %v10077_v10 = vsel %vm2455_vm2, %v2454_v21, %v10073_v47  ;;  %v6725_v21 = vld [vmem:[%s12051_s4 + $0x84] sm:$0xf] }
 0x33c   :  { %2891 = vmatmul.bf16.gmra.mxu2 %v10077_v10 }
 0x33d   :  { %2968 = vmatpush.bf16.msrb.mxu0 %v5843_v62 }
 0x341   :  { %2969 = vmatpush.bf16.msrb.mxu0 %v5835_v13 }
 0x342   :  { %v2420_v37 = vpop.permute.xlu1 %2419 }
 0x343   :  { %6019 = vmatmul.msk.bf16.gmra.mxu3 %vm2811_vm14, %v2420_v37  ;;  %v2479_v17 = vsel %vm2471_vm12, %v9997_v50, %v2420_v37  ;;  %v5907_v50 = vor.u32 %v6733_v0, %v5904_v7 }
 0x344   :  { %2915 = vmatmul.bf16.gmra.mxu0 %v2479_v17  ;;  %3051 = vmatmul.bf16.gmra.mxu1 %v2479_v17 }
 0x345   :  { %2970 = vmatpush.bf16.msrb.mxu0 %v5827_v54  ;;  %3002 = vmatpush.bf16.msrb.mxu2 %v5907_v50 }
 0x349   :  { %2971 = vmatpush.bf16.msrb.mxu0 %v5819_v46  ;;  %3003 = vmatpush.bf16.msrb.mxu2 %v5899_v63 }
 0x34a   :  { %v2424_v35 = vpop.permute.xlu0 %2423 }
 0x34b   :  { %v2485_v55 = vsel %vm2471_vm12, %v10073_v47, %v2424_v35  ;;  %v5872_v47 = vld [vmem:[%s12051_s4 + $0x88] sm:$0xf0] }
 0x34c   :  { %6012 = vmatmul.msk.bf16.vlgmr.msra.gmra.mxu2 %vm2811_vm14, %v10009_v26  ;;  %v5808_v26 = vld [vmem:[%s12051_s4 + $0x8] sm:$0xf0]  ;;  %v5875_v58 = vor.u32 %v6725_v21, %v5872_v47 }
 0x34d   :  { %v5811_v44 = vor.u32 %v6709_v36, %v5808_v26  ;;  %3004 = vmatpush.bf16.msrb.mxu2 %v5891_v34  ;;  %v2846_v34 = vadd.f32 %v10147_v22, %v10036_v5 }
 0x34f   :  { %2972 = vmatpush.bf16.msrb.mxu0 %v5811_v44 }
 0x351   :  { %3005 = vmatpush.bf16.msrb.mxu2 %v5883_v24 }
 0x353   :  { %6020 = vmatmul.msk.bf16.gmra.mxu3 %vm2811_vm14, %v2422_v53 }
 0x354   :  { %2920 = vmatmul.bf16.gmra.mxu0 %v2482_v39  ;;  %3056 = vmatmul.bf16.gmra.mxu1 %v2482_v39  ;;  %v2877_v19 = vpop.f32.mrf.mxu2 }
 0x355   :  { %v2878_v38 = vadd.f32 %v2877_v19, %v2844_v57  ;;  %3006 = vmatpush.bf16.msrb.mxu2 %v5875_v58 }
 0x35c   :  { %6013 = vmatmul.msk.bf16.gmra.mxu2 %vm2811_vm14, %v10053_v41  ;;  %v10160_v41 = vpop.f32.mrf.mxu0  ;;  %v2879_v25 = vpop.f32.mrf.mxu2 }
 0x363   :  { %6021 = vmatmul.msk.bf16.gmra.mxu3 %vm2811_vm14, %v2424_v35 }
 0x364   :  { %2925 = vmatmul.bf16.gmra.mxu0 %v2485_v55  ;;  %3061 = vmatmul.bf16.gmra.mxu1 %v2485_v55  ;;  %v2853_v2 = vpop.f32.mrf.mxu0  ;;  %v2880_v55 = vadd.f32 %v2879_v25, %v2846_v34 }
 0x365   :  { %v2854_v62 = vadd.f32 %v2853_v2, %v10036_v5 }
 0x36c   :  { %6014 = vmatmul.msk.bf16.gmra.mxu2 %vm2811_vm14, %v2420_v37  ;;  %v10176_v8 = vpop.f32.mrf.mxu0 }
 0x374   :  { %2973 = vmatmul.bf16.vlgmr.msrb.gmra.mxu0 %v9794_v1 }
 0x37c   :  { %6015 = vmatmul.msk.bf16.gmra.mxu2 %vm2811_vm14, %v2422_v53 }
 0x37f   :  { %v2882_v61 = vpop.f32.mrf.mxu2 }
 0x380   :  { %v2883_v48 = vadd.f32 %v2882_v61, %v2849_v49  ;;  %v2851_v49 = vadd.f32 %v10160_v41, %v10036_v5 }
 0x381   :  { %v2858_v37 = vpop.f32.mrf.mxu0 }
 0x384   :  { %2978 = vmatmul.bf16.gmra.mxu0 %v9810_v32 }
 0x387   :  { %v10186_v17 = vpop.f32.mrf.mxu2 }
 0x388   :  { %v2885_v22 = vadd.f32 %v10186_v17, %v2851_v49 }
 0x389   :  { %v10181_v4 = vpop.f32.mrf.mxu0 }
 0x38c   :  { %6016 = vmatmul.msk.bf16.gmra.mxu2 %vm2811_vm14, %v2424_v35 }
 0x391   :  { %v2906_v28 = vpop.f32.mrf.mxu0 }
 0x392   :  { %v2907_v1 = vadd.f32 %v2906_v28, %v10051_v9 }
 0x394   :  { %2983 = vmatmul.bf16.gmra.mxu0 %v9868_v52 }
 0x399   :  { %v2908_v32 = vpop.f32.mrf.mxu0 }
 0x39a   :  { %v2909_v19 = vadd.f32 %v2908_v32, %v2875_v40 }
 0x39c   :  { %3007 = vmatmul.bf16.vlgmr.msrb.gmra.mxu2 %v9850_v56  ;;  %v2859_v56 = vadd.f32 %v2858_v37, %v10036_v5 }
 0x39f   :  { %v2887_v29 = vpop.f32.mrf.mxu2 }
 0x3a0   :  { %v2888_v45 = vadd.f32 %v2887_v29, %v2854_v62 }
 0x3a4   :  { %2988 = vmatmul.bf16.gmra.mxu0 %v9938_v12 }
 0x3a7   :  { %v10193_v9 = vpop.f32.mrf.mxu2 }
 0x3ac   :  { %3012 = vmatmul.bf16.gmra.mxu2 %v9906_v16 }
 0x3b1   :  { %v2911_v13 = vpop.f32.mrf.mxu0 }
 0x3b2   :  { %v2912_v6 = vadd.f32 %v2911_v13, %v2878_v38  ;;  %v3076_v13 = vpop.f32.mrf.mxu3 }
 0x3b4   :  { %2993 = vmatmul.bf16.gmra.mxu0 %v10006_v43 }
 0x3b9   :  { %v2913_v52 = vpop.f32.mrf.mxu0 }
 0x3ba   :  { %v2914_v27 = vadd.f32 %v2913_v52, %v2880_v55 }
 0x3bc   :  { %3017 = vmatmul.bf16.gmra.mxu2 %v10001_v20 }
 0x3bf   :  { %v2892_v59 = vpop.f32.mrf.mxu2 }
 0x3c0   :  { %v2893_v0 = vadd.f32 %v2892_v59, %v2859_v56  ;;  %v2856_v59 = vadd.f32 %v10176_v8, %v10036_v5  ;;  %v10239_v8 = vpop.f32.mrf.mxu3 }
 0x3c1   :  { %v2916_v18 = vpop.f32.mrf.mxu0 }
 0x3c2   :  { %v2917_v54 = vadd.f32 %v2916_v18, %v2883_v48 }
 0x3c7   :  { %v10197_v7 = vpop.f32.mrf.mxu2 }
 0x3c8   :  { %v10261_v55 = vpop.f32.mrf.mxu3 }
 0x3c9   :  { %v2918_v12 = vpop.f32.mrf.mxu0 }
 0x3ca   :  { %v2919_v29 = vadd.f32 %v2918_v12, %v2885_v22 }
 0x3cc   :  { %3022 = vmatmul.bf16.gmra.mxu2 %v10027_v15 }
 0x3cf   :  { %v2940_v16 = vpop.f32.mrf.mxu2 }
 0x3d0   :  { %v2941_v50 = vadd.f32 %v2940_v16, %v2907_v1  ;;  %v3042_v1 = vpop.f32.mrf.mxu1 }
 0x3d1   :  { %v2921_v42 = vpop.f32.mrf.mxu0 }
 0x3d2   :  { %v2922_v43 = vadd.f32 %v2921_v42, %v2888_v45  ;;  %v3101_v14 = vsub.f32 0.0, %v2941_v50  ;;  %v2890_v50 = vadd.f32 %v10193_v9, %v2856_v59 }
 0x3d4   :  { %v3121_v35 = vmul.f32 1.442695, %v3101_v14  ;;  %v2861_v14 = vadd.f32 %v10181_v4, %v10036_v5 }
 0x3d6   :  { %7160 = vpow2.f32 %v3121_v35 }
 0x3d7   :  { %v2942_v33 = vpop.f32.mrf.mxu2 }
 0x3d8   :  { %v2943_v63 = vadd.f32 %v2942_v33, %v2909_v19  ;;  %v10232_v16 = vpop.f32.mrf.mxu1 }
 0x3d9   :  { %v10200_v46 = vpop.f32.mrf.mxu0 }
 0x3da   :  { %v3103_v51 = vsub.f32 0.0, %v2943_v63 }
 0x3dc   :  { %3027 = vmatmul.bf16.gmra.mxu2 %v10077_v10  ;;  %v3125_v31 = vmul.f32 1.442695, %v3103_v51  ;;  %v7161_v47 = vpop.eup %7160 }
 0x3dd   :  { %v10213_v25 = vadd.f32 1.0, %v7161_v47  ;;  %v6080_v47 = vld [vmem:[%s12053_s6 + $0x70] sm:$0xf] }
 0x3de   :  { %7162 = vpow2.f32 %v3125_v31  ;;  %v2895_v31 = vadd.f32 %v10197_v7, %v2861_v14  ;;  %v6776_v7 = vld [vmem:[%s12053_s6 + $0x74] sm:$0xf0] }
 0x3df   :  { %v2945_v20 = vpop.f32.mrf.mxu2  ;;  %vm3186_vm11 = vweird.f32 %v10213_v25 }
 0x3e0   :  { %v2946_v36 = vadd.f32 %v2945_v20, %v2912_v6 }
 0x3e1   :  { %v2926_v26 = vpop.f32.mrf.mxu0 }
 0x3e2   :  { %v2927_v44 = vadd.f32 %v2926_v26, %v2893_v0  ;;  %v3105_v24 = vsub.f32 0.0, %v2946_v36 }
 0x3e4   :  { %v3129_v21 = vmul.f32 1.442695, %v3105_v24  ;;  %v7163_v61 = vpop.eup %7162 }
 0x3e5   :  { %v10217_v45 = vadd.f32 1.0, %v7163_v61 }
 0x3e6   :  { %7164 = vpow2.f32 %v3129_v21 }
 0x3e7   :  { %v2947_v53 = vpop.f32.mrf.mxu2  ;;  %7166 = vrcp.f32 %v10213_v25  ;;  %v3222_v5 = vand.u32 2147483648, %v10217_v45  ;;  %vm3216_vm0 = vweird.f32 %v10217_v45 }
 0x3e8   :  { %v2948_v30 = vadd.f32 %v2947_v53, %v2914_v27 }
 0x3e9   :  { %v10206_v38 = vpop.f32.mrf.mxu0 }
 0x3ea   :  { %v3107_v58 = vsub.f32 0.0, %v2948_v30 }
 0x3ec   :  { %v3133_v62 = vmul.f32 1.442695, %v3107_v58  ;;  %v7165_v52 = vpop.eup %7164 }
 0x3ed   :  { %v10225_v0 = vadd.f32 1.0, %v7165_v52  ;;  %v10227_v18 = vpop.eup %7166 }
 0x3ee   :  { %7168 = vpow2.f32 %v3133_v62  ;;  %v3182_v26 = vmul.f32 %v10227_v18, %v10213_v25  ;;  %vm3187_vm15 = vweird.f32 %v10227_v18 }
 0x3ef   :  { %v2950_v39 = vpop.f32.mrf.mxu2  ;;  %7170 = vrcp.f32 %v10217_v45  ;;  %vm10313_vm1 = vmor %vm3186_vm11, %vm3187_vm15  ;;  %vm3246_vm9 = vweird.f32 %v10225_v0 }
 0x3f0   :  { %v2951_v57 = vadd.f32 %v2950_v39, %v2917_v54  ;;  %v10230_v54 = vperm.slane %v10033_v3, 1  ;;  %v2924_v3 = vadd.f32 %v10200_v46, %v2890_v50  ;;  %v3183_v19 = vsub.f32 1.0, %v3182_v26 }
 0x3f1   :  { %v2974_v2 = vpop.f32.mrf.mxu0 }
 0x3f2   :  { %v3109_v48 = vsub.f32 0.0, %v2951_v57  ;;  %v2975_v9 = vadd.f32 %v2974_v2, %v10230_v54  ;;  %v3184_v27 = vmul.f32 %v10227_v18, %v3183_v19  ;;  %v3252_v19 = vand.u32 2147483648, %v10225_v0 }
 0x3f4   :  { %v3137_v6 = vmul.f32 1.442695, %v3109_v48  ;;  %v7169_v12 = vpop.eup %7168  ;;  %v6081_v48 = vor.u32 %v6776_v7, %v6080_v47  ;;  %v3253_v47 = vor.u32 1.1754944e-38, %v3252_v19 }
 0x3f6   :  { %7172 = vpow2.f32 %v3137_v6  ;;  %3998 = vmatpush.bf16.msra.mxu0 %v6081_v48 }
 0x3f7   :  { %v2952_v15 = vpop.f32.mrf.mxu2  ;;  %7174 = vrcp.f32 %v10225_v0 }
 0x3f8   :  { %v2953_v41 = vadd.f32 %v2952_v15, %v2919_v29 }
 0x3f9   :  { %v2976_v32 = vpop.f32.mrf.mxu0 }
 0x3fa   :  { %v3111_v56 = vsub.f32 0.0, %v2953_v41  ;;  %v2977_v2 = vadd.f32 %v2976_v32, %v10230_v54 }
 0x3fc   :  { %v3141_v33 = vmul.f32 1.442695, %v3111_v56  ;;  %v10293_v56 = vor.u32 1.1754944e-38, %v3222_v5 }
 0x3fe   :  { %7176 = vpow2.f32 %v3141_v33  ;;  %v6774_v33 = vld [vmem:[%s12053_s6 + $0x64] sm:$0xf0] }
 0x3ff   :  { %v2955_v60 = vpop.f32.mrf.mxu2 }
 0x400   :  { %v2956_v10 = vadd.f32 %v2955_v60, %v2922_v43  ;;  %v10235_v43 = vpop.eup %7170  ;;  %v10257_v60 = vpop.f32.mrf.mxu1 }
 0x401   :  { %v10237_v20 = vpop.f32.mrf.mxu0  ;;  %v7173_v36 = vpop.eup %7172  ;;  %v3212_v11 = vmul.f32 %v10235_v43, %v10217_v45  ;;  %vm3217_vm4 = vweird.f32 %v10235_v43 }
 0x402   :  { %v3113_v42 = vsub.f32 0.0, %v2956_v10  ;;  %v10250_v15 = vadd.f32 1.0, %v7173_v36  ;;  %v10253_v63 = vpop.eup %7174  ;;  %v3190_v10 = vand.u32 2147483647, %v10213_v25  ;;  %vm10358_vm8 = vmor %vm3216_vm0, %vm3217_vm4 }
 0x403   :  { %v3213_v34 = vsub.f32 1.0, %v3212_v11  ;;  %v3242_v4 = vmul.f32 %v10253_v63, %v10225_v0  ;;  %vm3247_vm2 = vweird.f32 %v10253_v63 }
 0x404   :  { %v3145_v53 = vmul.f32 1.442695, %v3113_v42  ;;  %v7177_v24 = vpop.eup %7176  ;;  %vm10279_vm13 = vcmp.eq.f32.partialorder %v3190_v10, 8.507059e+37  ;;  %v6072_v42 = vld [vmem:[%s12053_s6 + $0x60] sm:$0xf]  ;;  %vm10415_vm14 = vmor %vm3246_vm9, %vm3247_vm2  ;;  %vm3306_vm0 = vweird.f32 %v10250_v15 }
 0x405   :  { %v3214_v22 = vmul.f32 %v10235_v43, %v3213_v34  ;;  %v10289_v41 = vadd.f32 1.0, %v7177_v24  ;;  %v3243_v59 = vsub.f32 1.0, %v3242_v4  ;;  %v3250_v10 = vand.u32 2147483647, %v10225_v0 }
 0x407   :  { %v2957_v23 = vpop.f32.mrf.mxu2  ;;  %v3215_v26 = vadd.f32 %v10235_v43, %v3214_v22  ;;  %vm10370_vm10 = vcmp.eq.f32.partialorder %v3250_v10, 8.507059e+37  ;;  %v6770_v22 = vld [vmem:[%s12053_s6 + $0x44] sm:$0xf0] }
 0x408   :  { %v2958_v39 = vadd.f32 %v2957_v23, %v2924_v3  ;;  %v3192_v23 = vand.u32 2147483648, %v10213_v25  ;;  %v10328_v25 = vpop.f32.mrf.mxu1 }
 0x409   :  { %v10270_v30 = vpop.f32.mrf.mxu0  ;;  %v3219_v58 = vsel %vm10358_vm8, %v10235_v43, %v3215_v26 }
 0x40a   :  { %v3115_v51 = vsub.f32 0.0, %v2958_v39  ;;  %v3193_v6 = vor.u32 1.1754944e-38, %v3192_v23  ;;  %v6073_v39 = vor.u32 %v6774_v33, %v6072_v42 }
 0x40c   :  { %v3149_v49 = vmul.f32 1.442695, %v3115_v51  ;;  %3999 = vmatpush.bf16.msra.mxu0 %v6073_v39  ;;  %v10342_v51 = vpop.f32.mrf.mxu3 }
 0x40f   :  { %v2960_v37 = vpop.f32.mrf.mxu2 }
 0x410   :  { %v10215_v28 = vadd.f32 %v2960_v37, %v2927_v44  ;;  %v10245_v44 = vadd.f32 1.0, %v7169_v12  ;;  %v10423_v36 = vpop.f32.mrf.mxu1 }
 0x411   :  { %v10348_v5 = vpop.f32.mrf.mxu0 }
 0x412   :  { %7178 = vrcp.f32 %v10245_v44  ;;  %vm3276_vm12 = vweird.f32 %v10245_v44 }
 0x413   :  { %7180 = vpow2.f32 %v3145_v53 }
 0x414   :  { %7182 = vrcp.f32 %v10250_v15 }
 0x417   :  { %v10221_v17 = vpop.f32.mrf.mxu2 }
 0x418   :  { %v10283_v37 = vpop.eup %7178 }
 0x419   :  { %v7181_v32 = vpop.eup %7180  ;;  %v3272_v50 = vmul.f32 %v10283_v37, %v10245_v44 }
 0x41a   :  { %v10291_v52 = vpop.eup %7182 }
 0x41b   :  { %v10332_v11 = vmul.f32 %v10291_v52, %v10250_v15  ;;  %v3273_v34 = vsub.f32 1.0, %v3272_v50  ;;  %vm3307_vm4 = vweird.f32 %v10291_v52 }
 0x41f   :  { %v3008_v57 = vpop.f32.mrf.mxu2 }
 0x420   :  { %v3009_v40 = vadd.f32 %v3008_v57, %v2975_v9  ;;  %v10322_v9 = vadd.f32 1.0, %v7181_v32  ;;  %v6772_v57 = vld [vmem:[%s12053_s6 + $0x54] sm:$0xf0]  ;;  %v6048_v32 = vld [vmem:[%s12053_s6 + $0x30] sm:$0xf] }
 0x422   :  { %v3043_v46 = vadd.f32 %v3042_v1, %v3009_v40  ;;  %v3220_v1 = vand.u32 2147483647, %v10217_v45 }
 0x424   :  { %v3077_v35 = vadd.f32 %v3076_v13, %v3043_v46  ;;  %v3185_v13 = vadd.f32 %v10227_v18, %v3184_v27  ;;  %vm10318_vm3 = vcmp.eq.f32.partialorder %v3220_v1, 8.507059e+37  ;;  %v3117_v27 = vsub.f32 0.0, %v10215_v28 }
 0x425   :  { %v3303_v28 = vsub.f32 1.0, %v10332_v11  ;;  %v3342_v11 = vand.u32 2147483648, %v10289_v41 }
 0x426   :  { %v3102_v21 = vsub.f32 0.0, %v3077_v35  ;;  %v3189_v40 = vsel %vm10313_vm1, %v10227_v18, %v3185_v13  ;;  %v2929_v35 = vadd.f32 %v10206_v38, %v2895_v31  ;;  %v3244_v18 = vmul.f32 %v10253_v63, %v3243_v59  ;;  %v6768_v13 = vld [vmem:[%s12053_s6 + $0x34] sm:$0xf0] }
 0x427   :  { %v3010_v61 = vpop.f32.mrf.mxu2  ;;  %v3153_v48 = vmul.f32 1.442695, %v3117_v27  ;;  %v2982_v59 = vadd.f32 %v10270_v30, %v10230_v54  ;;  %v3054_v30 = vpop.f32.mrf.mxu1 }
 0x428   :  { %v3123_v62 = vmul.f32 1.442695, %v3102_v21  ;;  %v3011_v29 = vadd.f32 %v3010_v61, %v2977_v2  ;;  %v10352_v2 = vsel %vm10279_vm13, %v3193_v6, %v3189_v40  ;;  %v3245_v43 = vadd.f32 %v10253_v63, %v3244_v18 }
 0x429   :  { %v3274_v6 = vmul.f32 %v10283_v37, %v3273_v34  ;;  %v2963_v26 = vadd.f32 %v10221_v17, %v2929_v35  ;;  %vm3277_vm13 = vweird.f32 %v10283_v37  ;;  %v2986_v34 = vpop.f32.mrf.mxu0 }
 0x42a   :  { %7184 = vpow2.f32 %v3123_v62  ;;  %v3045_v12 = vadd.f32 %v10232_v16, %v3011_v29  ;;  %v6064_v16 = vld [vmem:[%s12053_s6 + $0x50] sm:$0xf]  ;;  %vm10464_vm15 = vmor %vm3276_vm12, %vm3277_vm13 }
 0x42b   :  { %7186 = vpow2.f32 %v3149_v49  ;;  %v6065_v14 = vor.u32 %v6772_v57, %v6064_v16  ;;  %v3280_v49 = vand.u32 2147483647, %v10245_v44  ;;  %v6049_v16 = vor.u32 %v6768_v13, %v6048_v32  ;;  %vm10542_vm12 = vmor %vm3306_vm0, %vm3307_vm4 }
 0x42c   :  { %v3079_v53 = vadd.f32 %v10239_v8, %v3045_v12  ;;  %7188 = vrcp.f32 %v10289_v41  ;;  %v2980_v8 = vadd.f32 %v10237_v20, %v10230_v54  ;;  %v10401_v12 = vsel %vm10318_vm3, %v10293_v56, %v3219_v58 }
 0x42d   :  { %7190 = vrcp.f32 %v10322_v9  ;;  %4000 = vmatpush.bf16.msra.mxu0 %v6065_v14  ;;  %vm10419_vm11 = vcmp.eq.f32.partialorder %v3280_v49, 8.507059e+37  ;;  %v3275_v40 = vadd.f32 %v10283_v37, %v3274_v6  ;;  %v3312_v14 = vand.u32 2147483648, %v10250_v15 }
 0x42e   :  { %v3104_v46 = vsub.f32 0.0, %v3079_v53  ;;  %v3249_v53 = vsel %vm10415_vm14, %v10253_v63, %v3245_v43  ;;  %v3119_v18 = vsub.f32 0.0, %v2963_v26  ;;  %v10480_v49 = vadd.f32 %v2986_v34, %v10230_v54 }
 0x42f   :  { %v3013_v23 = vpop.f32.mrf.mxu2  ;;  %v3340_v6 = vand.u32 2147483647, %v10289_v41 }
 0x430   :  { %v7185_v24 = vpop.eup %7184  ;;  %v3127_v20 = vmul.f32 1.442695, %v3104_v46  ;;  %v3014_v4 = vadd.f32 %v3013_v23, %v2980_v8  ;;  %v10434_v8 = vpop.f32.mrf.mxu3  ;;  %v2985_v23 = vadd.f32 %v10348_v5, %v10230_v54 }
 0x431   :  { %v7187_v21 = vpop.eup %7186  ;;  %v10363_v31 = vadd.f32 1.0, %v7185_v24  ;;  %v6040_v24 = vld [vmem:[%s12053_s6 + $0x20] sm:$0xf]  ;;  %vm10582_vm4 = vcmp.eq.f32.partialorder %v3340_v6, 8.507059e+37 }
 0x432   :  { %7192 = vpow2.f32 %v3127_v20  ;;  %v3048_v7 = vadd.f32 %v10257_v60, %v3014_v4  ;;  %v10375_v61 = vpop.eup %7188  ;;  %v6056_v60 = vld [vmem:[%s12053_s6 + $0x40] sm:$0xf]  ;;  %v10386_v1 = vadd.f32 1.0, %v7187_v21  ;;  %v6766_v20 = vld [vmem:[%s12053_s6 + $0x24] sm:$0xf0]  ;;  %v10458_v4 = vsel %vm10370_vm10, %v3253_v47, %v3249_v53 }
 0x433   :  { %7194 = vrcp.f32 %v10363_v31  ;;  %v6057_v29 = vor.u32 %v6770_v22, %v6056_v60  ;;  %v10405_v50 = vpop.eup %7190  ;;  %v10409_v42 = vmul.f32 %v10375_v61, %v10289_v41  ;;  %v6041_v38 = vor.u32 %v6766_v20, %v6040_v24  ;;  %v6764_v47 = vld [vmem:[%s12053_s6 + $0x14] sm:$0xf0] }
 0x434   :  { %v3082_v62 = vadd.f32 %v10261_v55, %v3048_v7  ;;  %v3282_v55 = vand.u32 2147483648, %v10245_v44  ;;  %7196 = vpow2.f32 %v3153_v48  ;;  %v10438_v17 = vmul.f32 %v10405_v50, %v10322_v9  ;;  %v6032_v7 = vld [vmem:[%s12053_s6 + $0x10] sm:$0xf] }
 0x435   :  { %4001 = vmatpush.bf16.msra.mxu0 %v6057_v29  ;;  %7198 = vrcp.f32 %v10386_v1  ;;  %v3333_v10 = vsub.f32 1.0, %v10409_v42  ;;  %v3279_v44 = vsel %vm10464_vm15, %v10283_v37, %v3275_v40  ;;  %v10484_v48 = vor.u32 1.1754944e-38, %v3312_v14  ;;  %v6024_v40 = vld [vmem:[%s12053_s6] sm:$0xf] }
 0x436   :  { %v3106_v33 = vsub.f32 0.0, %v3082_v62  ;;  %v3283_v63 = vor.u32 1.1754944e-38, %v3282_v55  ;;  %v3363_v45 = vsub.f32 1.0, %v10438_v17  ;;  %v6033_v43 = vor.u32 %v6764_v47, %v6032_v7 }
 0x437   :  { %v3015_v3 = vpop.f32.mrf.mxu2  ;;  %v3304_v37 = vmul.f32 %v10291_v52, %v3303_v28  ;;  %v3157_v62 = vmul.f32 1.442695, %v3119_v18  ;;  %v3207_v56 = vand.u32 2147483648, %v10363_v31  ;;  %vm3201_vm3 = vweird.f32 %v10363_v31 }
 0x438   :  { %v7193_v0 = vpop.eup %7192  ;;  %v3131_v39 = vmul.f32 1.442695, %v3106_v33  ;;  %v3016_v57 = vadd.f32 %v3015_v3, %v2982_v59  ;;  %v10495_v13 = vsel %vm10419_vm11, %v3283_v63, %v3279_v44  ;;  %v6762_v63 = vld [vmem:[%s12053_s6 + $0x4] sm:$0xf0]  ;;  %v10550_v44 = vor.u32 1.1754944e-38, %v3342_v11 }
 0x439   :  { %v10432_v19 = vpop.eup %7194  ;;  %v10440_v46 = vadd.f32 1.0, %v7193_v0  ;;  %4002 = vmatpush.bf16.msra.mxu0 %v6049_v16  ;;  %v6025_v18 = vor.u32 %v6762_v63, %v6024_v40  ;;  %v3208_v20 = vor.u32 1.1754944e-38, %v3207_v56  ;;  %vm3336_vm11 = vweird.f32 %v10289_v41 }
 0x43a   :  { %v3197_v35 = vmul.f32 %v10432_v19, %v10363_v31  ;;  %7200 = vpow2.f32 %v3131_v39  ;;  %v3050_v27 = vadd.f32 %v10328_v25, %v3016_v57  ;;  %v7197_v58 = vpop.eup %7196  ;;  %vm3202_vm1 = vweird.f32 %v10432_v19  ;;  %v3088_v57 = vpop.f32.mrf.mxu3 }
 0x43b   :  { %7202 = vrcp.f32 %v10440_v46  ;;  %v10486_v60 = vpop.eup %7198  ;;  %v10498_v55 = vadd.f32 1.0, %v7197_v58  ;;  %v3305_v39 = vadd.f32 %v10291_v52, %v3304_v37  ;;  %vm10524_vm8 = vmor %vm3201_vm3, %vm3202_vm1  ;;  %v3237_v25 = vand.u32 2147483648, %v10440_v46 }
 0x43c   :  { %v3198_v5 = vsub.f32 1.0, %v3197_v35  ;;  %v3084_v21 = vadd.f32 %v10342_v51, %v3050_v27  ;;  %v3310_v51 = vand.u32 2147483647, %v10250_v15  ;;  %v10503_v26 = vmul.f32 %v10486_v60, %v10386_v1  ;;  %v2989_v35 = vpop.f32.mrf.mxu0 }
 0x43d   :  { %4003 = vmatpush.bf16.msra.mxu0 %v6041_v38  ;;  %vm3231_vm14 = vweird.f32 %v10440_v46  ;;  %v2990_v56 = vadd.f32 %v2989_v35, %v10230_v54  ;;  %vm3337_vm0 = vweird.f32 %v10375_v61 }
 0x43e   :  { %v3108_v22 = vsub.f32 0.0, %v3084_v21  ;;  %v3199_v29 = vmul.f32 %v10432_v19, %v3198_v5  ;;  %vm10529_vm9 = vcmp.eq.f32.partialorder %v3310_v51, 8.507059e+37  ;;  %v3235_v5 = vand.u32 2147483647, %v10440_v46 }
 0x43f   :  { %v3018_v32 = vpop.f32.mrf.mxu2 }
 0x440   :  { %v7201_v59 = vpop.eup %7200  ;;  %v3135_v33 = vmul.f32 1.442695, %v3108_v22  ;;  %v3019_v16 = vadd.f32 %v3018_v32, %v2985_v23  ;;  %v3200_v14 = vadd.f32 %v10432_v19, %v3199_v29  ;;  %vm3236_vm15 = vcmp.eq.f32.partialorder %v3235_v5, 8.507059e+37 }
 0x441   :  { %v7203_v28 = vpop.eup %7202  ;;  %v10507_v3 = vadd.f32 1.0, %v7201_v59  ;;  %4004 = vmatpush.bf16.msra.mxu0 %v6033_v43  ;;  %v3057_v59 = vpop.f32.mrf.mxu1 }
 0x442   :  { %v3227_v53 = vmul.f32 %v7203_v28, %v10440_v46  ;;  %7204 = vpow2.f32 %v3135_v33  ;;  %v3053_v0 = vadd.f32 %v10423_v36, %v3019_v16  ;;  %v3205_v36 = vand.u32 2147483647, %v10363_v31 }
 0x443   :  { %7206 = vrcp.f32 %v10507_v3  ;;  %v3204_v31 = vsel %vm10524_vm8, %v10432_v19, %v3200_v14  ;;  %vm3232_vm2 = vweird.f32 %v7203_v28  ;;  %v3309_v19 = vsel %vm10542_vm12, %v10291_v52, %v3305_v39  ;;  %vm10607_vm8 = vmor %vm3336_vm11, %vm3337_vm0 }
 0x444   :  { %7208 = vpow2.f32 %v3157_v62  ;;  %v3228_v27 = vsub.f32 1.0, %v3227_v53  ;;  %v3087_v23 = vadd.f32 %v10434_v8, %v3053_v0  ;;  %vm3206_vm10 = vcmp.eq.f32.partialorder %v3205_v36, 8.507059e+37  ;;  %vm3233_vm13 = vmor %vm3231_vm14, %vm3232_vm2 }
 0x445   :  { %4005 = vmatpush.bf16.msra.mxu0 %v6025_v18  ;;  %7210 = vrcp.f32 %v10498_v55  ;;  %v3209_v47 = vsel %vm3206_vm10, %v3208_v20, %v3204_v31  ;;  %v3238_v62 = vor.u32 1.1754944e-38, %v3237_v25  ;;  %v3334_v52 = vmul.f32 %v10375_v61, %v3333_v10 }
 0x446   :  { %v3229_v21 = vmul.f32 %v7203_v28, %v3228_v27  ;;  %v3110_v38 = vsub.f32 0.0, %v3087_v23  ;;  %v3393_v33 = vsub.f32 1.0, %v10503_v26  ;;  %v10577_v53 = vsel %vm10529_vm9, %v10484_v48, %v3309_v19 }
 0x447   :  { %v3020_v7 = vpop.f32.mrf.mxu2  ;;  %v3335_v0 = vadd.f32 %v10375_v61, %v3334_v52  ;;  %v3267_v36 = vand.u32 2147483648, %v10507_v3  ;;  %v3265_v6 = vand.u32 2147483647, %v10507_v3  ;;  %v3372_v20 = vand.u32 2147483648, %v10322_v9 }
 0x448   :  { %v7205_v58 = vpop.eup %7204  ;;  %v3139_v51 = vmul.f32 1.442695, %v3110_v38  ;;  %v3021_v15 = vadd.f32 %v3020_v7, %v10480_v49  ;;  %v3230_v22 = vadd.f32 %v7203_v28, %v3229_v21  ;;  %v10562_v49 = vpack.c.bf16 %v3209_v47, %v10352_v2  ;;  %v3091_v2 = vpop.f32.mrf.mxu3 }
 0x449   :  { %v7207_v43 = vpop.eup %7206  ;;  %v10555_v37 = vadd.f32 1.0, %v7205_v58  ;;  %vm3261_vm3 = vweird.f32 %v10507_v3  ;;  %v3268_v7 = vor.u32 1.1754944e-38, %v3267_v36  ;;  %v3339_v47 = vsel %vm10607_vm8, %v10375_v61, %v3335_v0 }
 0x44a   :  { %v7209_v29 = vpop.eup %7208  ;;  %7212 = vpow2.f32 %v3139_v51  ;;  %v3055_v46 = vadd.f32 %v3054_v30, %v3021_v15  ;;  %v3234_v32 = vsel %vm3233_vm13, %v7203_v28, %v3230_v22  ;;  %v3257_v11 = vmul.f32 %v7207_v43, %v10507_v3  ;;  %v3059_v15 = vpop.f32.mrf.mxu1 }
 0x44b   :  { %7214 = vrcp.f32 %v10555_v37  ;;  %v3239_v16 = vsel %vm3236_vm15, %v3238_v62, %v3234_v32  ;;  %v10572_v28 = vpop.eup %7210  ;;  %v3499_v63 = vunpack.c.l.b16 %v10562_v49  ;;  %v10590_v48 = vadd.f32 1.0, %v7209_v29 }
 0x44c   :  { %v3089_v42 = vadd.f32 %v3088_v57, %v3055_v46  ;;  %v10569_v10 = vpack.c.bf16 %v3239_v16, %v10401_v12  ;;  %v3258_v30 = vsub.f32 1.0, %v3257_v11  ;;  %v3370_v12 = vand.u32 2147483647, %v10322_v9  ;;  %v2991_v57 = vpop.f32.mrf.mxu0 }
 0x44d   :  { %vm3262_vm1 = vweird.f32 %v7207_v43  ;;  %v10598_v31 = vmul.f32 %v10572_v28, %v10498_v55  ;;  %vm3266_vm10 = vcmp.eq.f32.partialorder %v3265_v6, 8.507059e+37  ;;  %v10619_v51 = vor.u32 1.1754944e-38, %v3372_v20 }
 0x44e   :  { %v3112_v40 = vsub.f32 0.0, %v3089_v42  ;;  %v3501_v14 = vunpack.c.l.b16 %v10569_v10  ;;  %v3259_v35 = vmul.f32 %v7207_v43, %v3258_v30  ;;  %vm3263_vm9 = vmor %vm3261_vm3, %vm3262_vm1  ;;  %v2992_v62 = vadd.f32 %v2991_v57, %v10230_v54 }
 0x44f   :  { %v3023_v34 = vpop.f32.mrf.mxu2  ;;  %v3423_v22 = vsub.f32 1.0, %v10598_v31  ;;  %v10630_v46 = vsel %vm10582_vm4, %v10550_v44, %v3339_v47  ;;  %v3400_v32 = vand.u32 2147483647, %v10386_v1  ;;  %v3364_v39 = vmul.f32 %v10405_v50, %v3363_v45 }
 0x450   :  { %v7213_v27 = vpop.eup %7212  ;;  %v3143_v23 = vmul.f32 1.442695, %v3112_v40  ;;  %v3024_v18 = vadd.f32 %v3023_v34, %v2990_v56  ;;  %v10593_v24 = vpack.c.b16 %v3501_v14, %v3499_v63  ;;  %v3260_v21 = vadd.f32 %v7207_v43, %v3259_v35 }
 0x451   :  { %v7215_v25 = vpop.eup %7214  ;;  %v10600_v5 = vadd.f32 1.0, %v7213_v27  ;;  %v3402_v44 = vand.u32 2147483648, %v10386_v1  ;;  %vm3291_vm12 = vweird.f32 %v10555_v37  ;;  %vm3367_vm13 = vweird.f32 %v10405_v50 }
 0x452   :  { %7216 = vpow2.f32 %v3143_v23  ;;  %v3058_v8 = vadd.f32 %v3057_v59, %v3024_v18  ;;  %4006 = vmatmul.bf16.vlgmr.msra.gmra.mxu0 %v10593_v24  ;;  %v3264_v3 = vsel %vm3263_vm9, %v7207_v43, %v3260_v21  ;;  %v3287_v41 = vmul.f32 %v7215_v25, %v10555_v37  ;;  %v3093_v59 = vpop.f32.mrf.mxu3 }
 0x453   :  { %7218 = vrcp.f32 %v10600_v5  ;;  %v3269_v58 = vsel %vm3266_vm10, %v3268_v7, %v3264_v3  ;;  %v3297_v43 = vand.u32 2147483648, %v10555_v37  ;;  %vm3292_vm2 = vweird.f32 %v7215_v25 }
 0x454   :  { %7220 = vrcp.f32 %v10590_v48  ;;  %v3092_v19 = vadd.f32 %v3091_v2, %v3058_v8  ;;  %v10624_v52 = vpack.c.bf16 %v3269_v58, %v10458_v4  ;;  %v3288_v61 = vsub.f32 1.0, %v3287_v41  ;;  %v2994_v2 = vpop.f32.mrf.mxu0  ;;  %vm3293_vm14 = vmor %vm3291_vm12, %vm3292_vm2  ;;  %v3062_v41 = vpop.f32.mrf.mxu1 }
 0x455   :  { %v3295_v4 = vand.u32 2147483647, %v10555_v37  ;;  %v3298_v6 = vor.u32 1.1754944e-38, %v3297_v43  ;;  %v3502_v23 = vunpack.c.h.b16 %v10569_v10  ;;  %v3325_v18 = vand.u32 2147483647, %v10600_v5 }
 0x456   :  { %v3114_v29 = vsub.f32 0.0, %v3092_v19  ;;  %v3503_v11 = vunpack.c.l.b16 %v10624_v52  ;;  %v3289_v56 = vmul.f32 %v7215_v25, %v3288_v61  ;;  %v3504_v17 = vunpack.c.h.b16 %v10624_v52 }
 0x457   :  { %v3025_v16 = vpop.f32.mrf.mxu2  ;;  %vm3296_vm11 = vcmp.eq.f32.partialorder %v3295_v4, 8.507059e+37  ;;  %v10663_v38 = vadd.f32 %v10405_v50, %v3364_v39  ;;  %vm3366_vm15 = vweird.f32 %v10322_v9  ;;  %v2995_v8 = vadd.f32 %v2994_v2, %v10230_v54  ;;  %v6808_v9 = vld [vmem:[%s12053_s6 + $0x174] sm:$0xf0] }
 0x458   :  { %v7217_v42 = vpop.eup %7216  ;;  %v3147_v30 = vmul.f32 1.442695, %v3114_v29  ;;  %v3026_v0 = vadd.f32 %v3025_v16, %v2992_v62  ;;  %v3530_v63 = vpack.c.b16 %v3503_v11, %v3501_v14  ;;  %v3290_v36 = vadd.f32 %v7215_v25, %v3289_v56  ;;  %v6775_v62 = vld [vmem:[%s12053_s6 + $0x74] sm:$0xf]  ;;  %vm10752_vm9 = vmor %vm3366_vm15, %vm3367_vm13 }
 0x459   :  { %v10639_v57 = vpop.eup %7218  ;;  %v10641_v40 = vadd.f32 1.0, %v7217_v42  ;;  %v3531_v47 = vpack.c.b16 %v3504_v17, %v3502_v23  ;;  %v3327_v3 = vand.u32 2147483648, %v10600_v5  ;;  %vm3321_vm4 = vweird.f32 %v10600_v5 }
 0x45a   :  { %v10644_v34 = vpop.eup %7220  ;;  %7222 = vpow2.f32 %v3147_v30  ;;  %v3060_v35 = vadd.f32 %v3059_v15, %v3026_v0  ;;  %3538 = vrot.lane.b32.xlu1 %v3530_v63, %s7328_s26  ;;  %v3294_v45 = vsel %vm3293_vm14, %v7215_v25, %v3290_v36  ;;  %v3317_v14 = vmul.f32 %v10639_v57, %v10600_v5  ;;  %v3096_v56 = vpop.f32.mrf.mxu3 }
 0x45b   :  { %7224 = vrcp.f32 %v10641_v40  ;;  %v3299_v27 = vsel %vm3296_vm11, %v3298_v6, %v3294_v45  ;;  %v10657_v20 = vmul.f32 %v10644_v34, %v10590_v48  ;;  %vm3322_vm0 = vweird.f32 %v10639_v57 }
 0x45c   :  { %v3094_v37 = vadd.f32 %v3093_v59, %v3060_v35  ;;  %v10660_v21 = vpack.c.bf16 %v3299_v27, %v10495_v13  ;;  %v3318_v25 = vsub.f32 1.0, %v3317_v14  ;;  %vm10678_vm1 = vcmp.eq.f32.partialorder %v3325_v18, 8.507059e+37  ;;  %v6082_v59 = vld [vmem:[%s12053_s6 + $0x78] sm:$0xf0]  ;;  %v2996_v30 = vpop.f32.mrf.mxu0  ;;  %vm10700_vm3 = vmor %vm3321_vm4, %vm3322_vm0  ;;  %v6074_v35 = vld [vmem:[%s12053_s6 + $0x68] sm:$0xf0] }
 0x45d   :  { %v3328_v63 = vor.u32 1.1754944e-38, %v3327_v3  ;;  %v6085_v45 = vor.u32 %v6775_v62, %v6082_v59  ;;  %v6144_v14 = vld [vmem:[%s12053_s6 + $0xf0] sm:$0xf]  ;;  %vm3351_vm10 = vweird.f32 %v10641_v40  ;;  %v3369_v59 = vsel %vm10752_vm9, %v10405_v50, %v10663_v38 }
 0x45e   :  { %v3116_v7 = vsub.f32 0.0, %v3094_v37  ;;  %v3506_v58 = vunpack.c.h.b16 %v10660_v21  ;;  %v3505_v13 = vunpack.c.l.b16 %v10660_v21  ;;  %v3319_v15 = vmul.f32 %v10639_v57, %v3318_v25  ;;  %v6792_v37 = vld [vmem:[%s12053_s6 + $0xf4] sm:$0xf0] }
 0x45f   :  { %v3028_v19 = vpop.f32.mrf.mxu2  ;;  %v3357_v25 = vand.u32 2147483648, %v10641_v40  ;;  %4114 = vmatpush.bf16.msrb.mxu0 %v6085_v45  ;;  %v6145_v62 = vor.u32 %v6792_v37, %v6144_v14  ;;  %vm3397_vm12 = vweird.f32 %v10486_v60  ;;  %vm10794_vm11 = vcmp.eq.f32.partialorder %v3370_v12, 8.507059e+37 }
 0x460   :  { %v7223_v52 = vpop.eup %7222  ;;  %v3151_v61 = vmul.f32 1.442695, %v3116_v7  ;;  %v3029_v29 = vadd.f32 %v3028_v19, %v2995_v8  ;;  %v10691_v42 = vpack.c.b16 %v3506_v58, %v3504_v17  ;;  %v10695_v5 = vpack.c.b16 %v3505_v13, %v3503_v11  ;;  %v6773_v11 = vld [vmem:[%s12053_s6 + $0x64] sm:$0xf] }
 0x461   :  { %v10685_v16 = vpop.eup %7224  ;;  %v10687_v4 = vadd.f32 1.0, %v7223_v52  ;;  %v3320_v2 = vadd.f32 %v10639_v57, %v3319_v15  ;;  %v3355_v17 = vand.u32 2147483647, %v10641_v40  ;;  %v2997_v8 = vadd.f32 %v2996_v30, %v10230_v54  ;;  %v6256_v52 = vld [vmem:[%s12053_s6 + $0x1d0] sm:$0xf]  ;;  %4027 = vmatpush.bf16.msra.mxu2 %v6145_v62 }
 0x462   :  { %7226 = vpow2.f32 %v3151_v61  ;;  %v3063_v0 = vadd.f32 %v3062_v41, %v3029_v29  ;;  %v3347_v36 = vmul.f32 %v10685_v16, %v10641_v40  ;;  %3566 = vrot.lane.b32.xlu0 %v10691_v42, %s7329_s30  ;;  %3564 = vrot.lane.b32.xlu2 %v10695_v5, %s7329_s30  ;;  %v6077_v3 = vor.u32 %v6773_v11, %v6074_v35  ;;  %v6771_v41 = vld [vmem:[%s12053_s6 + $0x54] sm:$0xf]  ;;  %v3064_v40 = vpop.f32.mrf.mxu1  ;;  %v3098_v12 = vpop.f32.mrf.mxu3  ;;  %v6790_v62 = vld [vmem:[%s12053_s6 + $0xe4] sm:$0xf0] }
 0x463   :  { %7228 = vrcp.f32 %v10687_v4  ;;  %v3324_v6 = vsel %vm10700_vm3, %v10639_v57, %v3320_v2  ;;  %3540 = vrot.lane.b32.xlu1 %v3531_v47, %s7328_s26  ;;  %4011 = vmatmul.bf16.gmra.mxu0 %v10695_v5  ;;  %v6066_v47 = vld [vmem:[%s12053_s6 + $0x58] sm:$0xf0]  ;;  %v10744_v19 = vor.u32 1.1754944e-38, %v3402_v44  ;;  %vm3352_vm8 = vweird.f32 %v10685_v16  ;;  %v6820_v44 = vld [vmem:[%s12053_s6 + $0x1d4] sm:$0xf0] }
 0x464   :  { %v3097_v27 = vadd.f32 %v3096_v56, %v3063_v0  ;;  %v3329_v18 = vsel %vm10678_vm1, %v3328_v63, %v3324_v6  ;;  %v3348_v57 = vsub.f32 1.0, %v3347_v36  ;;  %vm10764_vm2 = vcmp.eq.f32.partialorder %v3355_v17, 8.507059e+37  ;;  %vm10782_vm14 = vmor %vm3351_vm10, %vm3352_vm8  ;;  %4115 = vmatpush.bf16.msrb.mxu0 %v6077_v3  ;;  %v6769_v17 = vld [vmem:[%s12053_s6 + $0x44] sm:$0xf] }
 0x465   :  { %v10734_v7 = vpack.c.bf16 %v3329_v18, %v10577_v53  ;;  %v3358_v39 = vor.u32 1.1754944e-38, %v3357_v25  ;;  %v6069_v6 = vor.u32 %v6771_v41, %v6066_v47  ;;  %v6257_v45 = vor.u32 %v6820_v44, %v6256_v52  ;;  %v6058_v18 = vld [vmem:[%s12053_s6 + $0x48] sm:$0xf0] }
 0x466   :  { %v3118_v15 = vsub.f32 0.0, %v3097_v27  ;;  %v3349_v54 = vmul.f32 %v10685_v16, %v3348_v57  ;;  %vm3396_vm13 = vweird.f32 %v10386_v1  ;;  %v6208_v57 = vld [vmem:[%s12053_s6 + $0x170] sm:$0xf]  ;;  %v3385_v25 = vand.u32 2147483647, %v10687_v4 }
 0x467   :  { %v3030_v61 = vpop.f32.mrf.mxu2  ;;  %v3507_v29 = vunpack.c.l.b16 %v10734_v7  ;;  %4087 = vmatpush.bf16.msrb.mxu3 %v6257_v45  ;;  %v3508_v26 = vunpack.c.h.b16 %v10734_v7  ;;  %v6209_v52 = vor.u32 %v6808_v9, %v6208_v57  ;;  %vm10835_vm0 = vcmp.eq.f32.partialorder %v3400_v32, 8.507059e+37  ;;  %v6767_v7 = vld [vmem:[%s12053_s6 + $0x34] sm:$0xf]  ;;  %vm10904_vm8 = vmor %vm3396_vm13, %vm3397_vm12  ;;  %v6034_v1 = vld [vmem:[%s12053_s6 + $0x18] sm:$0xf0] }
 0x468   :  { %v7227_v56 = vpop.eup %7226  ;;  %v3155_v2 = vmul.f32 1.442695, %v3118_v15  ;;  %v3031_v30 = vadd.f32 %v3030_v61, %v2997_v8  ;;  %v3350_v0 = vadd.f32 %v10685_v16, %v3349_v54  ;;  %v3394_v8 = vmul.f32 %v10486_v60, %v3393_v33  ;;  %v6136_v54 = vld [vmem:[%s12053_s6 + $0xe0] sm:$0xf]  ;;  %4116 = vmatpush.bf16.msrb.mxu0 %v6069_v6 }
 0x469   :  { %v10774_v63 = vpop.eup %7228  ;;  %v10776_v36 = vadd.f32 1.0, %v7227_v56  ;;  %v3532_v11 = vpack.c.b16 %v3507_v29, %v3505_v13  ;;  %v3387_v15 = vand.u32 2147483648, %v10687_v4  ;;  %v6061_v33 = vor.u32 %v6769_v17, %v6058_v18  ;;  %4056 = vmatpush.bf16.msrb.mxu1 %v6209_v52  ;;  %v6042_v18 = vld [vmem:[%s12053_s6 + $0x28] sm:$0xf0]  ;;  %v6200_v13 = vld [vmem:[%s12053_s6 + $0x160] sm:$0xf] }
 0x46a   :  { %7230 = vpow2.f32 %v3155_v2  ;;  %v3065_v14 = vadd.f32 %v3064_v40, %v3031_v30  ;;  %v3354_v37 = vsel %vm10782_vm14, %v10685_v16, %v3350_v0  ;;  %v3377_v27 = vmul.f32 %v10774_v63, %v10687_v4  ;;  %v6050_v2 = vld [vmem:[%s12053_s6 + $0x38] sm:$0xf0]  ;;  %v6120_v56 = vld [vmem:[%s12053_s6 + $0xc0] sm:$0xf] }
 0x46b   :  { %7232 = vrcp.f32 %v10776_v36  ;;  %3542 = vrot.lane.b32.xlu2 %v3532_v11, %s7328_s26  ;;  %v3359_v16 = vsel %vm10764_vm2, %v3358_v39, %v3354_v37  ;;  %vm3382_vm15 = vweird.f32 %v10774_v63  ;;  %vm3381_vm4 = vweird.f32 %v10687_v4 }
 0x46c   :  { %v3099_v3 = vadd.f32 %v3098_v12, %v3065_v14  ;;  %v10819_v41 = vpack.c.bf16 %v3359_v16, %v10630_v46  ;;  %v3378_v47 = vsub.f32 1.0, %v3377_v27  ;;  %vm10846_vm1 = vcmp.eq.f32.partialorder %v3385_v25, 8.507059e+37  ;;  %vm10868_vm3 = vmor %vm3381_vm4, %vm3382_vm15  ;;  %4117 = vmatpush.bf16.msrb.mxu0 %v6061_v33  ;;  %v6806_v12 = vld [vmem:[%s12053_s6 + $0x164] sm:$0xf0] }
 0x46d   :  { %v3395_v0 = vadd.f32 %v10486_v60, %v3394_v8  ;;  %v6137_v32 = vor.u32 %v6790_v62, %v6136_v54  ;;  %v3533_v45 = vpack.c.b16 %v3508_v26, %v3506_v58  ;;  %v3388_v37 = vor.u32 1.1754944e-38, %v3387_v15  ;;  %v6818_v15 = vld [vmem:[%s12053_s6 + $0x1c4] sm:$0xf0]  ;;  %v6128_v62 = vld [vmem:[%s12053_s6 + $0xd0] sm:$0xf] }
 0x46e   :  { %v3120_v46 = vsub.f32 0.0, %v3099_v3  ;;  %v3510_v44 = vunpack.c.h.b16 %v10819_v41  ;;  %v3509_v61 = vunpack.c.l.b16 %v10819_v41  ;;  %v3379_v43 = vmul.f32 %v10774_v63, %v3378_v47  ;;  %v6248_v47 = vld [vmem:[%s12053_s6 + $0x1c0] sm:$0xf] }
 0x46f   :  { %v6053_v27 = vor.u32 %v6767_v7, %v6050_v2  ;;  %4028 = vmatpush.bf16.msra.mxu2 %v6137_v32  ;;  %v3500_v57 = vunpack.c.h.b16 %v10562_v49  ;;  %v3430_v53 = vand.u32 2147483647, %v10498_v55  ;;  %v3453_v16 = vsub.f32 1.0, %v10657_v20  ;;  %v6192_v7 = vld [vmem:[%s12053_s6 + $0x150] sm:$0xf] }
 0x470   :  { %v7231_v39 = vpop.eup %7230  ;;  %v3159_v40 = vmul.f32 1.442695, %v3120_v46  ;;  %v10853_v11 = vpack.c.b16 %v3510_v44, %v3508_v26  ;;  %v10857_v35 = vpack.c.b16 %v3509_v61, %v3507_v29  ;;  %v3380_v4 = vadd.f32 %v10774_v63, %v3379_v43  ;;  %v6765_v29 = vld [vmem:[%s12053_s6 + $0x24] sm:$0xf]  ;;  %v6788_v26 = vld [vmem:[%s12053_s6 + $0xd4] sm:$0xf0] }
 0x471   :  { %v10860_v6 = vpop.eup %7232  ;;  %v10862_v17 = vadd.f32 1.0, %v7231_v39  ;;  %v3417_v25 = vand.u32 2147483648, %v10776_v36  ;;  %4118 = vmatpush.bf16.msrb.mxu0 %v6053_v27  ;;  %v6045_v8 = vor.u32 %v6765_v29, %v6042_v18  ;;  %v6201_v3 = vor.u32 %v6806_v12, %v6200_v13  ;;  %v6804_v2 = vld [vmem:[%s12053_s6 + $0x154] sm:$0xf0]  ;;  %v6240_v32 = vld [vmem:[%s12053_s6 + $0x1b0] sm:$0xf] }
 0x472   :  { %7234 = vpow2.f32 %v3159_v40  ;;  %3570 = vrot.lane.b32.xlu1 %v10853_v11, %s7329_s30  ;;  %3568 = vrot.lane.b32.xlu0 %v10857_v35, %s7329_s30  ;;  %v3384_v21 = vsel %vm10868_vm3, %v10774_v63, %v3380_v4  ;;  %v3407_v58 = vmul.f32 %v10860_v6, %v10776_v36  ;;  %v3374_v63 = vsel %vm10794_vm11, %v10619_v51, %v3369_v59  ;;  %v6763_v59 = vld [vmem:[%s12053_s6 + $0x14] sm:$0xf]  ;;  %v6816_v39 = vld [vmem:[%s12053_s6 + $0x1b4] sm:$0xf0] }
 0x473   :  { %7236 = vrcp.f32 %v10862_v17  ;;  %3544 = vrot.lane.b32.xlu2 %v3533_v45, %s7328_s26  ;;  %v3389_v9 = vsel %vm10846_vm1, %v3388_v37, %v3384_v21  ;;  %4016 = vmatmul.bf16.gmra.mxu0 %v10857_v35  ;;  %v3399_v51 = vsel %vm10904_vm8, %v10486_v60, %v3395_v0  ;;  %v10929_v60 = vpack.c.b16 %v3502_v23, %v3500_v57  ;;  %v6786_v0 = vld [vmem:[%s12053_s6 + $0xc4] sm:$0xf0]  ;;  %v6761_v21 = vld [vmem:[%s12053_s6 + $0x4] sm:$0xf]  ;;  %v6812_v12 = vld [vmem:[%s12053_s6 + $0x194] sm:$0xf0] }
 0x474   :  { %v10910_v50 = vpack.c.bf16 %v3389_v9, %v3374_v63  ;;  %v3408_v38 = vsub.f32 1.0, %v3407_v58  ;;  %vm3412_vm9 = vweird.f32 %v10860_v6  ;;  %v3415_v23 = vand.u32 2147483647, %v10776_v36  ;;  %4057 = vmatpush.bf16.msrb.mxu1 %v6201_v3  ;;  %v6026_v58 = vld [vmem:[%s12053_s6 + $0x8] sm:$0xf0] }
 0x475   :  { %v3404_v33 = vsel %vm10835_vm0, %v10744_v19, %v3399_v51  ;;  %v3424_v52 = vmul.f32 %v10572_v28, %v3423_v22  ;;  %v6249_v46 = vor.u32 %v6818_v15, %v6248_v47  ;;  %v6129_v43 = vor.u32 %v6788_v26, %v6128_v62  ;;  %4119 = vmatpush.bf16.msrb.mxu0 %v6045_v8  ;;  %v6096_v8 = vld [vmem:[%s12053_s6 + $0x90] sm:$0xf] }
 0x476   :  { %v3511_v54 = vunpack.c.l.b16 %v10910_v50  ;;  %v3409_v10 = vmul.f32 %v10860_v6, %v3408_v38  ;;  %vm3411_vm10 = vweird.f32 %v10776_v36  ;;  %v6193_v30 = vor.u32 %v6804_v2, %v6192_v7  ;;  %v6802_v7 = vld [vmem:[%s12053_s6 + $0x144] sm:$0xf0] }
 0x477   :  { %vm10981_vm2 = vmor %vm3411_vm10, %vm3412_vm9  ;;  %v6037_v45 = vor.u32 %v6763_v59, %v6034_v1  ;;  %4088 = vmatpush.bf16.msrb.mxu3 %v6249_v46  ;;  %v6241_v14 = vor.u32 %v6816_v39, %v6240_v32  ;;  %vm3416_vm12 = vcmp.eq.f32.partialorder %v3415_v23, 8.507059e+37  ;;  %4029 = vmatpush.bf16.msra.mxu2 %v6129_v43  ;;  %v6121_v29 = vor.u32 %v6786_v0, %v6120_v56  ;;  %v6184_v43 = vld [vmem:[%s12053_s6 + $0x140] sm:$0xf]  ;;  %v6112_v56 = vld [vmem:[%s12053_s6 + $0xb0] sm:$0xf] }
 0x478   :  { %v7235_v19 = vpop.eup %7234  ;;  %v3534_v31 = vpack.c.b16 %v3511_v54, %v3509_v61  ;;  %v3410_v22 = vadd.f32 %v10860_v6, %v3409_v10  ;;  %v3418_v61 = vor.u32 1.1754944e-38, %v3417_v25  ;;  %v3425_v57 = vadd.f32 %v10572_v28, %v3424_v52  ;;  %4058 = vmatpush.bf16.msrb.mxu1 %v6193_v30  ;;  %v6176_v32 = vld [vmem:[%s12053_s6 + $0x130] sm:$0xf]  ;;  %v6800_v39 = vld [vmem:[%s12053_s6 + $0x134] sm:$0xf0] }
 0x479   :  { %v7237_v40 = vpop.eup %7236  ;;  %v10977_v4 = vadd.f32 1.0, %v7235_v19  ;;  %vm3427_vm14 = vweird.f32 %v10572_v28  ;;  %vm3426_vm11 = vweird.f32 %v10498_v55  ;;  %v3432_v63 = vand.u32 2147483648, %v10498_v55  ;;  %4120 = vmatpush.bf16.msrb.mxu0 %v6037_v45  ;;  %v6784_v19 = vld [vmem:[%s12053_s6 + $0xb4] sm:$0xf0] }
 0x47a   :  { %3546 = vrot.lane.b32.xlu0 %v3534_v31, %s7328_s26  ;;  %v3414_v37 = vsel %vm10981_vm2, %v10860_v6, %v3410_v22  ;;  %v3437_v27 = vmul.f32 %v7237_v40, %v10862_v17  ;;  %v3512_v49 = vunpack.c.h.b16 %v10910_v50  ;;  %v3445_v51 = vand.u32 2147483647, %v10862_v17  ;;  %vm11008_vm13 = vmor %vm3426_vm11, %vm3427_vm14  ;;  %v6232_v31 = vld [vmem:[%s12053_s6 + $0x1a0] sm:$0xf] }
 0x47b   :  { %7238 = vrcp.f32 %v10977_v4  ;;  %v3419_v18 = vsel %vm3416_vm12, %v3418_v61, %v3414_v37  ;;  %v3447_v38 = vand.u32 2147483648, %v10862_v17  ;;  %v6029_v59 = vor.u32 %v6761_v21, %v6026_v58  ;;  %4089 = vmatpush.bf16.msrb.mxu3 %v6241_v14  ;;  %4030 = vmatpush.bf16.msra.mxu2 %v6121_v29 }
 0x47c   :  { %v10999_v6 = vpack.c.bf16 %v3419_v18, %v3404_v33  ;;  %v3438_v9 = vsub.f32 1.0, %v3437_v27  ;;  %vm3442_vm15 = vweird.f32 %v7237_v40  ;;  %v3429_v50 = vsel %vm11008_vm13, %v10572_v28, %v3425_v57 }
 0x47d   :  { %vm11017_vm0 = vcmp.eq.f32.partialorder %v3430_v53, 8.507059e+37  ;;  %v3454_v3 = vmul.f32 %v10644_v34, %v3453_v16  ;;  %vm3441_vm4 = vweird.f32 %v10862_v17  ;;  %v3535_v55 = vpack.c.b16 %v3512_v49, %v3510_v44  ;;  %4121 = vmatpush.bf16.msrb.mxu0 %v6029_v59  ;;  %v6782_v59 = vld [vmem:[%s12053_s6 + $0xa4] sm:$0xf0] }
 0x47e   :  { %v3513_v1 = vunpack.c.l.b16 %v10999_v6  ;;  %v3514_v13 = vunpack.c.h.b16 %v10999_v6  ;;  %v3439_v25 = vmul.f32 %v7237_v40, %v3438_v9  ;;  %v3433_v53 = vor.u32 1.1754944e-38, %v3432_v63  ;;  %vm3443_vm1 = vmor %vm3441_vm4, %vm3442_vm15  ;;  %v6168_v6 = vld [vmem:[%s12053_s6 + $0x120] sm:$0xf] }
 0x47f   :  { %v3448_v23 = vor.u32 1.1754944e-38, %v3447_v38  ;;  %v3460_v20 = vand.u32 2147483647, %v10590_v48  ;;  %vm3446_vm3 = vcmp.eq.f32.partialorder %v3445_v51, 8.507059e+37  ;;  %v3462_v17 = vand.u32 2147483648, %v10590_v48 }
 0x480   :  { %v11024_v47 = vpack.c.b16 %v3513_v1, %v3511_v54  ;;  %v11028_v15 = vpack.c.b16 %v3514_v13, %v3512_v49  ;;  %v3440_v10 = vadd.f32 %v7237_v40, %v3439_v25  ;;  %v3434_v41 = vsel %vm11017_vm0, %v3433_v53, %v3429_v50  ;;  %v6104_v38 = vld [vmem:[%s12053_s6 + $0xa0] sm:$0xf] }
 0x481   :  { %v7239_v28 = vpop.eup %7238  ;;  %vm3457_vm8 = vweird.f32 %v10644_v34  ;;  %v3475_v62 = vand.u32 2147483647, %v10977_v4  ;;  %v3455_v33 = vadd.f32 %v10644_v34, %v3454_v3  ;;  %v3477_v46 = vand.u32 2147483648, %v10977_v4  ;;  %v6780_v3 = vld [vmem:[%s12053_s6 + $0x94] sm:$0xf0] }
 0x482   :  { %3572 = vrot.lane.b32.xlu1 %v11024_v47, %s7329_s30  ;;  %3574 = vrot.lane.b32.xlu2 %v11028_v15, %s7329_s30  ;;  %v3444_v16 = vsel %vm3443_vm1, %v7237_v40, %v3440_v10  ;;  %v3467_v54 = vmul.f32 %v7239_v28, %v10977_v4  ;;  %vm3456_vm9 = vweird.f32 %v10590_v48  ;;  %v6185_v2 = vor.u32 %v6802_v7, %v6184_v43  ;;  %v6814_v48 = vld [vmem:[%s12053_s6 + $0x1a4] sm:$0xf0]  ;;  %v6088_v53 = vld [vmem:[%s12053_s6 + $0x80] sm:$0xf] }
 0x483   :  { %3548 = vrot.lane.b32.xlu0 %v3535_v55, %s7328_s26  ;;  %v3449_v44 = vsel %vm3446_vm3, %v3448_v23, %v3444_v16  ;;  %4021 = vmatmul.bf16.gmra.mxu0 %v11024_v47  ;;  %vm3472_vm10 = vweird.f32 %v7239_v28  ;;  %v6113_v0 = vor.u32 %v6784_v19, %v6112_v56  ;;  %vm11075_vm2 = vmor %vm3456_vm9, %vm3457_vm8  ;;  %v6233_v36 = vor.u32 %v6814_v48, %v6232_v31  ;;  %v6796_v55 = vld [vmem:[%s12053_s6 + $0x114] sm:$0xf0]  ;;  %v6810_v16 = vld [vmem:[%s12053_s6 + $0x184] sm:$0xf0] }
 0x484   :  { %v3489_v26 = vpack.c.bf16 %v3449_v44, %v3434_v41  ;;  %v3468_v52 = vsub.f32 1.0, %v3467_v54  ;;  %4059 = vmatpush.bf16.msrb.mxu1 %v6185_v2  ;;  %v6177_v61 = vor.u32 %v6800_v39, %v6176_v32  ;;  %v3459_v14 = vsel %vm11075_vm2, %v10644_v34, %v3455_v33  ;;  %v6152_v41 = vld [vmem:[%s12053_s6 + $0x100] sm:$0xf]  ;;  %v6794_v44 = vld [vmem:[%s12053_s6 + $0x104] sm:$0xf0] }
 0x485   :  { %vm3471_vm12 = vweird.f32 %v10977_v4  ;;  %4031 = vmatpush.bf16.msra.mxu2 %v6113_v0  ;;  %v3463_v27 = vor.u32 1.1754944e-38, %v3462_v17  ;;  %v3478_v21 = vor.u32 1.1754944e-38, %v3477_v46  ;;  %4090 = vmatpush.bf16.msrb.mxu3 %v6233_v36  ;;  %vm3461_vm11 = vcmp.eq.f32.partialorder %v3460_v20, 8.507059e+37  ;;  %v6778_v20 = vld [vmem:[%s12053_s6 + $0x84] sm:$0xf0] }
 0x486   :  { %v3528_v22 = vunpack.c.l.b16 %v3489_v26  ;;  %v3469_v30 = vmul.f32 %v7239_v28, %v3468_v52  ;;  %vm3473_vm14 = vmor %vm3471_vm12, %vm3472_vm10  ;;  %vm3476_vm13 = vcmp.eq.f32.partialorder %v3475_v62, 8.507059e+37  ;;  %v3529_v57 = vunpack.c.h.b16 %v3489_v26  ;;  %v6791_v26 = vld [vmem:[%s12053_s6 + $0xf4] sm:$0xf]  ;;  %v6146_v33 = vld [vmem:[%s12053_s6 + $0xf8] sm:$0xf0] }
 0x487   :  { %v3464_v29 = vsel %vm3461_vm11, %v3463_v27, %v3459_v14  ;;  %v6097_v10 = vor.u32 %v6780_v3, %v6096_v8  ;;  %v6089_v17 = vor.u32 %v6778_v20, %v6088_v53  ;;  %v6153_v62 = vor.u32 %v6794_v44, %v6152_v41  ;;  %v6819_v46 = vld [vmem:[%s12053_s6 + $0x1d4] sm:$0xf]  ;;  %v6258_v43 = vld [vmem:[%s12053_s6 + $0x1d8] sm:$0xf0]  ;;  %v6789_v2 = vld [vmem:[%s12053_s6 + $0xe4] sm:$0xf] }
 0x488   :  { %v3536_v45 = vpack.c.b16 %v3528_v22, %v3513_v1  ;;  %v3470_v37 = vadd.f32 %v7239_v28, %v3469_v30  ;;  %4060 = vmatpush.bf16.msrb.mxu1 %v6177_v61  ;;  %v3537_v4 = vpack.c.b16 %v3529_v57, %v3514_v13  ;;  %v6105_v1 = vor.u32 %v6782_v59, %v6104_v38  ;;  %v6798_v13 = vld [vmem:[%s12053_s6 + $0x124] sm:$0xf0]  ;;  %v6138_v56 = vld [vmem:[%s12053_s6 + $0xe8] sm:$0xf0]  ;;  %v6210_v31 = vld [vmem:[%s12053_s6 + $0x178] sm:$0xf0] }
 0x489   :  { %v6169_v25 = vor.u32 %v6798_v13, %v6168_v6  ;;  %v6149_v52 = vor.u32 %v6791_v26, %v6146_v33  ;;  %v6261_v7 = vor.u32 %v6819_v46, %v6258_v43  ;;  %v6141_v19 = vor.u32 %v6789_v2, %v6138_v56  ;;  %v6817_v30 = vld [vmem:[%s12053_s6 + $0x1c4] sm:$0xf]  ;;  %v6250_v0 = vld [vmem:[%s12053_s6 + $0x1c8] sm:$0xf0]  ;;  %v6787_v48 = vld [vmem:[%s12053_s6 + $0xd4] sm:$0xf] }
 0x48a   :  { %3550 = vrot.lane.b32.xlu1 %v3536_v45, %s7328_s26  ;;  %v3474_v58 = vsel %vm3473_vm14, %v7239_v28, %v3470_v37  ;;  %4032 = vmatpush.bf16.msra.mxu2 %v6105_v1  ;;  %v6160_v28 = vld [vmem:[%s12053_s6 + $0x110] sm:$0xf]  ;;  %v6253_v32 = vor.u32 %v6817_v30, %v6250_v0  ;;  %v6130_v39 = vld [vmem:[%s12053_s6 + $0xd8] sm:$0xf0]  ;;  %v6805_v40 = vld [vmem:[%s12053_s6 + $0x164] sm:$0xf] }
 0x48b   :  { %v3479_v18 = vsel %vm3476_vm13, %v3478_v21, %v3474_v58  ;;  %v6161_v23 = vor.u32 %v6796_v55, %v6160_v28  ;;  %v6202_v36 = vld [vmem:[%s12053_s6 + $0x168] sm:$0xf0]  ;;  %v6133_v61 = vor.u32 %v6787_v48, %v6130_v39  ;;  %v6785_v14 = vld [vmem:[%s12053_s6 + $0xc4] sm:$0xf]  ;;  %v6803_v27 = vld [vmem:[%s12053_s6 + $0x154] sm:$0xf] }
 0x48c   :  { %v3490_v63 = vpack.c.bf16 %v3479_v18, %v3464_v29  ;;  %4061 = vmatpush.bf16.msrb.mxu1 %v6169_v25  ;;  %v6205_v45 = vor.u32 %v6805_v40, %v6202_v36  ;;  %v6122_v37 = vld [vmem:[%s12053_s6 + $0xc8] sm:$0xf0]  ;;  %v6815_v58 = vld [vmem:[%s12053_s6 + $0x1b4] sm:$0xf]  ;;  %v6242_v29 = vld [vmem:[%s12053_s6 + $0x1b8] sm:$0xf0] }
 0x48d   :  { %v6125_v21 = vor.u32 %v6785_v14, %v6122_v37  ;;  %vm3554_vm15 = vcmask 261120   ;;  %vm3580_vm0 = vcmask 523264   ;;  %vm3985_vm4 = vcmask 785408   ;;  %v6234_v25 = vld [vmem:[%s12053_s6 + $0x1a8] sm:$0xf0] }
 0x48e   :  { %v3560_v34 = vunpack.c.l.b16 %v3490_v63  ;;  %v3561_v9 = vunpack.c.h.b16 %v3490_v63  ;;  %4033 = vmatpush.bf16.msra.mxu2 %v6097_v10  ;;  %v6781_v10 = vld [vmem:[%s12053_s6 + $0xa4] sm:$0xf]  ;;  %v6106_v28 = vld [vmem:[%s12053_s6 + $0xa8] sm:$0xf0]  ;;  %v6799_v55 = vld [vmem:[%s12053_s6 + $0x134] sm:$0xf] }
 0x48f   :  { %v6109_v53 = vor.u32 %v6781_v10, %v6106_v28  ;;  %v6779_v41 = vld [vmem:[%s12053_s6 + $0x94] sm:$0xf]  ;;  %v6170_v26 = vld [vmem:[%s12053_s6 + $0x128] sm:$0xf0]  ;;  %v6162_v30 = vld [vmem:[%s12053_s6 + $0x118] sm:$0xf0] }
 0x490   :  { %v3562_v49 = vpack.c.b16 %v3560_v34, %v3528_v22  ;;  %v3563_v51 = vpack.c.b16 %v3561_v9, %v3529_v57  ;;  %4062 = vmatpush.bf16.msrb.mxu1 %v6161_v23  ;;  %v6245_v57 = vor.u32 %v6815_v58, %v6242_v29  ;;  %v6178_v23 = vld [vmem:[%s12053_s6 + $0x138] sm:$0xf0]  ;;  %v6809_v0 = vld [vmem:[%s12053_s6 + $0x184] sm:$0xf]  ;;  %v6218_v48 = vld [vmem:[%s12053_s6 + $0x188] sm:$0xf0] }
 0x491   :  { %v6181_v20 = vor.u32 %v6799_v55, %v6178_v23  ;;  %v6221_v40 = vor.u32 %v6809_v0, %v6218_v48  ;;  %v6828_v23 = vld [vmem:[%s12055_s8 + $0x38] sm:$0xff] }
 0x492   :  { %3552 = vrot.lane.b32.xlu1 %v3537_v4, %s7328_s26  ;;  %3576 = vrot.lane.b32.xlu2 %v3562_v49, %s7329_s30  ;;  %v6783_v4 = vld [vmem:[%s12053_s6 + $0xb4] sm:$0xf]  ;;  %v6114_v49 = vld [vmem:[%s12053_s6 + $0xb8] sm:$0xf0] }
 0x493   :  { %3578 = vrot.lane.b32.xlu0 %v3563_v51, %s7329_s30  ;;  %4122 = vmatmul.bf16.vlgmr.msrb.gmra.mxu0 %v10593_v24  ;;  %v6224_v24 = vld [vmem:[%s12053_s6 + $0x190] sm:$0xf]  ;;  %v6801_v51 = vld [vmem:[%s12053_s6 + $0x144] sm:$0xf]  ;;  %v6117_v38 = vor.u32 %v6783_v4, %v6114_v49  ;;  %v6824_v0 = vld [vmem:[%s12055_s8 + $0x18] sm:$0xff] }
 0x494   :  { %v6225_v50 = vor.u32 %v6812_v12, %v6224_v24  ;;  %4034 = vmatpush.bf16.msra.mxu2 %v6089_v17  ;;  %4063 = vmatpush.bf16.msrb.mxu1 %v6153_v62  ;;  %v6813_v12 = vld [vmem:[%s12053_s6 + $0x1a4] sm:$0xf]  ;;  %v6811_v17 = vld [vmem:[%s12053_s6 + $0x194] sm:$0xf] }
 0x495   :  { %v6237_v3 = vor.u32 %v6813_v12, %v6234_v25  ;;  %v6797_v62 = vld [vmem:[%s12053_s6 + $0x124] sm:$0xf]  ;;  %4670 = vmatpush.bf16.msra.mxu0 %v6828_v23 }
 0x496   :  { %4091 = vmatpush.bf16.msrb.mxu3 %v6225_v50  ;;  %v6173_v43 = vor.u32 %v6797_v62, %v6170_v26  ;;  %v6826_v26 = vld [vmem:[%s12055_s8 + $0x28] sm:$0xff] }
 0x498   :  { %4143 = vmatpush.bf16.msrb.mxu2 %v6149_v52 }
 0x49c   :  { %4144 = vmatpush.bf16.msrb.mxu2 %v6141_v19  ;;  %v6090_v19 = vld [vmem:[%s12053_s6 + $0x88] sm:$0xf0] }
 0x4a0   :  { %4145 = vmatpush.bf16.msrb.mxu2 %v6133_v61  ;;  %v6793_v61 = vld [vmem:[%s12053_s6 + $0x104] sm:$0xf] }
 0x4a3   :  { %4127 = vmatmul.bf16.gmra.mxu0 %v10695_v5  ;;  %v6216_v5 = vld [vmem:[%s12053_s6 + $0x180] sm:$0xf] }
 0x4a4   :  { %v6217_v54 = vor.u32 %v6810_v16, %v6216_v5  ;;  %4146 = vmatpush.bf16.msrb.mxu2 %v6125_v21 }
 0x4a6   :  { %4092 = vmatpush.bf16.msrb.mxu3 %v6217_v54  ;;  %v6226_v54 = vld [vmem:[%s12053_s6 + $0x198] sm:$0xf0] }
 0x4a7   :  { %v6229_v44 = vor.u32 %v6811_v17, %v6226_v54 }
 0x4a8   :  { %4147 = vmatpush.bf16.msrb.mxu2 %v6117_v38 }
 0x4aa   :  { %4203 = vmatpush.bf16.msra.mxu3 %v6261_v7 }
 0x4ac   :  { %4148 = vmatpush.bf16.msrb.mxu2 %v6109_v53 }
 0x4ae   :  { %4204 = vmatpush.bf16.msra.mxu3 %v6253_v32 }
 0x4b2   :  { %4205 = vmatpush.bf16.msra.mxu3 %v6245_v57 }
 0x4b3   :  { %4132 = vmatmul.bf16.gmra.mxu0 %v10857_v35  ;;  %v6807_v35 = vld [vmem:[%s12053_s6 + $0x174] sm:$0xf] }
 0x4b4   :  { %v6213_v22 = vor.u32 %v6807_v35, %v6210_v31  ;;  %v6777_v35 = vld [vmem:[%s12053_s6 + $0x84] sm:$0xf]  ;;  %v6795_v31 = vld [vmem:[%s12053_s6 + $0x114] sm:$0xf] }
 0x4b5   :  { %v6165_v39 = vor.u32 %v6795_v31, %v6162_v30 }
 0x4b6   :  { %4172 = vmatpush.bf16.msra.mxu1 %v6213_v22  ;;  %4206 = vmatpush.bf16.msra.mxu3 %v6237_v3  ;;  %v6093_v22 = vor.u32 %v6777_v35, %v6090_v19 }
 0x4ba   :  { %4173 = vmatpush.bf16.msra.mxu1 %v6205_v45  ;;  %4207 = vmatpush.bf16.msra.mxu3 %v6229_v44  ;;  %v6154_v45 = vld [vmem:[%s12053_s6 + $0x108] sm:$0xf0] }
 0x4bb   :  { %v6157_v14 = vor.u32 %v6793_v61, %v6154_v45  ;;  %v6823_v45 = vld [vmem:[%s12055_s8 + $0x10] sm:$0xff] }
 0x4bc   :  { %v3565_v34 = vpop.permute.xlu2 %3564 }
 0x4be   :  { %4208 = vmatpush.bf16.msra.mxu3 %v6221_v40 }
 0x4c3   :  { %4137 = vmatmul.bf16.gmra.mxu0 %v11024_v47  ;;  %v6194_v47 = vld [vmem:[%s12053_s6 + $0x158] sm:$0xf0] }
 0x4c4   :  { %v6197_v18 = vor.u32 %v6803_v27, %v6194_v47 }
 0x4c5   :  { %v3543_v50 = vpop.permute.xlu2 %3542 }
 0x4c6   :  { %4174 = vmatpush.bf16.msra.mxu1 %v6197_v18  ;;  %v11249_v5 = vsel %vm3554_vm15, %v10691_v42, %v3543_v50  ;;  %v6098_v42 = vld [vmem:[%s12053_s6 + $0x98] sm:$0xf0] }
 0x4c7   :  { %v6101_v46 = vor.u32 %v6779_v41, %v6098_v42 }
 0x4c9   :  { %4149 = vmatpush.bf16.msrb.mxu2 %v6101_v46 }
 0x4cc   :  { %v3539_v63 = vpop.permute.xlu1 %3538 }
 0x4cd   :  { %v11204_v9 = vsel %vm3554_vm15, %v10929_v60, %v3539_v63  ;;  %v6186_v60 = vld [vmem:[%s12053_s6 + $0x148] sm:$0xf0]  ;;  %v3545_v16 = vpop.permute.xlu2 %3544  ;;  %4150 = vmatpush.bf16.msrb.mxu2 %v6093_v22 }
 0x4ce   :  { %4035 = vmatmul.bf16.vlgmr.msra.gmra.mxu2 %v11204_v9  ;;  %v6189_v59 = vor.u32 %v6801_v51, %v6186_v60  ;;  %v3556_v7 = vsel %vm3554_vm15, %v3543_v50, %v3545_v16  ;;  %v6827_v16 = vld [vmem:[%s12055_s8 + $0x30] sm:$0xff] }
 0x4cf   :  { %4671 = vmatpush.bf16.msra.mxu0 %v6827_v16 }
 0x4d0   :  { %4175 = vmatpush.bf16.msra.mxu1 %v6189_v59 }
 0x4d3   :  { %4672 = vmatpush.bf16.msra.mxu0 %v6826_v26 }
 0x4d4   :  { %v3567_v6 = vpop.permute.xlu0 %3566  ;;  %4176 = vmatpush.bf16.msra.mxu1 %v6181_v20 }
 0x4d5   :  { %v11220_v1 = vsel %vm3580_vm0, %v3565_v34, %v3567_v6  ;;  %v3541_v13 = vpop.permute.xlu1 %3540 }
 0x4d6   :  { %v3555_v24 = vsel %vm3554_vm15, %v3539_v63, %v3541_v13  ;;  %6262 = vmatmul.msk.bf16.vlgmr.msrb.gmra.mxu3 %vm3985_vm4, %v11220_v1 }
 0x4d7   :  { %v11232_v8 = vsel %vm3580_vm0, %v3555_v24, %v3565_v34 }
 0x4d8   :  { %4064 = vmatmul.bf16.vlgmr.msrb.gmra.mxu1 %v11232_v8 }
 0x4d9   :  { %4177 = vmatpush.bf16.msra.mxu1 %v6173_v43 }
 0x4dc   :  { %v3575_v37 = vpop.permute.xlu2 %3574 }
 0x4dd   :  { %4178 = vmatpush.bf16.msra.mxu1 %v6165_v39 }
 0x4de   :  { %4040 = vmatmul.bf16.gmra.mxu2 %v11249_v5 }
 0x4e1   :  { %4179 = vmatpush.bf16.msra.mxu1 %v6157_v14 }
 0x4e4   :  { %v3571_v33 = vpop.permute.xlu1 %3570  ;;  %v3569_v52 = vpop.permute.xlu0 %3568 }
 0x4e5   :  { %v3582_v2 = vsel %vm3580_vm0, %v3569_v52, %v3571_v33  ;;  %v3609_v56 = vsel %vm3580_vm0, %v3556_v7, %v3569_v52 }
 0x4e6   :  { %6263 = vmatmul.msk.bf16.gmra.mxu3 %vm3985_vm4, %v3582_v2 }
 0x4e8   :  { %4069 = vmatmul.bf16.gmra.mxu1 %v3609_v56 }
 0x4ec   :  { %v3547_v32 = vpop.permute.xlu0 %3546  ;;  %v3577_v63 = vpop.permute.xlu2 %3576 }
 0x4ed   :  { %v3596_v36 = vsel %vm3554_vm15, %v10853_v11, %v3547_v32 }
 0x4ee   :  { %4045 = vmatmul.bf16.gmra.mxu2 %v3596_v36 }
 0x4f4   :  { %v3573_v27 = vpop.permute.xlu1 %3572 }
 0x4f5   :  { %v3583_v21 = vsel %vm3580_vm0, %v3573_v27, %v3575_v37  ;;  %v3549_v47 = vpop.permute.xlu0 %3548 }
 0x4f6   :  { %v3557_v11 = vsel %vm3554_vm15, %v3547_v32, %v3549_v47  ;;  %6264 = vmatmul.msk.bf16.gmra.mxu3 %vm3985_vm4, %v3583_v21 }
 0x4f7   :  { %v3613_v58 = vsel %vm3580_vm0, %v3557_v11, %v3573_v27 }
 0x4f8   :  { %4074 = vmatmul.bf16.gmra.mxu1 %v3613_v58 }
 0x4fc   :  { %v3551_v29 = vpop.permute.xlu1 %3550 }
 0x4fd   :  { %v3600_v18 = vsel %vm3554_vm15, %v11028_v15, %v3551_v29  ;;  %v4007_v15 = vpop.f32.mrf.mxu0 }
 0x4fe   :  { %4050 = vmatmul.bf16.gmra.mxu2 %v3600_v18 }
 0x504   :  { %v3553_v57 = vpop.permute.xlu1 %3552 }
 0x505   :  { %v3558_v34 = vsel %vm3554_vm15, %v3551_v29, %v3553_v57  ;;  %v3579_v4 = vpop.permute.xlu0 %3578  ;;  %v4009_v38 = vpop.f32.mrf.mxu0 }
 0x506   :  { %v3584_v49 = vsel %vm3580_vm0, %v3577_v63, %v3579_v4  ;;  %v3617_v51 = vsel %vm3580_vm0, %v3558_v34, %v3577_v63  ;;  %v6822_v63 = vld [vmem:[%s12055_s8 + $0x8] sm:$0xff] }
 0x507   :  { %6265 = vmatmul.msk.bf16.gmra.mxu3 %vm3985_vm4, %v3584_v49 }
 0x508   :  { %4079 = vmatmul.bf16.gmra.mxu1 %v3617_v51 }
 0x50d   :  { %v4012_v60 = vpop.f32.mrf.mxu0 }
 0x50e   :  { %4151 = vmatmul.bf16.vlgmr.msrb.gmra.mxu2 %v11204_v9  ;;  %v11321_v9 = vld [vmem:[%s12054_s7] sm:$0x3] }
 0x50f   :  { %v11324_v59 = vperm.slane %v11321_v9, 0 }
 0x511   :  { %v4008_v13 = vadd.f32 %v4007_v15, %v11324_v59  ;;  %v4010_v10 = vadd.f32 %v4009_v38, %v11324_v59  ;;  %v4013_v44 = vadd.f32 %v4012_v60, %v11324_v59 }
 0x515   :  { %v4014_v6 = vpop.f32.mrf.mxu0 }
 0x516   :  { %v4015_v22 = vadd.f32 %v4014_v6, %v11324_v59  ;;  %v6821_v6 = vld [vmem:[%s12055_s8] sm:$0xff] }
 0x517   :  { %6266 = vmatmul.msk.bf16.vlgmr.msra.gmra.mxu3 %vm3985_vm4, %v11220_v1 }
 0x518   :  { %4180 = vmatmul.bf16.vlgmr.msra.gmra.mxu1 %v11232_v8 }
 0x51d   :  { %v4017_v25 = vpop.f32.mrf.mxu0 }
 0x51e   :  { %4156 = vmatmul.bf16.gmra.mxu2 %v11249_v5  ;;  %v4018_v29 = vadd.f32 %v4017_v25, %v11324_v59 }
 0x525   :  { %v4019_v42 = vpop.f32.mrf.mxu0 }
 0x526   :  { %v4020_v25 = vadd.f32 %v4019_v42, %v11324_v59 }
 0x527   :  { %6267 = vmatmul.msk.bf16.gmra.mxu3 %vm3985_vm4, %v3582_v2  ;;  %v6825_v2 = vld [vmem:[%s12055_s8 + $0x20] sm:$0xff] }
 0x528   :  { %4185 = vmatmul.bf16.gmra.mxu1 %v3609_v56  ;;  %4673 = vmatpush.bf16.msra.mxu0 %v6825_v2 }
 0x52c   :  { %4674 = vmatpush.bf16.msra.mxu0 %v6824_v0  ;;  %v6834_v0 = vld [vmem:[%s12055_s8 + $0x68] sm:$0xff] }
 0x52d   :  { %v11348_v48 = vpop.f32.mrf.mxu0 }
 0x52e   :  { %4161 = vmatmul.bf16.gmra.mxu2 %v3596_v36 }
 0x530   :  { %4675 = vmatpush.bf16.msra.mxu0 %v6823_v45 }
 0x534   :  { %4676 = vmatpush.bf16.msra.mxu0 %v6822_v63 }
 0x535   :  { %v11367_v15 = vpop.f32.mrf.mxu0 }
 0x537   :  { %6268 = vmatmul.msk.bf16.gmra.mxu3 %vm3985_vm4, %v3583_v21 }
 0x538   :  { %4190 = vmatmul.bf16.gmra.mxu1 %v3613_v58  ;;  %v6836_v58 = vld [vmem:[%s12055_s8 + $0x78] sm:$0xff]  ;;  %4677 = vmatpush.bf16.msra.mxu0 %v6821_v6 }
 0x539   :  { %4699 = vmatpush.bf16.msra.mxu2 %v6836_v58 }
 0x53e   :  { %4166 = vmatmul.bf16.gmra.mxu2 %v3600_v18 }
 0x547   :  { %6269 = vmatmul.msk.bf16.gmra.mxu3 %vm3985_vm4, %v3584_v49 }
 0x548   :  { %4195 = vmatmul.bf16.gmra.mxu1 %v3617_v51 }
 0x551   :  { %v4036_v1 = vpop.f32.mrf.mxu2 }
 0x552   :  { %v4037_v24 = vadd.f32 %v4036_v1, %v4008_v13 }
 0x555   :  { %v4065_v12 = vpop.f32.mrf.mxu1 }
 0x556   :  { %v4066_v50 = vadd.f32 %v4065_v12, %v4037_v24 }
 0x559   :  { %v4038_v8 = vpop.f32.mrf.mxu2  ;;  %v4094_v3 = vpop.f32.mrf.mxu3 }
 0x55a   :  { %v4095_v28 = vadd.f32 %v4094_v3, %v4066_v50  ;;  %v4039_v55 = vadd.f32 %v4038_v8, %v4010_v10  ;;  %v6835_v3 = vld [vmem:[%s12055_s8 + $0x70] sm:$0xff] }
 0x55b   :  { %4700 = vmatpush.bf16.msra.mxu2 %v6835_v3 }
 0x55c   :  { %v4230_v53 = vsub.f32 0.0, %v4095_v28 }
 0x55d   :  { %v4067_v20 = vpop.f32.mrf.mxu1 }
 0x55e   :  { %v4246_v5 = vmul.f32 1.442695, %v4230_v53  ;;  %v4068_v17 = vadd.f32 %v4067_v20, %v4039_v55 }
 0x55f   :  { %4701 = vmatpush.bf16.msra.mxu2 %v6834_v0 }
 0x560   :  { %7240 = vpow2.f32 %v4246_v5 }
 0x561   :  { %v4041_v54 = vpop.f32.mrf.mxu2  ;;  %v4096_v41 = vpop.f32.mrf.mxu3 }
 0x562   :  { %v4097_v62 = vadd.f32 %v4096_v41, %v4068_v17  ;;  %v4042_v33 = vadd.f32 %v4041_v54, %v4013_v44 }
 0x564   :  { %v4232_v52 = vsub.f32 0.0, %v4097_v62 }
 0x565   :  { %v4070_v46 = vpop.f32.mrf.mxu1 }
 0x566   :  { %v7241_v43 = vpop.eup %7240  ;;  %v4250_v7 = vmul.f32 1.442695, %v4232_v52  ;;  %v4071_v35 = vadd.f32 %v4070_v46, %v4042_v33 }
 0x567   :  { %v11341_v56 = vadd.f32 1.0, %v7241_v43 }
 0x568   :  { %7242 = vpow2.f32 %v4250_v7  ;;  %v11398_v7 = vpop.f32.mrf.mxu0 }
 0x569   :  { %7244 = vrcp.f32 %v11341_v56  ;;  %v4043_v19 = vpop.f32.mrf.mxu2  ;;  %v4099_v31 = vpop.f32.mrf.mxu3  ;;  %vm4299_vm3 = vweird.f32 %v11341_v56  ;;  %v4305_v53 = vand.u32 2147483648, %v11341_v56  ;;  %v4303_v20 = vand.u32 2147483647, %v11341_v56 }
 0x56a   :  { %v4100_v30 = vadd.f32 %v4099_v31, %v4071_v35  ;;  %v4044_v32 = vadd.f32 %v4043_v19, %v4015_v22 }
 0x56b   :  { %v4306_v52 = vor.u32 1.1754944e-38, %v4305_v53  ;;  %vm4304_vm12 = vcmp.eq.f32.partialorder %v4303_v20, 8.507059e+37 }
 0x56c   :  { %v4234_v39 = vsub.f32 0.0, %v4100_v30 }
 0x56d   :  { %v4072_v40 = vpop.f32.mrf.mxu1 }
 0x56e   :  { %v7243_v36 = vpop.eup %7242  ;;  %v4254_v61 = vmul.f32 1.442695, %v4234_v39  ;;  %v4073_v21 = vadd.f32 %v4072_v40, %v4044_v32  ;;  %v4023_v32 = vadd.f32 %v11348_v48, %v11324_v59  ;;  %v4025_v48 = vadd.f32 %v11367_v15, %v11324_v59 }
 0x56f   :  { %v11353_v14 = vpop.eup %7244  ;;  %v11355_v37 = vadd.f32 1.0, %v7243_v36 }
 0x570   :  { %v4295_v27 = vmul.f32 %v11353_v14, %v11341_v56  ;;  %7246 = vpow2.f32 %v4254_v61  ;;  %vm4300_vm1 = vweird.f32 %v11353_v14 }
 0x571   :  { %7248 = vrcp.f32 %v11355_v37  ;;  %v4046_v47 = vpop.f32.mrf.mxu2  ;;  %v4101_v11 = vpop.f32.mrf.mxu3  ;;  %v4335_v23 = vand.u32 2147483648, %v11355_v37  ;;  %v4333_v17 = vand.u32 2147483647, %v11355_v37  ;;  %vm11388_vm9 = vmor %vm4299_vm3, %vm4300_vm1  ;;  %vm4329_vm10 = vweird.f32 %v11355_v37 }
 0x572   :  { %v4296_v18 = vsub.f32 1.0, %v4295_v27  ;;  %v4102_v57 = vadd.f32 %v4101_v11, %v4073_v21  ;;  %v4047_v34 = vadd.f32 %v4046_v47, %v4018_v29 }
 0x573   :  { %v4336_v46 = vor.u32 1.1754944e-38, %v4335_v23  ;;  %vm4334_vm14 = vcmp.eq.f32.partialorder %v4333_v17, 8.507059e+37 }
 0x574   :  { %v4236_v4 = vsub.f32 0.0, %v4102_v57  ;;  %v4297_v38 = vmul.f32 %v11353_v14, %v4296_v18  ;;  %v4125_v57 = vpop.f32.mrf.mxu0 }
 0x575   :  { %v4075_v49 = vpop.f32.mrf.mxu1 }
 0x576   :  { %v7247_v51 = vpop.eup %7246  ;;  %v4258_v60 = vmul.f32 1.442695, %v4236_v4  ;;  %v4076_v12 = vadd.f32 %v4075_v49, %v4047_v34  ;;  %v4298_v55 = vadd.f32 %v11353_v14, %v4297_v38 }
 0x577   :  { %v7249_v1 = vpop.eup %7248  ;;  %v11373_v13 = vadd.f32 1.0, %v7247_v51 }
 0x578   :  { %v4325_v24 = vmul.f32 %v7249_v1, %v11355_v37  ;;  %7250 = vpow2.f32 %v4258_v60  ;;  %vm4330_vm8 = vweird.f32 %v7249_v1  ;;  %v4302_v62 = vsel %vm11388_vm9, %v11353_v14, %v4298_v55 }
 0x579   :  { %7252 = vrcp.f32 %v11373_v13  ;;  %v4048_v50 = vpop.f32.mrf.mxu2  ;;  %v4104_v8 = vpop.f32.mrf.mxu3  ;;  %vm4331_vm2 = vmor %vm4329_vm10, %vm4330_vm8  ;;  %v4307_v31 = vsel %vm4304_vm12, %v4306_v52, %v4302_v62  ;;  %v4363_v4 = vand.u32 2147483647, %v11373_v13  ;;  %vm4359_vm13 = vweird.f32 %v11373_v13 }
 0x57a   :  { %v4326_v10 = vsub.f32 1.0, %v4325_v24  ;;  %v4105_v28 = vadd.f32 %v4104_v8, %v4076_v12  ;;  %v4049_v16 = vadd.f32 %v4048_v50, %v4020_v25  ;;  %v4365_v51 = vand.u32 2147483648, %v11373_v13 }
 0x57b   :  { %v11416_v24 = vperm.slane %v11321_v9, 1  ;;  %vm4364_vm3 = vcmp.eq.f32.partialorder %v4363_v4, 8.507059e+37 }
 0x57c   :  { %v4327_v5 = vmul.f32 %v7249_v1, %v4326_v10  ;;  %v4238_v42 = vsub.f32 0.0, %v4105_v28  ;;  %v4366_v9 = vor.u32 1.1754944e-38, %v4365_v51 }
 0x57d   :  { %v4077_v41 = vpop.f32.mrf.mxu1  ;;  %v4124_v54 = vadd.f32 %v11398_v7, %v11416_v24 }
 0x57e   :  { %v7251_v44 = vpop.eup %7250  ;;  %v4328_v26 = vadd.f32 %v7249_v1, %v4327_v5  ;;  %v4078_v2 = vadd.f32 %v4077_v41, %v4049_v16  ;;  %v4262_v39 = vmul.f32 1.442695, %v4238_v42  ;;  %v4128_v42 = vpop.f32.mrf.mxu0 }
 0x57f   :  { %v11396_v33 = vpop.eup %7252  ;;  %v4284_v43 = vadd.f32 1.0, %v7251_v44 }
 0x580   :  { %v4332_v56 = vsel %vm4331_vm2, %v7249_v1, %v4328_v26  ;;  %v4355_v30 = vmul.f32 %v11396_v33, %v11373_v13  ;;  %vm4360_vm11 = vweird.f32 %v11396_v33 }
 0x581   :  { %7254 = vrcp.f32 %v4284_v43  ;;  %v4051_v35 = vpop.f32.mrf.mxu2  ;;  %v4106_v19 = vpop.f32.mrf.mxu3  ;;  %v4337_v22 = vsel %vm4334_vm14, %v4336_v46, %v4332_v56  ;;  %v4393_v38 = vand.u32 2147483647, %v4284_v43  ;;  %v4395_v60 = vand.u32 2147483648, %v4284_v43  ;;  %vm11420_vm0 = vmor %vm4359_vm13, %vm4360_vm11 }
 0x582   :  { %v4107_v40 = vadd.f32 %v4106_v19, %v4078_v2  ;;  %v4534_v36 = vpack.c.bf16 %v4337_v22, %v4307_v31  ;;  %v4356_v61 = vsub.f32 1.0, %v4355_v30  ;;  %v4052_v45 = vadd.f32 %v4051_v35, %v4023_v32 }
 0x583   :  { %7256 = vpow2.f32 %v4262_v39  ;;  %vm4389_vm1 = vweird.f32 %v4284_v43  ;;  %vm4394_vm9 = vcmp.eq.f32.partialorder %v4393_v38, 8.507059e+37  ;;  %v4396_v28 = vor.u32 1.1754944e-38, %v4395_v60 }
 0x584   :  { %v4240_v14 = vsub.f32 0.0, %v4107_v40  ;;  %4678 = vmatmul.bf16.vlgmr.msra.gmra.mxu0 %v4534_v36  ;;  %v4357_v21 = vmul.f32 %v11396_v33, %v4356_v61  ;;  %v4126_v35 = vadd.f32 %v4125_v57, %v11416_v24  ;;  %v6832_v40 = vld [vmem:[%s12055_s8 + $0x58] sm:$0xff]  ;;  %v4129_v60 = vadd.f32 %v4128_v42, %v11416_v24 }
 0x585   :  { %v4080_v37 = vpop.f32.mrf.mxu1 }
 0x586   :  { %v4266_v27 = vmul.f32 1.442695, %v4240_v14  ;;  %v4081_v11 = vadd.f32 %v4080_v37, %v4052_v45  ;;  %v4358_v34 = vadd.f32 %v11396_v33, %v4357_v21  ;;  %v4130_v14 = vpop.f32.mrf.mxu0 }
 0x587   :  { %v7255_v47 = vpop.eup %7254 }
 0x588   :  { %7258 = vpow2.f32 %v4266_v27  ;;  %v4385_v58 = vmul.f32 %v7255_v47, %v4284_v43  ;;  %vm4390_vm15 = vweird.f32 %v7255_v47  ;;  %v4362_v8 = vsel %vm11420_vm0, %v11396_v33, %v4358_v34  ;;  %v6833_v33 = vld [vmem:[%s12055_s8 + $0x60] sm:$0xff] }
 0x589   :  { %v4053_v29 = vpop.f32.mrf.mxu2  ;;  %v7257_v6 = vpop.eup %7256  ;;  %vm4391_vm8 = vmor %vm4389_vm1, %vm4390_vm15  ;;  %v4367_v16 = vsel %vm4364_vm3, %v4366_v9, %v4362_v8  ;;  %4702 = vmatpush.bf16.msra.mxu2 %v6833_v33  ;;  %v6829_v33 = vld [vmem:[%s12055_s8 + $0x40] sm:$0xff] }
 0x58a   :  { %v4109_v18 = vpop.f32.mrf.mxu3  ;;  %v4386_v49 = vsub.f32 1.0, %v4385_v58  ;;  %v4054_v1 = vadd.f32 %v4053_v29, %v4025_v48  ;;  %v11427_v10 = vadd.f32 1.0, %v7257_v6 }
 0x58b   :  { %v4110_v63 = vadd.f32 %v4109_v18, %v4081_v11 }
 0x58c   :  { %v4387_v15 = vmul.f32 %v7255_v47, %v4386_v49  ;;  %v4423_v21 = vand.u32 2147483647, %v11427_v10  ;;  %v4425_v29 = vand.u32 2147483648, %v11427_v10  ;;  %vm4419_vm12 = vweird.f32 %v11427_v10 }
 0x58d   :  { %v4242_v59 = vsub.f32 0.0, %v4110_v63  ;;  %v4082_v12 = vpop.f32.mrf.mxu1  ;;  %4703 = vmatpush.bf16.msra.mxu2 %v6832_v40 }
 0x58e   :  { %v7259_v50 = vpop.eup %7258  ;;  %v4388_v3 = vadd.f32 %v7255_v47, %v4387_v15  ;;  %v4083_v53 = vadd.f32 %v4082_v12, %v4054_v1  ;;  %v4426_v12 = vor.u32 1.1754944e-38, %v4425_v29  ;;  %vm4424_vm15 = vcmp.eq.f32.partialorder %v4423_v21, 8.507059e+37 }
 0x58f   :  { %v4270_v13 = vmul.f32 1.442695, %v4242_v59  ;;  %v11429_v55 = vadd.f32 1.0, %v7259_v50  ;;  %v6830_v59 = vld [vmem:[%s12055_s8 + $0x48] sm:$0xff] }
 0x590   :  { %v4392_v23 = vsel %vm4391_vm8, %v7255_v47, %v4388_v3  ;;  %v6831_v47 = vld [vmem:[%s12055_s8 + $0x50] sm:$0xff] }
 0x591   :  { %7260 = vpow2.f32 %v4270_v13  ;;  %v4152_v5 = vpop.f32.mrf.mxu2  ;;  %v4397_v17 = vsel %vm4394_vm9, %v4396_v28, %v4392_v23  ;;  %v4455_v63 = vand.u32 2147483648, %v11429_v55  ;;  %v4453_v51 = vand.u32 2147483647, %v11429_v55  ;;  %4704 = vmatpush.bf16.msra.mxu2 %v6831_v47 }
 0x592   :  { %v4111_v20 = vpop.f32.mrf.mxu3  ;;  %v4536_v44 = vpack.c.bf16 %v4397_v17, %v4367_v16  ;;  %7262 = vrcp.f32 %v11427_v10  ;;  %v4153_v26 = vadd.f32 %v4152_v5, %v4124_v54  ;;  %vm4449_vm11 = vweird.f32 %v11429_v55  ;;  %v4133_v54 = vpop.f32.mrf.mxu0 }
 0x593   :  { %v4112_v41 = vadd.f32 %v4111_v20, %v4083_v53  ;;  %7264 = vrcp.f32 %v11429_v55  ;;  %v4456_v3 = vor.u32 1.1754944e-38, %v4455_v63  ;;  %vm4454_vm0 = vcmp.eq.f32.partialorder %v4453_v51, 8.507059e+37 }
 0x594   :  { %4683 = vmatmul.bf16.gmra.mxu0 %v4536_v44 }
 0x595   :  { %v4244_v62 = vsub.f32 0.0, %v4112_v41  ;;  %v4181_v52 = vpop.f32.mrf.mxu1  ;;  %4705 = vmatpush.bf16.msra.mxu2 %v6830_v59 }
 0x596   :  { %v4182_v7 = vadd.f32 %v4181_v52, %v4153_v26  ;;  %v4131_v52 = vadd.f32 %v4130_v14, %v11416_v24 }
 0x597   :  { %v7261_v46 = vpop.eup %7260  ;;  %v4274_v43 = vmul.f32 1.442695, %v4244_v62 }
 0x598   :  { %v11438_v2 = vadd.f32 1.0, %v7261_v46  ;;  %v7263_v56 = vpop.eup %7262 }
 0x599   :  { %7266 = vpow2.f32 %v4274_v43  ;;  %v4154_v19 = vpop.f32.mrf.mxu2  ;;  %v7265_v22 = vpop.eup %7264  ;;  %v4415_v39 = vmul.f32 %v7263_v56, %v11427_v10  ;;  %vm4420_vm10 = vweird.f32 %v7263_v56  ;;  %4706 = vmatpush.bf16.msra.mxu2 %v6829_v33 }
 0x59a   :  { %7268 = vrcp.f32 %v11438_v2  ;;  %v4210_v31 = vpop.f32.mrf.mxu3  ;;  %v4155_v0 = vadd.f32 %v4154_v19, %v4126_v35  ;;  %v4445_v61 = vmul.f32 %v7265_v22, %v11429_v55  ;;  %vm4450_vm2 = vweird.f32 %v7265_v22  ;;  %vm11467_vm14 = vmor %vm4419_vm12, %vm4420_vm10 }
 0x59b   :  { %v4211_v30 = vadd.f32 %v4210_v31, %v4182_v7  ;;  %v4416_v27 = vsub.f32 1.0, %v4415_v39  ;;  %vm4451_vm13 = vmor %vm4449_vm11, %vm4450_vm2  ;;  %v4485_v39 = vand.u32 2147483648, %v11438_v2  ;;  %vm4479_vm9 = vweird.f32 %v11438_v2 }
 0x59c   :  { %v4446_v18 = vsub.f32 1.0, %v4445_v61 }
 0x59d   :  { %v4231_v32 = vsub.f32 0.0, %v4211_v30  ;;  %v4183_v36 = vpop.f32.mrf.mxu1  ;;  %v4417_v57 = vmul.f32 %v7263_v56, %v4416_v27 }
 0x59e   :  { %v4184_v48 = vadd.f32 %v4183_v36, %v4155_v0  ;;  %v4447_v49 = vmul.f32 %v7265_v22, %v4446_v18 }
 0x59f   :  { %v7267_v45 = vpop.eup %7266  ;;  %v4248_v37 = vmul.f32 1.442695, %v4231_v32  ;;  %v4418_v1 = vadd.f32 %v7263_v56, %v4417_v57  ;;  %v4135_v57 = vpop.f32.mrf.mxu0 }
 0x5a0   :  { %v11451_v11 = vpop.eup %7268  ;;  %v11453_v58 = vadd.f32 1.0, %v7267_v45  ;;  %v4448_v25 = vadd.f32 %v7265_v22, %v4447_v49  ;;  %v4483_v45 = vand.u32 2147483647, %v11438_v2 }
 0x5a1   :  { %7270 = vpow2.f32 %v4248_v37  ;;  %v4157_v34 = vpop.f32.mrf.mxu2  ;;  %v4475_v38 = vmul.f32 %v11451_v11, %v11438_v2  ;;  %v4422_v8 = vsel %vm11467_vm14, %v7263_v56, %v4418_v1  ;;  %vm4480_vm3 = vweird.f32 %v11451_v11 }
 0x5a2   :  { %7272 = vrcp.f32 %v11453_v58  ;;  %v4212_v4 = vpop.f32.mrf.mxu3  ;;  %v4158_v50 = vadd.f32 %v4157_v34, %v4129_v60  ;;  %v4452_v9 = vsel %vm4451_vm13, %v7265_v22, %v4448_v25  ;;  %v4427_v20 = vsel %vm4424_vm15, %v4426_v12, %v4422_v8  ;;  %vm11504_vm2 = vmor %vm4479_vm9, %vm4480_vm3 }
 0x5a3   :  { %v4213_v6 = vadd.f32 %v4212_v4, %v4184_v48  ;;  %v4476_v28 = vsub.f32 1.0, %v4475_v38  ;;  %v4457_v5 = vsel %vm4454_vm0, %v4456_v3, %v4452_v9  ;;  %v4515_v7 = vand.u32 2147483648, %v11453_v58 }
 0x5a4   :  { %v4538_v17 = vpack.c.bf16 %v4457_v5, %v4427_v20  ;;  %v4513_v30 = vand.u32 2147483647, %v11453_v58  ;;  %vm4509_vm8 = vweird.f32 %v11453_v58  ;;  %v4134_v2 = vadd.f32 %v4133_v54, %v11416_v24 }
 0x5a5   :  { %v4233_v13 = vsub.f32 0.0, %v4213_v6  ;;  %v4186_v10 = vpop.f32.mrf.mxu1  ;;  %v4477_v26 = vmul.f32 %v11451_v11, %v4476_v28  ;;  %v4516_v37 = vor.u32 1.1754944e-38, %v4515_v7  ;;  %v4486_v4 = vor.u32 1.1754944e-38, %v4485_v39 }
 0x5a6   :  { %v4187_v41 = vadd.f32 %v4186_v10, %v4158_v50  ;;  %4688 = vmatmul.bf16.gmra.mxu0 %v4538_v17  ;;  %vm4514_vm12 = vcmp.eq.f32.partialorder %v4513_v30, 8.507059e+37  ;;  %vm4484_vm14 = vcmp.eq.f32.partialorder %v4483_v45, 8.507059e+37  ;;  %v4136_v8 = vadd.f32 %v4135_v57, %v11416_v24 }
 0x5a7   :  { %v7271_v53 = vpop.eup %7270  ;;  %v4252_v23 = vmul.f32 1.442695, %v4233_v13  ;;  %v4478_v22 = vadd.f32 %v11451_v11, %v4477_v26  ;;  %v4138_v17 = vpop.f32.mrf.mxu0 }
 0x5a8   :  { %v7273_v16 = vpop.eup %7272  ;;  %v11475_v55 = vadd.f32 1.0, %v7271_v53  ;;  %v4139_v39 = vadd.f32 %v4138_v17, %v11416_v24 }
 0x5a9   :  { %7274 = vpow2.f32 %v4252_v23  ;;  %v4505_v44 = vmul.f32 %v7273_v16, %v11453_v58  ;;  %v4159_v42 = vpop.f32.mrf.mxu2  ;;  %vm4510_vm1 = vweird.f32 %v7273_v16  ;;  %v4482_v18 = vsel %vm11504_vm2, %v11451_v11, %v4478_v22 }
 0x5aa   :  { %7276 = vrcp.f32 %v11475_v55  ;;  %v4215_v62 = vpop.f32.mrf.mxu3  ;;  %v4160_v56 = vadd.f32 %v4159_v42, %v4131_v52  ;;  %vm11496_vm10 = vmor %vm4509_vm8, %vm4510_vm1  ;;  %v4487_v60 = vsel %vm4484_vm14, %v4486_v4, %v4482_v18  ;;  %vm4314_vm11 = vweird.f32 %v11475_v55 }
 0x5ab   :  { %v4216_v46 = vadd.f32 %v4215_v62, %v4187_v41  ;;  %v4506_v43 = vsub.f32 1.0, %v4505_v44  ;;  %v4320_v23 = vand.u32 2147483648, %v11475_v55  ;;  %v4318_v5 = vand.u32 2147483647, %v11475_v55 }
 0x5ad   :  { %v4235_v35 = vsub.f32 0.0, %v4216_v46  ;;  %v4507_v19 = vmul.f32 %v7273_v16, %v4506_v43  ;;  %v4188_v31 = vpop.f32.mrf.mxu1  ;;  %v4321_v7 = vor.u32 1.1754944e-38, %v4320_v23  ;;  %vm4319_vm8 = vcmp.eq.f32.partialorder %v4318_v5, 8.507059e+37 }
 0x5ae   :  { %v4189_v21 = vadd.f32 %v4188_v31, %v4160_v56 }
 0x5af   :  { %v7275_v0 = vpop.eup %7274  ;;  %v4256_v32 = vmul.f32 1.442695, %v4235_v35  ;;  %v4508_v40 = vadd.f32 %v7273_v16, %v4507_v19 }
 0x5b0   :  { %v11490_v36 = vpop.eup %7276  ;;  %v11492_v61 = vadd.f32 1.0, %v7275_v0 }
 0x5b1   :  { %v4310_v27 = vmul.f32 %v11490_v36, %v11475_v55  ;;  %7278 = vpow2.f32 %v4256_v32  ;;  %v4512_v58 = vsel %vm11496_vm10, %v7273_v16, %v4508_v40  ;;  %v4162_v48 = vpop.f32.mrf.mxu2  ;;  %vm4315_vm13 = vweird.f32 %v11490_v36 }
 0x5b2   :  { %7280 = vrcp.f32 %v11492_v61  ;;  %v4217_v29 = vpop.f32.mrf.mxu3  ;;  %v4517_v49 = vsel %vm4514_vm12, %v4516_v37, %v4512_v58  ;;  %v4163_v51 = vadd.f32 %v4162_v48, %v4134_v2  ;;  %v4350_v20 = vand.u32 2147483648, %v11492_v61  ;;  %vm11530_vm0 = vmor %vm4314_vm11, %vm4315_vm13 }
 0x5b3   :  { %v4311_v63 = vsub.f32 1.0, %v4310_v27  ;;  %v4218_v34 = vadd.f32 %v4217_v29, %v4189_v21  ;;  %v4540_v1 = vpack.c.bf16 %v4517_v49, %v4487_v60  ;;  %v4348_v16 = vand.u32 2147483647, %v11492_v61  ;;  %v4140_v21 = vpop.f32.mrf.mxu0 }
 0x5b4   :  { %vm4344_vm1 = vweird.f32 %v11492_v61  ;;  %v4351_v56 = vor.u32 1.1754944e-38, %v4350_v20  ;;  %v4141_v57 = vadd.f32 %v4140_v21, %v11416_v24 }
 0x5b5   :  { %v4237_v38 = vsub.f32 0.0, %v4218_v34  ;;  %v4191_v6 = vpop.f32.mrf.mxu1  ;;  %v4312_v15 = vmul.f32 %v11490_v36, %v4311_v63  ;;  %vm4349_vm9 = vcmp.eq.f32.partialorder %v4348_v16, 8.507059e+37 }
 0x5b6   :  { %v4192_v13 = vadd.f32 %v4191_v6, %v4163_v51  ;;  %4693 = vmatmul.bf16.gmra.mxu0 %v4540_v1 }
 0x5b7   :  { %v7279_v59 = vpop.eup %7278  ;;  %v4260_v12 = vmul.f32 1.442695, %v4237_v38  ;;  %v4313_v53 = vadd.f32 %v11490_v36, %v4312_v15 }
 0x5b8   :  { %v7281_v25 = vpop.eup %7280  ;;  %v11516_v50 = vadd.f32 1.0, %v7279_v59 }
 0x5b9   :  { %v4340_v11 = vmul.f32 %v7281_v25, %v11492_v61  ;;  %7282 = vpow2.f32 %v4260_v12  ;;  %v4164_v3 = vpop.f32.mrf.mxu2  ;;  %vm4345_vm15 = vweird.f32 %v7281_v25  ;;  %v4317_v52 = vsel %vm11530_vm0, %v11490_v36, %v4313_v53 }
 0x5ba   :  { %7284 = vrcp.f32 %v11516_v50  ;;  %v4220_v10 = vpop.f32.mrf.mxu3  ;;  %v4165_v41 = vadd.f32 %v4164_v3, %v4136_v8  ;;  %vm4346_vm3 = vmor %vm4344_vm1, %vm4345_vm15  ;;  %v4322_v30 = vsel %vm4319_vm8, %v4321_v7, %v4317_v52  ;;  %v4378_v51 = vand.u32 2147483647, %v11516_v50 }
 0x5bb   :  { %v4341_v9 = vsub.f32 1.0, %v4340_v11  ;;  %v4221_v28 = vadd.f32 %v4220_v10, %v4192_v13  ;;  %vm4374_vm2 = vweird.f32 %v11516_v50  ;;  %v4380_v60 = vand.u32 2147483648, %v11516_v50 }
 0x5bc   :  { %vm4379_vm13 = vcmp.eq.f32.partialorder %v4378_v51, 8.507059e+37 }
 0x5bd   :  { %v4342_v54 = vmul.f32 %v7281_v25, %v4341_v9  ;;  %v4239_v44 = vsub.f32 0.0, %v4221_v28  ;;  %v4193_v62 = vpop.f32.mrf.mxu1  ;;  %v4381_v9 = vor.u32 1.1754944e-38, %v4380_v60 }
 0x5be   :  { %v4194_v35 = vadd.f32 %v4193_v62, %v4165_v41 }
 0x5bf   :  { %v7283_v26 = vpop.eup %7282  ;;  %v4264_v33 = vmul.f32 1.442695, %v4239_v44  ;;  %v4343_v46 = vadd.f32 %v7281_v25, %v4342_v54 }
 0x5c0   :  { %v11538_v43 = vpop.eup %7284  ;;  %v4285_v55 = vadd.f32 1.0, %v7283_v26 }
 0x5c1   :  { %7286 = vpow2.f32 %v4264_v33  ;;  %v4347_v19 = vsel %vm4346_vm3, %v7281_v25, %v4343_v46  ;;  %v4167_v31 = vpop.f32.mrf.mxu2  ;;  %v4370_v32 = vmul.f32 %v11538_v43, %v11516_v50  ;;  %vm4375_vm10 = vweird.f32 %v11538_v43  ;;  %v6456_v25 = vld [vmem:[%s12056_s9 + $0xf0] sm:$0xf] }
 0x5c2   :  { %7288 = vrcp.f32 %v4285_v55  ;;  %v4222_v22 = vpop.f32.mrf.mxu3  ;;  %v4352_v0 = vsel %vm4349_vm9, %v4351_v56, %v4347_v19  ;;  %v4168_v45 = vadd.f32 %v4167_v31, %v4139_v39  ;;  %v4408_v6 = vand.u32 2147483647, %v4285_v55  ;;  %vm11553_vm14 = vmor %vm4374_vm2, %vm4375_vm10 }
 0x5c3   :  { %v4223_v40 = vadd.f32 %v4222_v22, %v4194_v35  ;;  %v4535_v36 = vpack.c.bf16 %v4352_v0, %v4322_v30  ;;  %v4371_v61 = vsub.f32 1.0, %v4370_v32  ;;  %v4410_v1 = vand.u32 2147483648, %v4285_v55  ;;  %v6352_v30 = vld [vmem:[%s12056_s9 + $0x20] sm:$0xf] }
 0x5c4   :  { %vm4404_vm11 = vweird.f32 %v4285_v55  ;;  %vm4409_vm0 = vcmp.eq.f32.partialorder %v4408_v6, 8.507059e+37 }
 0x5c5   :  { %v4241_v14 = vsub.f32 0.0, %v4223_v40  ;;  %4707 = vmatmul.bf16.vlgmr.msra.gmra.mxu2 %v4535_v36  ;;  %v4196_v37 = vpop.f32.mrf.mxu1  ;;  %v4372_v58 = vmul.f32 %v11538_v43, %v4371_v61  ;;  %v4411_v28 = vor.u32 1.1754944e-38, %v4410_v1 }
 0x5c6   :  { %v4197_v29 = vadd.f32 %v4196_v37, %v4168_v45 }
 0x5c7   :  { %v7287_v27 = vpop.eup %7286  ;;  %v4268_v47 = vmul.f32 1.442695, %v4241_v14  ;;  %v4373_v49 = vadd.f32 %v11538_v43, %v4372_v58 }
 0x5c8   :  { %v7289_v2 = vpop.eup %7288  ;;  %v11544_v48 = vadd.f32 1.0, %v7287_v27 }
 0x5c9   :  { %7290 = vpow2.f32 %v4268_v47  ;;  %v4400_v18 = vmul.f32 %v7289_v2, %v4285_v55  ;;  %v4169_v63 = vpop.f32.mrf.mxu2  ;;  %vm4405_vm12 = vweird.f32 %v7289_v2  ;;  %v4377_v8 = vsel %vm11553_vm14, %v11538_v43, %v4373_v49 }
 0x5ca   :  { %7292 = vrcp.f32 %v11544_v48  ;;  %v4225_v34 = vpop.f32.mrf.mxu3  ;;  %v4170_v59 = vadd.f32 %v4169_v63, %v4141_v57  ;;  %vm4406_vm15 = vmor %vm4404_vm11, %vm4405_vm12  ;;  %v4382_v16 = vsel %vm4379_vm13, %v4381_v9, %v4377_v8  ;;  %vm4434_vm3 = vweird.f32 %v11544_v48 }
 0x5cb   :  { %v4226_v4 = vadd.f32 %v4225_v34, %v4197_v29  ;;  %v4401_v38 = vsub.f32 1.0, %v4400_v18  ;;  %v4440_v55 = vand.u32 2147483648, %v11544_v48  ;;  %v4438_v19 = vand.u32 2147483647, %v11544_v48 }
 0x5cd   :  { %v4243_v24 = vsub.f32 0.0, %v4226_v4  ;;  %v4402_v15 = vmul.f32 %v7289_v2, %v4401_v38  ;;  %v4198_v12 = vpop.f32.mrf.mxu1  ;;  %v4441_v61 = vor.u32 1.1754944e-38, %v4440_v55  ;;  %vm4439_vm12 = vcmp.eq.f32.partialorder %v4438_v19, 8.507059e+37  ;;  %v6844_v55 = vld [vmem:[%s12056_s9 + $0x34] sm:$0xf0] }
 0x5ce   :  { %v4199_v53 = vadd.f32 %v4198_v12, %v4170_v59 }
 0x5cf   :  { %v7291_v11 = vpop.eup %7290  ;;  %v4272_v13 = vmul.f32 1.442695, %v4243_v24  ;;  %v4403_v50 = vadd.f32 %v7289_v2, %v4402_v15 }
 0x5d0   :  { %v7293_v3 = vpop.eup %7292  ;;  %v4289_v10 = vadd.f32 1.0, %v7291_v11  ;;  %v6868_v11 = vld [vmem:[%s12056_s9 + $0xf4] sm:$0xf0] }
 0x5d1   :  { %7294 = vpow2.f32 %v4272_v13  ;;  %v4407_v23 = vsel %vm4406_vm15, %v7289_v2, %v4403_v50  ;;  %v4430_v20 = vmul.f32 %v7293_v3, %v11544_v48  ;;  %vm4435_vm1 = vweird.f32 %v7293_v3  ;;  %v6392_v13 = vld [vmem:[%s12056_s9 + $0x70] sm:$0xf]  ;;  %v6852_v50 = vld [vmem:[%s12056_s9 + $0x74] sm:$0xf0] }
 0x5d2   :  { %7296 = vrcp.f32 %v4289_v10  ;;  %v4227_v5 = vpop.f32.mrf.mxu3  ;;  %v4412_v17 = vsel %vm4409_vm0, %v4411_v28, %v4407_v23  ;;  %v4470_v35 = vand.u32 2147483648, %v4289_v10  ;;  %v4468_v22 = vand.u32 2147483647, %v4289_v10  ;;  %vm11564_vm9 = vmor %vm4434_vm3, %vm4435_vm1  ;;  %v6448_v28 = vld [vmem:[%s12056_s9 + $0xe0] sm:$0xf] }
 0x5d3   :  { %v4228_v54 = vadd.f32 %v4227_v5, %v4199_v53  ;;  %v4537_v41 = vpack.c.bf16 %v4412_v17, %v4382_v16  ;;  %v4431_v44 = vsub.f32 1.0, %v4430_v20  ;;  %vm4464_vm10 = vweird.f32 %v4289_v10  ;;  %v6866_v53 = vld [vmem:[%s12056_s9 + $0xe4] sm:$0xf0]  ;;  %v6851_v20 = vld [vmem:[%s12056_s9 + $0x74] sm:$0xf] }
 0x5d4   :  { %v4471_v45 = vor.u32 1.1754944e-38, %v4470_v35  ;;  %vm4469_vm14 = vcmp.eq.f32.partialorder %v4468_v22, 8.507059e+37  ;;  %v6457_v8 = vor.u32 %v6868_v11, %v6456_v25  ;;  %v6393_v9 = vor.u32 %v6852_v50, %v6392_v13  ;;  %v6394_v5 = vld [vmem:[%s12056_s9 + $0x78] sm:$0xf0]  ;;  %v6884_v22 = vld [vmem:[%s12056_s9 + $0x174] sm:$0xf0] }
 0x5d5   :  { %v4245_v42 = vsub.f32 0.0, %v4228_v54  ;;  %4712 = vmatmul.bf16.gmra.mxu2 %v4537_v41  ;;  %v4432_v33 = vmul.f32 %v7293_v3, %v4431_v44  ;;  %v6449_v23 = vor.u32 %v6866_v53, %v6448_v28  ;;  %v6397_v17 = vor.u32 %v6851_v20, %v6394_v5  ;;  %v6376_v54 = vld [vmem:[%s12056_s9 + $0x50] sm:$0xf]  ;;  %v6848_v41 = vld [vmem:[%s12056_s9 + $0x54] sm:$0xf0] }
 0x5d6   :  { %5058 = vmatpush.bf16.msrb.mxu3 %v6457_v8  ;;  %5044 = vmatpush.bf16.msrb.mxu1 %v6393_v9  ;;  %v6377_v44 = vor.u32 %v6848_v41, %v6376_v54  ;;  %v6841_v13 = vld [vmem:[%s12056_s9 + $0x24] sm:$0xf]  ;;  %v6354_v8 = vld [vmem:[%s12056_s9 + $0x28] sm:$0xf0]  ;;  %v6504_v9 = vld [vmem:[%s12056_s9 + $0x150] sm:$0xf] }
 0x5d7   :  { %v7295_v62 = vpop.eup %7294  ;;  %v4276_v26 = vmul.f32 1.442695, %v4245_v42  ;;  %v4433_v7 = vadd.f32 %v7293_v3, %v4432_v33  ;;  %5086 = vmatpush.bf16.msrb.mxu2 %v6397_v17  ;;  %v6368_v42 = vld [vmem:[%s12056_s9 + $0x40] sm:$0xf]  ;;  %v6864_v33 = vld [vmem:[%s12056_s9 + $0xd4] sm:$0xf0] }
 0x5d8   :  { %v7297_v52 = vpop.eup %7296  ;;  %v4291_v46 = vadd.f32 1.0, %v7295_v62  ;;  %v6846_v62 = vld [vmem:[%s12056_s9 + $0x44] sm:$0xf0]  ;;  %v6865_v50 = vld [vmem:[%s12056_s9 + $0xe4] sm:$0xf] }
 0x5d9   :  { %7298 = vpow2.f32 %v4276_v26  ;;  %v4460_v43 = vmul.f32 %v7297_v52, %v4289_v10  ;;  %vm4465_vm8 = vweird.f32 %v7297_v52  ;;  %v4437_v32 = vsel %vm11564_vm9, %v7293_v3, %v4433_v7  ;;  %v6384_v3 = vld [vmem:[%s12056_s9 + $0x60] sm:$0xf]  ;;  %v6850_v10 = vld [vmem:[%s12056_s9 + $0x64] sm:$0xf0]  ;;  %v6440_v26 = vld [vmem:[%s12056_s9 + $0xd0] sm:$0xf] }
 0x5da   :  { %7300 = vrcp.f32 %v4291_v46  ;;  %vm4466_vm2 = vmor %vm4464_vm10, %vm4465_vm8  ;;  %v4442_v27 = vsel %vm4439_vm12, %v4441_v61, %v4437_v32  ;;  %vm4494_vm13 = vweird.f32 %v4291_v46  ;;  %v4500_v63 = vand.u32 2147483648, %v4291_v46  ;;  %5059 = vmatpush.bf16.msrb.mxu3 %v6449_v23  ;;  %v6386_v7 = vld [vmem:[%s12056_s9 + $0x68] sm:$0xf0]  ;;  %v6842_v32 = vld [vmem:[%s12056_s9 + $0x24] sm:$0xf0] }
 0x5db   :  { %v4461_v56 = vsub.f32 1.0, %v4460_v43  ;;  %v4498_v4 = vand.u32 2147483647, %v4291_v46  ;;  %v6385_v16 = vor.u32 %v6850_v10, %v6384_v3  ;;  %v6849_v43 = vld [vmem:[%s12056_s9 + $0x64] sm:$0xf]  ;;  %v6357_v3 = vor.u32 %v6841_v13, %v6354_v8 }
 0x5dc   :  { %v4501_v6 = vor.u32 1.1754944e-38, %v4500_v63  ;;  %v6389_v35 = vor.u32 %v6849_v43, %v6386_v7  ;;  %v6450_v10 = vld [vmem:[%s12056_s9 + $0xe8] sm:$0xf0]  ;;  %v6880_v28 = vld [vmem:[%s12056_s9 + $0x154] sm:$0xf0] }
 0x5dd   :  { %v4462_v31 = vmul.f32 %v7297_v52, %v4461_v56  ;;  %vm4499_vm8 = vcmp.eq.f32.partialorder %v4498_v4, 8.507059e+37  ;;  %5045 = vmatpush.bf16.msrb.mxu1 %v6385_v16  ;;  %v6360_v56 = vld [vmem:[%s12056_s9 + $0x30] sm:$0xf]  ;;  %v6838_v4 = vld [vmem:[%s12056_s9 + $0x4] sm:$0xf0]  ;;  %v6453_v53 = vor.u32 %v6865_v50, %v6450_v10  ;;  %v6505_v23 = vor.u32 %v6880_v28, %v6504_v9 }
 0x5de   :  { %5087 = vmatpush.bf16.msrb.mxu2 %v6389_v35  ;;  %v6361_v19 = vor.u32 %v6844_v55, %v6360_v56  ;;  %v6416_v20 = vld [vmem:[%s12056_s9 + $0xa0] sm:$0xf]  ;;  %v6858_v5 = vld [vmem:[%s12056_s9 + $0xa4] sm:$0xf0]  ;;  %v6839_v16 = vld [vmem:[%s12056_s9 + $0x14] sm:$0xf] }
 0x5df   :  { %v7299_v0 = vpop.eup %7298  ;;  %v4463_v39 = vadd.f32 %v7297_v52, %v4462_v31  ;;  %v6520_v31 = vld [vmem:[%s12056_s9 + $0x170] sm:$0xf]  ;;  %v6417_v17 = vor.u32 %v6858_v5, %v6416_v20  ;;  %v6346_v54 = vld [vmem:[%s12056_s9 + $0x18] sm:$0xf0]  ;;  %v6863_v41 = vld [vmem:[%s12056_s9 + $0xd4] sm:$0xf] }
 0x5e0   :  { %v7301_v40 = vpop.eup %7300  ;;  %v4293_v36 = vadd.f32 1.0, %v7299_v0  ;;  %v6521_v0 = vor.u32 %v6884_v22, %v6520_v31  ;;  %v6338_v7 = vld [vmem:[%s12056_s9 + $0x8] sm:$0xf0]  ;;  %v6861_v56 = vld [vmem:[%s12056_s9 + $0xc4] sm:$0xf] }
 0x5e1   :  { %v4467_v14 = vsel %vm4466_vm2, %v7297_v52, %v4463_v39  ;;  %v4490_v37 = vmul.f32 %v7301_v40, %v4291_v46  ;;  %vm4495_vm11 = vweird.f32 %v7301_v40  ;;  %5046 = vmatpush.bf16.msrb.mxu1 %v6377_v44  ;;  %v6369_v52 = vor.u32 %v6846_v62, %v6368_v42  ;;  %v6432_v39 = vld [vmem:[%s12056_s9 + $0xc0] sm:$0xf]  ;;  %v6442_v44 = vld [vmem:[%s12056_s9 + $0xd8] sm:$0xf0]  ;;  %v6434_v55 = vld [vmem:[%s12056_s9 + $0xc8] sm:$0xf0] }
 0x5e2   :  { %7302 = vrcp.f32 %v4293_v36  ;;  %v4472_v21 = vsel %vm4469_vm14, %v4471_v45, %v4467_v14  ;;  %v4530_v34 = vand.u32 2147483648, %v4293_v36  ;;  %v4528_v51 = vand.u32 2147483647, %v4293_v36  ;;  %vm4496_vm0 = vmor %vm4494_vm13, %vm4495_vm11  ;;  %v6847_v45 = vld [vmem:[%s12056_s9 + $0x54] sm:$0xf]  ;;  %5072 = vmatpush.bf16.msrb.mxu0 %v6521_v0 }
 0x5e3   :  { %v4539_v47 = vpack.c.bf16 %v4472_v21, %v4442_v27  ;;  %v4491_v58 = vsub.f32 1.0, %v4490_v37  ;;  %vm4524_vm1 = vweird.f32 %v4293_v36  ;;  %v6441_v46 = vor.u32 %v6864_v33, %v6440_v26  ;;  %v6378_v14 = vld [vmem:[%s12056_s9 + $0x58] sm:$0xf0]  ;;  %v6344_v37 = vld [vmem:[%s12056_s9 + $0x10] sm:$0xf] }
 0x5e4   :  { %v4531_v1 = vor.u32 1.1754944e-38, %v4530_v34  ;;  %vm4529_vm9 = vcmp.eq.f32.partialorder %v4528_v51, 8.507059e+37  ;;  %v6381_v21 = vor.u32 %v6847_v45, %v6378_v14  ;;  %v6860_v51 = vld [vmem:[%s12056_s9 + $0xb4] sm:$0xf0]  ;;  %v6349_v42 = vor.u32 %v6839_v16, %v6346_v54  ;;  %v6408_v26 = vld [vmem:[%s12056_s9 + $0x90] sm:$0xf] }
 0x5e5   :  { %4717 = vmatmul.bf16.gmra.mxu2 %v4539_v47  ;;  %v4492_v2 = vmul.f32 %v7301_v40, %v4491_v58  ;;  %5060 = vmatpush.bf16.msrb.mxu3 %v6441_v46  ;;  %v6840_v47 = vld [vmem:[%s12056_s9 + $0x14] sm:$0xf0]  ;;  %v6845_v58 = vld [vmem:[%s12056_s9 + $0x44] sm:$0xf]  ;;  %v6445_v62 = vor.u32 %v6863_v41, %v6442_v44  ;;  %v6496_v35 = vld [vmem:[%s12056_s9 + $0x140] sm:$0xf] }
 0x5e6   :  { %5047 = vmatpush.bf16.msrb.mxu1 %v6369_v52  ;;  %5088 = vmatpush.bf16.msrb.mxu2 %v6381_v21  ;;  %v6856_v33 = vld [vmem:[%s12056_s9 + $0x94] sm:$0xf0]  ;;  %v6837_v52 = vld [vmem:[%s12056_s9 + $0x4] sm:$0xf]  ;;  %v6400_v31 = vld [vmem:[%s12056_s9 + $0x80] sm:$0xf] }
 0x5e7   :  { %v4493_v18 = vadd.f32 %v7301_v40, %v4492_v2  ;;  %v6370_v2 = vld [vmem:[%s12056_s9 + $0x48] sm:$0xf0]  ;;  %v6409_v43 = vor.u32 %v6856_v33, %v6408_v26  ;;  %v6859_v45 = vld [vmem:[%s12056_s9 + $0xb4] sm:$0xf]  ;;  %v6426_v14 = vld [vmem:[%s12056_s9 + $0xb8] sm:$0xf0] }
 0x5e8   :  { %v7303_v48 = vpop.eup %7302  ;;  %v6373_v63 = vor.u32 %v6845_v58, %v6370_v2  ;;  %v6429_v21 = vor.u32 %v6859_v45, %v6426_v14  ;;  %v6857_v2 = vld [vmem:[%s12056_s9 + $0xa4] sm:$0xf]  ;;  %v6480_v13 = vld [vmem:[%s12056_s9 + $0x120] sm:$0xf]  ;;  %v6874_v8 = vld [vmem:[%s12056_s9 + $0x124] sm:$0xf0] }
 0x5e9   :  { %v4520_v29 = vmul.f32 %v7303_v48, %v4293_v36  ;;  %vm4525_vm15 = vweird.f32 %v7303_v48  ;;  %v4497_v38 = vsel %vm4496_vm0, %v7301_v40, %v4493_v18  ;;  %v6862_v40 = vld [vmem:[%s12056_s9 + $0xc4] sm:$0xf0]  ;;  %v6353_v36 = vor.u32 %v6842_v32, %v6352_v30  ;;  %v6875_v5 = vld [vmem:[%s12056_s9 + $0x134] sm:$0xf]  ;;  %v6490_v16 = vld [vmem:[%s12056_s9 + $0x138] sm:$0xf0] }
 0x5ea   :  { %vm4526_vm3 = vmor %vm4524_vm1, %vm4525_vm15  ;;  %v4502_v24 = vsel %vm4499_vm8, %v4501_v6, %v4497_v38  ;;  %5048 = vmatpush.bf16.msrb.mxu1 %v6361_v19  ;;  %v6433_v61 = vor.u32 %v6862_v40, %v6432_v39  ;;  %v6882_v18 = vld [vmem:[%s12056_s9 + $0x164] sm:$0xf0]  ;;  %v6362_v6 = vld [vmem:[%s12056_s9 + $0x38] sm:$0xf0]  ;;  %5089 = vmatpush.bf16.msrb.mxu2 %v6373_v63  ;;  %v6341_v30 = vor.u32 %v6837_v52, %v6338_v7 }
 0x5eb   :  { %v4521_v57 = vsub.f32 1.0, %v4520_v29  ;;  %v6512_v29 = vld [vmem:[%s12056_s9 + $0x160] sm:$0xf]  ;;  %v6878_v19 = vld [vmem:[%s12056_s9 + $0x144] sm:$0xf0]  ;;  %v6437_v39 = vor.u32 %v6861_v56, %v6434_v55  ;;  %v6493_v44 = vor.u32 %v6875_v5, %v6490_v16  ;;  %v6892_v5 = vld [vmem:[%s12058_s11 + $0x38] sm:$0xff] }
 0x5ec   :  { %5061 = vmatpush.bf16.msrb.mxu3 %v6433_v61  ;;  %v6513_v34 = vor.u32 %v6882_v18, %v6512_v29  ;;  %v6497_v0 = vor.u32 %v6878_v19, %v6496_v35  ;;  %v6854_v32 = vld [vmem:[%s12056_s9 + $0x84] sm:$0xf0]  ;;  %v6883_v40 = vld [vmem:[%s12056_s9 + $0x174] sm:$0xf]  ;;  %v6881_v29 = vld [vmem:[%s12056_s9 + $0x164] sm:$0xf] }
 0x5ed   :  { %v4522_v49 = vmul.f32 %v7303_v48, %v4521_v57  ;;  %v6336_v57 = vld [vmem:[%s12056_s9] sm:$0xf]  ;;  %v6401_v61 = vor.u32 %v6854_v32, %v6400_v31  ;;  %v6488_v63 = vld [vmem:[%s12056_s9 + $0x130] sm:$0xf]  ;;  %v6873_v52 = vld [vmem:[%s12056_s9 + $0x124] sm:$0xf] }
 0x5ee   :  { %5049 = vmatpush.bf16.msrb.mxu1 %v6353_v36  ;;  %5073 = vmatpush.bf16.msrb.mxu0 %v6513_v34  ;;  %v6522_v36 = vld [vmem:[%s12056_s9 + $0x178] sm:$0xf0]  ;;  %v6876_v34 = vld [vmem:[%s12056_s9 + $0x134] sm:$0xf0]  ;;  %v6871_v55 = vld [vmem:[%s12056_s9 + $0x114] sm:$0xf] }
 0x5ef   :  { %v4523_v60 = vadd.f32 %v7303_v48, %v4522_v49  ;;  %v6424_v49 = vld [vmem:[%s12056_s9 + $0xb0] sm:$0xf]  ;;  %v6872_v56 = vld [vmem:[%s12056_s9 + $0x114] sm:$0xf0]  ;;  %v6474_v35 = vld [vmem:[%s12056_s9 + $0x118] sm:$0xf0] }
 0x5f0   :  { %v6425_v38 = vor.u32 %v6860_v51, %v6424_v49  ;;  %v6489_v51 = vor.u32 %v6876_v34, %v6488_v63  ;;  %v6464_v31 = vld [vmem:[%s12056_s9 + $0x100] sm:$0xf] }
 0x5f1   :  { %v4527_v59 = vsel %vm4526_vm3, %v7303_v48, %v4523_v60  ;;  %v6345_v48 = vor.u32 %v6840_v47, %v6344_v37  ;;  %v6843_v60 = vld [vmem:[%s12056_s9 + $0x34] sm:$0xf]  ;;  %v6525_v37 = vor.u32 %v6883_v40, %v6522_v36  ;;  %v6466_v40 = vld [vmem:[%s12056_s9 + $0x108] sm:$0xf0] }
 0x5f2   :  { %v4532_v15 = vsel %vm4529_vm9, %v4531_v1, %v4527_v59  ;;  %v6867_v1 = vld [vmem:[%s12056_s9 + $0xf4] sm:$0xf]  ;;  %v6458_v59 = vld [vmem:[%s12056_s9 + $0xf8] sm:$0xf0]  ;;  %5062 = vmatpush.bf16.msrb.mxu3 %v6425_v38  ;;  %5074 = vmatpush.bf16.msrb.mxu0 %v6505_v23 }
 0x5f3   :  { %v4541_v12 = vpack.c.bf16 %v4532_v15, %v4502_v24  ;;  %5050 = vmatpush.bf16.msrb.mxu1 %v6345_v48  ;;  %v6337_v24 = vor.u32 %v6838_v4, %v6336_v57  ;;  %v6365_v15 = vor.u32 %v6843_v60, %v6362_v6  ;;  %v6418_v48 = vld [vmem:[%s12056_s9 + $0xa8] sm:$0xf0]  ;;  %v6855_v38 = vld [vmem:[%s12056_s9 + $0x94] sm:$0xf]  ;;  %v6410_v60 = vld [vmem:[%s12056_s9 + $0x98] sm:$0xf0] }
 0x5f4   :  { %v6421_v18 = vor.u32 %v6857_v2, %v6418_v48  ;;  %v6514_v57 = vld [vmem:[%s12056_s9 + $0x168] sm:$0xf0]  ;;  %v6879_v6 = vld [vmem:[%s12056_s9 + $0x154] sm:$0xf] }
 0x5f5   :  { %4722 = vmatmul.bf16.gmra.mxu2 %v4541_v12  ;;  %v6461_v12 = vor.u32 %v6867_v1, %v6458_v59  ;;  %v6517_v49 = vor.u32 %v6881_v29, %v6514_v57  ;;  %v6506_v1 = vld [vmem:[%s12056_s9 + $0x158] sm:$0xf0] }
 0x5f6   :  { %5090 = vmatpush.bf16.msrb.mxu2 %v6365_v15  ;;  %5063 = vmatpush.bf16.msrb.mxu3 %v6417_v17  ;;  %v6509_v15 = vor.u32 %v6879_v6, %v6506_v1 }
 0x5f7   :  { %5051 = vmatpush.bf16.msrb.mxu1 %v6337_v24  ;;  %5075 = vmatpush.bf16.msrb.mxu0 %v6497_v0  ;;  %v6413_v24 = vor.u32 %v6855_v38, %v6410_v60  ;;  %v6477_v0 = vor.u32 %v6871_v55, %v6474_v35  ;;  %v4798_v60 = vld [vmem:[%s12057_s10] sm:$0x3] }
 0x5fa   :  { %5091 = vmatpush.bf16.msrb.mxu2 %v6357_v3  ;;  %5064 = vmatpush.bf16.msrb.mxu3 %v6409_v43  ;;  %v6481_v3 = vor.u32 %v6874_v8, %v6480_v13  ;;  %v6472_v43 = vld [vmem:[%s12056_s9 + $0x110] sm:$0xf] }
 0x5fb   :  { %5100 = vmatpush.bf16.msra.mxu1 %v6461_v12  ;;  %v6853_v12 = vld [vmem:[%s12056_s9 + $0x84] sm:$0xf]  ;;  %5076 = vmatpush.bf16.msrb.mxu0 %v6489_v51  ;;  %v6473_v19 = vor.u32 %v6872_v56, %v6472_v43 }
 0x5fe   :  { %5092 = vmatpush.bf16.msrb.mxu2 %v6349_v42  ;;  %5065 = vmatpush.bf16.msrb.mxu3 %v6401_v61 }
 0x5ff   :  { %5101 = vmatpush.bf16.msra.mxu1 %v6453_v53  ;;  %5077 = vmatpush.bf16.msrb.mxu0 %v6481_v3 }
 0x601   :  { %v11657_v27 = vpop.f32.mrf.mxu0 }
 0x602   :  { %5093 = vmatpush.bf16.msrb.mxu2 %v6341_v30  ;;  %5114 = vmatpush.bf16.msra.mxu3 %v6525_v37 }
 0x603   :  { %5102 = vmatpush.bf16.msra.mxu1 %v6445_v62  ;;  %5078 = vmatpush.bf16.msrb.mxu0 %v6473_v19 }
 0x606   :  { %5115 = vmatpush.bf16.msra.mxu3 %v6517_v49 }
 0x607   :  { %5103 = vmatpush.bf16.msra.mxu1 %v6437_v39  ;;  %v6869_v39 = vld [vmem:[%s12056_s9 + $0x104] sm:$0xf] }
 0x608   :  { %v6469_v14 = vor.u32 %v6869_v39, %v6466_v40  ;;  %v6888_v39 = vld [vmem:[%s12058_s11 + $0x18] sm:$0xff] }
 0x609   :  { %v11698_v25 = vpop.f32.mrf.mxu0  ;;  %v6900_v40 = vld [vmem:[%s12058_s11 + $0x78] sm:$0xff] }
 0x60a   :  { %5116 = vmatpush.bf16.msra.mxu3 %v6509_v15  ;;  %5488 = vmatpush.bf16.msra.mxu2 %v6900_v40 }
 0x60b   :  { %5104 = vmatpush.bf16.msra.mxu1 %v6429_v21 }
 0x60f   :  { %5105 = vmatpush.bf16.msra.mxu1 %v6421_v18 }
 0x611   :  { %v4684_v46 = vpop.f32.mrf.mxu0 }
 0x613   :  { %5106 = vmatpush.bf16.msra.mxu1 %v6413_v24 }
 0x619   :  { %v4686_v47 = vpop.f32.mrf.mxu0 }
 0x623   :  { %v4689_v20 = vpop.f32.mrf.mxu0 }
 0x62b   :  { %v4691_v30 = vpop.f32.mrf.mxu0 }
 0x648   :  { %v11700_v11 = vpop.f32.mrf.mxu2 }
 0x649   :  { %v4709_v59 = vadd.f32 %v11700_v11, %v11657_v27  ;;  %v6877_v27 = vld [vmem:[%s12056_s9 + $0x144] sm:$0xf]  ;;  %v6498_v11 = vld [vmem:[%s12056_s9 + $0x148] sm:$0xf0] }
 0x64a   :  { %v6501_v23 = vor.u32 %v6877_v27, %v6498_v11 }
 0x64c   :  { %5117 = vmatpush.bf16.msra.mxu3 %v6501_v23 }
 0x650   :  { %v4710_v22 = vpop.f32.mrf.mxu2  ;;  %5118 = vmatpush.bf16.msra.mxu3 %v6493_v44  ;;  %v6891_v44 = vld [vmem:[%s12058_s11 + $0x30] sm:$0xff] }
 0x651   :  { %v4711_v4 = vadd.f32 %v4710_v22, %v11698_v25  ;;  %v6402_v25 = vld [vmem:[%s12056_s9 + $0x88] sm:$0xf0]  ;;  %v6870_v22 = vld [vmem:[%s12056_s9 + $0x104] sm:$0xf0] }
 0x652   :  { %v6405_v53 = vor.u32 %v6853_v12, %v6402_v25  ;;  %v6465_v32 = vor.u32 %v6870_v22, %v6464_v31  ;;  %v4801_v25 = vperm.slane %v4798_v60, 1  ;;  %v6889_v31 = vld [vmem:[%s12058_s11 + $0x20] sm:$0xff] }
 0x653   :  { %v4728_v50 = vadd.f32 %v4711_v4, %v4709_v59  ;;  %v4800_v59 = vperm.slane %v4798_v60, 0 }
 0x654   :  { %5107 = vmatpush.bf16.msra.mxu1 %v6405_v53  ;;  %5079 = vmatpush.bf16.msrb.mxu0 %v6465_v32 }
 0x655   :  { %v4732_v17 = vpack.c.bf16 %v4728_v50, %v4728_v50 }
 0x657   :  { %v4738_v42 = vunpack.c.l.b16 %v4732_v17 }
 0x658   :  { %v4713_v58 = vpop.f32.mrf.mxu2  ;;  %5475 = vmatpush.bf16.msra.mxu0 %v6892_v5 }
 0x659   :  { %v4714_v10 = vadd.f32 %v4713_v58, %v4684_v46  ;;  %v6482_v46 = vld [vmem:[%s12056_s9 + $0x128] sm:$0xf0] }
 0x65a   :  { %v6485_v7 = vor.u32 %v6873_v52, %v6482_v46 }
 0x65c   :  { %5119 = vmatpush.bf16.msra.mxu3 %v6485_v7  ;;  %5476 = vmatpush.bf16.msra.mxu0 %v6891_v44  ;;  %v6890_v7 = vld [vmem:[%s12058_s11 + $0x28] sm:$0xff] }
 0x660   :  { %v4715_v9 = vpop.f32.mrf.mxu2  ;;  %5120 = vmatpush.bf16.msra.mxu3 %v6477_v0  ;;  %5477 = vmatpush.bf16.msra.mxu0 %v6890_v7  ;;  %v6894_v7 = vld [vmem:[%s12058_s11 + $0x48] sm:$0xff] }
 0x661   :  { %v4716_v28 = vadd.f32 %v4715_v9, %v4686_v47  ;;  %v4694_v47 = vpop.f32.mrf.mxu0 }
 0x663   :  { %v4729_v54 = vadd.f32 %v4716_v28, %v4714_v10 }
 0x664   :  { %5121 = vmatpush.bf16.msra.mxu3 %v6469_v14  ;;  %5478 = vmatpush.bf16.msra.mxu0 %v6889_v31  ;;  %v6899_v14 = vld [vmem:[%s12058_s11 + $0x70] sm:$0xff] }
 0x665   :  { %v4733_v41 = vpack.c.bf16 %v4729_v54, %v4729_v54  ;;  %5489 = vmatpush.bf16.msra.mxu2 %v6899_v14  ;;  %v6905_v14 = vld [vmem:[%s12058_s11 + $0xa0] sm:$0xff] }
 0x667   :  { %v4739_v62 = vunpack.c.l.b16 %v4733_v41 }
 0x668   :  { %v4718_v26 = vpop.f32.mrf.mxu2  ;;  %5479 = vmatpush.bf16.msra.mxu0 %v6888_v39 }
 0x669   :  { %v4740_v33 = vpack.c.b16 %v4739_v62, %v4738_v42  ;;  %v4719_v61 = vadd.f32 %v4718_v26, %v4689_v20  ;;  %v4696_v29 = vpop.f32.mrf.mxu0 }
 0x66b   :  { %5052 = vmatmul.bf16.vlgmr.msrb.gmra.mxu1 %v4740_v33  ;;  %5094 = vmatmul.bf16.vlgmr.msrb.gmra.mxu2 %v4740_v33 }
 0x670   :  { %v4720_v36 = vpop.f32.mrf.mxu2 }
 0x671   :  { %v4721_v45 = vadd.f32 %v4720_v36, %v4691_v30 }
 0x673   :  { %v4730_v37 = vadd.f32 %v4721_v45, %v4719_v61 }
 0x675   :  { %v4734_v21 = vpack.c.bf16 %v4730_v37, %v4730_v37  ;;  %v6908_v37 = vld [vmem:[%s12058_s11 + $0xb8] sm:$0xff] }
 0x676   :  { %5501 = vmatpush.bf16.msrb.mxu1 %v6908_v37  ;;  %v6912_v37 = vld [vmem:[%s12058_s11 + $0xd8] sm:$0xff] }
 0x677   :  { %v4743_v58 = vunpack.c.l.b16 %v4734_v21 }
 0x678   :  { %v4723_v2 = vpop.f32.mrf.mxu2 }
 0x679   :  { %v4744_v48 = vpack.c.b16 %v4743_v58, %v4739_v62  ;;  %v4724_v57 = vadd.f32 %v4723_v2, %v4694_v47  ;;  %v6887_v47 = vld [vmem:[%s12058_s11 + $0x10] sm:$0xff] }
 0x67a   :  { %5480 = vmatpush.bf16.msra.mxu0 %v6887_v47  ;;  %v6911_v47 = vld [vmem:[%s12058_s11 + $0xd0] sm:$0xff] }
 0x67b   :  { %5066 = vmatmul.bf16.vlgmr.msrb.gmra.mxu3 %v4744_v48  ;;  %5108 = vmatmul.bf16.vlgmr.msra.gmra.mxu1 %v4744_v48 }
 0x680   :  { %v4725_v18 = vpop.f32.mrf.mxu2 }
 0x681   :  { %v4726_v63 = vadd.f32 %v4725_v18, %v4696_v29  ;;  %v6898_v29 = vld [vmem:[%s12058_s11 + $0x68] sm:$0xff] }
 0x682   :  { %5490 = vmatpush.bf16.msra.mxu2 %v6898_v29  ;;  %v6909_v29 = vld [vmem:[%s12058_s11 + $0xc0] sm:$0xff] }
 0x683   :  { %v4731_v34 = vadd.f32 %v4726_v63, %v4724_v57 }
 0x685   :  { %v4735_v4 = vpack.c.bf16 %v4731_v34, %v4731_v34  ;;  %v6886_v34 = vld [vmem:[%s12058_s11 + $0x8] sm:$0xff] }
 0x686   :  { %5481 = vmatpush.bf16.msra.mxu0 %v6886_v34 }
 0x687   :  { %v4747_v49 = vunpack.c.l.b16 %v4735_v4 }
 0x689   :  { %v4748_v51 = vpack.c.b16 %v4747_v49, %v4743_v58  ;;  %v6907_v58 = vld [vmem:[%s12058_s11 + $0xb0] sm:$0xff] }
 0x68a   :  { %5502 = vmatpush.bf16.msrb.mxu1 %v6907_v58  ;;  %v6903_v58 = vld [vmem:[%s12058_s11 + $0x90] sm:$0xff] }
 0x68b   :  { %5080 = vmatmul.bf16.vlgmr.msrb.gmra.mxu0 %v4748_v51  ;;  %5122 = vmatmul.bf16.vlgmr.msra.gmra.mxu3 %v4748_v51 }
 0x6e8   :  { %v5053_v38 = vpop.f32.mrf.mxu1 }
 0x6e9   :  { %v5054_v24 = vadd.f32 %v5053_v38, %v4800_v59  ;;  %v6897_v38 = vld [vmem:[%s12058_s11 + $0x60] sm:$0xff] }
 0x6ea   :  { %5491 = vmatpush.bf16.msra.mxu2 %v6897_v38 }
 0x6ee   :  { %v5095_v15 = vpop.f32.mrf.mxu2 }
 0x6ef   :  { %v5096_v50 = vadd.f32 %v5095_v15, %v4801_v25 }
 0x6f0   :  { %v5055_v6 = vpop.f32.mrf.mxu1 }
 0x6f1   :  { %v5056_v10 = vadd.f32 %v5055_v6, %v4800_v59 }
 0x6f6   :  { %v5097_v16 = vpop.f32.mrf.mxu2 }
 0x6f7   :  { %v5098_v62 = vadd.f32 %v5097_v16, %v4801_v25  ;;  %v6917_v25 = vld [vmem:[%s12061_s13 + $0x10] sm:$0xff] }
 0x6f8   :  { %v5109_v27 = vpop.f32.mrf.mxu1 }
 0x6f9   :  { %v5110_v9 = vadd.f32 %v5109_v27, %v5096_v50 }
 0x6fe   :  { %v5067_v1 = vpop.f32.mrf.mxu3 }
 0x6ff   :  { %v5068_v13 = vadd.f32 %v5067_v1, %v5054_v24 }
 0x700   :  { %v5111_v42 = vpop.f32.mrf.mxu1 }
 0x701   :  { %v5112_v46 = vadd.f32 %v5111_v42, %v5098_v62 }
 0x706   :  { %v5069_v12 = vpop.f32.mrf.mxu3 }
 0x707   :  { %v5070_v23 = vadd.f32 %v5069_v12, %v5056_v10  ;;  %v6885_v12 = vld [vmem:[%s12058_s11] sm:$0xff] }
 0x708   :  { %v5081_v11 = vpop.f32.mrf.mxu0  ;;  %5482 = vmatpush.bf16.msra.mxu0 %v6885_v12  ;;  %v6918_v12 = vld [vmem:[%s12061_s13 + $0x18] sm:$0xff] }
 0x709   :  { %v5082_v8 = vadd.f32 %v5081_v11, %v5068_v13 }
 0x70b   :  { %v5128_v3 = vsub.f32 0.0, %v5082_v8  ;;  %v6896_v8 = vld [vmem:[%s12058_s11 + $0x58] sm:$0xff] }
 0x70c   :  { %5492 = vmatpush.bf16.msra.mxu2 %v6896_v8  ;;  %v6922_v8 = vld [vmem:[%s12062_s15 + $0x10] sm:$0x10] }
 0x70d   :  { %v5132_v28 = vmul.f32 1.442695, %v5128_v3 }
 0x70e   :  { %v5123_v53 = vpop.f32.mrf.mxu3 }
 0x70f   :  { %7304 = vpow2.f32 %v5132_v28  ;;  %v5124_v20 = vadd.f32 %v5123_v53, %v5110_v9 }
 0x710   :  { %v5083_v17 = vpop.f32.mrf.mxu0 }
 0x711   :  { %v5129_v54 = vsub.f32 0.0, %v5124_v20  ;;  %v5084_v41 = vadd.f32 %v5083_v17, %v5070_v23 }
 0x713   :  { %v5134_v26 = vmul.f32 1.442695, %v5129_v54  ;;  %v5130_v33 = vsub.f32 0.0, %v5084_v41  ;;  %v6895_v54 = vld [vmem:[%s12058_s11 + $0x50] sm:$0xff] }
 0x714   :  { %5493 = vmatpush.bf16.msra.mxu2 %v6895_v54 }
 0x715   :  { %v7305_v52 = vpop.eup %7304  ;;  %7306 = vpow2.f32 %v5134_v26  ;;  %v5136_v43 = vmul.f32 1.442695, %v5130_v33 }
 0x716   :  { %v11879_v56 = vadd.f32 1.0, %v7305_v52  ;;  %v5125_v55 = vpop.f32.mrf.mxu3 }
 0x717   :  { %7308 = vpow2.f32 %v5136_v43  ;;  %v5126_v35 = vadd.f32 %v5125_v55, %v5112_v46 }
 0x718   :  { %7310 = vrcp.f32 %v11879_v56  ;;  %vm5149_vm2 = vweird.f32 %v11879_v56  ;;  %v5155_v60 = vand.u32 2147483648, %v11879_v56  ;;  %v5153_v59 = vand.u32 2147483647, %v11879_v56  ;;  %5494 = vmatpush.bf16.msra.mxu2 %v6894_v7  ;;  %v6935_v7 = vld [vmem:[%s12063_s16] ss:$0 sm:$0xff] }
 0x719   :  { %v5131_v19 = vsub.f32 0.0, %v5126_v35 }
 0x71a   :  { %v5156_v3 = vor.u32 1.1754944e-38, %v5155_v60  ;;  %vm5154_vm15 = vcmp.eq.f32.partialorder %v5153_v59, 8.507059e+37 }
 0x71b   :  { %v7307_v22 = vpop.eup %7306  ;;  %v5138_v30 = vmul.f32 1.442695, %v5131_v19 }
 0x71c   :  { %v5141_v0 = vadd.f32 1.0, %v7307_v22 }
 0x71d   :  { %v7309_v32 = vpop.eup %7308  ;;  %7312 = vpow2.f32 %v5138_v30  ;;  %v6893_v30 = vld [vmem:[%s12058_s11 + $0x40] sm:$0xff] }
 0x71e   :  { %v7311_v36 = vpop.eup %7310  ;;  %7314 = vrcp.f32 %v5141_v0  ;;  %v11892_v45 = vadd.f32 1.0, %v7309_v32  ;;  %v5170_v6 = vand.u32 2147483648, %v5141_v0  ;;  %v5168_v15 = vand.u32 2147483647, %v5141_v0  ;;  %5495 = vmatpush.bf16.msra.mxu2 %v6893_v30 }
 0x71f   :  { %v5145_v61 = vmul.f32 %v7311_v36, %v11879_v56  ;;  %vm5150_vm10 = vweird.f32 %v7311_v36  ;;  %vm5164_vm11 = vweird.f32 %v5141_v0 }
 0x720   :  { %7316 = vrcp.f32 %v11892_v45  ;;  %vm11929_vm14 = vmor %vm5149_vm2, %vm5150_vm10  ;;  %v5171_v10 = vor.u32 1.1754944e-38, %v5170_v6  ;;  %vm5169_vm0 = vcmp.eq.f32.partialorder %v5168_v15, 8.507059e+37  ;;  %vm5179_vm3 = vweird.f32 %v11892_v45  ;;  %v5538_v6 = vld [vmem:[%s12061_s13 + $0x28] sm:$0x3]  ;;  %v6919_v15 = vld [vmem:[%s12061_s13 + $0x20] sm:$0xff] }
 0x721   :  { %v5146_v21 = vsub.f32 1.0, %v5145_v61  ;;  %v5183_v41 = vand.u32 2147483647, %v11892_v45  ;;  %v5185_v44 = vand.u32 2147483648, %v11892_v45  ;;  %v6906_v61 = vld [vmem:[%s12058_s11 + $0xa8] sm:$0xff] }
 0x722   :  { %5503 = vmatpush.bf16.msrb.mxu1 %v6906_v61 }
 0x723   :  { %v7313_v2 = vpop.eup %7312  ;;  %v5147_v48 = vmul.f32 %v7311_v36, %v5146_v21  ;;  %v5186_v56 = vor.u32 1.1754944e-38, %v5185_v44  ;;  %v6904_v21 = vld [vmem:[%s12058_s11 + $0x98] sm:$0xff] }
 0x724   :  { %v7315_v18 = vpop.eup %7314  ;;  %v11910_v57 = vadd.f32 1.0, %v7313_v2  ;;  %v6910_v2 = vld [vmem:[%s12058_s11 + $0xc8] sm:$0xff] }
 0x725   :  { %v5160_v63 = vmul.f32 %v7315_v18, %v5141_v0  ;;  %v5148_v49 = vadd.f32 %v7311_v36, %v5147_v48  ;;  %vm5165_vm12 = vweird.f32 %v7315_v18  ;;  %v6902_v48 = vld [vmem:[%s12058_s11 + $0x88] sm:$0xff] }
 0x726   :  { %7318 = vrcp.f32 %v11910_v57  ;;  %v11916_v4 = vpop.eup %7316  ;;  %vm5166_vm13 = vmor %vm5164_vm11, %vm5165_vm12  ;;  %v5200_v42 = vand.u32 2147483648, %v11910_v57  ;;  %v5198_v33 = vand.u32 2147483647, %v11910_v57  ;;  %vm5194_vm10 = vweird.f32 %v11910_v57  ;;  %5504 = vmatpush.bf16.msrb.mxu1 %v6905_v14 }
 0x727   :  { %v5161_v51 = vsub.f32 1.0, %v5160_v63  ;;  %v5175_v1 = vmul.f32 %v11916_v4, %v11892_v45  ;;  %v5152_v11 = vsel %vm11929_vm14, %v7311_v36, %v5148_v49  ;;  %vm5180_vm1 = vweird.f32 %v11916_v4  ;;  %v6914_v36 = vld [vmem:[%s12058_s11 + $0xe8] sm:$0xff]  ;;  %v6913_v45 = vld [vmem:[%s12058_s11 + $0xe0] sm:$0xff] }
 0x728   :  { %v5157_v23 = vsel %vm5154_vm15, %v5156_v3, %v5152_v11  ;;  %vm5181_vm9 = vmor %vm5179_vm3, %vm5180_vm1  ;;  %v5201_v55 = vor.u32 1.1754944e-38, %v5200_v42  ;;  %vm5184_vm12 = vcmp.eq.f32.partialorder %v5183_v41, 8.507059e+37  ;;  %vm5199_vm14 = vcmp.eq.f32.partialorder %v5198_v33, 8.507059e+37  ;;  %5516 = vmatpush.bf16.msrb.mxu3 %v6914_v36  ;;  %v6678_v11 = vld [vmem:[%s12062_s15 + $0x10] sm:$0xf] }
 0x729   :  { %v5162_v24 = vmul.f32 %v7315_v18, %v5161_v51  ;;  %v5176_v13 = vsub.f32 1.0, %v5175_v1  ;;  %v5564_v1 = vunpack.c.l.b16 %v5538_v6  ;;  %v6679_v3 = vor.u32 %v6922_v8, %v6678_v11 }
 0x72a   :  { %5505 = vmatpush.bf16.msrb.mxu1 %v6904_v21 }
 0x72b   :  { %v5163_v27 = vadd.f32 %v7315_v18, %v5162_v24  ;;  %v5177_v9 = vmul.f32 %v11916_v4, %v5176_v13  ;;  %v5570_v59 = vpack.c.b16 %v5564_v1, %v5564_v1  ;;  %v6916_v13 = vld [vmem:[%s12061_s13 + $0x8] sm:$0xff] }
 0x72c   :  { %v7319_v50 = vpop.eup %7318  ;;  %5517 = vmatpush.bf16.msrb.mxu3 %v6913_v45 }
 0x72d   :  { %v5190_v28 = vmul.f32 %v7319_v50, %v11910_v57  ;;  %v5167_v53 = vsel %vm5166_vm13, %v7315_v18, %v5163_v27  ;;  %v5178_v17 = vadd.f32 %v11916_v4, %v5177_v9  ;;  %vm5195_vm8 = vweird.f32 %v7319_v50  ;;  %v6901_v18 = vld [vmem:[%s12058_s11 + $0x80] sm:$0xff]  ;;  %v6921_v9 = vld [vmem:[%s12062_s15 + $0x8] sm:$0xff] }
 0x72e   :  { %v5172_v20 = vsel %vm5169_vm0, %v5171_v10, %v5167_v53  ;;  %vm5196_vm2 = vmor %vm5194_vm10, %vm5195_vm8  ;;  %5506 = vmatpush.bf16.msrb.mxu1 %v6903_v58  ;;  %v5580_v24 = vsel %vm2822_vm7, %v5570_v59, 0  ;;  %v6915_v27 = vld [vmem:[%s12061_s13] sm:$0xff]  ;;  %vm5623_vm7 = vcmask 343040  }
 0x72f   :  { %v5191_v5 = vsub.f32 1.0, %v5190_v28  ;;  %v11940_v16 = vpack.c.bf16 %v5172_v20, %v5157_v23  ;;  %v5182_v46 = vsel %vm5181_vm9, %v11916_v4, %v5178_v17  ;;  %v6933_v53 = vld [vmem:[%s12059_s12] ss:$0 sm:$0xff] }
 0x730   :  { %v5187_v19 = vsel %vm5184_vm12, %v5186_v56, %v5182_v46  ;;  %5518 = vmatpush.bf16.msrb.mxu3 %v6912_v37 }
 0x731   :  { %v5207_v62 = vunpack.c.l.b16 %v11940_v16  ;;  %v5192_v26 = vmul.f32 %v7319_v50, %v5191_v5  ;;  %v5208_v57 = vunpack.c.h.b16 %v11940_v16 }
 0x732   :  { %5507 = vmatpush.bf16.msrb.mxu1 %v6902_v48 }
 0x733   :  { %v5209_v52 = vpack.c.b16 %v5207_v62, %v5207_v62  ;;  %v5193_v43 = vadd.f32 %v7319_v50, %v5192_v26  ;;  %v5210_v63 = vpack.c.b16 %v5208_v57, %v5208_v57  ;;  %v6920_v62 = vld [vmem:[%s12062_s15] sm:$0xff] }
 0x734   :  { %5519 = vmatpush.bf16.msrb.mxu3 %v6911_v47  ;;  %v6934_v26 = vld [vmem:[%s12060_s14] ss:$0 sm:$0xff] }
 0x735   :  { %5483 = vmatmul.bf16.vlgmr.msra.gmra.mxu0 %v5209_v52  ;;  %v5197_v35 = vsel %vm5196_vm2, %v7319_v50, %v5193_v43 }
 0x736   :  { %v5202_v31 = vsel %vm5199_vm14, %v5201_v55, %v5197_v35  ;;  %5508 = vmatpush.bf16.msrb.mxu1 %v6901_v18 }
 0x737   :  { %v5205_v22 = vpack.c.bf16 %v5202_v31, %v5187_v19 }
 0x738   :  { %5520 = vmatpush.bf16.msrb.mxu3 %v6910_v2 }
 0x739   :  { %v5214_v0 = vunpack.c.h.b16 %v5205_v22  ;;  %v5213_v32 = vunpack.c.l.b16 %v5205_v22 }
 0x73b   :  { %v5216_v39 = vpack.c.b16 %v5214_v0, %v5214_v0  ;;  %v5215_v40 = vpack.c.b16 %v5213_v32, %v5213_v32 }
 0x73c   :  { %5521 = vmatpush.bf16.msrb.mxu3 %v6909_v29 }
 0x73d   :  { %5219 = vrot.lane.b32.xlu0 %v5216_v39, %s12081_s20  ;;  %5217 = vrot.lane.b32.xlu2 %v5215_v40, %s12081_s20 }
 0x740   :  { %5584 = vmatpush.bf16.msra.mxu3 %v5580_v24 }
 0x744   :  { %5585 = vmatpush.bf16.msra.mxu3 %v6919_v15 }
 0x748   :  { %5586 = vmatpush.bf16.msra.mxu3 %v6918_v12 }
 0x74c   :  { %5587 = vmatpush.bf16.msra.mxu3 %v6917_v25 }
 0x750   :  { %5588 = vmatpush.bf16.msra.mxu3 %v6916_v13 }
 0x754   :  { %5589 = vmatpush.bf16.msra.mxu3 %v6915_v27 }
 0x797   :  { %v5218_v34 = vpop.permute.xlu2 %5217 }
 0x798   :  { %v5226_v4 = vsel %vm428_vm6, %v5210_v63, %v5218_v34 }
 0x799   :  { %5496 = vmatmul.bf16.vlgmr.msra.gmra.mxu2 %v5226_v4 }
 0x7af   :  { %v5220_v49 = vpop.permute.xlu0 %5219 }
 0x7b0   :  { %v5222_v51 = vsel %vm428_vm6, %v5218_v34, %v5220_v49  ;;  %6646 = vmatmul.msk.bf16.vlgmr.msrb.gmra.mxu3 %vm3985_vm4, %v5220_v49  ;;  %vm5627_vm6 = vcmask 1044480  }
 0x7b1   :  { %5509 = vmatmul.bf16.vlgmr.msrb.gmra.mxu1 %v5222_v51  ;;  %v5629_v10 = vsel %vm5627_vm6, %v6679_v3, 0 }
 0x7b2   :  { %v5484_v38 = vpop.f32.mrf.mxu0  ;;  %5636 = vmatpush.bf16.msrb.mxu0 %v5629_v10 }
 0x7b3   :  { %v5485_v23 = vadd.f32 %v6933_v53, %v5484_v38 }
 0x7b6   :  { %5637 = vmatpush.bf16.msrb.mxu0 %v6921_v9 }
 0x7ba   :  { %v5486_v60 = vpop.f32.mrf.mxu0  ;;  %5638 = vmatpush.bf16.msrb.mxu0 %v6920_v62 }
 0x81c   :  { %v5497_v50 = vpop.f32.mrf.mxu2 }
 0x81d   :  { %v5498_v5 = vadd.f32 %v5497_v50, %v5485_v23 }
 0x824   :  { %v5499_v28 = vpop.f32.mrf.mxu2 }
 0x82e   :  { %v5510_v20 = vpop.f32.mrf.mxu1 }
 0x82f   :  { %v5511_v16 = vadd.f32 %v5510_v20, %v5498_v5 }
 0x833   :  { %v5523_v17 = vpop.f32.mrf.mxu3 }
 0x834   :  { %v5524_v54 = vadd.f32 %v5523_v17, %v5511_v16 }
 0x836   :  { %v5527_v41 = vpack.c.bf16 %v5524_v54, %v5524_v54  ;;  %v5512_v44 = vpop.f32.mrf.mxu1 }
 0x838   :  { %6667 = vmatmul.msk.bf16.vlgmr.msra.gmra.mxu3 %vm399_vm5, %v5527_v41  ;;  %vm5644_vm5 = vcmask 80896  }
 0x83b   :  { %v5525_v42 = vpop.f32.mrf.mxu3 }
 0x8bb   :  { %v5591_v33 = vpop.f32.mrf.mxu3 }
 0x8bc   :  { %v5592_v52 = vadd.f32 %v6934_v26, %v5591_v33 }
 0x8be   :  { %v5595_v46 = vpack.c.bf16 %v5592_v52, %v5592_v52 }
 0x8c0   :  { %6680 = vmatmul.msk.bf16.vlgmr.msrb.gmra.mxu0 %vm5623_vm7, %v5595_v46 }
 0x8c3   :  { %v5593_v43 = vpop.f32.mrf.mxu3 }
 0x93d   :  { %v5640_v56 = vpop.f32.mrf.mxu0 }
 0x93e   :  { %v5641_v55 = vadd.f32 %v6935_v7, %v5640_v56 }
 0x940   :  { %5645 = vst.msk [vmem:[%s12064_s17] sm:$0xff] %vm5644_vm5, %v5641_v55 }
 0x945   :  { %v5642_v35 = vpop.f32.mrf.mxu0 }

</bundles_post_ra>
